<compile_context>
chip_gen: v7x
topology: tpu7x:2x2x1
jax: 0.10.0
libtpu: 0.0.40
codegen_flags: <defaults>
</compile_context>

<pallas_src>
import math
from functools import partial

import jax
import jax.numpy as jnp
from jax.experimental import pallas as pl
from jax.experimental.pallas import tpu as pltpu


# ---------------------------------------------------------------------------
# In-kernel helpers (traced inside the kernel)
# ---------------------------------------------------------------------------

def _layer_norm(x2, lnw, lnb):
    """LayerNorm over the last axis of a 2-D (rows, C) array (eps=1e-5)."""
    mu = jnp.mean(x2, axis=-1, keepdims=True)
    var = jnp.mean(jnp.square(x2 - mu), axis=-1, keepdims=True)
    xn = (x2 - mu) * jax.lax.rsqrt(var + 1e-5)
    return xn * lnw + lnb


def _gated_attention_delta(x3, lnw_ref, lnb_ref, wqkvg_ref, bqkvg_ref,
                           wo_ref, bo_ref, heads):
    """Gated self-attention over axis 1 of x3 (N, L, C). Returns the delta."""
    n, l, c = x3.shape
    d = c // heads
    nl = n * l

    x2 = x3.reshape(nl, c)                          # leading-dim merge (no relayout)
    xn = _layer_norm(x2, lnw_ref[0], lnb_ref[0])    # (NL, C) f32
    xb = xn.astype(jnp.bfloat16)                    # one cast, lane-dense

    # Fused Q|K|V|G projection: one (NL,C)x(C,4C) MXU op. Wq carries the
    # 1/sqrt(d) score scale; the bias row is zero except the gate slice.
    qkvg = jnp.dot(xb, wqkvg_ref[0], preferred_element_type=jnp.float32)
    qkvg = qkvg + bqkvg_ref[0]                      # (NL, 4C) f32

    gate = jax.nn.sigmoid(qkvg[:, 3 * c:])          # (NL, C) f32, single full sigmoid
    qkv_b = qkvg[:, :3 * c].astype(jnp.bfloat16)    # single cast for MXU operands

    outs = []
    for h in range(heads):                          # static tiny unroll (H=4)
        q3 = qkv_b[:, h * d:(h + 1) * d].reshape(n, l, d)
        k3 = qkv_b[:, c + h * d:c + (h + 1) * d].reshape(n, l, d)
        v3 = qkv_b[:, 2 * c + h * d:2 * c + (h + 1) * d].reshape(n, l, d)

        s = jnp.einsum('bqd,bkd->bqk', q3, k3,
                       preferred_element_type=jnp.float32)            # (n,l,l)
        m = jnp.max(s, axis=-1, keepdims=True)
        p = jnp.exp(s - m)
        denom = jnp.sum(p, axis=-1, keepdims=True)
        p = p * pl.reciprocal(denom, approx=True)                     # EUP slot

        oh = jnp.einsum('bqk,bkd->bqd', p.astype(jnp.bfloat16), v3,
                        preferred_element_type=jnp.float32)           # (n,l,d)
        outs.append(oh.reshape(nl, d))

    # Heads are contiguous channel slices -> single lane-axis assembly, one
    # full-lane gate multiply, one fused (NL,C)x(C,C) output projection.
    o_all = jnp.concatenate(outs, axis=1)           # (NL, C) f32
    gated = (o_all * gate).astype(jnp.bfloat16)
    y2 = jnp.dot(gated, wo_ref[0], preferred_element_type=jnp.float32) + bo_ref[0]
    return y2.reshape(n, l, c)


def _transition_delta(x3, lnw_ref, lnb_ref, w1_ref, b1_ref, w2_ref, b2_ref):
    """Transition (LN -> Linear -> ReLU -> Linear) on (N, L, C). Returns delta."""
    n, l, c = x3.shape
    x2 = x3.reshape(n * l, c)
    xn = _layer_norm(x2, lnw_ref[0], lnb_ref[0])
    h = jnp.dot(xn.astype(jnp.bfloat16), w1_ref[0],
                preferred_element_type=jnp.float32) + b1_ref[0]       # (NL, 4C)
    h = jnp.maximum(h, 0.0)
    y = jnp.dot(h.astype(jnp.bfloat16), w2_ref[0],
                preferred_element_type=jnp.float32) + b2_ref[0]       # (NL, C)
    return y.reshape(n, l, c)


# ---------------------------------------------------------------------------
# Fused Evoformer kernel: one grid step == one Evoformer block.
# ---------------------------------------------------------------------------

def _evoformer_kernel(msa_ref,
                      r_lnw, r_lnb, r_wqkvg, r_bqkvg, r_wo, r_bo,
                      c_lnw, c_lnb, c_wqkvg, c_bqkvg, c_wo, c_bo,
                      t_lnw, t_lnb, t_w1, t_b1, t_w2, t_b2,
                      out_ref, *, heads):
    blk = pl.program_id(0)

    # out_ref's block index is constant across the "arbitrary" grid axis, so it
    # stays VMEM-resident and doubles as the carried MSA state.
    @pl.when(blk == 0)
    def _():
        out_ref[...] = msa_ref[...]

    x = out_ref[...]                            # (S, R, C) f32

    # Row attention: attend over residues R within each sequence.
    x = x + _gated_attention_delta(x, r_lnw, r_lnb, r_wqkvg, r_bqkvg,
                                   r_wo, r_bo, heads)

    # Column attention: attend over sequences S within each residue column.
    # Axis swap stays in VMEM (no HBM round trip).
    xt = pltpu.einshape("abc->bac", x)          # (R, S, C)
    xt = xt + _gated_attention_delta(xt, c_lnw, c_lnb, c_wqkvg, c_bqkvg,
                                     c_wo, c_bo, heads)
    x = pltpu.einshape("abc->bac", xt)          # (S, R, C)

    # Transition MLP.
    x = x + _transition_delta(x, t_lnw, t_lnb, t_w1, t_b1, t_w2, t_b2)

    out_ref[...] = x                            # carry to next block / final out


# ---------------------------------------------------------------------------
# pallas_call wrapper
# ---------------------------------------------------------------------------

def _stacked_spec(arr):
    """BlockSpec selecting the current Evoformer block from a (B, ...) stack."""
    rest = arr.shape[1:]
    nz = len(rest)
    return pl.BlockSpec((1,) + rest, lambda b, _nz=nz: (b,) + (0,) * _nz)


def evoformer_forward(msa, stacked_params, heads):
    """msa: (S, R, C) f32. stacked_params: flat list of (num_blocks, ...) arrays."""
    S, R, C = msa.shape
    num_blocks = stacked_params[0].shape[0]
    assert C % heads == 0

    msa_spec = pl.BlockSpec((S, R, C), lambda b: (0, 0, 0))
    return pl.pallas_call(
        partial(_evoformer_kernel, heads=heads),
        grid=(num_blocks,),
        out_shape=jax.ShapeDtypeStruct((S, R, C), jnp.float32),
        in_specs=[msa_spec] + [_stacked_spec(a) for a in stacked_params],
        out_specs=pl.BlockSpec((S, R, C), lambda b: (0, 0, 0)),
        compiler_params=pltpu.CompilerParams(
            dimension_semantics=("arbitrary",),          # blocks are sequential
            vmem_limit_bytes=48 * 1024 * 1024),          # explicit budget (fits v7x)
    )(msa, *stacked_params)


# ---------------------------------------------------------------------------
# Parameter initialization (deterministic, synthetic) + packing
# ---------------------------------------------------------------------------

def _init_attention_params(key, c):
    ks = jax.random.split(key, 7)
    s = 0.05
    return dict(
        lnw=jnp.ones((c,), jnp.float32),
        lnb=jnp.zeros((c,), jnp.float32),
        wq=s * jax.random.normal(ks[0], (c, c), jnp.float32),
        wk=s * jax.random.normal(ks[1], (c, c), jnp.float32),
        wv=s * jax.random.normal(ks[2], (c, c), jnp.float32),
        wg=s * jax.random.normal(ks[3], (c, c), jnp.float32),
        bg=s * jax.random.normal(ks[4], (c,), jnp.float32),
        wo=s * jax.random.normal(ks[5], (c, c), jnp.float32),
        bo=s * jax.random.normal(ks[6], (c,), jnp.float32),
    )


def _init_transition_params(key, c, proj=4):
    ks = jax.random.split(key, 4)
    s = 0.05
    return dict(
        lnw=jnp.ones((c,), jnp.float32),
        lnb=jnp.zeros((c,), jnp.float32),
        w1=s * jax.random.normal(ks[0], (c, proj * c), jnp.float32),
        b1=s * jax.random.normal(ks[1], (proj * c,), jnp.float32),
        w2=s * jax.random.normal(ks[2], (proj * c, c), jnp.float32),
        b2=s * jax.random.normal(ks[3], (c,), jnp.float32),
    )


def _pack_attention(blocks, heads):
    """Stack per-block attention params; fuse Wq|Wk|Wv|Wg and the gate bias."""
    c = blocks[0]["wq"].shape[0]
    d = c // heads
    scale = 1.0 / math.sqrt(d)

    lnw = jnp.stack([b["lnw"].reshape(1, c) for b in blocks])                  # (B,1,C)
    lnb = jnp.stack([b["lnb"].reshape(1, c) for b in blocks])
    # Fused projection weight (score scale folded into Wq), bf16 for the MXU.
    wqkvg = jnp.stack([
        jnp.concatenate([b["wq"] * scale, b["wk"], b["wv"], b["wg"]], axis=1)
        for b in blocks]).astype(jnp.bfloat16)                                 # (B,C,4C)
    # Fused bias row: only the gate slice is non-zero.
    bqkvg = jnp.stack([
        jnp.concatenate([jnp.zeros((3 * c,), jnp.float32), b["bg"]]).reshape(1, 4 * c)
        for b in blocks])                                                      # (B,1,4C)
    wo = jnp.stack([b["wo"] for b in blocks]).astype(jnp.bfloat16)             # (B,C,C)
    bo = jnp.stack([b["bo"].reshape(1, c) for b in blocks])                    # (B,1,C)
    return [lnw, lnb, wqkvg, bqkvg, wo, bo]


def _pack_transition(blocks):
    c = blocks[0]["w1"].shape[0]
    pc = blocks[0]["w1"].shape[1]
    lnw = jnp.stack([b["lnw"].reshape(1, c) for b in blocks])
    lnb = jnp.stack([b["lnb"].reshape(1, c) for b in blocks])
    w1 = jnp.stack([b["w1"] for b in blocks]).astype(jnp.bfloat16)             # (B,C,4C)
    b1 = jnp.stack([b["b1"].reshape(1, pc) for b in blocks])
    w2 = jnp.stack([b["w2"] for b in blocks]).astype(jnp.bfloat16)             # (B,4C,C)
    b2 = jnp.stack([b["b2"].reshape(1, c) for b in blocks])
    return [lnw, lnb, w1, b1, w2, b2]


def init_evoformer_params(key, c, heads, num_blocks, proj=4):
    row_blocks, col_blocks, tr_blocks = [], [], []
    for _ in range(num_blocks):
        kr, kc, kt, key = jax.random.split(key, 4)
        row_blocks.append(_init_attention_params(kr, c))
        col_blocks.append(_init_attention_params(kc, c))
        tr_blocks.append(_init_transition_params(kt, c, proj))
    return (_pack_attention(row_blocks, heads)
            + _pack_attention(col_blocks, heads)
            + _pack_transition(tr_blocks))


def depth_prob(p_lowest: float, layer: int, n_layers: int) -> float:
    return 1 - layer / n_layers * (1 - p_lowest)


# ---------------------------------------------------------------------------

if __name__ == "__main__":
    msa_embedding_dim = 32
    heads = 4
    num_blocks = 2
    p_keep_lowest = 0.5          # only relevant in training (stochastic depth)
    S, R = 8, 16                 # num sequences, num residues

    key = jax.random.PRNGKey(0)
    k_x, k_p = jax.random.split(key)
    msa_repr = jax.random.normal(k_x, (S, R, msa_embedding_dim), jnp.float32)
    params = init_evoformer_params(k_p, msa_embedding_dim, heads, num_blocks)

    out = evoformer_forward(msa_repr, params, heads)
    out = jax.block_until_ready(out)
    assert out.shape == (S, R, msa_embedding_dim)
    assert bool(jnp.all(jnp.isfinite(out)))
    print("KERNEL_OK")
</pallas_src>

<mosaic_0001>
module attributes {stable_mosaic.version = 11 : i64} {
  func.func @_evoformer_kernel(%arg0: i32, %arg1: memref<8x16x32xf32, #tpu.memory_space<vmem>>, %arg2: memref<1x1x32xf32, #tpu.memory_space<vmem>>, %arg3: memref<1x1x32xf32, #tpu.memory_space<vmem>>, %arg4: memref<1x32x128xbf16, #tpu.memory_space<vmem>>, %arg5: memref<1x1x128xf32, #tpu.memory_space<vmem>>, %arg6: memref<1x32x32xbf16, #tpu.memory_space<vmem>>, %arg7: memref<1x1x32xf32, #tpu.memory_space<vmem>>, %arg8: memref<1x1x32xf32, #tpu.memory_space<vmem>>, %arg9: memref<1x1x32xf32, #tpu.memory_space<vmem>>, %arg10: memref<1x32x128xbf16, #tpu.memory_space<vmem>>, %arg11: memref<1x1x128xf32, #tpu.memory_space<vmem>>, %arg12: memref<1x32x32xbf16, #tpu.memory_space<vmem>>, %arg13: memref<1x1x32xf32, #tpu.memory_space<vmem>>, %arg14: memref<1x1x32xf32, #tpu.memory_space<vmem>>, %arg15: memref<1x1x32xf32, #tpu.memory_space<vmem>>, %arg16: memref<1x32x128xbf16, #tpu.memory_space<vmem>>, %arg17: memref<1x1x128xf32, #tpu.memory_space<vmem>>, %arg18: memref<1x128x32xbf16, #tpu.memory_space<vmem>>, %arg19: memref<1x1x32xf32, #tpu.memory_space<vmem>>, %arg20: memref<8x16x32xf32, #tpu.memory_space<vmem>>) attributes {dimension_semantics = [#tpu.dimension_semantics<arbitrary>], iteration_bounds = array<i64: 2>, scalar_prefetch = 0 : i64, scratch_operands = 0 : i64, tpu.core_type = #tpu.core_type<tc>, window_params = [{pipeline_mode = #tpu.pipeline_mode<synchronous>, transform_indices = @transform_0, window_bounds = array<i64: 8, 16, 32>}, {transform_indices = @transform_1, window_bounds = array<i64: 1, 1, 32>}, {transform_indices = @transform_2, window_bounds = array<i64: 1, 1, 32>}, {transform_indices = @transform_3, window_bounds = array<i64: 1, 32, 128>}, {transform_indices = @transform_4, window_bounds = array<i64: 1, 1, 128>}, {transform_indices = @transform_5, window_bounds = array<i64: 1, 32, 32>}, {transform_indices = @transform_6, window_bounds = array<i64: 1, 1, 32>}, {transform_indices = @transform_7, window_bounds = array<i64: 1, 1, 32>}, {transform_indices = @transform_8, window_bounds = array<i64: 1, 1, 32>}, {transform_indices = @transform_9, window_bounds = array<i64: 1, 32, 128>}, {transform_indices = @transform_10, window_bounds = array<i64: 1, 1, 128>}, {transform_indices = @transform_11, window_bounds = array<i64: 1, 32, 32>}, {transform_indices = @transform_12, window_bounds = array<i64: 1, 1, 32>}, {transform_indices = @transform_13, window_bounds = array<i64: 1, 1, 32>}, {transform_indices = @transform_14, window_bounds = array<i64: 1, 1, 32>}, {transform_indices = @transform_15, window_bounds = array<i64: 1, 32, 128>}, {transform_indices = @transform_16, window_bounds = array<i64: 1, 1, 128>}, {transform_indices = @transform_17, window_bounds = array<i64: 1, 128, 32>}, {transform_indices = @transform_18, window_bounds = array<i64: 1, 1, 32>}, {pipeline_mode = #tpu.pipeline_mode<synchronous>, transform_indices = @transform_19, window_bounds = array<i64: 8, 16, 32>}]} {
    %c0_i32 = arith.constant 0 : i32
    %0 = arith.cmpi eq, %arg0, %c0_i32 : i32
    %1 = arith.extui %0 : i1 to i32
    %c0_i32_0 = arith.constant 0 : i32
    %2 = arith.cmpi ne, %1, %c0_i32_0 : i32
    scf.if %2 {
      %c0_115 = arith.constant 0 : index
      %c0_116 = arith.constant 0 : index
      %c0_117 = arith.constant 0 : index
      %324 = vector.load %arg1[%c0_115, %c0_116, %c0_117] : memref<8x16x32xf32, #tpu.memory_space<vmem>>, vector<8x16x32xf32>
      %c0_118 = arith.constant 0 : index
      %c0_119 = arith.constant 0 : index
      %c0_120 = arith.constant 0 : index
      %325 = vector.load %arg20[%c0_118, %c0_119, %c0_120] : memref<8x16x32xf32, #tpu.memory_space<vmem>>, vector<8x16x32xf32>
      tpu.vector_store %arg20[%c0_118, %c0_119, %c0_120], %324 {strides = array<i32>} : memref<8x16x32xf32, #tpu.memory_space<vmem>>, vector<8x16x32xf32>,
    } else {
    }
    %c0 = arith.constant 0 : index
    %c0_1 = arith.constant 0 : index
    %c0_2 = arith.constant 0 : index
    %3 = vector.load %arg20[%c0, %c0_1, %c0_2] : memref<8x16x32xf32, #tpu.memory_space<vmem>>, vector<8x16x32xf32>
    %4 = vector.shape_cast %3 : vector<8x16x32xf32> to vector<128x32xf32>
    %c0_3 = arith.constant 0 : index
    %c0_4 = arith.constant 0 : index
    %c0_5 = arith.constant 0 : index
    %5 = vector.load %arg2[%c0_3, %c0_4, %c0_5] : memref<1x1x32xf32, #tpu.memory_space<vmem>>, vector<1x1x32xf32>
    %6 = vector.shape_cast %5 : vector<1x1x32xf32> to vector<1x32xf32>
    %c0_6 = arith.constant 0 : index
    %c0_7 = arith.constant 0 : index
    %c0_8 = arith.constant 0 : index
    %7 = vector.load %arg3[%c0_6, %c0_7, %c0_8] : memref<1x1x32xf32, #tpu.memory_space<vmem>>, vector<1x1x32xf32>
    %8 = vector.shape_cast %7 : vector<1x1x32xf32> to vector<1x32xf32>
    %cst = arith.constant dense<0.000000e+00> : vector<128xf32>
    %9 = vector.multi_reduction <add>, %4, %cst [1] : vector<128x32xf32> to vector<128xf32>
    %10 = vector.shape_cast %9 : vector<128xf32> to vector<128x1xf32>
    %cst_9 = arith.constant 3.200000e+01 : f32
    %11 = vector.broadcast %cst_9 : f32 to vector<128x1xf32>
    %12 = arith.divf %10, %11 : vector<128x1xf32>
    %13 = vector.broadcast %12 : vector<128x1xf32> to vector<128x32xf32>
    %14 = arith.subf %4, %13 : vector<128x32xf32>
    %15 = arith.mulf %14, %14 : vector<128x32xf32>
    %cst_10 = arith.constant dense<0.000000e+00> : vector<128xf32>
    %16 = vector.multi_reduction <add>, %15, %cst_10 [1] : vector<128x32xf32> to vector<128xf32>
    %17 = vector.shape_cast %16 : vector<128xf32> to vector<128x1xf32>
    %cst_11 = arith.constant 3.200000e+01 : f32
    %18 = vector.broadcast %cst_11 : f32 to vector<128x1xf32>
    %19 = arith.divf %17, %18 : vector<128x1xf32>
    %20 = vector.broadcast %12 : vector<128x1xf32> to vector<128x32xf32>
    %21 = arith.subf %4, %20 : vector<128x32xf32>
    %cst_12 = arith.constant 9.99999974E-6 : f32
    %22 = vector.broadcast %cst_12 : f32 to vector<128x1xf32>
    %23 = arith.addf %19, %22 : vector<128x1xf32>
    %24 = math.rsqrt %23 : vector<128x1xf32>
    %25 = vector.broadcast %24 : vector<128x1xf32> to vector<128x32xf32>
    %26 = arith.mulf %21, %25 : vector<128x32xf32>
    %27 = vector.broadcast %6 : vector<1x32xf32> to vector<128x32xf32>
    %28 = arith.mulf %26, %27 : vector<128x32xf32>
    %29 = vector.broadcast %8 : vector<1x32xf32> to vector<128x32xf32>
    %30 = arith.addf %28, %29 : vector<128x32xf32>
    %31 = arith.truncf %30 : vector<128x32xf32> to vector<128x32xbf16>
    %c0_13 = arith.constant 0 : index
    %c0_14 = arith.constant 0 : index
    %c0_15 = arith.constant 0 : index
    %32 = vector.load %arg4[%c0_13, %c0_14, %c0_15] : memref<1x32x128xbf16, #tpu.memory_space<vmem>>, vector<1x32x128xbf16>
    %33 = vector.shape_cast %32 : vector<1x32x128xbf16> to vector<32x128xbf16>
    %cst_16 = arith.constant dense<0.000000e+00> : vector<128x128xf32>
    %34 = tpu.matmul %31, %33, %cst_16 {dimension_numbers = #tpu.dot_dimension_numbers<[1], [0], [0], [1], [0, 0, 1, 1], [], []>} : vector<128x32xbf16>, vector<32x128xbf16>, vector<128x128xf32> -> vector<128x128xf32>
    %c0_17 = arith.constant 0 : index
    %c0_18 = arith.constant 0 : index
    %c0_19 = arith.constant 0 : index
    %35 = vector.load %arg5[%c0_17, %c0_18, %c0_19] : memref<1x1x128xf32, #tpu.memory_space<vmem>>, vector<1x1x128xf32>
    %36 = vector.shape_cast %35 : vector<1x1x128xf32> to vector<1x128xf32>
    %37 = vector.broadcast %36 : vector<1x128xf32> to vector<128x128xf32>
    %38 = arith.addf %34, %37 : vector<128x128xf32>
    %39 = vector.extract_strided_slice %38 {offsets = [0, 96], sizes = [128, 32], strides = [1, 1]} : vector<128x128xf32> to vector<128x32xf32>
    %40 = arith.negf %39 : vector<128x32xf32>
    %41 = math.exp %40 : vector<128x32xf32>
    %cst_20 = arith.constant 1.000000e+00 : f32
    %42 = vector.broadcast %cst_20 : f32 to vector<128x32xf32>
    %43 = arith.addf %42, %41 : vector<128x32xf32>
    %44 = arith.divf %42, %43 : vector<128x32xf32>
    %45 = vector.extract_strided_slice %38 {offsets = [0, 0], sizes = [128, 96], strides = [1, 1]} : vector<128x128xf32> to vector<128x96xf32>
    %46 = arith.truncf %45 : vector<128x96xf32> to vector<128x96xbf16>
    %47 = vector.extract_strided_slice %46 {offsets = [0, 0], sizes = [128, 8], strides = [1, 1]} : vector<128x96xbf16> to vector<128x8xbf16>
    %48 = vector.shape_cast %47 : vector<128x8xbf16> to vector<8x16x8xbf16>
    %49 = vector.extract_strided_slice %46 {offsets = [0, 32], sizes = [128, 8], strides = [1, 1]} : vector<128x96xbf16> to vector<128x8xbf16>
    %50 = vector.shape_cast %49 : vector<128x8xbf16> to vector<8x16x8xbf16>
    %51 = vector.extract_strided_slice %46 {offsets = [0, 64], sizes = [128, 8], strides = [1, 1]} : vector<128x96xbf16> to vector<128x8xbf16>
    %52 = vector.shape_cast %51 : vector<128x8xbf16> to vector<8x16x8xbf16>
    "tpu.trace_start"() <{level = 10 : i32, message = "bqd,bkd->bqk"}> : () -> ()
    %cst_21 = arith.constant dense<0.000000e+00> : vector<8x16x16xf32>
    %53 = tpu.matmul %48, %50, %cst_21 {dimension_numbers = #tpu.dot_dimension_numbers<[2], [2], [1], [1], [0, 0, 0, 1, 1, 1], [0], [0]>} : vector<8x16x8xbf16>, vector<8x16x8xbf16>, vector<8x16x16xf32> -> vector<8x16x16xf32>
    "tpu.trace_stop"() : () -> ()
    %cst_22 = arith.constant dense<0xFF800000> : vector<8x16xf32>
    %54 = vector.multi_reduction <maximumf>, %53, %cst_22 [2] : vector<8x16x16xf32> to vector<8x16xf32>
    %55 = vector.shape_cast %54 : vector<8x16xf32> to vector<8x16x1xf32>
    %56 = vector.broadcast %55 : vector<8x16x1xf32> to vector<8x16x16xf32>
    %57 = arith.subf %53, %56 : vector<8x16x16xf32>
    %58 = math.exp %57 : vector<8x16x16xf32>
    %cst_23 = arith.constant dense<0.000000e+00> : vector<8x16xf32>
    %59 = vector.multi_reduction <add>, %58, %cst_23 [2] : vector<8x16x16xf32> to vector<8x16xf32>
    %60 = vector.shape_cast %59 : vector<8x16xf32> to vector<8x16x1xf32>
    %61 = tpu.reciprocal %60 {approx = true} : vector<8x16x1xf32> -> vector<8x16x1xf32>
    %62 = vector.broadcast %61 : vector<8x16x1xf32> to vector<8x16x16xf32>
    %63 = arith.mulf %58, %62 : vector<8x16x16xf32>
    %64 = arith.truncf %63 : vector<8x16x16xf32> to vector<8x16x16xbf16>
    "tpu.trace_start"() <{level = 10 : i32, message = "bqk,bkd->bqd"}> : () -> ()
    %cst_24 = arith.constant dense<0.000000e+00> : vector<8x16x8xf32>
    %65 = tpu.matmul %64, %52, %cst_24 {dimension_numbers = #tpu.dot_dimension_numbers<[2], [1], [1], [2], [0, 0, 0, 1, 1, 2], [0], [0]>} : vector<8x16x16xbf16>, vector<8x16x8xbf16>, vector<8x16x8xf32> -> vector<8x16x8xf32>
    "tpu.trace_stop"() : () -> ()
    %66 = vector.shape_cast %65 : vector<8x16x8xf32> to vector<128x8xf32>
    %67 = vector.extract_strided_slice %46 {offsets = [0, 8], sizes = [128, 8], strides = [1, 1]} : vector<128x96xbf16> to vector<128x8xbf16>
    %68 = vector.shape_cast %67 : vector<128x8xbf16> to vector<8x16x8xbf16>
    %69 = vector.extract_strided_slice %46 {offsets = [0, 40], sizes = [128, 8], strides = [1, 1]} : vector<128x96xbf16> to vector<128x8xbf16>
    %70 = vector.shape_cast %69 : vector<128x8xbf16> to vector<8x16x8xbf16>
    %71 = vector.extract_strided_slice %46 {offsets = [0, 72], sizes = [128, 8], strides = [1, 1]} : vector<128x96xbf16> to vector<128x8xbf16>
    %72 = vector.shape_cast %71 : vector<128x8xbf16> to vector<8x16x8xbf16>
    "tpu.trace_start"() <{level = 10 : i32, message = "bqd,bkd->bqk"}> : () -> ()
    %cst_25 = arith.constant dense<0.000000e+00> : vector<8x16x16xf32>
    %73 = tpu.matmul %68, %70, %cst_25 {dimension_numbers = #tpu.dot_dimension_numbers<[2], [2], [1], [1], [0, 0, 0, 1, 1, 1], [0], [0]>} : vector<8x16x8xbf16>, vector<8x16x8xbf16>, vector<8x16x16xf32> -> vector<8x16x16xf32>
    "tpu.trace_stop"() : () -> ()
    %cst_26 = arith.constant dense<0xFF800000> : vector<8x16xf32>
    %74 = vector.multi_reduction <maximumf>, %73, %cst_26 [2] : vector<8x16x16xf32> to vector<8x16xf32>
    %75 = vector.shape_cast %74 : vector<8x16xf32> to vector<8x16x1xf32>
    %76 = vector.broadcast %75 : vector<8x16x1xf32> to vector<8x16x16xf32>
    %77 = arith.subf %73, %76 : vector<8x16x16xf32>
    %78 = math.exp %77 : vector<8x16x16xf32>
    %cst_27 = arith.constant dense<0.000000e+00> : vector<8x16xf32>
    %79 = vector.multi_reduction <add>, %78, %cst_27 [2] : vector<8x16x16xf32> to vector<8x16xf32>
    %80 = vector.shape_cast %79 : vector<8x16xf32> to vector<8x16x1xf32>
    %81 = tpu.reciprocal %80 {approx = true} : vector<8x16x1xf32> -> vector<8x16x1xf32>
    %82 = vector.broadcast %81 : vector<8x16x1xf32> to vector<8x16x16xf32>
    %83 = arith.mulf %78, %82 : vector<8x16x16xf32>
    %84 = arith.truncf %83 : vector<8x16x16xf32> to vector<8x16x16xbf16>
    "tpu.trace_start"() <{level = 10 : i32, message = "bqk,bkd->bqd"}> : () -> ()
    %cst_28 = arith.constant dense<0.000000e+00> : vector<8x16x8xf32>
    %85 = tpu.matmul %84, %72, %cst_28 {dimension_numbers = #tpu.dot_dimension_numbers<[2], [1], [1], [2], [0, 0, 0, 1, 1, 2], [0], [0]>} : vector<8x16x16xbf16>, vector<8x16x8xbf16>, vector<8x16x8xf32> -> vector<8x16x8xf32>
    "tpu.trace_stop"() : () -> ()
    %86 = vector.shape_cast %85 : vector<8x16x8xf32> to vector<128x8xf32>
    %87 = vector.extract_strided_slice %46 {offsets = [0, 16], sizes = [128, 8], strides = [1, 1]} : vector<128x96xbf16> to vector<128x8xbf16>
    %88 = vector.shape_cast %87 : vector<128x8xbf16> to vector<8x16x8xbf16>
    %89 = vector.extract_strided_slice %46 {offsets = [0, 48], sizes = [128, 8], strides = [1, 1]} : vector<128x96xbf16> to vector<128x8xbf16>
    %90 = vector.shape_cast %89 : vector<128x8xbf16> to vector<8x16x8xbf16>
    %91 = vector.extract_strided_slice %46 {offsets = [0, 80], sizes = [128, 8], strides = [1, 1]} : vector<128x96xbf16> to vector<128x8xbf16>
    %92 = vector.shape_cast %91 : vector<128x8xbf16> to vector<8x16x8xbf16>
    "tpu.trace_start"() <{level = 10 : i32, message = "bqd,bkd->bqk"}> : () -> ()
    %cst_29 = arith.constant dense<0.000000e+00> : vector<8x16x16xf32>
    %93 = tpu.matmul %88, %90, %cst_29 {dimension_numbers = #tpu.dot_dimension_numbers<[2], [2], [1], [1], [0, 0, 0, 1, 1, 1], [0], [0]>} : vector<8x16x8xbf16>, vector<8x16x8xbf16>, vector<8x16x16xf32> -> vector<8x16x16xf32>
    "tpu.trace_stop"() : () -> ()
    %cst_30 = arith.constant dense<0xFF800000> : vector<8x16xf32>
    %94 = vector.multi_reduction <maximumf>, %93, %cst_30 [2] : vector<8x16x16xf32> to vector<8x16xf32>
    %95 = vector.shape_cast %94 : vector<8x16xf32> to vector<8x16x1xf32>
    %96 = vector.broadcast %95 : vector<8x16x1xf32> to vector<8x16x16xf32>
    %97 = arith.subf %93, %96 : vector<8x16x16xf32>
    %98 = math.exp %97 : vector<8x16x16xf32>
    %cst_31 = arith.constant dense<0.000000e+00> : vector<8x16xf32>
    %99 = vector.multi_reduction <add>, %98, %cst_31 [2] : vector<8x16x16xf32> to vector<8x16xf32>
    %100 = vector.shape_cast %99 : vector<8x16xf32> to vector<8x16x1xf32>
    %101 = tpu.reciprocal %100 {approx = true} : vector<8x16x1xf32> -> vector<8x16x1xf32>
    %102 = vector.broadcast %101 : vector<8x16x1xf32> to vector<8x16x16xf32>
    %103 = arith.mulf %98, %102 : vector<8x16x16xf32>
    %104 = arith.truncf %103 : vector<8x16x16xf32> to vector<8x16x16xbf16>
    "tpu.trace_start"() <{level = 10 : i32, message = "bqk,bkd->bqd"}> : () -> ()
    %cst_32 = arith.constant dense<0.000000e+00> : vector<8x16x8xf32>
    %105 = tpu.matmul %104, %92, %cst_32 {dimension_numbers = #tpu.dot_dimension_numbers<[2], [1], [1], [2], [0, 0, 0, 1, 1, 2], [0], [0]>} : vector<8x16x16xbf16>, vector<8x16x8xbf16>, vector<8x16x8xf32> -> vector<8x16x8xf32>
    "tpu.trace_stop"() : () -> ()
    %106 = vector.shape_cast %105 : vector<8x16x8xf32> to vector<128x8xf32>
    %107 = vector.extract_strided_slice %46 {offsets = [0, 24], sizes = [128, 8], strides = [1, 1]} : vector<128x96xbf16> to vector<128x8xbf16>
    %108 = vector.shape_cast %107 : vector<128x8xbf16> to vector<8x16x8xbf16>
    %109 = vector.extract_strided_slice %46 {offsets = [0, 56], sizes = [128, 8], strides = [1, 1]} : vector<128x96xbf16> to vector<128x8xbf16>
    %110 = vector.shape_cast %109 : vector<128x8xbf16> to vector<8x16x8xbf16>
    %111 = vector.extract_strided_slice %46 {offsets = [0, 88], sizes = [128, 8], strides = [1, 1]} : vector<128x96xbf16> to vector<128x8xbf16>
    %112 = vector.shape_cast %111 : vector<128x8xbf16> to vector<8x16x8xbf16>
    "tpu.trace_start"() <{level = 10 : i32, message = "bqd,bkd->bqk"}> : () -> ()
    %cst_33 = arith.constant dense<0.000000e+00> : vector<8x16x16xf32>
    %113 = tpu.matmul %108, %110, %cst_33 {dimension_numbers = #tpu.dot_dimension_numbers<[2], [2], [1], [1], [0, 0, 0, 1, 1, 1], [0], [0]>} : vector<8x16x8xbf16>, vector<8x16x8xbf16>, vector<8x16x16xf32> -> vector<8x16x16xf32>
    "tpu.trace_stop"() : () -> ()
    %cst_34 = arith.constant dense<0xFF800000> : vector<8x16xf32>
    %114 = vector.multi_reduction <maximumf>, %113, %cst_34 [2] : vector<8x16x16xf32> to vector<8x16xf32>
    %115 = vector.shape_cast %114 : vector<8x16xf32> to vector<8x16x1xf32>
    %116 = vector.broadcast %115 : vector<8x16x1xf32> to vector<8x16x16xf32>
    %117 = arith.subf %113, %116 : vector<8x16x16xf32>
    %118 = math.exp %117 : vector<8x16x16xf32>
    %cst_35 = arith.constant dense<0.000000e+00> : vector<8x16xf32>
    %119 = vector.multi_reduction <add>, %118, %cst_35 [2] : vector<8x16x16xf32> to vector<8x16xf32>
    %120 = vector.shape_cast %119 : vector<8x16xf32> to vector<8x16x1xf32>
    %121 = tpu.reciprocal %120 {approx = true} : vector<8x16x1xf32> -> vector<8x16x1xf32>
    %122 = vector.broadcast %121 : vector<8x16x1xf32> to vector<8x16x16xf32>
    %123 = arith.mulf %118, %122 : vector<8x16x16xf32>
    %124 = arith.truncf %123 : vector<8x16x16xf32> to vector<8x16x16xbf16>
    "tpu.trace_start"() <{level = 10 : i32, message = "bqk,bkd->bqd"}> : () -> ()
    %cst_36 = arith.constant dense<0.000000e+00> : vector<8x16x8xf32>
    %125 = tpu.matmul %124, %112, %cst_36 {dimension_numbers = #tpu.dot_dimension_numbers<[2], [1], [1], [2], [0, 0, 0, 1, 1, 2], [0], [0]>} : vector<8x16x16xbf16>, vector<8x16x8xbf16>, vector<8x16x8xf32> -> vector<8x16x8xf32>
    "tpu.trace_stop"() : () -> ()
    %126 = vector.shape_cast %125 : vector<8x16x8xf32> to vector<128x8xf32>
    %127 = tpu.concatenate %66, %86, %106, %126 in 1 : vector<128x8xf32>, vector<128x8xf32>, vector<128x8xf32>, vector<128x8xf32> -> vector<128x32xf32>
    %128 = arith.mulf %127, %44 : vector<128x32xf32>
    %129 = arith.truncf %128 : vector<128x32xf32> to vector<128x32xbf16>
    %c0_37 = arith.constant 0 : index
    %c0_38 = arith.constant 0 : index
    %c0_39 = arith.constant 0 : index
    %130 = vector.load %arg6[%c0_37, %c0_38, %c0_39] : memref<1x32x32xbf16, #tpu.memory_space<vmem>>, vector<1x32x32xbf16>
    %131 = vector.shape_cast %130 : vector<1x32x32xbf16> to vector<32x32xbf16>
    %cst_40 = arith.constant dense<0.000000e+00> : vector<128x32xf32>
    %132 = tpu.matmul %129, %131, %cst_40 {dimension_numbers = #tpu.dot_dimension_numbers<[1], [0], [0], [1], [0, 0, 1, 1], [], []>} : vector<128x32xbf16>, vector<32x32xbf16>, vector<128x32xf32> -> vector<128x32xf32>
    %c0_41 = arith.constant 0 : index
    %c0_42 = arith.constant 0 : index
    %c0_43 = arith.constant 0 : index
    %133 = vector.load %arg7[%c0_41, %c0_42, %c0_43] : memref<1x1x32xf32, #tpu.memory_space<vmem>>, vector<1x1x32xf32>
    %134 = vector.shape_cast %133 : vector<1x1x32xf32> to vector<1x32xf32>
    %135 = vector.broadcast %134 : vector<1x32xf32> to vector<128x32xf32>
    %136 = arith.addf %132, %135 : vector<128x32xf32>
    %137 = vector.shape_cast %136 : vector<128x32xf32> to vector<8x16x32xf32>
    %138 = arith.addf %3, %137 : vector<8x16x32xf32>
    %139 = tpu.transpose %138, [1, 0, 2] : vector<8x16x32xf32> -> vector<16x8x32xf32>
    %140 = vector.shape_cast %139 : vector<16x8x32xf32> to vector<128x32xf32>
    %c0_44 = arith.constant 0 : index
    %c0_45 = arith.constant 0 : index
    %c0_46 = arith.constant 0 : index
    %141 = vector.load %arg8[%c0_44, %c0_45, %c0_46] : memref<1x1x32xf32, #tpu.memory_space<vmem>>, vector<1x1x32xf32>
    %142 = vector.shape_cast %141 : vector<1x1x32xf32> to vector<1x32xf32>
    %c0_47 = arith.constant 0 : index
    %c0_48 = arith.constant 0 : index
    %c0_49 = arith.constant 0 : index
    %143 = vector.load %arg9[%c0_47, %c0_48, %c0_49] : memref<1x1x32xf32, #tpu.memory_space<vmem>>, vector<1x1x32xf32>
    %144 = vector.shape_cast %143 : vector<1x1x32xf32> to vector<1x32xf32>
    %cst_50 = arith.constant dense<0.000000e+00> : vector<128xf32>
    %145 = vector.multi_reduction <add>, %140, %cst_50 [1] : vector<128x32xf32> to vector<128xf32>
    %146 = vector.shape_cast %145 : vector<128xf32> to vector<128x1xf32>
    %cst_51 = arith.constant 3.200000e+01 : f32
    %147 = vector.broadcast %cst_51 : f32 to vector<128x1xf32>
    %148 = arith.divf %146, %147 : vector<128x1xf32>
    %149 = vector.broadcast %148 : vector<128x1xf32> to vector<128x32xf32>
    %150 = arith.subf %140, %149 : vector<128x32xf32>
    %151 = arith.mulf %150, %150 : vector<128x32xf32>
    %cst_52 = arith.constant dense<0.000000e+00> : vector<128xf32>
    %152 = vector.multi_reduction <add>, %151, %cst_52 [1] : vector<128x32xf32> to vector<128xf32>
    %153 = vector.shape_cast %152 : vector<128xf32> to vector<128x1xf32>
    %cst_53 = arith.constant 3.200000e+01 : f32
    %154 = vector.broadcast %cst_53 : f32 to vector<128x1xf32>
    %155 = arith.divf %153, %154 : vector<128x1xf32>
    %156 = vector.broadcast %148 : vector<128x1xf32> to vector<128x32xf32>
    %157 = arith.subf %140, %156 : vector<128x32xf32>
    %cst_54 = arith.constant 9.99999974E-6 : f32
    %158 = vector.broadcast %cst_54 : f32 to vector<128x1xf32>
    %159 = arith.addf %155, %158 : vector<128x1xf32>
    %160 = math.rsqrt %159 : vector<128x1xf32>
    %161 = vector.broadcast %160 : vector<128x1xf32> to vector<128x32xf32>
    %162 = arith.mulf %157, %161 : vector<128x32xf32>
    %163 = vector.broadcast %142 : vector<1x32xf32> to vector<128x32xf32>
    %164 = arith.mulf %162, %163 : vector<128x32xf32>
    %165 = vector.broadcast %144 : vector<1x32xf32> to vector<128x32xf32>
    %166 = arith.addf %164, %165 : vector<128x32xf32>
    %167 = arith.truncf %166 : vector<128x32xf32> to vector<128x32xbf16>
    %c0_55 = arith.constant 0 : index
    %c0_56 = arith.constant 0 : index
    %c0_57 = arith.constant 0 : index
    %168 = vector.load %arg10[%c0_55, %c0_56, %c0_57] : memref<1x32x128xbf16, #tpu.memory_space<vmem>>, vector<1x32x128xbf16>
    %169 = vector.shape_cast %168 : vector<1x32x128xbf16> to vector<32x128xbf16>
    %cst_58 = arith.constant dense<0.000000e+00> : vector<128x128xf32>
    %170 = tpu.matmul %167, %169, %cst_58 {dimension_numbers = #tpu.dot_dimension_numbers<[1], [0], [0], [1], [0, 0, 1, 1], [], []>} : vector<128x32xbf16>, vector<32x128xbf16>, vector<128x128xf32> -> vector<128x128xf32>
    %c0_59 = arith.constant 0 : index
    %c0_60 = arith.constant 0 : index
    %c0_61 = arith.constant 0 : index
    %171 = vector.load %arg11[%c0_59, %c0_60, %c0_61] : memref<1x1x128xf32, #tpu.memory_space<vmem>>, vector<1x1x128xf32>
    %172 = vector.shape_cast %171 : vector<1x1x128xf32> to vector<1x128xf32>
    %173 = vector.broadcast %172 : vector<1x128xf32> to vector<128x128xf32>
    %174 = arith.addf %170, %173 : vector<128x128xf32>
    %175 = vector.extract_strided_slice %174 {offsets = [0, 96], sizes = [128, 32], strides = [1, 1]} : vector<128x128xf32> to vector<128x32xf32>
    %176 = arith.negf %175 : vector<128x32xf32>
    %177 = math.exp %176 : vector<128x32xf32>
    %cst_62 = arith.constant 1.000000e+00 : f32
    %178 = vector.broadcast %cst_62 : f32 to vector<128x32xf32>
    %179 = arith.addf %178, %177 : vector<128x32xf32>
    %180 = arith.divf %178, %179 : vector<128x32xf32>
    %181 = vector.extract_strided_slice %174 {offsets = [0, 0], sizes = [128, 96], strides = [1, 1]} : vector<128x128xf32> to vector<128x96xf32>
    %182 = arith.truncf %181 : vector<128x96xf32> to vector<128x96xbf16>
    %183 = vector.extract_strided_slice %182 {offsets = [0, 0], sizes = [128, 8], strides = [1, 1]} : vector<128x96xbf16> to vector<128x8xbf16>
    %184 = vector.shape_cast %183 : vector<128x8xbf16> to vector<16x8x8xbf16>
    %185 = vector.extract_strided_slice %182 {offsets = [0, 32], sizes = [128, 8], strides = [1, 1]} : vector<128x96xbf16> to vector<128x8xbf16>
    %186 = vector.shape_cast %185 : vector<128x8xbf16> to vector<16x8x8xbf16>
    %187 = vector.extract_strided_slice %182 {offsets = [0, 64], sizes = [128, 8], strides = [1, 1]} : vector<128x96xbf16> to vector<128x8xbf16>
    %188 = vector.shape_cast %187 : vector<128x8xbf16> to vector<16x8x8xbf16>
    "tpu.trace_start"() <{level = 10 : i32, message = "bqd,bkd->bqk"}> : () -> ()
    %cst_63 = arith.constant dense<0.000000e+00> : vector<16x8x8xf32>
    %189 = tpu.matmul %184, %186, %cst_63 {dimension_numbers = #tpu.dot_dimension_numbers<[2], [2], [1], [1], [0, 0, 0, 1, 1, 1], [0], [0]>} : vector<16x8x8xbf16>, vector<16x8x8xbf16>, vector<16x8x8xf32> -> vector<16x8x8xf32>
    "tpu.trace_stop"() : () -> ()
    %cst_64 = arith.constant dense<0xFF800000> : vector<16x8xf32>
    %190 = vector.multi_reduction <maximumf>, %189, %cst_64 [2] : vector<16x8x8xf32> to vector<16x8xf32>
    %191 = vector.shape_cast %190 : vector<16x8xf32> to vector<16x8x1xf32>
    %192 = vector.broadcast %191 : vector<16x8x1xf32> to vector<16x8x8xf32>
    %193 = arith.subf %189, %192 : vector<16x8x8xf32>
    %194 = math.exp %193 : vector<16x8x8xf32>
    %cst_65 = arith.constant dense<0.000000e+00> : vector<16x8xf32>
    %195 = vector.multi_reduction <add>, %194, %cst_65 [2] : vector<16x8x8xf32> to vector<16x8xf32>
    %196 = vector.shape_cast %195 : vector<16x8xf32> to vector<16x8x1xf32>
    %197 = tpu.reciprocal %196 {approx = true} : vector<16x8x1xf32> -> vector<16x8x1xf32>
    %198 = vector.broadcast %197 : vector<16x8x1xf32> to vector<16x8x8xf32>
    %199 = arith.mulf %194, %198 : vector<16x8x8xf32>
    %200 = arith.truncf %199 : vector<16x8x8xf32> to vector<16x8x8xbf16>
    "tpu.trace_start"() <{level = 10 : i32, message = "bqk,bkd->bqd"}> : () -> ()
    %cst_66 = arith.constant dense<0.000000e+00> : vector<16x8x8xf32>
    %201 = tpu.matmul %200, %188, %cst_66 {dimension_numbers = #tpu.dot_dimension_numbers<[2], [1], [1], [2], [0, 0, 0, 1, 1, 2], [0], [0]>} : vector<16x8x8xbf16>, vector<16x8x8xbf16>, vector<16x8x8xf32> -> vector<16x8x8xf32>
    "tpu.trace_stop"() : () -> ()
    %202 = vector.shape_cast %201 : vector<16x8x8xf32> to vector<128x8xf32>
    %203 = vector.extract_strided_slice %182 {offsets = [0, 8], sizes = [128, 8], strides = [1, 1]} : vector<128x96xbf16> to vector<128x8xbf16>
    %204 = vector.shape_cast %203 : vector<128x8xbf16> to vector<16x8x8xbf16>
    %205 = vector.extract_strided_slice %182 {offsets = [0, 40], sizes = [128, 8], strides = [1, 1]} : vector<128x96xbf16> to vector<128x8xbf16>
    %206 = vector.shape_cast %205 : vector<128x8xbf16> to vector<16x8x8xbf16>
    %207 = vector.extract_strided_slice %182 {offsets = [0, 72], sizes = [128, 8], strides = [1, 1]} : vector<128x96xbf16> to vector<128x8xbf16>
    %208 = vector.shape_cast %207 : vector<128x8xbf16> to vector<16x8x8xbf16>
    "tpu.trace_start"() <{level = 10 : i32, message = "bqd,bkd->bqk"}> : () -> ()
    %cst_67 = arith.constant dense<0.000000e+00> : vector<16x8x8xf32>
    %209 = tpu.matmul %204, %206, %cst_67 {dimension_numbers = #tpu.dot_dimension_numbers<[2], [2], [1], [1], [0, 0, 0, 1, 1, 1], [0], [0]>} : vector<16x8x8xbf16>, vector<16x8x8xbf16>, vector<16x8x8xf32> -> vector<16x8x8xf32>
    "tpu.trace_stop"() : () -> ()
    %cst_68 = arith.constant dense<0xFF800000> : vector<16x8xf32>
    %210 = vector.multi_reduction <maximumf>, %209, %cst_68 [2] : vector<16x8x8xf32> to vector<16x8xf32>
    %211 = vector.shape_cast %210 : vector<16x8xf32> to vector<16x8x1xf32>
    %212 = vector.broadcast %211 : vector<16x8x1xf32> to vector<16x8x8xf32>
    %213 = arith.subf %209, %212 : vector<16x8x8xf32>
    %214 = math.exp %213 : vector<16x8x8xf32>
    %cst_69 = arith.constant dense<0.000000e+00> : vector<16x8xf32>
    %215 = vector.multi_reduction <add>, %214, %cst_69 [2] : vector<16x8x8xf32> to vector<16x8xf32>
    %216 = vector.shape_cast %215 : vector<16x8xf32> to vector<16x8x1xf32>
    %217 = tpu.reciprocal %216 {approx = true} : vector<16x8x1xf32> -> vector<16x8x1xf32>
    %218 = vector.broadcast %217 : vector<16x8x1xf32> to vector<16x8x8xf32>
    %219 = arith.mulf %214, %218 : vector<16x8x8xf32>
    %220 = arith.truncf %219 : vector<16x8x8xf32> to vector<16x8x8xbf16>
    "tpu.trace_start"() <{level = 10 : i32, message = "bqk,bkd->bqd"}> : () -> ()
    %cst_70 = arith.constant dense<0.000000e+00> : vector<16x8x8xf32>
    %221 = tpu.matmul %220, %208, %cst_70 {dimension_numbers = #tpu.dot_dimension_numbers<[2], [1], [1], [2], [0, 0, 0, 1, 1, 2], [0], [0]>} : vector<16x8x8xbf16>, vector<16x8x8xbf16>, vector<16x8x8xf32> -> vector<16x8x8xf32>
    "tpu.trace_stop"() : () -> ()
    %222 = vector.shape_cast %221 : vector<16x8x8xf32> to vector<128x8xf32>
    %223 = vector.extract_strided_slice %182 {offsets = [0, 16], sizes = [128, 8], strides = [1, 1]} : vector<128x96xbf16> to vector<128x8xbf16>
    %224 = vector.shape_cast %223 : vector<128x8xbf16> to vector<16x8x8xbf16>
    %225 = vector.extract_strided_slice %182 {offsets = [0, 48], sizes = [128, 8], strides = [1, 1]} : vector<128x96xbf16> to vector<128x8xbf16>
    %226 = vector.shape_cast %225 : vector<128x8xbf16> to vector<16x8x8xbf16>
    %227 = vector.extract_strided_slice %182 {offsets = [0, 80], sizes = [128, 8], strides = [1, 1]} : vector<128x96xbf16> to vector<128x8xbf16>
    %228 = vector.shape_cast %227 : vector<128x8xbf16> to vector<16x8x8xbf16>
    "tpu.trace_start"() <{level = 10 : i32, message = "bqd,bkd->bqk"}> : () -> ()
    %cst_71 = arith.constant dense<0.000000e+00> : vector<16x8x8xf32>
    %229 = tpu.matmul %224, %226, %cst_71 {dimension_numbers = #tpu.dot_dimension_numbers<[2], [2], [1], [1], [0, 0, 0, 1, 1, 1], [0], [0]>} : vector<16x8x8xbf16>, vector<16x8x8xbf16>, vector<16x8x8xf32> -> vector<16x8x8xf32>
    "tpu.trace_stop"() : () -> ()
    %cst_72 = arith.constant dense<0xFF800000> : vector<16x8xf32>
    %230 = vector.multi_reduction <maximumf>, %229, %cst_72 [2] : vector<16x8x8xf32> to vector<16x8xf32>
    %231 = vector.shape_cast %230 : vector<16x8xf32> to vector<16x8x1xf32>
    %232 = vector.broadcast %231 : vector<16x8x1xf32> to vector<16x8x8xf32>
    %233 = arith.subf %229, %232 : vector<16x8x8xf32>
    %234 = math.exp %233 : vector<16x8x8xf32>
    %cst_73 = arith.constant dense<0.000000e+00> : vector<16x8xf32>
    %235 = vector.multi_reduction <add>, %234, %cst_73 [2] : vector<16x8x8xf32> to vector<16x8xf32>
    %236 = vector.shape_cast %235 : vector<16x8xf32> to vector<16x8x1xf32>
    %237 = tpu.reciprocal %236 {approx = true} : vector<16x8x1xf32> -> vector<16x8x1xf32>
    %238 = vector.broadcast %237 : vector<16x8x1xf32> to vector<16x8x8xf32>
    %239 = arith.mulf %234, %238 : vector<16x8x8xf32>
    %240 = arith.truncf %239 : vector<16x8x8xf32> to vector<16x8x8xbf16>
    "tpu.trace_start"() <{level = 10 : i32, message = "bqk,bkd->bqd"}> : () -> ()
    %cst_74 = arith.constant dense<0.000000e+00> : vector<16x8x8xf32>
    %241 = tpu.matmul %240, %228, %cst_74 {dimension_numbers = #tpu.dot_dimension_numbers<[2], [1], [1], [2], [0, 0, 0, 1, 1, 2], [0], [0]>} : vector<16x8x8xbf16>, vector<16x8x8xbf16>, vector<16x8x8xf32> -> vector<16x8x8xf32>
    "tpu.trace_stop"() : () -> ()
    %242 = vector.shape_cast %241 : vector<16x8x8xf32> to vector<128x8xf32>
    %243 = vector.extract_strided_slice %182 {offsets = [0, 24], sizes = [128, 8], strides = [1, 1]} : vector<128x96xbf16> to vector<128x8xbf16>
    %244 = vector.shape_cast %243 : vector<128x8xbf16> to vector<16x8x8xbf16>
    %245 = vector.extract_strided_slice %182 {offsets = [0, 56], sizes = [128, 8], strides = [1, 1]} : vector<128x96xbf16> to vector<128x8xbf16>
    %246 = vector.shape_cast %245 : vector<128x8xbf16> to vector<16x8x8xbf16>
    %247 = vector.extract_strided_slice %182 {offsets = [0, 88], sizes = [128, 8], strides = [1, 1]} : vector<128x96xbf16> to vector<128x8xbf16>
    %248 = vector.shape_cast %247 : vector<128x8xbf16> to vector<16x8x8xbf16>
    "tpu.trace_start"() <{level = 10 : i32, message = "bqd,bkd->bqk"}> : () -> ()
    %cst_75 = arith.constant dense<0.000000e+00> : vector<16x8x8xf32>
    %249 = tpu.matmul %244, %246, %cst_75 {dimension_numbers = #tpu.dot_dimension_numbers<[2], [2], [1], [1], [0, 0, 0, 1, 1, 1], [0], [0]>} : vector<16x8x8xbf16>, vector<16x8x8xbf16>, vector<16x8x8xf32> -> vector<16x8x8xf32>
    "tpu.trace_stop"() : () -> ()
    %cst_76 = arith.constant dense<0xFF800000> : vector<16x8xf32>
    %250 = vector.multi_reduction <maximumf>, %249, %cst_76 [2] : vector<16x8x8xf32> to vector<16x8xf32>
    %251 = vector.shape_cast %250 : vector<16x8xf32> to vector<16x8x1xf32>
    %252 = vector.broadcast %251 : vector<16x8x1xf32> to vector<16x8x8xf32>
    %253 = arith.subf %249, %252 : vector<16x8x8xf32>
    %254 = math.exp %253 : vector<16x8x8xf32>
    %cst_77 = arith.constant dense<0.000000e+00> : vector<16x8xf32>
    %255 = vector.multi_reduction <add>, %254, %cst_77 [2] : vector<16x8x8xf32> to vector<16x8xf32>
    %256 = vector.shape_cast %255 : vector<16x8xf32> to vector<16x8x1xf32>
    %257 = tpu.reciprocal %256 {approx = true} : vector<16x8x1xf32> -> vector<16x8x1xf32>
    %258 = vector.broadcast %257 : vector<16x8x1xf32> to vector<16x8x8xf32>
    %259 = arith.mulf %254, %258 : vector<16x8x8xf32>
    %260 = arith.truncf %259 : vector<16x8x8xf32> to vector<16x8x8xbf16>
    "tpu.trace_start"() <{level = 10 : i32, message = "bqk,bkd->bqd"}> : () -> ()
    %cst_78 = arith.constant dense<0.000000e+00> : vector<16x8x8xf32>
    %261 = tpu.matmul %260, %248, %cst_78 {dimension_numbers = #tpu.dot_dimension_numbers<[2], [1], [1], [2], [0, 0, 0, 1, 1, 2], [0], [0]>} : vector<16x8x8xbf16>, vector<16x8x8xbf16>, vector<16x8x8xf32> -> vector<16x8x8xf32>
    "tpu.trace_stop"() : () -> ()
    %262 = vector.shape_cast %261 : vector<16x8x8xf32> to vector<128x8xf32>
    %263 = tpu.concatenate %202, %222, %242, %262 in 1 : vector<128x8xf32>, vector<128x8xf32>, vector<128x8xf32>, vector<128x8xf32> -> vector<128x32xf32>
    %264 = arith.mulf %263, %180 : vector<128x32xf32>
    %265 = arith.truncf %264 : vector<128x32xf32> to vector<128x32xbf16>
    %c0_79 = arith.constant 0 : index
    %c0_80 = arith.constant 0 : index
    %c0_81 = arith.constant 0 : index
    %266 = vector.load %arg12[%c0_79, %c0_80, %c0_81] : memref<1x32x32xbf16, #tpu.memory_space<vmem>>, vector<1x32x32xbf16>
    %267 = vector.shape_cast %266 : vector<1x32x32xbf16> to vector<32x32xbf16>
    %cst_82 = arith.constant dense<0.000000e+00> : vector<128x32xf32>
    %268 = tpu.matmul %265, %267, %cst_82 {dimension_numbers = #tpu.dot_dimension_numbers<[1], [0], [0], [1], [0, 0, 1, 1], [], []>} : vector<128x32xbf16>, vector<32x32xbf16>, vector<128x32xf32> -> vector<128x32xf32>
    %c0_83 = arith.constant 0 : index
    %c0_84 = arith.constant 0 : index
    %c0_85 = arith.constant 0 : index
    %269 = vector.load %arg13[%c0_83, %c0_84, %c0_85] : memref<1x1x32xf32, #tpu.memory_space<vmem>>, vector<1x1x32xf32>
    %270 = vector.shape_cast %269 : vector<1x1x32xf32> to vector<1x32xf32>
    %271 = vector.broadcast %270 : vector<1x32xf32> to vector<128x32xf32>
    %272 = arith.addf %268, %271 : vector<128x32xf32>
    %273 = vector.shape_cast %272 : vector<128x32xf32> to vector<16x8x32xf32>
    %274 = arith.addf %139, %273 : vector<16x8x32xf32>
    %275 = tpu.transpose %274, [1, 0, 2] : vector<16x8x32xf32> -> vector<8x16x32xf32>
    %276 = vector.shape_cast %275 : vector<8x16x32xf32> to vector<128x32xf32>
    %c0_86 = arith.constant 0 : index
    %c0_87 = arith.constant 0 : index
    %c0_88 = arith.constant 0 : index
    %277 = vector.load %arg14[%c0_86, %c0_87, %c0_88] : memref<1x1x32xf32, #tpu.memory_space<vmem>>, vector<1x1x32xf32>
    %278 = vector.shape_cast %277 : vector<1x1x32xf32> to vector<1x32xf32>
    %c0_89 = arith.constant 0 : index
    %c0_90 = arith.constant 0 : index
    %c0_91 = arith.constant 0 : index
    %279 = vector.load %arg15[%c0_89, %c0_90, %c0_91] : memref<1x1x32xf32, #tpu.memory_space<vmem>>, vector<1x1x32xf32>
    %280 = vector.shape_cast %279 : vector<1x1x32xf32> to vector<1x32xf32>
    %cst_92 = arith.constant dense<0.000000e+00> : vector<128xf32>
    %281 = vector.multi_reduction <add>, %276, %cst_92 [1] : vector<128x32xf32> to vector<128xf32>
    %282 = vector.shape_cast %281 : vector<128xf32> to vector<128x1xf32>
    %cst_93 = arith.constant 3.200000e+01 : f32
    %283 = vector.broadcast %cst_93 : f32 to vector<128x1xf32>
    %284 = arith.divf %282, %283 : vector<128x1xf32>
    %285 = vector.broadcast %284 : vector<128x1xf32> to vector<128x32xf32>
    %286 = arith.subf %276, %285 : vector<128x32xf32>
    %287 = arith.mulf %286, %286 : vector<128x32xf32>
    %cst_94 = arith.constant dense<0.000000e+00> : vector<128xf32>
    %288 = vector.multi_reduction <add>, %287, %cst_94 [1] : vector<128x32xf32> to vector<128xf32>
    %289 = vector.shape_cast %288 : vector<128xf32> to vector<128x1xf32>
    %cst_95 = arith.constant 3.200000e+01 : f32
    %290 = vector.broadcast %cst_95 : f32 to vector<128x1xf32>
    %291 = arith.divf %289, %290 : vector<128x1xf32>
    %292 = vector.broadcast %284 : vector<128x1xf32> to vector<128x32xf32>
    %293 = arith.subf %276, %292 : vector<128x32xf32>
    %cst_96 = arith.constant 9.99999974E-6 : f32
    %294 = vector.broadcast %cst_96 : f32 to vector<128x1xf32>
    %295 = arith.addf %291, %294 : vector<128x1xf32>
    %296 = math.rsqrt %295 : vector<128x1xf32>
    %297 = vector.broadcast %296 : vector<128x1xf32> to vector<128x32xf32>
    %298 = arith.mulf %293, %297 : vector<128x32xf32>
    %299 = vector.broadcast %278 : vector<1x32xf32> to vector<128x32xf32>
    %300 = arith.mulf %298, %299 : vector<128x32xf32>
    %301 = vector.broadcast %280 : vector<1x32xf32> to vector<128x32xf32>
    %302 = arith.addf %300, %301 : vector<128x32xf32>
    %303 = arith.truncf %302 : vector<128x32xf32> to vector<128x32xbf16>
    %c0_97 = arith.constant 0 : index
    %c0_98 = arith.constant 0 : index
    %c0_99 = arith.constant 0 : index
    %304 = vector.load %arg16[%c0_97, %c0_98, %c0_99] : memref<1x32x128xbf16, #tpu.memory_space<vmem>>, vector<1x32x128xbf16>
    %305 = vector.shape_cast %304 : vector<1x32x128xbf16> to vector<32x128xbf16>
    %cst_100 = arith.constant dense<0.000000e+00> : vector<128x128xf32>
    %306 = tpu.matmul %303, %305, %cst_100 {dimension_numbers = #tpu.dot_dimension_numbers<[1], [0], [0], [1], [0, 0, 1, 1], [], []>} : vector<128x32xbf16>, vector<32x128xbf16>, vector<128x128xf32> -> vector<128x128xf32>
    %c0_101 = arith.constant 0 : index
    %c0_102 = arith.constant 0 : index
    %c0_103 = arith.constant 0 : index
    %307 = vector.load %arg17[%c0_101, %c0_102, %c0_103] : memref<1x1x128xf32, #tpu.memory_space<vmem>>, vector<1x1x128xf32>
    %308 = vector.shape_cast %307 : vector<1x1x128xf32> to vector<1x128xf32>
    %309 = vector.broadcast %308 : vector<1x128xf32> to vector<128x128xf32>
    %310 = arith.addf %306, %309 : vector<128x128xf32>
    %cst_104 = arith.constant 0.000000e+00 : f32
    %311 = vector.broadcast %cst_104 : f32 to vector<128x128xf32>
    %312 = arith.maximumf %310, %311 : vector<128x128xf32>
    %313 = arith.truncf %312 : vector<128x128xf32> to vector<128x128xbf16>
    %c0_105 = arith.constant 0 : index
    %c0_106 = arith.constant 0 : index
    %c0_107 = arith.constant 0 : index
    %314 = vector.load %arg18[%c0_105, %c0_106, %c0_107] : memref<1x128x32xbf16, #tpu.memory_space<vmem>>, vector<1x128x32xbf16>
    %315 = vector.shape_cast %314 : vector<1x128x32xbf16> to vector<128x32xbf16>
    %cst_108 = arith.constant dense<0.000000e+00> : vector<128x32xf32>
    %316 = tpu.matmul %313, %315, %cst_108 {dimension_numbers = #tpu.dot_dimension_numbers<[1], [0], [0], [1], [0, 0, 1, 1], [], []>} : vector<128x128xbf16>, vector<128x32xbf16>, vector<128x32xf32> -> vector<128x32xf32>
    %c0_109 = arith.constant 0 : index
    %c0_110 = arith.constant 0 : index
    %c0_111 = arith.constant 0 : index
    %317 = vector.load %arg19[%c0_109, %c0_110, %c0_111] : memref<1x1x32xf32, #tpu.memory_space<vmem>>, vector<1x1x32xf32>
    %318 = vector.shape_cast %317 : vector<1x1x32xf32> to vector<1x32xf32>
    %319 = vector.broadcast %318 : vector<1x32xf32> to vector<128x32xf32>
    %320 = arith.addf %316, %319 : vector<128x32xf32>
    %321 = vector.shape_cast %320 : vector<128x32xf32> to vector<8x16x32xf32>
    %322 = arith.addf %275, %321 : vector<8x16x32xf32>
    %c0_112 = arith.constant 0 : index
    %c0_113 = arith.constant 0 : index
    %c0_114 = arith.constant 0 : index
    %323 = vector.load %arg20[%c0_112, %c0_113, %c0_114] : memref<8x16x32xf32, #tpu.memory_space<vmem>>, vector<8x16x32xf32>
    tpu.vector_store %arg20[%c0_112, %c0_113, %c0_114], %322 {strides = array<i32>} : memref<8x16x32xf32, #tpu.memory_space<vmem>>, vector<8x16x32xf32>,
    return
  }
  func.func @transform_0(%arg0: i32) -> (i32, i32, i32) {
    %c0_i32 = arith.constant 0 : i32
    %c0_i32_0 = arith.constant 0 : i32
    %c0_i32_1 = arith.constant 0 : i32
    %c0_i32_2 = arith.constant 0 : i32
    return %c0_i32, %c0_i32_0, %c0_i32_1 : i32, i32, i32
  }
  func.func @transform_1(%arg0: i32) -> (i32, i32, i32) {
    %c0_i32 = arith.constant 0 : i32
    %c0_i32_0 = arith.constant 0 : i32
    %c0_i32_1 = arith.constant 0 : i32
    return %arg0, %c0_i32, %c0_i32_0 : i32, i32, i32
  }
  func.func @transform_2(%arg0: i32) -> (i32, i32, i32) {
    %c0_i32 = arith.constant 0 : i32
    %c0_i32_0 = arith.constant 0 : i32
    %c0_i32_1 = arith.constant 0 : i32
    return %arg0, %c0_i32, %c0_i32_0 : i32, i32, i32
  }
  func.func @transform_3(%arg0: i32) -> (i32, i32, i32) {
    %c0_i32 = arith.constant 0 : i32
    %c0_i32_0 = arith.constant 0 : i32
    %c0_i32_1 = arith.constant 0 : i32
    return %arg0, %c0_i32, %c0_i32_0 : i32, i32, i32
  }
  func.func @transform_4(%arg0: i32) -> (i32, i32, i32) {
    %c0_i32 = arith.constant 0 : i32
    %c0_i32_0 = arith.constant 0 : i32
    %c0_i32_1 = arith.constant 0 : i32
    return %arg0, %c0_i32, %c0_i32_0 : i32, i32, i32
  }
  func.func @transform_5(%arg0: i32) -> (i32, i32, i32) {
    %c0_i32 = arith.constant 0 : i32
    %c0_i32_0 = arith.constant 0 : i32
    %c0_i32_1 = arith.constant 0 : i32
    return %arg0, %c0_i32, %c0_i32_0 : i32, i32, i32
  }
  func.func @transform_6(%arg0: i32) -> (i32, i32, i32) {
    %c0_i32 = arith.constant 0 : i32
    %c0_i32_0 = arith.constant 0 : i32
    %c0_i32_1 = arith.constant 0 : i32
    return %arg0, %c0_i32, %c0_i32_0 : i32, i32, i32
  }
  func.func @transform_7(%arg0: i32) -> (i32, i32, i32) {
    %c0_i32 = arith.constant 0 : i32
    %c0_i32_0 = arith.constant 0 : i32
    %c0_i32_1 = arith.constant 0 : i32
    return %arg0, %c0_i32, %c0_i32_0 : i32, i32, i32
  }
  func.func @transform_8(%arg0: i32) -> (i32, i32, i32) {
    %c0_i32 = arith.constant 0 : i32
    %c0_i32_0 = arith.constant 0 : i32
    %c0_i32_1 = arith.constant 0 : i32
    return %arg0, %c0_i32, %c0_i32_0 : i32, i32, i32
  }
  func.func @transform_9(%arg0: i32) -> (i32, i32, i32) {
    %c0_i32 = arith.constant 0 : i32
    %c0_i32_0 = arith.constant 0 : i32
    %c0_i32_1 = arith.constant 0 : i32
    return %arg0, %c0_i32, %c0_i32_0 : i32, i32, i32
  }
  func.func @transform_10(%arg0: i32) -> (i32, i32, i32) {
    %c0_i32 = arith.constant 0 : i32
    %c0_i32_0 = arith.constant 0 : i32
    %c0_i32_1 = arith.constant 0 : i32
    return %arg0, %c0_i32, %c0_i32_0 : i32, i32, i32
  }
  func.func @transform_11(%arg0: i32) -> (i32, i32, i32) {
    %c0_i32 = arith.constant 0 : i32
    %c0_i32_0 = arith.constant 0 : i32
    %c0_i32_1 = arith.constant 0 : i32
    return %arg0, %c0_i32, %c0_i32_0 : i32, i32, i32
  }
  func.func @transform_12(%arg0: i32) -> (i32, i32, i32) {
    %c0_i32 = arith.constant 0 : i32
    %c0_i32_0 = arith.constant 0 : i32
    %c0_i32_1 = arith.constant 0 : i32
    return %arg0, %c0_i32, %c0_i32_0 : i32, i32, i32
  }
  func.func @transform_13(%arg0: i32) -> (i32, i32, i32) {
    %c0_i32 = arith.constant 0 : i32
    %c0_i32_0 = arith.constant 0 : i32
    %c0_i32_1 = arith.constant 0 : i32
    return %arg0, %c0_i32, %c0_i32_0 : i32, i32, i32
  }
  func.func @transform_14(%arg0: i32) -> (i32, i32, i32) {
    %c0_i32 = arith.constant 0 : i32
    %c0_i32_0 = arith.constant 0 : i32
    %c0_i32_1 = arith.constant 0 : i32
    return %arg0, %c0_i32, %c0_i32_0 : i32, i32, i32
  }
  func.func @transform_15(%arg0: i32) -> (i32, i32, i32) {
    %c0_i32 = arith.constant 0 : i32
    %c0_i32_0 = arith.constant 0 : i32
    %c0_i32_1 = arith.constant 0 : i32
    return %arg0, %c0_i32, %c0_i32_0 : i32, i32, i32
  }
  func.func @transform_16(%arg0: i32) -> (i32, i32, i32) {
    %c0_i32 = arith.constant 0 : i32
    %c0_i32_0 = arith.constant 0 : i32
    %c0_i32_1 = arith.constant 0 : i32
    return %arg0, %c0_i32, %c0_i32_0 : i32, i32, i32
  }
  func.func @transform_17(%arg0: i32) -> (i32, i32, i32) {
    %c0_i32 = arith.constant 0 : i32
    %c0_i32_0 = arith.constant 0 : i32
    %c0_i32_1 = arith.constant 0 : i32
    return %arg0, %c0_i32, %c0_i32_0 : i32, i32, i32
  }
  func.func @transform_18(%arg0: i32) -> (i32, i32, i32) {
    %c0_i32 = arith.constant 0 : i32
    %c0_i32_0 = arith.constant 0 : i32
    %c0_i32_1 = arith.constant 0 : i32
    return %arg0, %c0_i32, %c0_i32_0 : i32, i32, i32
  }
  func.func @transform_19(%arg0: i32) -> (i32, i32, i32) {
    %c0_i32 = arith.constant 0 : i32
    %c0_i32_0 = arith.constant 0 : i32
    %c0_i32_1 = arith.constant 0 : i32
    %c0_i32_2 = arith.constant 0 : i32
    return %c0_i32, %c0_i32_0, %c0_i32_1 : i32, i32, i32
  }
}

</mosaic_0001>

<bundles_post_ra>
// kernel: tpu_custom_call.1
= control target key start
LH: loop header
LB: loop body
LE: loop exit
PB: predicated region body
PF: predicated region fallthrough
CT: control target
= control target key end

     0   :  { %s24647_s0 = inlined_call_operand.vmem [shape: f32[8,16,32], index: 0, kind: input, shape index: {}]   ;;  %s24648_s1 = inlined_call_operand.hbm [shape: f32[2,1,32], index: 1, kind: input, shape index: {}]   ;;  %s24649_s2 = inlined_call_operand.hbm [shape: f32[2,1,32], index: 2, kind: input, shape index: {}]   ;;  %s24650_s3 = inlined_call_operand.vmem [shape: bf16[2,32,128], index: 3, kind: input, shape index: {}]   ;;  %s24651_s4 = inlined_call_operand.hbm [shape: f32[2,1,128], index: 4, kind: input, shape index: {}]   ;;  %s24652_s5 = inlined_call_operand.hbm [shape: bf16[2,32,32], index: 5, kind: input, shape index: {}]   ;;  %s24653_s6 = inlined_call_operand.hbm [shape: f32[2,1,32], index: 6, kind: input, shape index: {}]   ;;  %s24654_s7 = inlined_call_operand.hbm [shape: f32[2,1,32], index: 7, kind: input, shape index: {}]   ;;  %s24655_s8 = inlined_call_operand.hbm [shape: f32[2,1,32], index: 8, kind: input, shape index: {}]   ;;  %s24656_s9 = inlined_call_operand.vmem [shape: bf16[2,32,128], index: 9, kind: input, shape index: {}]   ;;  %s24657_s10 = inlined_call_operand.hbm [shape: f32[2,1,128], index: 10, kind: input, shape index: {}]   ;;  %s24658_s11 = inlined_call_operand.hbm [shape: bf16[2,32,32], index: 11, kind: input, shape index: {}]   ;;  %s24659_s12 = inlined_call_operand.hbm [shape: f32[2,1,32], index: 12, kind: input, shape index: {}]   ;;  %s24660_s13 = inlined_call_operand.hbm [shape: f32[2,1,32], index: 13, kind: input, shape index: {}]   ;;  %s24661_s14 = inlined_call_operand.hbm [shape: f32[2,1,32], index: 14, kind: input, shape index: {}]   ;;  %s24662_s15 = inlined_call_operand.hbm [shape: bf16[2,32,128], index: 15, kind: input, shape index: {}]   ;;  %s24663_s16 = inlined_call_operand.hbm [shape: f32[2,1,128], index: 16, kind: input, shape index: {}]   ;;  %s24664_s17 = inlined_call_operand.vmem [shape: bf16[2,128,32], index: 17, kind: input, shape index: {}]   ;;  %s24665_s18 = inlined_call_operand.vmem [shape: f32[2,1,32], index: 18, kind: input, shape index: {}]   ;;  %s24666_s19 = inlined_call_operand.hbm [shape: f32[8,16,32], index: 19, kind: output, shape index: {}]  }
   0x1   :  { %24730 = sst [smem:[#allocation100_spill]] %s24647_s0 }
   0x2   :  { %24731 = sst [smem:[#allocation101_spill]] %s24648_s1 }
   0x3   :  { %24732 = sst [smem:[#allocation102_spill]] %s24649_s2 }
   0x4   :  { %24733 = sst [smem:[#allocation103_spill]] %s24650_s3 }
   0x5   :  { %24734 = sst [smem:[#allocation104_spill]] %s24651_s4 }
   0x6   :  { %24735 = sst [smem:[#allocation105_spill]] %s24652_s5 }
   0x7   :  { %24736 = sst [smem:[#allocation106_spill]] %s24653_s6 }
   0x8   :  { %24737 = sst [smem:[#allocation107_spill]] %s24654_s7 }
   0x9   :  { %24738 = sst [smem:[#allocation108_spill]] %s24656_s9 }
   0xa   :  { %24739 = sst [smem:[#allocation109_spill]] %s24657_s10 }
   0xb   :  { %24740 = sst [smem:[#allocation110_spill]] %s24659_s12 }
   0xc   :  { %24741 = sst [smem:[#allocation111_spill]] %s24664_s17 }
   0xd   :  { %24742 = sst [smem:[#allocation112_spill]] %s24665_s18 }
   0xe   :  { %24743 = sst [smem:[#allocation113_spill]] %s24666_s19 }
   0xf   :  { %24 = vsyncpa [#allocation3], 0 }
  0x10   :  { %26 = vsyncpa [#allocation3 + $0x1], 0 }
  0x11   :  { %27 = vsyncpa [#allocation6], 0 }
  0x12   :  { %29 = vsyncpa [#allocation6 + $0x1], 0 }
  0x13   :  { %30 = vsyncpa [#allocation9], 0 }
  0x14   :  { %32 = vsyncpa [#allocation9 + $0x1], 0 }
  0x15   :  { %33 = vsyncpa [#allocation12], 0 }
  0x16   :  { %35 = vsyncpa [#allocation12 + $0x1], 0 }
  0x17   :  { %36 = vsyncpa [#allocation15], 0 }
  0x18   :  { %38 = vsyncpa [#allocation15 + $0x1], 0 }
  0x19   :  { %39 = vsyncpa [#allocation18], 0 }
  0x1a   :  { %41 = vsyncpa [#allocation18 + $0x1], 0 }
  0x1b   :  { %42 = vsyncpa [#allocation21], 0 }
  0x1c   :  { %44 = vsyncpa [#allocation21 + $0x1], 0 }
  0x1d   :  { %45 = vsyncpa [#allocation24], 0 }
  0x1e   :  { %47 = vsyncpa [#allocation24 + $0x1], 0 }
  0x1f   :  { %48 = vsyncpa [#allocation4], 0  ;;  %s19203_s0 = smov 0   ;;  %s19205_s30 = smov 0  }
  0x20   :  { %s19207_s20 = smov 0   ;;  %s19209_s21 = smov 0  }
  0x21 LB: > { %24744 = sst [smem:[#allocation35_spill]] %s19056_s30  ;;  %s19222_s1 = sadd.s32 4294967295, %s19064_s21   ;;  %s19064_s21 = sphi %s19209_s21, %s24983_s21   ;;  %s19060_s20 = sphi %s19207_s20, %s24986_s20   ;;  %s19056_s30 = sphi %s19205_s30, %s24985_s30   ;;  %s19052_s0 = sphi %s19203_s0, %s24984_s0  }
  0x22   : > { %24745 = sst [smem:[#allocation36_spill]] %s19060_s20  ;;  %s19225_s22 = sadd.s32 1, %s19064_s21  }
  0x23   : > { %24746 = sst [smem:[#allocation37_spill]] %s19222_s1  ;;  %s79_s2 = ssub.s32 %s19064_s21, %s19225_s22 }
  0x24   : > { %24747 = sst [smem:[#allocation38_spill]] %s19225_s22  ;;  %s82_s23 = sadd.s32 1, %s19060_s20 }
  0x25   : > { %p80_p0 = scmp.eq.s32.totalorder %s79_s2, 0  ;;  %p89_p1 = scmp.ne.s32.totalorder %s19060_s20, %s19056_s30 }
  0x26   : > { %p90_p2 = scmp.eq.s32.totalorder %s19064_s21, 0  ;;  %p95_p3 = scmp.ne.s32.totalorder %s19056_s30, %s19052_s0 }
  0x27   : > { %s19235_s24 = scalar_select %p80_p0, %s19060_s20, %s82_s23  }
  0x28   : > { %p19237_p4 = por %p90_p2, %p89_p1  ;;  %p96_p5 = scmp.eq.s32.totalorder %s19222_s1, 0 }
  0x29   : > { %24748 = sst [smem:[#allocation39_spill]] %s19235_s24  ;;  %p15615_p7 = scmp.ge.s32.totalorder %s19064_s21, 2 }
  0x2a   : > { %p19242_p6 = por %p96_p5, %p95_p3  ;;  %s19248_s26 = sand.u32 (!%p15615_p7), 1, %s19060_s20  }
  0x2b   : > { %581 = sbr.rel (%p15615_p7) target bundleno = 406 (0x196), region = 20  ;;  %s19251_s27 = sshll.u32 (!%p15615_p7), %s19064_s21, 4 }
  0x2c   : > { %s24750_s3 = scalar_select %p19242_p6, 1, 0 }
  0x2d   : > { %s19254_s28 = sand.u32 (!%p15615_p7), 1, %s19064_s21   ;;  %s24752_s2 = sld [smem:[#allocation102_spill]] (!%p15615_p7) }
  0x2e   : > { %24751 = sst [smem:[#allocation40_spill]] %s24750_s3  ;;  %s605_s24 = scalar_lea.vmem (!%p15615_p7), [#allocation5], %s19248_s26 }
  0x2f   : > { %s612_s20 = sshll.u32 (!%p15615_p7), %s605_s24, 4  ;;  %s19266_s22 = sshll.u32 (!%p15615_p7), %s19248_s26, 4  ;;  %s19263_s20 = int_to_ptr.vmem [resolvable:$true] %s612_s20 }
  0x30   : > { %s24678_s19 = scalar_lea.sflag (!%p15615_p7), [#allocation6], %s19254_s28 }
  0x33   : > { %s19260_s23 = scalar_lea.hbm %s24752_s2, %s19251_s27  ;;  %s18584_s17 = scalar_lea.hbm %s24752_s2, 32 }
  0x34   : > { %s18580_s18 = scalar_lea.hbm %s19260_s23, 16  ;;  %p18585_p11 = scmp.lt.u32.totalorder %s19260_s23, %s24752_s2 }
  0x35   : > { %p18581_p8 = scmp.ne.s32.totalorder %s19260_s23, %s18580_s18  ;;  %p18586_p12 = scmp.lt.u32.totalorder %s18584_s17, %s18580_s18 }
  0x36   : > { %p18588_p0 = scmp.lt.u32.totalorder %s18580_s18, %s19260_s23 }
  0x37   : > { %p18582_p9 = pnand %p18581_p8, %p19237_p4  ;;  %p18587_p13 = por %p18586_p12, %p18585_p11 }
  0x39   : > { %p18583_p10 = pneg %p18582_p9  ;;  %p18589_p1 = por %p18588_p0, %p18587_p13 }
  0x3b   : > { %p18590_p2 = pnand %p18589_p1, %p18583_p10 }
  0x3d   : > { %18593 = shalt.err (!%p18590_p2)
}
  0x3e   : > { %s18594_s24 = scalar_lea.vmem %s19263_s20, 16  ;;  %s19066_s29 = smov [#allocation5]  }
  0x3f   : > { %p18595_p3 = scmp.ne.s32.totalorder %s19263_s20, %s18594_s24  ;;  %s18598_s0 = sshll.u32 %s19066_s29, 4  ;;  %s18599_s0 = int_to_ptr.vmem [resolvable:$false] %s18598_s0 }
  0x40   : > { %s18600_s9 = scalar_lea.vmem %s18599_s0, 32  ;;  %p18601_p8 = scmp.lt.s32.totalorder %s19263_s20, %s18599_s0 }
  0x41   : > { %p18596_p5 = pnand %p18595_p3, %p19237_p4  ;;  %p18602_p9 = scmp.lt.s32.totalorder %s18600_s9, %s18594_s24 }
  0x43   : > { %p18597_p7 = pneg %p18596_p5  ;;  %p18603_p11 = por %p18602_p9, %p18601_p8 }
  0x45   : > { %p18604_p12 = pnand %p18603_p11, %p18597_p7 }
  0x47   : > { %18607 = shalt.err (!%p18604_p12)
}
  0x48   : > { %17722 = dma.hbm_to_vmem [thread:$0]  (%p19237_p4), %s19260_s23, 16, %s19263_s20, %s24678_s19  }
  0x49   : > { %s19293_s17 = sshll.u32 %s19064_s21, 8  ;;  %s24753_s5 = sld [smem:[#allocation105_spill]] }
  0x4a   : > { %s648_s29 = scalar_lea.vmem [#allocation8], %s19266_s22  ;;  %s24690_s9 = scalar_lea.sflag [#allocation9], %s19254_s28 }
  0x4b   : > { %s655_s0 = sshll.u32 %s648_s29, 4  ;;  %s19302_s0 = int_to_ptr.vmem [resolvable:$true] %s655_s0 }
  0x4f   : > { %s19299_s24 = scalar_lea.hbm %s24753_s5, %s19293_s17  ;;  %s18612_s18 = scalar_lea.hbm %s24753_s5, 512 }
  0x50   : > { %s18608_s2 = scalar_lea.hbm %s19299_s24, 256  ;;  %p18613_p1 = scmp.lt.u32.totalorder %s19299_s24, %s24753_s5 }
  0x51   : > { %p18609_p10 = scmp.ne.s32.totalorder %s19299_s24, %s18608_s2  ;;  %p18614_p2 = scmp.lt.u32.totalorder %s18612_s18, %s18608_s2 }
  0x52   : > { %p18616_p5 = scmp.lt.u32.totalorder %s18608_s2, %s19299_s24 }
  0x53   : > { %p18610_p13 = pnand %p18609_p10, %p19237_p4  ;;  %p18615_p3 = por %p18614_p2, %p18613_p1 }
  0x55   : > { %p18611_p0 = pneg %p18610_p13  ;;  %p18617_p7 = por %p18616_p5, %p18615_p3 }
  0x57   : > { %p18618_p8 = pnand %p18617_p7, %p18611_p0 }
  0x59   : > { %18621 = shalt.err (!%p18618_p8)
}
  0x5a   : > { %s18622_s29 = scalar_lea.vmem %s19302_s0, 256  ;;  %s19067_s20 = smov [#allocation8]  }
  0x5b   : > { %p18623_p9 = scmp.ne.s32.totalorder %s19302_s0, %s18622_s29  ;;  %s18626_s23 = sshll.u32 %s19067_s20, 4  ;;  %s18627_s23 = int_to_ptr.vmem [resolvable:$false] %s18626_s23 }
  0x5c   : > { %s18628_s19 = scalar_lea.vmem %s18627_s23, 512  ;;  %p18629_p10 = scmp.lt.s32.totalorder %s19302_s0, %s18627_s23 }
  0x5d   : > { %p18624_p11 = pnand %p18623_p9, %p19237_p4  ;;  %p18630_p13 = scmp.lt.s32.totalorder %s18628_s19, %s18622_s29 }
  0x5f   : > { %p18625_p12 = pneg %p18624_p11  ;;  %p18631_p1 = por %p18630_p13, %p18629_p10 }
  0x61   : > { %p18632_p2 = pnand %p18631_p1, %p18625_p12 }
  0x63   : > { %18635 = shalt.err (!%p18632_p2)
}
  0x64   : > { %s24682_s2 = smov 64   ;;  %s24684_s18 = smov 4  }
  0x65   : > { %17724 = dma.hbm_to_vmem [thread:$0]  (%p19237_p4), %s19299_s24, 256, %s19302_s0, %s24690_s9, %s24682_s2, %s24682_s2, %s24684_s18  }
  0x66   : > { %s24754_s7 = sld [smem:[#allocation107_spill]]  ;;  %s685_s23 = scalar_lea.vmem [#allocation11], %s19248_s26 }
  0x67   : > { %s692_s19 = sshll.u32 %s685_s23, 4  ;;  %s24687_s5 = scalar_lea.sflag [#allocation12], %s19254_s28  ;;  %s693_s19 = int_to_ptr.vmem [resolvable:$true] %s692_s19 }
  0x6c   : > { %s19335_s20 = scalar_lea.hbm %s24754_s7, %s19251_s27  ;;  %s18640_s0 = scalar_lea.hbm %s24754_s7, 32 }
  0x6d   : > { %s18636_s3 = scalar_lea.hbm %s19335_s20, 16  ;;  %p18641_p7 = scmp.lt.u32.totalorder %s19335_s20, %s24754_s7 }
  0x6e   : > { %p18637_p0 = scmp.ne.s32.totalorder %s19335_s20, %s18636_s3  ;;  %p18642_p8 = scmp.lt.u32.totalorder %s18640_s0, %s18636_s3 }
  0x6f   : > { %p18644_p11 = scmp.lt.u32.totalorder %s18636_s3, %s19335_s20 }
  0x70   : > { %p18638_p3 = pnand %p18637_p0, %p19237_p4  ;;  %p18643_p9 = por %p18642_p8, %p18641_p7 }
  0x72   : > { %p18639_p5 = pneg %p18638_p3  ;;  %p18645_p12 = por %p18644_p11, %p18643_p9 }
  0x74   : > { %p18646_p10 = pnand %p18645_p12, %p18639_p5 }
  0x76   : > { %18649 = shalt.err (!%p18646_p10)
}
  0x77   : > { %s18650_s23 = scalar_lea.vmem %s693_s19, 16  ;;  %s19070_s2 = smov [#allocation11]  }
  0x78   : > { %p18651_p13 = scmp.ne.s32.totalorder %s693_s19, %s18650_s23  ;;  %s18654_s18 = sshll.u32 %s19070_s2, 4  ;;  %s18655_s18 = int_to_ptr.vmem [resolvable:$false] %s18654_s18 }
  0x79   : > { %s18656_s30 = scalar_lea.vmem %s18655_s18, 32  ;;  %p18657_p0 = scmp.lt.s32.totalorder %s693_s19, %s18655_s18 }
  0x7a   : > { %p18652_p1 = pnand %p18651_p13, %p19237_p4  ;;  %p18658_p3 = scmp.lt.s32.totalorder %s18656_s30, %s18650_s23 }
  0x7c   : > { %p18653_p2 = pneg %p18652_p1  ;;  %p18659_p6 = por %p18658_p3, %p18657_p0 }
  0x7e   : > { %p18660_p7 = pnand %p18659_p6, %p18653_p2 }
  0x80   : > { %18663 = shalt.err (!%p18660_p7)
}
  0x81   : > { %17726 = dma.hbm_to_vmem [thread:$0]  (%p19237_p4), %s19335_s20, 16, %s693_s19, %s24687_s5  }
  0x82   : > { %s24755_s10 = sld [smem:[#allocation109_spill]]  ;;  %s727_s18 = scalar_lea.vmem [#allocation14], %s19248_s26 }
  0x83   : > { %s734_s0 = sshll.u32 %s727_s18, 4  ;;  %s24688_s1 = scalar_lea.sflag [#allocation15], %s19254_s28  ;;  %s735_s0 = int_to_ptr.vmem [resolvable:$true] %s734_s0 }
  0x88   : > { %s19362_s2 = scalar_lea.hbm %s24755_s10, %s19251_s27  ;;  %s18668_s19 = scalar_lea.hbm %s24755_s10, 32 }
  0x89   : > { %s18664_s29 = scalar_lea.hbm %s19362_s2, 16  ;;  %p18669_p9 = scmp.lt.u32.totalorder %s19362_s2, %s24755_s10 }
  0x8a   : > { %p18665_p6 = scmp.ne.s32.totalorder %s19362_s2, %s18664_s29  ;;  %p18670_p11 = scmp.lt.u32.totalorder %s18668_s19, %s18664_s29 }
  0x8b   : > { %p18672_p10 = scmp.lt.u32.totalorder %s18664_s29, %s19362_s2 }
  0x8c   : > { %p18666_p5 = pnand %p18665_p6, %p19237_p4  ;;  %p18671_p12 = por %p18670_p11, %p18669_p9 }
  0x8e   : > { %p18667_p8 = pneg %p18666_p5  ;;  %p18673_p13 = por %p18672_p10, %p18671_p12 }
  0x90   : > { %p18674_p1 = pnand %p18673_p13, %p18667_p8 }
  0x92   : > { %18677 = shalt.err (!%p18674_p1)
}
  0x93   : > { %s18678_s24 = scalar_lea.vmem %s735_s0, 16  ;;  %s19071_s18 = smov [#allocation14]  }
  0x94   : > { %p18679_p2 = scmp.ne.s32.totalorder %s735_s0, %s18678_s24  ;;  %s18682_s5 = sshll.u32 %s19071_s18, 4  ;;  %s18683_s5 = int_to_ptr.vmem [resolvable:$false] %s18682_s5 }
  0x95   : > { %s18684_s23 = scalar_lea.vmem %s18683_s5, 32  ;;  %p18685_p7 = scmp.lt.s32.totalorder %s735_s0, %s18683_s5 }
  0x96   : > { %p18680_p0 = pnand %p18679_p2, %p19237_p4  ;;  %p18686_p6 = scmp.lt.s32.totalorder %s18684_s23, %s18678_s24 }
  0x98   : > { %p18681_p3 = pneg %p18680_p0  ;;  %p18687_p5 = por %p18686_p6, %p18685_p7 }
  0x9a   : > { %p18688_p9 = pnand %p18687_p5, %p18681_p3 }
  0x9c   : > { %18691 = shalt.err (!%p18688_p9)
}
  0x9d   : > { %17728 = dma.hbm_to_vmem [thread:$0]  (%p19237_p4), %s19362_s2, 16, %s735_s0, %s24688_s1  }
  0x9e   : > { %s24756_s12 = sld [smem:[#allocation110_spill]]  ;;  %s765_s5 = scalar_lea.vmem [#allocation17], %s19248_s26 }
  0x9f   : > { %s772_s30 = sshll.u32 %s765_s5, 4  ;;  %s24689_s3 = scalar_lea.sflag [#allocation18], %s19254_s28  ;;  %s773_s30 = int_to_ptr.vmem [resolvable:$true] %s772_s30 }
  0xa4   : > { %s19389_s19 = scalar_lea.hbm %s24756_s12, %s19251_s27  ;;  %s18696_s0 = scalar_lea.hbm %s24756_s12, 32 }
  0xa5   : > { %s18692_s24 = scalar_lea.hbm %s19389_s19, 16  ;;  %p18697_p10 = scmp.lt.u32.totalorder %s19389_s19, %s24756_s12 }
  0xa6   : > { %p18693_p8 = scmp.ne.s32.totalorder %s19389_s19, %s18692_s24  ;;  %p18698_p13 = scmp.lt.u32.totalorder %s18696_s0, %s18692_s24 }
  0xa7   : > { %p18700_p2 = scmp.lt.u32.totalorder %s18692_s24, %s19389_s19 }
  0xa8   : > { %p18694_p11 = pnand %p18693_p8, %p19237_p4  ;;  %p18699_p1 = por %p18698_p13, %p18697_p10 }
  0xaa   : > { %p18695_p12 = pneg %p18694_p11  ;;  %p18701_p0 = por %p18700_p2, %p18699_p1 }
  0xac   : > { %p18702_p3 = pnand %p18701_p0, %p18695_p12 }
  0xae   : > { %18705 = shalt.err (!%p18702_p3)
}
  0xaf   : > { %s18706_s20 = scalar_lea.vmem %s773_s30, 16  ;;  %s19072_s5 = smov [#allocation17]  }
  0xb0   : > { %p18707_p7 = scmp.ne.s32.totalorder %s773_s30, %s18706_s20  ;;  %s18710_s1 = sshll.u32 %s19072_s5, 4  ;;  %s18711_s1 = int_to_ptr.vmem [resolvable:$false] %s18710_s1 }
  0xb1   : > { %s18712_s18 = scalar_lea.vmem %s18711_s1, 32  ;;  %p18713_p9 = scmp.lt.s32.totalorder %s773_s30, %s18711_s1 }
  0xb2   : > { %p18708_p6 = pnand %p18707_p7, %p19237_p4  ;;  %p18714_p8 = scmp.lt.s32.totalorder %s18712_s18, %s18706_s20 }
  0xb4   : > { %p18709_p5 = pneg %p18708_p6  ;;  %p18715_p11 = por %p18714_p8, %p18713_p9 }
  0xb6   : > { %p18716_p10 = pnand %p18715_p11, %p18709_p5 }
  0xb8   : > { %18719 = shalt.err (!%p18716_p10)
}
  0xb9   : > { %17730 = dma.hbm_to_vmem [thread:$0]  (%p19237_p4), %s19389_s19, 16, %s773_s30, %s24689_s3  }
  0xba   : > { %s19416_s0 = scalar_lea.hbm %s24661_s14, %s19251_s27  ;;  %s799_s1 = scalar_lea.vmem [#allocation20], %s19248_s26 }
  0xbb   : > { %s806_s23 = sshll.u32 %s799_s1, 4  ;;  %s24691_s29 = scalar_lea.sflag [#allocation21], %s19254_s28  ;;  %s807_s23 = int_to_ptr.vmem [resolvable:$true] %s806_s23 }
  0xbc   : > { %s18720_s20 = scalar_lea.hbm %s19416_s0, 16  ;;  %s18724_s30 = scalar_lea.hbm %s24661_s14, 32 }
  0xbd   : > { %p18721_p12 = scmp.ne.s32.totalorder %s19416_s0, %s18720_s20  ;;  %p18725_p2 = scmp.lt.u32.totalorder %s19416_s0, %s24661_s14 }
  0xbe   : > { %p18726_p0 = scmp.lt.u32.totalorder %s18724_s30, %s18720_s20  ;;  %p18728_p7 = scmp.lt.u32.totalorder %s18720_s20, %s19416_s0 }
  0xbf   : > { %p18722_p13 = pnand %p18721_p12, %p19237_p4 }
  0xc0   : > { %p18727_p3 = por %p18726_p0, %p18725_p2 }
  0xc1   : > { %p18723_p1 = pneg %p18722_p13 }
  0xc2   : > { %p18729_p6 = por %p18728_p7, %p18727_p3 }
  0xc4   : > { %p18730_p5 = pnand %p18729_p6, %p18723_p1 }
  0xc6   : > { %18733 = shalt.err (!%p18730_p5)
}
  0xc7   : > { %s18734_s2 = scalar_lea.vmem %s807_s23, 16  ;;  %s19073_s1 = smov [#allocation20]  }
  0xc8   : > { %p18735_p9 = scmp.ne.s32.totalorder %s807_s23, %s18734_s2  ;;  %s18738_s3 = sshll.u32 %s19073_s1, 4  ;;  %s18739_s3 = int_to_ptr.vmem [resolvable:$false] %s18738_s3 }
  0xc9   : > { %s18740_s5 = scalar_lea.vmem %s18739_s3, 32  ;;  %p18741_p10 = scmp.lt.s32.totalorder %s807_s23, %s18739_s3 }
  0xca   : > { %p18736_p8 = pnand %p18735_p9, %p19237_p4  ;;  %p18742_p12 = scmp.lt.s32.totalorder %s18740_s5, %s18734_s2 }
  0xcc   : > { %p18737_p11 = pneg %p18736_p8  ;;  %p18743_p13 = por %p18742_p12, %p18741_p10 }
  0xce   : > { %p18744_p0 = pnand %p18743_p13, %p18737_p11 }
  0xd0   : > { %18747 = shalt.err (!%p18744_p0)
}
  0xd1   : > { %17732 = dma.hbm_to_vmem [thread:$0]  (%p19237_p4), %s19416_s0, 16, %s807_s23, %s24691_s29  }
  0xd2   : > { %s24757_s30 = sld [smem:[#allocation101_spill]]  ;;  %s588_s3 = scalar_lea.vmem [#allocation2], %s19248_s26 }
  0xd3   : > { %s595_s2 = sshll.u32 %s588_s3, 4  ;;  %s24759_s4 = sld [smem:[#allocation104_spill]]  ;;  %s19446_s2 = int_to_ptr.vmem [resolvable:$true] %s595_s2 }
  0xd4   : > { %s586_s7 = scalar_lea.sflag [#allocation3], %s19248_s26 }
  0xd8   : > { %s24758_s18 = smov %s24757_s30  ;;  %s19443_s24 = scalar_lea.hbm %s24757_s30, %s19251_s27 }
  0xd9   : > { %s19452_s9 = scalar_lea.hbm %s24759_s4, %s19251_s27  ;;  %s18748_s0 = scalar_lea.hbm %s19443_s24, 16 }
  0xda   : > { %p18749_p1 = scmp.ne.s32.totalorder %s19443_s24, %s18748_s0  ;;  %s18752_s19 = scalar_lea.hbm %s24758_s18, 32 }
  0xdb   : > { %p18753_p7 = scmp.lt.u32.totalorder %s19443_s24, %s24758_s18  ;;  %p18754_p6 = scmp.lt.u32.totalorder %s18752_s19, %s18748_s0 }
  0xdc   : > { %p18750_p2 = pnand %p18749_p1, %p19237_p4  ;;  %p18756_p9 = scmp.lt.u32.totalorder %s18748_s0, %s19443_s24 }
  0xdd   : > { %p18755_p5 = por %p18754_p6, %p18753_p7 }
  0xde   : > { %p18751_p3 = pneg %p18750_p2 }
  0xdf   : > { %p18757_p8 = por %p18756_p9, %p18755_p5 }
  0xe1   : > { %p18758_p11 = pnand %p18757_p8, %p18751_p3 }
  0xe3   : > { %18761 = shalt.err (!%p18758_p11)
}
  0xe4   : > { %s18762_s3 = scalar_lea.vmem %s19446_s2, 16  ;;  %s19074_s1 = smov [#allocation2]  }
  0xe5   : > { %p18763_p10 = scmp.ne.s32.totalorder %s19446_s2, %s18762_s3  ;;  %s18766_s5 = sshll.u32 %s19074_s1, 4  ;;  %s18767_s5 = int_to_ptr.vmem [resolvable:$false] %s18766_s5 }
  0xe6   : > { %s18768_s29 = scalar_lea.vmem %s18767_s5, 32  ;;  %p18769_p0 = scmp.lt.s32.totalorder %s19446_s2, %s18767_s5 }
  0xe7   : > { %p18764_p12 = pnand %p18763_p10, %p19237_p4  ;;  %p18770_p1 = scmp.lt.s32.totalorder %s18768_s29, %s18762_s3 }
  0xe9   : > { %p18765_p13 = pneg %p18764_p12  ;;  %p18771_p2 = por %p18770_p1, %p18769_p0 }
  0xeb   : > { %p18772_p7 = pnand %p18771_p2, %p18765_p13 }
  0xed   : > { %18775 = shalt.err (!%p18772_p7)
}
  0xee   : > { %17721 = dma.hbm_to_vmem [thread:$0]  (%p19237_p4), %s19443_s24, 16, %s19446_s2, %s586_s7  }
  0xef   : > { %s630_s0 = scalar_lea.vmem [#allocation7], %s19248_s26  ;;  %s24760_s6 = sld [smem:[#allocation106_spill]] }
  0xf0   : > { %s637_s23 = sshll.u32 %s630_s0, 4  ;;  %s18776_s3 = scalar_lea.hbm %s19452_s9, 16  ;;  %s638_s23 = int_to_ptr.vmem [resolvable:$true] %s637_s23 }
  0xf1   : > { %p18777_p3 = scmp.ne.s32.totalorder %s19452_s9, %s18776_s3  ;;  %s18780_s29 = scalar_lea.hbm %s24759_s4, 32 }
  0xf2   : > { %p18781_p9 = scmp.lt.u32.totalorder %s19452_s9, %s24759_s4  ;;  %p18782_p8 = scmp.lt.u32.totalorder %s18780_s29, %s18776_s3 }
  0xf3   : > { %p18778_p6 = pnand %p18777_p3, %p19237_p4  ;;  %p18784_p10 = scmp.lt.u32.totalorder %s18776_s3, %s19452_s9 }
  0xf4   : > { %p18783_p11 = por %p18782_p8, %p18781_p9 }
  0xf5   : > { %s19481_s30 = scalar_lea.hbm %s24760_s6, %s19251_s27  ;;  %p18779_p5 = pneg %p18778_p6 }
  0xf6   : > { %p18785_p12 = por %p18784_p10, %p18783_p11 }
  0xf8   : > { %p18786_p13 = pnand %p18785_p12, %p18779_p5 }
  0xfa   : > { %18789 = shalt.err (!%p18786_p13)
}
  0xfb   : > { %s18790_s7 = scalar_lea.vmem %s638_s23, 16  ;;  %s19075_s24 = smov [#allocation7]  }
  0xfc   : > { %p18791_p0 = scmp.ne.s32.totalorder %s638_s23, %s18790_s7  ;;  %s18794_s2 = sshll.u32 %s19075_s24, 4  ;;  %s18795_s2 = int_to_ptr.vmem [resolvable:$false] %s18794_s2 }
  0xfd   : > { %s18796_s0 = scalar_lea.vmem %s18795_s2, 32  ;;  %p18797_p7 = scmp.lt.s32.totalorder %s638_s23, %s18795_s2 }
  0xfe   : > { %p18792_p1 = pnand %p18791_p0, %p19237_p4  ;;  %p18798_p3 = scmp.lt.s32.totalorder %s18796_s0, %s18790_s7 }
 0x100   : > { %p18793_p2 = pneg %p18792_p1  ;;  %p18799_p6 = por %p18798_p3, %p18797_p7 }
 0x102   : > { %p18800_p8 = pnand %p18799_p6, %p18793_p2 }
 0x104   : > { %18803 = shalt.err (!%p18800_p8)
}
 0x105   : > { %s24761_s10 = scalar_lea.sflag [#allocation6], %s19254_s28  ;;  %s668_s12 = scalar_lea.vmem [#allocation10], %s19248_s26 }
 0x106   : > { %17723 = dma.hbm_to_vmem [thread:$0]  (%p19237_p4), %s19452_s9, 16, %s638_s23, %s24761_s10  }
 0x107   : > { %s675_s20 = sshll.u32 %s668_s12, 4  ;;  %s19507_s1 = scalar_lea.hbm %s24655_s8, %s19251_s27  ;;  %s676_s20 = int_to_ptr.vmem [resolvable:$true] %s675_s20 }
 0x108   : > { %s18804_s5 = scalar_lea.hbm %s19481_s30, 16  ;;  %s18808_s24 = scalar_lea.hbm %s24760_s6, 32 }
 0x109   : > { %p18805_p5 = scmp.ne.s32.totalorder %s19481_s30, %s18804_s5  ;;  %p18809_p10 = scmp.lt.u32.totalorder %s19481_s30, %s24760_s6 }
 0x10a   : > { %p18810_p12 = scmp.lt.u32.totalorder %s18808_s24, %s18804_s5  ;;  %p18812_p0 = scmp.lt.u32.totalorder %s18804_s5, %s19481_s30 }
 0x10b   : > { %p18806_p9 = pnand %p18805_p5, %p19237_p4 }
 0x10c   : > { %p18811_p13 = por %p18810_p12, %p18809_p10 }
 0x10d   : > { %p18807_p11 = pneg %p18806_p9 }
 0x10e   : > { %p18813_p1 = por %p18812_p0, %p18811_p13 }
 0x110   : > { %p18814_p2 = pnand %p18813_p1, %p18807_p11 }
 0x112   : > { %18817 = shalt.err (!%p18814_p2)
}
 0x113   : > { %s18818_s9 = scalar_lea.vmem %s676_s20, 16  ;;  %s19076_s23 = smov [#allocation10]  }
 0x114   : > { %p18819_p7 = scmp.ne.s32.totalorder %s676_s20, %s18818_s9  ;;  %s18822_s10 = sshll.u32 %s19076_s23, 4  ;;  %s18823_s10 = int_to_ptr.vmem [resolvable:$false] %s18822_s10 }
 0x115   : > { %s18824_s12 = scalar_lea.vmem %s18823_s10, 32  ;;  %p18825_p8 = scmp.lt.s32.totalorder %s676_s20, %s18823_s10 }
 0x116   : > { %p18820_p3 = pnand %p18819_p7, %p19237_p4  ;;  %p18826_p5 = scmp.lt.s32.totalorder %s18824_s12, %s18818_s9 }
 0x118   : > { %p18821_p6 = pneg %p18820_p3  ;;  %p18827_p9 = por %p18826_p5, %p18825_p8 }
 0x11a   : > { %p18828_p10 = pnand %p18827_p9, %p18821_p6 }
 0x11c   : > { %18831 = shalt.err (!%p18828_p10)
}
 0x11d   : > { %s24762_s19 = scalar_lea.sflag [#allocation9], %s19254_s28  ;;  %s702_s3 = scalar_lea.vmem [#allocation13], %s19248_s26 }
 0x11e   : > { %17725 = dma.hbm_to_vmem [thread:$0]  (%p19237_p4), %s19481_s30, 16, %s676_s20, %s24762_s19  }
 0x11f   : > { %s709_s5 = sshll.u32 %s702_s3, 4  ;;  %s19533_s24 = scalar_lea.hbm %s24658_s11, %s19293_s17  ;;  %s710_s5 = int_to_ptr.vmem [resolvable:$true] %s709_s5 }
 0x120   : > { %s18832_s2 = scalar_lea.hbm %s19507_s1, 16  ;;  %s18836_s23 = scalar_lea.hbm %s24655_s8, 32 }
 0x121   : > { %p18833_p11 = scmp.ne.s32.totalorder %s19507_s1, %s18832_s2  ;;  %p18837_p0 = scmp.lt.u32.totalorder %s19507_s1, %s24655_s8 }
 0x122   : > { %p18838_p1 = scmp.lt.u32.totalorder %s18836_s23, %s18832_s2  ;;  %p18840_p7 = scmp.lt.u32.totalorder %s18832_s2, %s19507_s1 }
 0x123   : > { %p18834_p12 = pnand %p18833_p11, %p19237_p4 }
 0x124   : > { %p18839_p2 = por %p18838_p1, %p18837_p0 }
 0x125   : > { %p18835_p13 = pneg %p18834_p12 }
 0x126   : > { %p18841_p3 = por %p18840_p7, %p18839_p2 }
 0x128   : > { %p18842_p6 = pnand %p18841_p3, %p18835_p13 }
 0x12a   : > { %18845 = shalt.err (!%p18842_p6)
}
 0x12b   : > { %s18846_s30 = scalar_lea.vmem %s710_s5, 16  ;;  %s19077_s20 = smov [#allocation13]  }
 0x12c   : > { %p18847_p8 = scmp.ne.s32.totalorder %s710_s5, %s18846_s30  ;;  %s18850_s19 = sshll.u32 %s19077_s20, 4  ;;  %s18851_s19 = int_to_ptr.vmem [resolvable:$false] %s18850_s19 }
 0x12d   : > { %s18852_s3 = scalar_lea.vmem %s18851_s19, 32  ;;  %p18853_p10 = scmp.lt.s32.totalorder %s710_s5, %s18851_s19 }
 0x12e   : > { %p18848_p5 = pnand %p18847_p8, %p19237_p4  ;;  %p18854_p11 = scmp.lt.s32.totalorder %s18852_s3, %s18846_s30 }
 0x130   : > { %p18849_p9 = pneg %p18848_p5  ;;  %p18855_p12 = por %p18854_p11, %p18853_p10 }
 0x132   : > { %p18856_p0 = pnand %p18855_p12, %p18849_p9 }
 0x134   : > { %18859 = shalt.err (!%p18856_p0)
}
 0x135   : > { %s24763_s29 = scalar_lea.sflag [#allocation12], %s19254_s28  ;;  %s745_s7 = scalar_lea.vmem [#allocation16], %s19266_s22 }
 0x136   : > { %17727 = dma.hbm_to_vmem [thread:$0]  (%p19237_p4), %s19507_s1, 16, %s710_s5, %s24763_s29  }
 0x137   : > { %s752_s2 = sshll.u32 %s745_s7, 4  ;;  %s19561_s23 = scalar_lea.hbm %s24660_s13, %s19251_s27  ;;  %s19555_s2 = int_to_ptr.vmem [resolvable:$true] %s752_s2 }
 0x138   : > { %s18860_s10 = scalar_lea.hbm %s19533_s24, 256  ;;  %s18864_s20 = scalar_lea.hbm %s24658_s11, 512 }
 0x139   : > { %p18861_p13 = scmp.ne.s32.totalorder %s19533_s24, %s18860_s10  ;;  %p18865_p7 = scmp.lt.u32.totalorder %s19533_s24, %s24658_s11 }
 0x13a   : > { %p18866_p3 = scmp.lt.u32.totalorder %s18864_s20, %s18860_s10  ;;  %p18868_p8 = scmp.lt.u32.totalorder %s18860_s10, %s19533_s24 }
 0x13b   : > { %p18862_p1 = pnand %p18861_p13, %p19237_p4 }
 0x13c   : > { %p18867_p6 = por %p18866_p3, %p18865_p7 }
 0x13d   : > { %p18863_p2 = pneg %p18862_p1 }
 0x13e   : > { %p18869_p5 = por %p18868_p8, %p18867_p6 }
 0x140   : > { %p18870_p9 = pnand %p18869_p5, %p18863_p2 }
 0x142   : > { %18873 = shalt.err (!%p18870_p9)
}
 0x143   : > { %s18874_s5 = scalar_lea.vmem %s19555_s2, 256  ;;  %s19078_s3 = smov [#allocation16]  }
 0x144   : > { %p18875_p10 = scmp.ne.s32.totalorder %s19555_s2, %s18874_s5  ;;  %s18878_s29 = sshll.u32 %s19078_s3, 4  ;;  %s18879_s29 = int_to_ptr.vmem [resolvable:$false] %s18878_s29 }
 0x145   : > { %s18880_s7 = scalar_lea.vmem %s18879_s29, 512  ;;  %p18881_p0 = scmp.lt.s32.totalorder %s19555_s2, %s18879_s29 }
 0x146   : > { %p18876_p11 = pnand %p18875_p10, %p19237_p4  ;;  %p18882_p13 = scmp.lt.s32.totalorder %s18880_s7, %s18874_s5 }
 0x148   : > { %p18877_p12 = pneg %p18876_p11  ;;  %p18883_p1 = por %p18882_p13, %p18881_p0 }
 0x14a   : > { %p18884_p7 = pnand %p18883_p1, %p18877_p12 }
 0x14c   : > { %18887 = shalt.err (!%p18884_p7)
}
 0x14d   : > { %s24764_s0 = smov 4   ;;  %s24765_s9 = smov 64  }
 0x14e   : > { %s24766_s10 = scalar_lea.sflag [#allocation15], %s19254_s28  ;;  %s782_s12 = scalar_lea.vmem [#allocation19], %s19248_s26 }
 0x14f   : > { %17729 = dma.hbm_to_vmem [thread:$0]  (%p19237_p4), %s19533_s24, 256, %s19555_s2, %s24766_s10, %s24765_s9, %s24765_s9, %s24764_s0  }
 0x150   : > { %s789_s30 = sshll.u32 %s782_s12, 4  ;;  %s19594_s1 = scalar_lea.hbm %s24662_s15, %s19293_s17  ;;  %s790_s30 = int_to_ptr.vmem [resolvable:$true] %s789_s30 }
 0x151   : > { %s18888_s5 = scalar_lea.hbm %s19561_s23, 16  ;;  %s18892_s7 = scalar_lea.hbm %s24660_s13, 32 }
 0x152   : > { %p18889_p2 = scmp.ne.s32.totalorder %s19561_s23, %s18888_s5  ;;  %p18893_p8 = scmp.lt.u32.totalorder %s19561_s23, %s24660_s13 }
 0x153   : > { %p18894_p5 = scmp.lt.u32.totalorder %s18892_s7, %s18888_s5  ;;  %p18896_p10 = scmp.lt.u32.totalorder %s18888_s5, %s19561_s23 }
 0x154   : > { %p18890_p3 = pnand %p18889_p2, %p19237_p4 }
 0x155   : > { %p18895_p9 = por %p18894_p5, %p18893_p8 }
 0x156   : > { %p18891_p6 = pneg %p18890_p3 }
 0x157   : > { %p18897_p11 = por %p18896_p10, %p18895_p9 }
 0x159   : > { %p18898_p12 = pnand %p18897_p11, %p18891_p6 }
 0x15b   : > { %18901 = shalt.err (!%p18898_p12)
}
 0x15c   : > { %s18902_s17 = scalar_lea.vmem %s790_s30, 16  ;;  %s19079_s24 = smov [#allocation19]  }
 0x15d   : > { %p18903_p0 = scmp.ne.s32.totalorder %s790_s30, %s18902_s17  ;;  %s18906_s2 = sshll.u32 %s19079_s24, 4  ;;  %s18907_s2 = int_to_ptr.vmem [resolvable:$false] %s18906_s2 }
 0x15e   : > { %s18908_s10 = scalar_lea.vmem %s18907_s2, 32  ;;  %p18909_p7 = scmp.lt.s32.totalorder %s790_s30, %s18907_s2 }
 0x15f   : > { %p18904_p13 = pnand %p18903_p0, %p19237_p4  ;;  %p18910_p2 = scmp.lt.s32.totalorder %s18908_s10, %s18902_s17 }
 0x161   : > { %p18905_p1 = pneg %p18904_p13  ;;  %p18911_p3 = por %p18910_p2, %p18909_p7 }
 0x163   : > { %p18912_p5 = pnand %p18911_p3, %p18905_p1 }
 0x165   : > { %18915 = shalt.err (!%p18912_p5)
}
 0x166   : > { %s24767_s4 = scalar_lea.sflag [#allocation18], %s19254_s28  ;;  %s817_s6 = scalar_lea.vmem [#allocation22], %s19266_s22 }
 0x167   : > { %17731 = dma.hbm_to_vmem [thread:$0]  (%p19237_p4), %s19561_s23, 16, %s790_s30, %s24767_s4  }
 0x168   : > { %s824_s12 = sshll.u32 %s817_s6, 4  ;;  %s18916_s20 = scalar_lea.hbm %s19594_s1, 256  ;;  %s19616_s12 = int_to_ptr.vmem [resolvable:$true] %s824_s12 }
 0x169   : > { %p18917_p6 = scmp.ne.s32.totalorder %s19594_s1, %s18916_s20  ;;  %s18920_s3 = scalar_lea.hbm %s24662_s15, 512 }
 0x16a   : > { %p18921_p10 = scmp.lt.u32.totalorder %s19594_s1, %s24662_s15  ;;  %p18922_p11 = scmp.lt.u32.totalorder %s18920_s3, %s18916_s20 }
 0x16b   : > { %p18918_p8 = pnand %p18917_p6, %p19237_p4  ;;  %p18924_p0 = scmp.lt.u32.totalorder %s18916_s20, %s19594_s1 }
 0x16c   : > { %p18923_p12 = por %p18922_p11, %p18921_p10 }
 0x16d   : > { %p18919_p9 = pneg %p18918_p8 }
 0x16e   : > { %p18925_p13 = por %p18924_p0, %p18923_p12 }
 0x170   : > { %p18926_p1 = pnand %p18925_p13, %p18919_p9 }
 0x172   : > { %18929 = shalt.err (!%p18926_p1)
}
 0x173   : > { %s18930_s22 = scalar_lea.vmem %s19616_s12, 256  ;;  %s19080_s23 = smov [#allocation22]  }
 0x174   : > { %p18931_p7 = scmp.ne.s32.totalorder %s19616_s12, %s18930_s22  ;;  %s18934_s30 = sshll.u32 %s19080_s23, 4  ;;  %s18935_s30 = int_to_ptr.vmem [resolvable:$false] %s18934_s30 }
 0x175   : > { %s18936_s17 = scalar_lea.vmem %s18935_s30, 512  ;;  %p18937_p5 = scmp.lt.s32.totalorder %s19616_s12, %s18935_s30 }
 0x176   : > { %p18932_p2 = pnand %p18931_p7, %p19237_p4  ;;  %p18938_p6 = scmp.lt.s32.totalorder %s18936_s17, %s18930_s22 }
 0x178   : > { %p18933_p3 = pneg %p18932_p2  ;;  %p18939_p8 = por %p18938_p6, %p18937_p5 }
 0x17a   : > { %p18940_p10 = pnand %p18939_p8, %p18933_p3 }
 0x17c   : > { %18943 = shalt.err (!%p18940_p10)
}
 0x17d   : > { %s24768_s24 = scalar_lea.sflag [#allocation21], %s19254_s28  ;;  %s19648_s4 = scalar_lea.hbm %s24663_s16, %s19251_s27 }
 0x17e   : > { %17733 = dma.hbm_to_vmem [thread:$0]  (%p19237_p4), %s19594_s1, 256, %s19616_s12, %s24768_s24, %s24765_s9, %s24765_s9, %s24764_s0  }
 0x17f   : > { %s837_s6 = scalar_lea.vmem [#allocation23], %s19248_s26  ;;  %s835_s28 = scalar_lea.sflag [#allocation24], %s19248_s26 }
 0x180   : > { %s844_s20 = sshll.u32 %s837_s6, 4  ;;  %s18944_s19 = scalar_lea.hbm %s19648_s4, 16  ;;  %s845_s20 = int_to_ptr.vmem [resolvable:$true] %s844_s20 }
 0x181   : > { %p18945_p9 = scmp.ne.s32.totalorder %s19648_s4, %s18944_s19  ;;  %s18948_s9 = scalar_lea.hbm %s24663_s16, 32 }
 0x182   : > { %p18949_p0 = scmp.lt.u32.totalorder %s19648_s4, %s24663_s16  ;;  %p18950_p13 = scmp.lt.u32.totalorder %s18948_s9, %s18944_s19 }
 0x183   : > { %p18946_p11 = pnand %p18945_p9, %p19237_p4  ;;  %p18952_p7 = scmp.lt.u32.totalorder %s18944_s19, %s19648_s4 }
 0x184   : > { %p18951_p1 = por %p18950_p13, %p18949_p0 }
 0x185   : > { %p18947_p12 = pneg %p18946_p11 }
 0x186   : > { %p18953_p2 = por %p18952_p7, %p18951_p1 }
 0x188   : > { %p18954_p3 = pnand %p18953_p2, %p18947_p12 }
 0x18a   : > { %18957 = shalt.err (!%p18954_p3)
}
 0x18b   : > { %s18958_s26 = scalar_lea.vmem %s845_s20, 16  ;;  %s19081_s12 = smov [#allocation23]  }
 0x18c   : > { %p18959_p5 = scmp.ne.s32.totalorder %s845_s20, %s18958_s26  ;;  %s18962_s3 = sshll.u32 %s19081_s12, 4  ;;  %s18963_s3 = int_to_ptr.vmem [resolvable:$false] %s18962_s3 }
 0x18d   : > { %s18964_s29 = scalar_lea.vmem %s18963_s3, 32  ;;  %p18965_p10 = scmp.lt.s32.totalorder %s845_s20, %s18963_s3 }
 0x18e   : > { %p18960_p6 = pnand %p18959_p5, %p19237_p4  ;;  %p18966_p9 = scmp.lt.s32.totalorder %s18964_s29, %s18958_s26 }
 0x190   : > { %p18961_p8 = pneg %p18960_p6  ;;  %p18967_p11 = por %p18966_p9, %p18965_p10 }
 0x192   : > { %p18968_p0 = pnand %p18967_p11, %p18961_p8 }
 0x194   : > { %18971 = shalt.err (!%p18968_p0)
}
 0x195   : > { %17734 = dma.hbm_to_vmem [thread:$0]  (%p19237_p4), %s19648_s4, 16, %s845_s20, %s835_s28  }
 0x196 PF: > { %p15636_p12 = scmp.ge.s32.totalorder %s19064_s21, 1  ;;  %p863_p13 = scmp.lt.s32.totalorder %s19064_s21, 3 }
 0x198   : > { %p864_p1 = pnand %p15636_p12, %p863_p13 }
 0x19a   : > { %867 = sbr.rel (%p864_p1) target bundleno = 8858 (0x229a), region = 96 }
 0x1a1   : > { %s24769_s7 = sld [smem:[#allocation35_spill]]  ;;  %s24770_s22 = sld [smem:[#allocation40_spill]] }
 0x1a7   : > { %s19672_s23 = sand.u32 1, %s24769_s7   ;;  %p24771_p7 = scmp.ne.s32.totalorder %s24770_s22, 0 }
 0x1a8   : > { %s870_s30 = scalar_lea.sflag [#allocation3], %s19672_s23  ;;  %s872_s17 = scalar_lea.vmem [#allocation2], %s19672_s23 }
 0x1a9   : > { %19015 = dma.done.wait (%p24771_p7), %s870_s30, 16  }
 0x1aa   : > { %19017 = vsyncadd (%p24771_p7), %s870_s30, 4294967280  ;;  %s24772_s25 = sld [smem:[#allocation37_spill]]  ;;  %s880_s2 = scalar_lea.vmem [#allocation5], %s19672_s23 }
 0x1b0   : > { %s19681_s24 = sand.u32 1, %s24772_s25  }
 0x1b1   : > { %s878_s21 = scalar_lea.sflag [#allocation6], %s19681_s24 }
 0x1b2   : > { %19019 = dma.done.wait (%p24771_p7), %s878_s21, 32  }
 0x1b3   : > { %19021 = vsyncadd (%p24771_p7), %s878_s21, 4294967264  ;;  %s19690_s10 = sshll.u32 %s19672_s23, 4  ;;  %s894_s6 = scalar_lea.sflag [#allocation9], %s19681_s24 }
 0x1b4   : > { %19023 = dma.done.wait (%p24771_p7), %s894_s6, 272  }
 0x1b5   : > { %19025 = vsyncadd (%p24771_p7), %s894_s6, 4294967024  ;;  %s911_s19 = scalar_lea.sflag [#allocation12], %s19681_s24 }
 0x1b6   : > { %19027 = dma.done.wait (%p24771_p7), %s911_s19, 32  }
 0x1b7   : > { %19029 = vsyncadd (%p24771_p7), %s911_s19, 4294967264  ;;  %s927_s9 = scalar_lea.sflag [#allocation15], %s19681_s24 }
 0x1b8   : > { %19031 = dma.done.wait (%p24771_p7), %s927_s9, 272  }
 0x1b9   : > { %19033 = vsyncadd (%p24771_p7), %s927_s9, 4294967024  ;;  %s944_s26 = scalar_lea.sflag [#allocation18], %s19681_s24 }
 0x1ba   : > { %19035 = dma.done.wait (%p24771_p7), %s944_s26, 32  }
 0x1bb   : > { %19037 = vsyncadd (%p24771_p7), %s944_s26, 4294967264  ;;  %s960_s29 = scalar_lea.sflag [#allocation21], %s19681_s24 }
 0x1bc   : > { %19039 = dma.done.wait (%p24771_p7), %s960_s29, 272  }
 0x1bd   : > { %19041 = vsyncadd (%p24771_p7), %s960_s29, 4294967024  ;;  %s977_s21 = scalar_lea.sflag [#allocation24], %s19672_s23 }
 0x1be   : > { %19043 = dma.done.wait (%p24771_p7), %s977_s21, 16  }
 0x1bf   : > { %19045 = vsyncadd (%p24771_p7), %s977_s21, 4294967280  ;;  %p1101_p4 = scmp.lt.s32.totalorder %s24772_s25, 1  ;;  %s24773_s7 = sld [smem:[#allocation103_spill]] }
 0x1c0   : > { %s24774_s12 = sld [smem:[#allocation108_spill]]  ;;  %s24775_s1 = sld [smem:[#allocation111_spill]] }
 0x1c1   : > { %s19736_s24 = scalar_select %p1101_p4, %s24772_s25, 1 }
 0x1c2   : > { %s24776_s20 = sld [smem:[#allocation112_spill]]  ;;  %p15646_p2 = scmp.ne.s32.totalorder %s24772_s25, 0 }
 0x1c3   : > { %s15964_s19 = sshll.u32 %s19736_s24, 4  ;;  %s15966_s9 = sshll.u32 %s19736_s24, 6  ;;  %vm1140_vm0 = vcmask (!%p15646_p2), 261120  }
 0x1c4   : > { %1123 = sbr.rel (%p15646_p2) target bundleno = 467 (0x1d3), region = 156  ;;  %s24777_s29 = sld [smem:[#allocation100_spill]] (!%p15646_p2) }
 0x1c5   : > { %s19743_s3 = scalar_lea.vmem %s24773_s7, %s15964_s19 }
 0x1c6   : > { %s19748_s22 = scalar_lea.vmem %s24774_s12, %s15964_s19  ;;  %s19753_s0 = scalar_lea.vmem %s24775_s1, %s15966_s9 }
 0x1c8   : > { %s1118_s4 = scalar_lea.vmem %s24776_s20, %s19736_s24 }
 0x1ca   : > { %v1124_v0 = vld [vmem:[%s24777_s29] sm:$0xff] (!%p15646_p2)  ;;  %v1125_v1 = vld [vmem:[%s24777_s29 + $0x8] sm:$0xff] (!%p15646_p2)  ;;  %v1126_v2 = vld [vmem:[%s24777_s29 + $0x10] sm:$0xff] (!%p15646_p2) }
 0x1cb   : > { %1141 = vst.msk [vmem:[#allocation25] sm:$0xff] %vm1140_vm0, %v1124_v0  ;;  %1142 = vst.msk [vmem:[#allocation25 + $0x8] sm:$0xff] %vm1140_vm0, %v1125_v1  ;;  %v1127_v3 = vld [vmem:[%s24777_s29 + $0x18] sm:$0xff]  ;;  %v1128_v4 = vld [vmem:[%s24777_s29 + $0x20] sm:$0xff] }
 0x1cc   : > { %1143 = vst.msk [vmem:[#allocation25 + $0x10] sm:$0xff] %vm1140_vm0, %v1126_v2  ;;  %v1129_v5 = vld [vmem:[%s24777_s29 + $0x28] sm:$0xff]  ;;  %1144 = vst.msk [vmem:[#allocation25 + $0x18] sm:$0xff] %vm1140_vm0, %v1127_v3  ;;  %v1130_v6 = vld [vmem:[%s24777_s29 + $0x30] sm:$0xff] }
 0x1cd   : > { %1145 = vst.msk [vmem:[#allocation25 + $0x20] sm:$0xff] %vm1140_vm0, %v1128_v4  ;;  %1146 = vst.msk [vmem:[#allocation25 + $0x28] sm:$0xff] %vm1140_vm0, %v1129_v5  ;;  %v1131_v7 = vld [vmem:[%s24777_s29 + $0x38] sm:$0xff]  ;;  %v1132_v8 = vld [vmem:[%s24777_s29 + $0x40] sm:$0xff] }
 0x1ce   : > { %1147 = vst.msk [vmem:[#allocation25 + $0x30] sm:$0xff] %vm1140_vm0, %v1130_v6  ;;  %1148 = vst.msk [vmem:[#allocation25 + $0x38] sm:$0xff] %vm1140_vm0, %v1131_v7  ;;  %v1133_v9 = vld [vmem:[%s24777_s29 + $0x48] sm:$0xff]  ;;  %v1134_v10 = vld [vmem:[%s24777_s29 + $0x50] sm:$0xff] }
 0x1cf   : > { %1149 = vst.msk [vmem:[#allocation25 + $0x40] sm:$0xff] %vm1140_vm0, %v1132_v8  ;;  %v1135_v11 = vld [vmem:[%s24777_s29 + $0x58] sm:$0xff]  ;;  %1150 = vst.msk [vmem:[#allocation25 + $0x48] sm:$0xff] %vm1140_vm0, %v1133_v9  ;;  %v1136_v12 = vld [vmem:[%s24777_s29 + $0x60] sm:$0xff] }
 0x1d0   : > { %1151 = vst.msk [vmem:[#allocation25 + $0x50] sm:$0xff] %vm1140_vm0, %v1134_v10  ;;  %1152 = vst.msk [vmem:[#allocation25 + $0x58] sm:$0xff] %vm1140_vm0, %v1135_v11  ;;  %v1137_v13 = vld [vmem:[%s24777_s29 + $0x68] sm:$0xff]  ;;  %v1138_v14 = vld [vmem:[%s24777_s29 + $0x70] sm:$0xff] }
 0x1d1   : > { %1153 = vst.msk [vmem:[#allocation25 + $0x60] sm:$0xff] %vm1140_vm0, %v1136_v12  ;;  %1154 = vst.msk [vmem:[#allocation25 + $0x68] sm:$0xff] %vm1140_vm0, %v1137_v13  ;;  %v1139_v15 = vld [vmem:[%s24777_s29 + $0x78] sm:$0xff] }
 0x1d2   : > { %1155 = vst.msk [vmem:[#allocation25 + $0x70] sm:$0xff] %vm1140_vm0, %v1138_v14  ;;  %1156 = vst.msk [vmem:[#allocation25 + $0x78] sm:$0xff] %vm1140_vm0, %v1139_v15 }
 0x1d3 PF: > { %vm1175_vm1 = vcmask 261120   ;;  %v1159_v17 = vld [vmem:[#allocation25 + $0x10] sm:$0xff]  ;;  %v1160_v21 = vld [vmem:[#allocation25 + $0x18] sm:$0xff]  ;;  %vm19083_vm2 = vmmov 0   ;;  %vm1688_vm3 = vcmask 64512   ;;  %vm2086_vm4 = vcmask 130048  }
 0x1d4   : > { %v1182_v20 = vsel %vm1175_vm1, %v1159_v17, 0.0  ;;  %v19826_v22 = vld [vmem:[#allocation25 + $0x20] sm:$0xff]  ;;  %v19828_v23 = vld [vmem:[#allocation25 + $0x28] sm:$0xff]  ;;  %v1185_v27 = vsel %vm1175_vm1, %v1160_v21, 0.0  ;;  %s19086_s6 = smov 88   ;;  %s19087_s27 = smov 120  }
 0x1d5   : > { %1183 = vadd.xlane.f32.xlu1 %v1182_v20  ;;  %v19830_v24 = vld [vmem:[#allocation25 + $0x30] sm:$0xff]  ;;  %v19832_v25 = vld [vmem:[#allocation25 + $0x38] sm:$0xff]  ;;  %v1188_v30 = vsel %vm1175_vm1, %v19826_v22, 0.0  ;;  %v1191_v31 = vsel %vm1175_vm1, %v19828_v23, 0.0  ;;  %s19088_s25 = smov 56   ;;  %s19089_s20 = smov 80  }
 0x1d6   : > { %v19836_v28 = vld [vmem:[#allocation25 + $0x40] sm:$0xff]  ;;  %v19838_v29 = vld [vmem:[#allocation25 + $0x48] sm:$0xff]  ;;  %v1194_v32 = vsel %vm1175_vm1, %v19830_v24, 0.0  ;;  %v1197_v33 = vsel %vm1175_vm1, %v19832_v25, 0.0  ;;  %s19090_s28 = smov 112   ;;  %s19091_s5 = smov 48  }
 0x1d7   : > { %v1200_v34 = vsel %vm1175_vm1, %v19836_v28, 0.0  ;;  %v1203_v35 = vsel %vm1175_vm1, %v19838_v29, 0.0  ;;  %v19852_v36 = vld [vmem:[#allocation25 + $0x50] sm:$0xff]  ;;  %v19854_v37 = vld [vmem:[#allocation25 + $0x58] sm:$0xff]  ;;  %s19092_s1 = smov 72   ;;  %s19093_s19 = smov 104  }
 0x1d8   : > { %v1206_v38 = vsel %vm1175_vm1, %v19852_v36, 0.0  ;;  %v1209_v39 = vsel %vm1175_vm1, %v19854_v37, 0.0  ;;  %v19860_v40 = vld [vmem:[#allocation25 + $0x60] sm:$0xff]  ;;  %v19862_v41 = vld [vmem:[#allocation25 + $0x68] sm:$0xff]  ;;  %s19094_s9 = smov 40   ;;  %s19095_s21 = smov 8  }
 0x1d9   : > { %1186 = vadd.xlane.f32.xlu1 %v1185_v27  ;;  %v1212_v42 = vsel %vm1175_vm1, %v19860_v40, 0.0  ;;  %v1215_v43 = vsel %vm1175_vm1, %v19862_v41, 0.0  ;;  %v19868_v44 = vld [vmem:[#allocation25 + $0x70] sm:$0xff]  ;;  %v19870_v45 = vld [vmem:[#allocation25 + $0x78] sm:$0xff]  ;;  %s19096_s26 = smov 16   ;;  %s19097_s7 = smov 32  }
 0x1da   : > { %v1157_v16 = vld [vmem:[#allocation25] sm:$0xff]  ;;  %v1158_v18 = vld [vmem:[#allocation25 + $0x8] sm:$0xff]  ;;  %v1218_v46 = vsel %vm1175_vm1, %v19868_v44, 0.0  ;;  %v1221_v47 = vsel %vm1175_vm1, %v19870_v45, 0.0  ;;  %s24830_s30 = scalar_lea.vmem [#allocation8], %s19690_s10  ;;  %s19098_s12 = smov 24  }
 0x1db   : > { %v1176_v19 = vsel %vm1175_vm1, %v1157_v16, 0.0  ;;  %v1179_v26 = vsel %vm1175_vm1, %v1158_v18, 0.0  ;;  %vm5775_vm5 = vcmask 195584   ;;  %vm7827_vm6 = vcmask 1043456   ;;  %s19101_s24 = smov [#allocation25]  }
 0x1dc   : > { %1177 = vadd.xlane.f32.xlu0 %v1176_v19 }
 0x1dd   : > { %1192 = vadd.xlane.f32.xlu1 %v1191_v31 }
 0x1e0   : > { %1180 = vadd.xlane.f32.xlu0 %v1179_v26 }
 0x1e1   : > { %1198 = vadd.xlane.f32.xlu1 %v1197_v33 }
 0x1e4   : > { %1189 = vadd.xlane.f32.xlu0 %v1188_v30 }
 0x1e5   : > { %1204 = vadd.xlane.f32.xlu1 %v1203_v35 }
 0x1e8   : > { %1195 = vadd.xlane.f32.xlu0 %v1194_v32 }
 0x1e9   : > { %1210 = vadd.xlane.f32.xlu1 %v1209_v39 }
 0x1ec   : > { %1201 = vadd.xlane.f32.xlu0 %v1200_v34 }
 0x1ed   : > { %1216 = vadd.xlane.f32.xlu1 %v1215_v43 }
 0x1f0   : > { %1207 = vadd.xlane.f32.xlu0 %v1206_v38 }
 0x1f1   : > { %1222 = vadd.xlane.f32.xlu1 %v1221_v47 }
 0x1f4   : > { %1213 = vadd.xlane.f32.xlu0 %v1212_v42 }
 0x1f8   : > { %1219 = vadd.xlane.f32.xlu0 %v1218_v46 }
 0x262   : > { %v1184_v49 = vpop.xlane.xlu1 %1183 }
 0x263   : > { %v1227_v51 = vmul.f32 0.03125, %v1184_v49 }
 0x265   : > { %v19878_v53 = vsub.f32 %v1159_v17, %v1227_v51 }
 0x266   : > { %v1187_v55 = vpop.xlane.xlu1 %1186 }
 0x267   : > { %v1228_v57 = vmul.f32 0.03125, %v1187_v55  ;;  %v1259_v59 = vmul.f32 %v19878_v53, %v19878_v53 }
 0x269   : > { %v1178_v48 = vpop.xlane.xlu0 %1177  ;;  %v19886_v61 = vsub.f32 %v1160_v21, %v1228_v57  ;;  %v1279_v1 = vsel %vm1175_vm1, %v1259_v59, 0.0 }
 0x26a   : > { %v1225_v50 = vmul.f32 0.03125, %v1178_v48  ;;  %v1193_v0 = vpop.xlane.xlu1 %1192 }
 0x26b   : > { %v1230_v3 = vmul.f32 0.03125, %v1193_v0  ;;  %v1260_v5 = vmul.f32 %v19886_v61, %v19886_v61 }
 0x26c   : > { %v19876_v52 = vsub.f32 %v1157_v16, %v1225_v50 }
 0x26d   : > { %v1181_v54 = vpop.xlane.xlu0 %1180  ;;  %v19898_v7 = vsub.f32 %v19828_v23, %v1230_v3  ;;  %v1282_v11 = vsel %vm1175_vm1, %v1260_v5, 0.0  ;;  %v17811_v5 = vld [vmem:[%s19743_s3 + $0x8] sm:$0xff]  }
 0x26e   : > { %v1226_v56 = vmul.f32 0.03125, %v1181_v54  ;;  %v1257_v58 = vmul.f32 %v19876_v52, %v19876_v52  ;;  %v1199_v10 = vpop.xlane.xlu1 %1198 }
 0x26f   : > { %v1232_v13 = vmul.f32 0.03125, %v1199_v10  ;;  %v1262_v15 = vmul.f32 %v19898_v7, %v19898_v7 }
 0x270   : > { %v19884_v60 = vsub.f32 %v1158_v18, %v1226_v56  ;;  %v1273_v62 = vsel %vm1175_vm1, %v1257_v58, 0.0 }
 0x271   : > { %1274 = vadd.xlane.f32.xlu0 %v1273_v62  ;;  %v1190_v63 = vpop.xlane.xlu0 %1189  ;;  %v19910_v17 = vsub.f32 %v19832_v25, %v1232_v13  ;;  %v1288_v21 = vsel %vm1175_vm1, %v1262_v15, 0.0 }
 0x272   : > { %v1229_v2 = vmul.f32 0.03125, %v1190_v63  ;;  %v1258_v4 = vmul.f32 %v19884_v60, %v19884_v60  ;;  %v1205_v20 = vpop.xlane.xlu1 %1204 }
 0x273   : > { %v1234_v23 = vmul.f32 0.03125, %v1205_v20 }
 0x274   : > { %v19895_v6 = vsub.f32 %v19826_v22, %v1229_v2  ;;  %v1276_v8 = vsel %vm1175_vm1, %v1258_v4, 0.0 }
 0x275   : > { %1280 = vadd.xlane.f32.xlu0 %v1279_v1  ;;  %1277 = vadd.xlane.f32.xlu1 %v1276_v8  ;;  %v1196_v9 = vpop.xlane.xlu0 %1195  ;;  %v19922_v25 = vsub.f32 %v19838_v29, %v1234_v23 }
 0x276   : > { %v1231_v12 = vmul.f32 0.03125, %v1196_v9  ;;  %v1261_v14 = vmul.f32 %v19895_v6, %v19895_v6  ;;  %v1211_v32 = vpop.xlane.xlu1 %1210 }
 0x277   : > { %v1236_v35 = vmul.f32 0.03125, %v1211_v32 }
 0x278   : > { %v19907_v16 = vsub.f32 %v19830_v24, %v1231_v12  ;;  %v1285_v18 = vsel %vm1175_vm1, %v1261_v14, 0.0  ;;  %v1264_v24 = vmul.f32 %v19910_v17, %v19910_v17 }
 0x279   : > { %1283 = vadd.xlane.f32.xlu1 %v1282_v11  ;;  %1286 = vadd.xlane.f32.xlu0 %v1285_v18  ;;  %v1202_v19 = vpop.xlane.xlu0 %1201  ;;  %v19934_v29 = vsub.f32 %v19854_v37, %v1236_v35 }
 0x27a   : > { %v1233_v22 = vmul.f32 0.03125, %v1202_v19  ;;  %v1263_v26 = vmul.f32 %v19907_v16, %v19907_v16  ;;  %v1294_v33 = vsel %vm1175_vm1, %v1264_v24, 0.0  ;;  %v1217_v46 = vpop.xlane.xlu1 %1216 }
 0x27b   : > { %v1238_v49 = vmul.f32 0.03125, %v1217_v46 }
 0x27c   : > { %v19919_v27 = vsub.f32 %v19836_v28, %v1233_v22  ;;  %v1291_v30 = vsel %vm1175_vm1, %v1263_v26, 0.0  ;;  %v1266_v28 = vmul.f32 %v19922_v25, %v19922_v25 }
 0x27d   : > { %1289 = vadd.xlane.f32.xlu1 %v1288_v21  ;;  %1292 = vadd.xlane.f32.xlu0 %v1291_v30  ;;  %v1208_v31 = vpop.xlane.xlu0 %1207  ;;  %v19946_v37 = vsub.f32 %v19862_v41, %v1238_v49 }
 0x27e   : > { %v1235_v34 = vmul.f32 0.03125, %v1208_v31  ;;  %v1265_v38 = vmul.f32 %v19919_v27, %v19919_v27  ;;  %v1300_v47 = vsel %vm1175_vm1, %v1266_v28, 0.0  ;;  %v1223_v56 = vpop.xlane.xlu1 %1222 }
 0x27f   : > { %v1240_v59 = vmul.f32 0.03125, %v1223_v56 }
 0x280   : > { %v19931_v39 = vsub.f32 %v19852_v36, %v1235_v34  ;;  %v1297_v42 = vsel %vm1175_vm1, %v1265_v38, 0.0  ;;  %v1268_v36 = vmul.f32 %v19934_v29, %v19934_v29 }
 0x281   : > { %1295 = vadd.xlane.f32.xlu1 %v1294_v33  ;;  %1298 = vadd.xlane.f32.xlu0 %v1297_v42  ;;  %v1214_v43 = vpop.xlane.xlu0 %1213  ;;  %v19958_v63 = vsub.f32 %v19870_v45, %v1240_v59  ;;  %v17810_v45 = vld [vmem:[%s19743_s3] sm:$0xff]   ;;  %s19085_s3 = smov 64  }
 0x282   : > { %v1237_v48 = vmul.f32 0.03125, %v1214_v43  ;;  %v1267_v50 = vmul.f32 %v19931_v39, %v19931_v39  ;;  %v1306_v57 = vsel %vm1175_vm1, %v1268_v36, 0.0  ;;  %16433 = vmatprep.subr.bf16.mxu0 %v17810_v45  ;;  %17717 = vmatprep.subr.bf16.mxu1 %v17810_v45  ;;  %v19979_v59 = vld [vmem:[%s880_s2] ss:$0 sm:$0xff]  ;;  %s19084_s2 = smov 96  }
 0x283   : > { %v1272_v3 = vmul.f32 %v19958_v63, %v19958_v63  ;;  %16434 = vmatpush3.bf16.msra.mxu0 %v17810_v45  ;;  %17719 = vmatpush3.bf16.msra.mxu1 %v17810_v45 }
 0x284   : > { %v19943_v51 = vsub.f32 %v19860_v40, %v1237_v48  ;;  %v1303_v54 = vsel %vm1175_vm1, %v1267_v50, 0.0  ;;  %v1270_v40 = vmul.f32 %v19946_v37, %v19946_v37  ;;  %16435 = vmatprep.subr.bf16.mxu0 %v17811_v5  ;;  %17718 = vmatprep.subr.bf16.mxu1 %v17811_v5 }
 0x285   : > { %1301 = vadd.xlane.f32.xlu1 %v1300_v47  ;;  %1304 = vadd.xlane.f32.xlu0 %v1303_v54  ;;  %v1220_v55 = vpop.xlane.xlu0 %1219  ;;  %v19973_v47 = vld [vmem:[%s872_s17] ss:$0 sm:$0xff]  ;;  %s24778_s17 = scalar_lea.vmem [#allocation7], %s19672_s23 }
 0x286   : > { %v1239_v58 = vmul.f32 0.03125, %v1220_v55  ;;  %v1269_v62 = vmul.f32 %v19943_v51, %v19943_v51  ;;  %v1312_v1 = vsel %vm1175_vm1, %v1270_v40, 0.0 }
 0x287   : > { %16436 = vmatpush3.bf16.msra.mxu0 %v17811_v5  ;;  %17720 = vmatpush3.bf16.msra.mxu1 %v17811_v5 }
 0x288   : > { %v19955_v41 = vsub.f32 %v19868_v44, %v1239_v58  ;;  %v1309_v0 = vsel %vm1175_vm1, %v1269_v62, 0.0  ;;  %v1318_v44 = vsel %vm1175_vm1, %v1272_v3, 0.0 }
 0x289   : > { %1307 = vadd.xlane.f32.xlu1 %v1306_v57  ;;  %1310 = vadd.xlane.f32.xlu0 %v1309_v0 }
 0x28a   : > { %v1271_v2 = vmul.f32 %v19955_v41, %v19955_v41 }
 0x28c   : > { %v1315_v4 = vsel %vm1175_vm1, %v1271_v2, 0.0 }
 0x28d   : > { %1313 = vadd.xlane.f32.xlu1 %v1312_v1  ;;  %1316 = vadd.xlane.f32.xlu0 %v1315_v4 }
 0x291   : > { %1319 = vadd.xlane.f32.xlu1 %v1318_v44 }
 0x2fe   : > { %v1275_v8 = vpop.xlane.xlu0 %1274 }
 0x2ff   : > { %v1321_v9 = vmul.f32 0.03125, %v1275_v8 }
 0x301   : > { %v1337_v10 = vadd.f32 1e-05, %v1321_v9 }
 0x302   : > { %v1278_v11 = vpop.xlane.xlu1 %1277  ;;  %v1281_v12 = vpop.xlane.xlu0 %1280 }
 0x303   : > { %17828 = vrsqrt.f32 %v1337_v10  ;;  %v1322_v13 = vmul.f32 0.03125, %v1278_v11  ;;  %v1323_v14 = vmul.f32 0.03125, %v1281_v12 }
 0x305   : > { %v1338_v15 = vadd.f32 1e-05, %v1322_v13  ;;  %v1339_v18 = vadd.f32 1e-05, %v1323_v14 }
 0x306   : > { %v1284_v19 = vpop.xlane.xlu1 %1283  ;;  %v1287_v20 = vpop.xlane.xlu0 %1286 }
 0x307   : > { %17830 = vrsqrt.f32 %v1338_v15  ;;  %v1324_v21 = vmul.f32 0.03125, %v1284_v19  ;;  %v1325_v22 = vmul.f32 0.03125, %v1287_v20 }
 0x308   : > { %17832 = vrsqrt.f32 %v1339_v18 }
 0x309   : > { %v1340_v23 = vadd.f32 1e-05, %v1324_v21  ;;  %v1341_v26 = vadd.f32 1e-05, %v1325_v22 }
 0x30a   : > { %v1290_v24 = vpop.xlane.xlu1 %1289  ;;  %v1293_v30 = vpop.xlane.xlu0 %1292 }
 0x30b   : > { %17834 = vrsqrt.f32 %v1340_v23  ;;  %v1326_v31 = vmul.f32 0.03125, %v1290_v24  ;;  %v1327_v32 = vmul.f32 0.03125, %v1293_v30 }
 0x30c   : > { %17836 = vrsqrt.f32 %v1341_v26 }
 0x30d   : > { %v17829_v33 = vpop.eup %17828  ;;  %v1342_v34 = vadd.f32 1e-05, %v1326_v31  ;;  %v1343_v35 = vadd.f32 1e-05, %v1327_v32 }
 0x30e   : > { %v1296_v38 = vpop.xlane.xlu1 %1295  ;;  %v1299_v28 = vpop.xlane.xlu0 %1298  ;;  %v1369_v42 = vmul.f32 %v17829_v33, %v19876_v52 }
 0x30f   : > { %17838 = vrsqrt.f32 %v1342_v34  ;;  %v1328_v43 = vmul.f32 0.03125, %v1296_v38  ;;  %v1329_v46 = vmul.f32 0.03125, %v1299_v28 }
 0x310   : > { %17840 = vrsqrt.f32 %v1343_v35  ;;  %v1391_v57 = vmul.f32 %v19973_v47, %v1369_v42 }
 0x311   : > { %v17831_v48 = vpop.eup %17830  ;;  %v1344_v49 = vadd.f32 1e-05, %v1328_v43  ;;  %v1345_v50 = vadd.f32 1e-05, %v1329_v46 }
 0x312   : > { %v17833_v36 = vpop.eup %17832  ;;  %v1302_v54 = vpop.xlane.xlu1 %1301  ;;  %v1370_v56 = vmul.f32 %v17831_v48, %v19884_v60  ;;  %v1413_v60 = vadd.f32 %v19979_v59, %v1391_v57 }
 0x313   : > { %v1305_v55 = vpop.xlane.xlu0 %1304  ;;  %17842 = vrsqrt.f32 %v1344_v49  ;;  %v1330_v52 = vmul.f32 0.03125, %v1302_v54  ;;  %v1371_v62 = vmul.f32 %v17833_v36, %v19878_v53 }
 0x314   : > { %v1331_v58 = vmul.f32 0.03125, %v1305_v55  ;;  %17844 = vrsqrt.f32 %v1345_v50  ;;  %v1392_v40 = vmul.f32 %v19973_v47, %v1370_v56 }
 0x315   : > { %v17835_v0 = vpop.eup %17834  ;;  %v1346_v1 = vadd.f32 1e-05, %v1330_v52  ;;  %v1393_v8 = vmul.f32 %v19973_v47, %v1371_v62 }
 0x316   : > { %v1347_v2 = vadd.f32 1e-05, %v1331_v58  ;;  %v17837_v3 = vpop.eup %17836  ;;  %v1308_v4 = vpop.xlane.xlu1 %1307  ;;  %v1414_v45 = vadd.f32 %v19979_v59, %v1392_v40  ;;  %v1372_v5 = vmul.f32 %v17835_v0, %v19886_v61 }
 0x317   : > { %v1311_v44 = vpop.xlane.xlu0 %1310  ;;  %17846 = vrsqrt.f32 %v1346_v1  ;;  %v1332_v9 = vmul.f32 0.03125, %v1308_v4  ;;  %v1373_v12 = vmul.f32 %v17837_v3, %v19895_v6  ;;  %v1415_v61 = vadd.f32 %v19979_v59, %v1393_v8 }
 0x318   : > { %v1333_v53 = vmul.f32 0.03125, %v1311_v44  ;;  %17848 = vrsqrt.f32 %v1347_v2  ;;  %v1429_v10 = vpack.c.bf16 %v1414_v45, %v1413_v60  ;;  %v1394_v11 = vmul.f32 %v19973_v47, %v1372_v5 }
 0x319   : > { %v17839_v13 = vpop.eup %17838  ;;  %v1348_v14 = vadd.f32 1e-05, %v1332_v9  ;;  %v1395_v23 = vmul.f32 %v19973_v47, %v1373_v12 }
 0x31a   : > { %v1349_v15 = vadd.f32 1e-05, %v1333_v53  ;;  %v17841_v18 = vpop.eup %17840  ;;  %v1314_v19 = vpop.xlane.xlu1 %1313  ;;  %16437 = vmatprep.mubr.msk.bf16.mxu0 %vm1175_vm1, %v1429_v10  ;;  %v1416_v21 = vadd.f32 %v19979_v59, %v1394_v11  ;;  %v1374_v22 = vmul.f32 %v17839_v13, %v19898_v7 }
 0x31b   : > { %v1317_v20 = vpop.xlane.xlu0 %1316  ;;  %17850 = vrsqrt.f32 %v1348_v14  ;;  %v1334_v26 = vmul.f32 0.03125, %v1314_v19  ;;  %v1375_v6 = vmul.f32 %v17841_v18, %v19907_v16  ;;  %v1417_v7 = vadd.f32 %v19979_v59, %v1395_v23 }
 0x31c   : > { %v1335_v24 = vmul.f32 0.03125, %v1317_v20  ;;  %17852 = vrsqrt.f32 %v1349_v15  ;;  %v1430_v30 = vpack.c.bf16 %v1416_v21, %v1415_v61  ;;  %v1396_v31 = vmul.f32 %v19973_v47, %v1374_v22  ;;  %v15649_v61 = vld [vmem:[%s24778_s17] ss:$0 sm:$0xff]  ;;  %s24831_s17 = smov %s24830_s30 }
 0x31d   : > { %v17843_v32 = vpop.eup %17842  ;;  %v1350_v33 = vadd.f32 1e-05, %v1334_v26  ;;  %v1397_v43 = vmul.f32 %v19973_v47, %v1375_v6  ;;  %v24692_v20 = vmov 0.0  }
 0x31e   : > { %v1351_v34 = vadd.f32 1e-05, %v1335_v24  ;;  %v17845_v35 = vpop.eup %17844  ;;  %v1320_v38 = vpop.xlane.xlu1 %1319  ;;  %16438 = vmatmul.mubr.msk.bf16.vlgmr.msra.gmra.mrb[0].mxu0 %vm1175_vm1, %v1430_v30  ;;  %v1418_v28 = vadd.f32 %v19979_v59, %v1396_v31  ;;  %v1376_v42 = vmul.f32 %v17843_v32, %v19910_v17  ;;  %16453 = vmatprep.subr.bf16.mxu1 %v24692_v20 }
 0x31f   : > { %17854 = vrsqrt.f32 %v1350_v33  ;;  %v1336_v16 = vmul.f32 0.03125, %v1320_v38  ;;  %v1377_v46 = vmul.f32 %v17845_v35, %v19919_v27  ;;  %v1419_v55 = vadd.f32 %v19979_v59, %v1397_v43  ;;  %16477 = vmatprep.subr.bf16.mxu0 %v24692_v20 }
 0x320   : > { %17856 = vrsqrt.f32 %v1351_v34  ;;  %v1431_v48 = vpack.c.bf16 %v1418_v28, %v1417_v7  ;;  %v1398_v49 = vmul.f32 %v19973_v47, %v1376_v42 }
 0x321   : > { %v17847_v50 = vpop.eup %17846  ;;  %v1352_v36 = vadd.f32 1e-05, %v1336_v16  ;;  %v1399_v57 = vmul.f32 %v19973_v47, %v1377_v46 }
 0x322   : > { %v17849_v54 = vpop.eup %17848  ;;  %16441 = vmatprep.mubr.msk.bf16.mxu0 %vm1175_vm1, %v1431_v48  ;;  %v1420_v56 = vadd.f32 %v19979_v59, %v1398_v49  ;;  %v1378_v17 = vmul.f32 %v17847_v50, %v19922_v25 }
 0x323   : > { %17858 = vrsqrt.f32 %v1352_v36  ;;  %v1379_v27 = vmul.f32 %v17849_v54, %v19931_v39  ;;  %v1421_v0 = vadd.f32 %v19979_v59, %v1399_v57 }
 0x324   : > { %v1432_v52 = vpack.c.bf16 %v1420_v56, %v1419_v55  ;;  %v1400_v58 = vmul.f32 %v19973_v47, %v1378_v17 }
 0x325   : > { %v17851_v62 = vpop.eup %17850  ;;  %v1401_v25 = vmul.f32 %v19973_v47, %v1379_v27 }
 0x326   : > { %v17853_v40 = vpop.eup %17852  ;;  %16442 = vmatmul.mubr.msk.bf16.gmra.mrb[4].mxu0 %vm1175_vm1, %v1432_v52  ;;  %v1422_v1 = vadd.f32 %v19979_v59, %v1400_v58  ;;  %v1380_v2 = vmul.f32 %v17851_v62, %v19934_v29 }
 0x327   : > { %v1381_v3 = vmul.f32 %v17853_v40, %v19943_v51  ;;  %v1423_v45 = vadd.f32 %v19979_v59, %v1401_v25  ;;  %16479 = vmatprep.mubr.msk.bf16.mxu0 %vm19083_vm2, %v24692_v20 }
 0x328   : > { %v1433_v4 = vpack.c.bf16 %v1422_v1, %v1421_v0  ;;  %v1402_v39 = vmul.f32 %v19973_v47, %v1380_v2 }
 0x329   : > { %v17855_v44 = vpop.eup %17854  ;;  %v1403_v9 = vmul.f32 %v19973_v47, %v1381_v3 }
 0x32a   : > { %v17857_v60 = vpop.eup %17856  ;;  %16445 = vmatprep.mubr.msk.bf16.mxu1 %vm1175_vm1, %v1433_v4  ;;  %v1424_v5 = vadd.f32 %v19979_v59, %v1402_v39  ;;  %v1382_v8 = vmul.f32 %v17855_v44, %v19946_v37 }
 0x32b   : > { %v1383_v29 = vmul.f32 %v17857_v60, %v19955_v41  ;;  %v1425_v11 = vadd.f32 %v19979_v59, %v1403_v9 }
 0x32c   : > { %v1434_v53 = vpack.c.bf16 %v1424_v5, %v1423_v45  ;;  %v1404_v51 = vmul.f32 %v19973_v47, %v1382_v8 }
 0x32d   : > { %v17859_v10 = vpop.eup %17858  ;;  %v1405_v14 = vmul.f32 %v19973_v47, %v1383_v29 }
 0x32e   : > { %16446 = vmatmul.mubr.msk.bf16.vlgmr.msra.gmra.mrb[0].mxu1 %vm1175_vm1, %v1434_v53  ;;  %v1426_v12 = vadd.f32 %v19979_v59, %v1404_v51  ;;  %v1384_v13 = vmul.f32 %v17859_v10, %v19958_v63 }
 0x32f   : > { %v1427_v41 = vadd.f32 %v19979_v59, %v1405_v14 }
 0x330   : > { %v1435_v37 = vpack.c.bf16 %v1426_v12, %v1425_v11  ;;  %v1406_v15 = vmul.f32 %v19973_v47, %v1384_v13 }
 0x332   : > { %16449 = vmatprep.mubr.msk.bf16.mxu1 %vm1175_vm1, %v1435_v37  ;;  %v1428_v18 = vadd.f32 %v19979_v59, %v1406_v15 }
 0x334   : > { %v1436_v19 = vpack.c.bf16 %v1428_v18, %v1427_v41 }
 0x336   : > { %16450 = vmatmul.mubr.msk.bf16.gmra.mrb[4].mxu1 %vm1175_vm1, %v1436_v19 }
 0x337   : > { %16455 = vmatprep.mubr.msk.bf16.mxu1 %vm19083_vm2, %v24692_v20 }
 0x3f1   : > { %v16439_v63 = vpop.f32.mrb[0].mxu0 }
 0x3f2   : > { %v1518_v21 = vpop.f32.mrb[1].mxu0  ;;  %v20038_v47 = vadd.f32 %v16439_v63, %v15649_v61 }
 0x3f3   : > { %v16440_v22 = vpop.f32.mrb[2].mxu0  ;;  %v20042_v24 = vadd.f32 %v15649_v61, %v1518_v21 }
 0x3f4   : > { %v20040_v23 = vadd.f32 %v16440_v22, %v15649_v61  ;;  %v1521_v26 = vpop.f32.mrb[3].mxu0 }
 0x3f5   : > { %v20044_v59 = vadd.f32 %v15649_v61, %v1521_v26 }
 0x3f6   : > { %v20052_v6 = vpack.c.bf16 %v20040_v23, %v20038_v47 }
 0x3f7   : > { %v20056_v30 = vpack.c.bf16 %v20044_v59, %v20042_v24 }
 0x3f8   : > { %1737 = vrot.lane.b32.xlu1 %v20052_v6, %s19084_s2 }
 0x3f9   : > { %1686 = vrot.lane.b32.xlu0 %v20056_v30, %s19084_s2  ;;  %v16443_v31 = vpop.f32.mrb[4].mxu0 }
 0x3fa   : > { %v1534_v32 = vpop.f32.mrb[5].mxu0  ;;  %v20062_v34 = vadd.f32 %v16443_v31, %v15649_v61 }
 0x3fb   : > { %v16444_v33 = vpop.f32.mrb[6].mxu0  ;;  %v20066_v7 = vadd.f32 %v15649_v61, %v1534_v32 }
 0x3fc   : > { %v20064_v35 = vadd.f32 %v16444_v33, %v15649_v61  ;;  %v1537_v38 = vpop.f32.mrb[7].mxu0 }
 0x3fd   : > { %v20068_v28 = vadd.f32 %v15649_v61, %v1537_v38 }
 0x3fe   : > { %v20072_v42 = vpack.c.bf16 %v20064_v35, %v20062_v34 }
 0x3ff   : > { %v20076_v43 = vpack.c.bf16 %v20068_v28, %v20066_v7 }
 0x401   : > { %1787 = vrot.lane.b32.xlu1 %v20076_v43, %s19084_s2  ;;  %v16447_v16 = vpop.f32.mrb[0].mxu1 }
 0x402   : > { %v1550_v46 = vpop.f32.mrb[1].mxu1  ;;  %v20080_v49 = vadd.f32 %v16447_v16, %v15649_v61 }
 0x403   : > { %v16448_v48 = vpop.f32.mrb[2].mxu1  ;;  %v20084_v54 = vadd.f32 %v15649_v61, %v1550_v46 }
 0x404   : > { %v20082_v50 = vadd.f32 %v16448_v48, %v15649_v61  ;;  %v1553_v36 = vpop.f32.mrb[3].mxu1 }
 0x405   : > { %v20086_v55 = vadd.f32 %v15649_v61, %v1553_v36  ;;  %1837 = vrot.lane.b32.xlu1 %v20072_v42, %s19084_s2 }
 0x406   : > { %24779 = vst [vmem:[#allocation41_spill] sm:$0xff] %v20082_v50  ;;  %v20092_v56 = vpack.c.bf16 %v20082_v50, %v20080_v49 }
 0x407   : > { %24780 = vst [vmem:[#allocation42_spill] sm:$0xff] %v20086_v55  ;;  %v20096_v17 = vpack.c.bf16 %v20086_v55, %v20084_v54 }
 0x409   : > { %1937 = vrot.lane.b32.xlu1 %v20092_v56, %s19084_s2  ;;  %1887 = vrot.lane.b32.xlu0 %v20096_v17, %s19084_s2  ;;  %v16451_v57 = vpop.f32.mrb[4].mxu1 }
 0x40a   : > { %v1566_v27 = vpop.f32.mrb[5].mxu1  ;;  %v20102_v58 = vadd.f32 %v16451_v57, %v15649_v61 }
 0x40b   : > { %v16452_v52 = vpop.f32.mrb[6].mxu1  ;;  %v20106_v0 = vadd.f32 %v15649_v61, %v1566_v27 }
 0x40c   : > { %24781 = vst [vmem:[#allocation43_spill] sm:$0xff] %v20102_v58  ;;  %v20104_v62 = vadd.f32 %v16452_v52, %v15649_v61  ;;  %v1569_v40 = vpop.f32.mrb[7].mxu1 }
 0x40d   : > { %v20108_v1 = vadd.f32 %v15649_v61, %v1569_v40 }
 0x40e   : > { %24782 = vst [vmem:[#allocation44_spill] sm:$0xff] %v20104_v62  ;;  %v20112_v2 = vpack.c.bf16 %v20104_v62, %v20102_v58 }
 0x40f   : > { %24783 = vst [vmem:[#allocation45_spill] sm:$0xff] %v20108_v1  ;;  %v20116_v25 = vpack.c.bf16 %v20108_v1, %v20106_v0 }
 0x410   : > { %2037 = vrot.lane.b32.xlu1 %v20112_v2, %s19084_s2 }
 0x411   : > { %1987 = vrot.lane.b32.xlu0 %v20116_v25, %s19084_s2 }
 0x414   : > { %2318 = vrot.lane.b32.xlu1 %v20052_v6, %s19085_s3 }
 0x415   : > { %2271 = vrot.lane.b32.xlu0 %v20056_v30, %s19085_s3 }
 0x418   : > { %2412 = vrot.lane.b32.xlu1 %v20072_v42, %s19085_s3 }
 0x41c   : > { %2365 = vrot.lane.b32.xlu1 %v20076_v43, %s19085_s3 }
 0x46a   : > { %v1738_v39 = vpop.permute.xlu1 %1737 }
 0x46b   : > { %v1687_v3 = vpop.permute.xlu0 %1686  ;;  %v1743_v44 = vsel %vm1688_vm3, %v1738_v39, 0 }
 0x46c   : > { %v1693_v4 = vsel %vm1688_vm3, %v1687_v3, 0 }
 0x46d   : > { %16454 = vmatpush3.bf16.xpose.msra.mxu1 %v1693_v4 }
 0x46e   : > { %16459 = vmatprep.subr.bf16.mxu1 %v24692_v20 }
 0x473   : > { %v1788_v60 = vpop.permute.xlu1 %1787 }
 0x474   : > { %16456 = vmatmul.mubr.msk.bf16.vlgmr.msra.gmra.mrb[8].mxu1 %vm1688_vm3, %v20056_v30  ;;  %v1793_v5 = vsel %vm1688_vm3, %v1788_v60, 0 }
 0x475   : > { %16460 = vmatpush3.bf16.xpose.msra.mxu1 %v1743_v44  ;;  %16461 = vmatprep.mubr.msk.bf16.mxu1 %vm19083_vm2, %v24692_v20 }
 0x476   : > { %16465 = vmatprep.subr.bf16.mxu1 %v24692_v20 }
 0x477   : > { %v1838_v9 = vpop.permute.xlu1 %1837 }
 0x478   : > { %v1843_v53 = vsel %vm1688_vm3, %v1838_v9, 0 }
 0x47b   : > { %v1888_v45 = vpop.permute.xlu0 %1887  ;;  %v1938_v10 = vpop.permute.xlu1 %1937 }
 0x47c   : > { %v1893_v8 = vsel %vm1688_vm3, %v1888_v45, 0  ;;  %16462 = vmatmul.mubr.msk.bf16.vlgmr.msra.gmra.mrb[12].mxu1 %vm1688_vm3, %v20052_v6  ;;  %v1943_v11 = vsel %vm1688_vm3, %v1938_v10, 0 }
 0x47d   : > { %16466 = vmatpush3.bf16.xpose.msra.mxu1 %v1793_v5  ;;  %16478 = vmatpush3.bf16.xpose.msra.mxu0 %v1893_v8 }
 0x47e   : > { %16467 = vmatprep.mubr.msk.bf16.mxu1 %vm19083_vm2, %v24692_v20  ;;  %16471 = vmatprep.subr.bf16.mxu1 %v24692_v20 }
 0x47f   : > { %16489 = vmatprep.subr.bf16.mxu0 %v24692_v20 }
 0x482   : > { %v2038_v13 = vpop.permute.xlu1 %2037 }
 0x483   : > { %v1988_v29 = vpop.permute.xlu0 %1987  ;;  %v2043_v14 = vsel %vm1688_vm3, %v2038_v13, 0 }
 0x484   : > { %v1993_v51 = vsel %vm1688_vm3, %v1988_v29, 0  ;;  %16468 = vmatmul.mubr.msk.bf16.vlgmr.msra.gmra.mrb[16].mxu1 %vm1688_vm3, %v20076_v43  ;;  %16480 = vmatmul.mubr.msk.bf16.vlgmr.msra.gmra.mrb[8].mxu0 %vm1688_vm3, %v20096_v17 }
 0x485   : > { %16472 = vmatpush3.bf16.xpose.msra.mxu1 %v1843_v53  ;;  %16490 = vmatpush3.bf16.xpose.msra.mxu0 %v1993_v51 }
 0x486   : > { %16473 = vmatprep.mubr.msk.bf16.mxu1 %vm19083_vm2, %v24692_v20  ;;  %16491 = vmatprep.mubr.msk.bf16.mxu0 %vm19083_vm2, %v24692_v20  ;;  %v2319_v37 = vpop.permute.xlu1 %2318 }
 0x487   : > { %16483 = vmatprep.subr.bf16.mxu1 %v24692_v20  ;;  %16501 = vmatprep.subr.bf16.mxu0 %v24692_v20  ;;  %v2272_v12 = vpop.permute.xlu0 %2271 }
 0x48c   : > { %16474 = vmatmul.mubr.msk.bf16.vlgmr.msra.gmra.mrb[20].mxu1 %vm1688_vm3, %v20072_v42  ;;  %16492 = vmatmul.mubr.msk.bf16.vlgmr.msra.gmra.mrb[12].mxu0 %vm1688_vm3, %v20116_v25 }
 0x48d   : > { %16484 = vmatpush3.bf16.xpose.msra.mxu1 %v1943_v11  ;;  %16502 = vmatpush3.bf16.msra.mxu0 %v2272_v12 }
 0x48e   : > { %16485 = vmatprep.mubr.msk.bf16.mxu1 %vm19083_vm2, %v24692_v20  ;;  %16495 = vmatprep.subr.bf16.mxu1 %v24692_v20 }
 0x48f   : > { %16503 = vmatprep.mubr.msk.bf16.mxu0 %vm19083_vm2, %v24692_v20  ;;  %16513 = vmatprep.subr.bf16.mxu0 %v24692_v20 }
 0x494   : > { %16486 = vmatmul.mubr.msk.bf16.vlgmr.msra.gmra.mrb[24].mxu1 %vm1688_vm3, %v20092_v56 }
 0x495   : > { %16496 = vmatpush3.bf16.xpose.msra.mxu1 %v2043_v14  ;;  %16497 = vmatprep.mubr.msk.bf16.mxu1 %vm19083_vm2, %v24692_v20 }
 0x496   : > { %16507 = vmatprep.subr.bf16.mxu1 %v24692_v20 }
 0x49c   : > { %16498 = vmatmul.mubr.msk.bf16.vlgmr.msra.gmra.mrb[28].mxu1 %vm1688_vm3, %v20112_v2 }
 0x49d   : > { %16508 = vmatpush3.bf16.msra.mxu1 %v2319_v37  ;;  %16509 = vmatprep.mubr.msk.bf16.mxu1 %vm19083_vm2, %v24692_v20 }
 0x49e   : > { %16519 = vmatprep.subr.bf16.mxu1 %v24692_v20 }
 0x547   : > { %v20180_v15 = vpop.f32.mrb[8].mxu1 }
 0x548   : > { %v16457_v41 = vpop.f32.mrb[9].mxu1  ;;  %v2087_v18 = vsel %vm2086_vm4, %v20180_v15, -inf }
 0x549   : > { %2088 = vmax.xlane.f32.xlu0 %v2087_v18  ;;  %v20184_v19 = vpop.f32.mrb[10].mxu1 }
 0x54a   : > { %v16458_v63 = vpop.f32.mrb[11].mxu1  ;;  %v2090_v61 = vsel %vm2086_vm4, %v20184_v19, -inf }
 0x54b   : > { %2091 = vmax.xlane.f32.xlu1 %v2090_v61 }
 0x54f   : > { %v20188_v21 = vpop.f32.mrb[12].mxu1 }
 0x550   : > { %v16463_v22 = vpop.f32.mrb[13].mxu1  ;;  %v2093_v40 = vsel %vm2086_vm4, %v20188_v21, -inf }
 0x551   : > { %v20190_v26 = vpop.f32.mrb[14].mxu1 }
 0x552   : > { %v16464_v31 = vpop.f32.mrb[15].mxu1  ;;  %v2096_v53 = vsel %vm2086_vm4, %v20190_v26, -inf }
 0x557   : > { %v20192_v32 = vpop.f32.mrb[16].mxu1  ;;  %v20194_v33 = vpop.f32.mrb[8].mxu0 }
 0x558   : > { %v16469_v38 = vpop.f32.mrb[17].mxu1  ;;  %v16481_v16 = vpop.f32.mrb[9].mxu0  ;;  %v2111_v46 = vsel %vm2086_vm4, %v20194_v33, -inf  ;;  %v2099_v12 = vsel %vm2086_vm4, %v20192_v32, -inf }
 0x559   : > { %v20198_v48 = vpop.f32.mrb[18].mxu1  ;;  %2112 = vmax.xlane.f32.xlu0 %v2111_v46  ;;  %v20200_v36 = vpop.f32.mrb[10].mxu0 }
 0x55a   : > { %v16470_v57 = vpop.f32.mrb[19].mxu1  ;;  %v16482_v27 = vpop.f32.mrb[11].mxu0  ;;  %v2114_v52 = vsel %vm2086_vm4, %v20200_v36, -inf  ;;  %v2102_v51 = vsel %vm2086_vm4, %v20198_v48, -inf }
 0x55b   : > { %2115 = vmax.xlane.f32.xlu1 %v2114_v52  ;;  %v20248_v57 = vpop.permute.xlu1 %2412 }
 0x55d   : > { %2094 = vmax.xlane.f32.xlu0 %v2093_v40 }
 0x55f   : > { %v20206_v3 = vpop.f32.mrb[20].mxu1  ;;  %v20208_v4 = vpop.f32.mrb[12].mxu0 }
 0x560   : > { %v16475_v39 = vpop.f32.mrb[21].mxu1  ;;  %v16493_v44 = vpop.f32.mrb[13].mxu0  ;;  %v2123_v60 = vsel %vm2086_vm4, %v20208_v4, -inf  ;;  %v2105_v41 = vsel %vm2086_vm4, %v20206_v3, -inf }
 0x561   : > { %v20212_v45 = vpop.f32.mrb[22].mxu1  ;;  %2124 = vmax.xlane.f32.xlu0 %v2123_v60  ;;  %v20214_v5 = vpop.f32.mrb[14].mxu0 }
 0x562   : > { %v16476_v8 = vpop.f32.mrb[23].mxu1  ;;  %v16494_v9 = vpop.f32.mrb[15].mxu0  ;;  %v2126_v29 = vsel %vm2086_vm4, %v20214_v5, -inf  ;;  %v2108_v37 = vsel %vm2086_vm4, %v20212_v45, -inf }
 0x563   : > { %2127 = vmax.xlane.f32.xlu1 %v2126_v29  ;;  %v20250_v27 = vpop.permute.xlu1 %2365 }
 0x565   : > { %2097 = vmax.xlane.f32.xlu0 %v2096_v53 }
 0x567   : > { %v20222_v10 = vpop.f32.mrb[24].mxu1  ;;  %2103 = vmax.xlane.f32.xlu1 %v2102_v51 }
 0x568   : > { %v16487_v11 = vpop.f32.mrb[25].mxu1  ;;  %v2117_v22 = vsel %vm2086_vm4, %v20222_v10, -inf }
 0x569   : > { %v20226_v13 = vpop.f32.mrb[26].mxu1  ;;  %2100 = vmax.xlane.f32.xlu0 %v2099_v12 }
 0x56a   : > { %v16488_v14 = vpop.f32.mrb[27].mxu1  ;;  %v2120_v18 = vsel %vm2086_vm4, %v20226_v13, -inf }
 0x56b   : > { %2109 = vmax.xlane.f32.xlu1 %v2108_v37 }
 0x56d   : > { %2106 = vmax.xlane.f32.xlu0 %v2105_v41 }
 0x56f   : > { %v20234_v63 = vpop.f32.mrb[28].mxu1  ;;  %2121 = vmax.xlane.f32.xlu1 %v2120_v18 }
 0x570   : > { %v16499_v61 = vpop.f32.mrb[29].mxu1  ;;  %v2129_v16 = vsel %vm2086_vm4, %v20234_v63, -inf }
 0x571   : > { %v20238_v31 = vpop.f32.mrb[30].mxu1  ;;  %2118 = vmax.xlane.f32.xlu0 %v2117_v22 }
 0x572   : > { %v16500_v38 = vpop.f32.mrb[31].mxu1  ;;  %v2132_v46 = vsel %vm2086_vm4, %v20238_v31, -inf }
 0x575   : > { %2130 = vmax.xlane.f32.xlu0 %v2129_v16 }
 0x580   : > { %2506 = vrot.lane.b32.xlu1 %v20092_v56, %s19085_s3 }
 0x58b   : > { %2459 = vrot.lane.b32.xlu0 %v20096_v17, %s19085_s3 }
 0x5a4   : > { %2133 = vmax.xlane.f32.xlu1 %v2132_v46 }
 0x5d6   : > { %v2089_v52 = vpop.xlane.xlu0 %2088 }
 0x5d7   : > { %v2135_v40 = vsub.f32 %v20180_v15, %v2089_v52 }
 0x5d8   : > { %v2092_v39 = vpop.xlane.xlu1 %2091 }
 0x5d9   : > { %v2151_v44 = vmul.f32 1.442695, %v2135_v40  ;;  %v2136_v60 = vsub.f32 %v20184_v19, %v2092_v39 }
 0x5db   : > { %17860 = vpow2.f32 %v2151_v44  ;;  %v2153_v8 = vmul.f32 1.442695, %v2136_v60 }
 0x5dd   : > { %17862 = vpow2.f32 %v2153_v8 }
 0x5e5   : > { %v20254_v9 = vpop.eup %17860 }
 0x5e6   : > { %v2113_v29 = vpop.xlane.xlu0 %2112  ;;  %v2183_v53 = vsel %vm2086_vm4, %v20254_v9, 0.0 }
 0x5e7   : > { %v20258_v51 = vpop.eup %17862  ;;  %v2143_v11 = vsub.f32 %v20194_v33, %v2113_v29  ;;  %2184 = vadd.xlane.f32.xlu0 %v2183_v53 }
 0x5e8   : > { %v2116_v12 = vpop.xlane.xlu1 %2115  ;;  %v2186_v15 = vsel %vm2086_vm4, %v20258_v51, 0.0 }
 0x5e9   : > { %v2167_v14 = vmul.f32 1.442695, %v2143_v11  ;;  %v2144_v19 = vsub.f32 %v20200_v36, %v2116_v12  ;;  %2187 = vadd.xlane.f32.xlu1 %v2186_v15 }
 0x5ea   : > { %v2095_v37 = vpop.xlane.xlu0 %2094 }
 0x5eb   : > { %17864 = vpow2.f32 %v2167_v14  ;;  %v2169_v41 = vmul.f32 1.442695, %v2144_v19  ;;  %v2137_v18 = vsub.f32 %v20188_v21, %v2095_v37 }
 0x5ed   : > { %17866 = vpow2.f32 %v2169_v41  ;;  %v2155_v61 = vmul.f32 1.442695, %v2137_v18 }
 0x5ee   : > { %v2125_v22 = vpop.xlane.xlu0 %2124 }
 0x5ef   : > { %17868 = vpow2.f32 %v2155_v61  ;;  %v2147_v33 = vsub.f32 %v20208_v4, %v2125_v22 }
 0x5f0   : > { %v2128_v38 = vpop.xlane.xlu1 %2127 }
 0x5f1   : > { %v2175_v16 = vmul.f32 1.442695, %v2147_v33  ;;  %v2148_v46 = vsub.f32 %v20214_v5, %v2128_v38 }
 0x5f2   : > { %v2098_v52 = vpop.xlane.xlu0 %2097 }
 0x5f3   : > { %17870 = vpow2.f32 %v2175_v16  ;;  %v2138_v36 = vsub.f32 %v20190_v26, %v2098_v52  ;;  %v2177_v44 = vmul.f32 1.442695, %v2148_v46 }
 0x5f4   : > { %v2104_v40 = vpop.xlane.xlu1 %2103 }
 0x5f5   : > { %v20268_v39 = vpop.eup %17864  ;;  %v2157_v60 = vmul.f32 1.442695, %v2138_v36  ;;  %v2140_v21 = vsub.f32 %v20198_v48, %v2104_v40 }
 0x5f6   : > { %v2101_v8 = vpop.xlane.xlu0 %2100  ;;  %v2207_v29 = vsel %vm2086_vm4, %v20268_v39, 0.0 }
 0x5f7   : > { %v20273_v4 = vpop.eup %17866  ;;  %17872 = vpow2.f32 %v2157_v60  ;;  %v2139_v5 = vsub.f32 %v20192_v32, %v2101_v8  ;;  %2208 = vadd.xlane.f32.xlu0 %v2207_v29  ;;  %v2161_v12 = vmul.f32 1.442695, %v2140_v21 }
 0x5f8   : > { %v2110_v53 = vpop.xlane.xlu1 %2109  ;;  %v2210_v26 = vsel %vm2086_vm4, %v20273_v4, 0.0  ;;  %17874 = vpow2.f32 %v2177_v44 }
 0x5f9   : > { %v20278_v11 = vpop.eup %17868  ;;  %v2159_v15 = vmul.f32 1.442695, %v2139_v5  ;;  %v2142_v48 = vsub.f32 %v20212_v45, %v2110_v53  ;;  %2211 = vadd.xlane.f32.xlu1 %v2210_v26 }
 0x5fa   : > { %v2107_v14 = vpop.xlane.xlu0 %2106  ;;  %v2189_v19 = vsel %vm2086_vm4, %v20278_v11, 0.0 }
 0x5fb   : > { %17876 = vpow2.f32 %v2159_v15  ;;  %v2141_v32 = vsub.f32 %v20206_v3, %v2107_v14  ;;  %2190 = vadd.xlane.f32.xlu0 %v2189_v19  ;;  %v2165_v41 = vmul.f32 1.442695, %v2142_v48 }
 0x5fc   : > { %17878 = vpow2.f32 %v2161_v12  ;;  %v2122_v53 = vpop.xlane.xlu1 %2121 }
 0x5fd   : > { %v20284_v37 = vpop.eup %17870  ;;  %v2163_v18 = vmul.f32 1.442695, %v2141_v32  ;;  %v2146_v12 = vsub.f32 %v20226_v13, %v2122_v53 }
 0x5fe   : > { %v2119_v61 = vpop.xlane.xlu0 %2118  ;;  %v2219_v22 = vsel %vm2086_vm4, %v20284_v37, 0.0 }
 0x5ff   : > { %17880 = vpow2.f32 %v2163_v18  ;;  %v2145_v45 = vsub.f32 %v20222_v10, %v2119_v61  ;;  %2220 = vadd.xlane.f32.xlu0 %v2219_v22  ;;  %v2173_v48 = vmul.f32 1.442695, %v2146_v12 }
 0x600   : > { %17882 = vpow2.f32 %v2165_v41  ;;  %v20335_v13 = vpop.permute.xlu1 %2506 }
 0x601   : > { %v20289_v33 = vpop.eup %17872  ;;  %v2171_v38 = vmul.f32 1.442695, %v2145_v45 }
 0x602   : > { %v2192_v3 = vsel %vm2086_vm4, %v20289_v33, 0.0  ;;  %v20293_v16 = vpop.eup %17874  ;;  %v2131_v26 = vpop.xlane.xlu0 %2130 }
 0x603   : > { %17884 = vpow2.f32 %v2171_v38  ;;  %2193 = vadd.xlane.f32.xlu1 %v2192_v3  ;;  %v2222_v52 = vsel %vm2086_vm4, %v20293_v16, 0.0  ;;  %v2149_v15 = vsub.f32 %v20234_v63, %v2131_v26 }
 0x604   : > { %17886 = vpow2.f32 %v2173_v48 }
 0x605   : > { %v20295_v46 = vpop.eup %17876  ;;  %v2179_v14 = vmul.f32 1.442695, %v2149_v15 }
 0x606   : > { %v2195_v10 = vsel %vm2086_vm4, %v20295_v46, 0.0  ;;  %v20301_v36 = vpop.eup %17878  ;;  %v20348_v45 = vpop.permute.xlu0 %2459 }
 0x607   : > { %2223 = vadd.xlane.f32.xlu1 %v2222_v52  ;;  %2196 = vadd.xlane.f32.xlu0 %v2195_v10  ;;  %v2198_v44 = vsel %vm2086_vm4, %v20301_v36, 0.0  ;;  %17888 = vpow2.f32 %v2179_v14 }
 0x609   : > { %v20303_v40 = vpop.eup %17880 }
 0x60a   : > { %v2201_v60 = vsel %vm2086_vm4, %v20303_v40, 0.0  ;;  %v20309_v21 = vpop.eup %17882 }
 0x60b   : > { %2199 = vadd.xlane.f32.xlu1 %v2198_v44  ;;  %2202 = vadd.xlane.f32.xlu0 %v2201_v60  ;;  %v2204_v29 = vsel %vm2086_vm4, %v20309_v21, 0.0 }
 0x60d   : > { %v20311_v8 = vpop.eup %17884 }
 0x60e   : > { %v2213_v5 = vsel %vm2086_vm4, %v20311_v8, 0.0  ;;  %v20323_v19 = vpop.eup %17886 }
 0x60f   : > { %2205 = vadd.xlane.f32.xlu1 %v2204_v29  ;;  %2214 = vadd.xlane.f32.xlu0 %v2213_v5  ;;  %v2216_v41 = vsel %vm2086_vm4, %v20323_v19, 0.0 }
 0x611   : > { %v20325_v32 = vpop.eup %17888 }
 0x612   : > { %v2225_v18 = vsel %vm2086_vm4, %v20325_v32, 0.0 }
 0x620   : > { %2600 = vrot.lane.b32.xlu1 %v20112_v2, %s19085_s3 }
 0x625   : > { %2553 = vrot.lane.b32.xlu0 %v20116_v25, %s19085_s3 }
 0x631   : > { %v2134_v63 = vpop.xlane.xlu1 %2133 }
 0x632   : > { %v2150_v61 = vsub.f32 %v20238_v31, %v2134_v63 }
 0x634   : > { %v2181_v22 = vmul.f32 1.442695, %v2150_v61 }
 0x636   : > { %17890 = vpow2.f32 %v2181_v22 }
 0x640   : > { %v20352_v3 = vpop.eup %17890 }
 0x641   : > { %v2228_v52 = vsel %vm2086_vm4, %v20352_v3, 0.0 }
 0x644   : > { %2217 = vadd.xlane.f32.xlu1 %v2216_v41  ;;  %2226 = vadd.xlane.f32.xlu0 %v2225_v18 }
 0x655   : > { %2700 = vrot.lane.b32.xlu1 %v20052_v6, %s19086_s6 }
 0x65a   : > { %2649 = vrot.lane.b32.xlu0 %v20056_v30, %s19086_s6 }
 0x65e   : > { %2647 = vrot.lane.b32.xlu0 %v20056_v30, %s19087_s27 }
 0x662   : > { %2698 = vrot.lane.b32.xlu0 %v20052_v6, %s19087_s27 }
 0x666   : > { %2749 = vrot.lane.b32.xlu0 %v20076_v43, %s19087_s27 }
 0x66a   : > { %2800 = vrot.lane.b32.xlu0 %v20072_v42, %s19087_s27 }
 0x66e   : > { %2851 = vrot.lane.b32.xlu0 %v20096_v17, %s19087_s27 }
 0x672   : > { %2902 = vrot.lane.b32.xlu0 %v20092_v56, %s19087_s27 }
 0x674   : > { %v2185_v38 = vpop.xlane.xlu0 %2184 }
 0x675   : > { %17892 = vrcp.f32 %v2185_v38 }
 0x676   : > { %v2188_v31 = vpop.xlane.xlu1 %2187  ;;  %2953 = vrot.lane.b32.xlu0 %v20116_v25, %s19087_s27 }
 0x677   : > { %17894 = vrcp.f32 %v2188_v31 }
 0x679   : > { %2229 = vadd.xlane.f32.xlu1 %v2228_v52 }
 0x67f   : > { %v17893_v10 = vpop.eup %17892 }
 0x680   : > { %v2247_v60 = vmul.f32 %v17893_v10, %v20254_v9 }
 0x681   : > { %v17895_v44 = vpop.eup %17894 }
 0x682   : > { %v2248_v29 = vmul.f32 %v17895_v44, %v20258_v51 }
 0x684   : > { %v2209_v5 = vpop.xlane.xlu0 %2208  ;;  %v2263_v53 = vpack.c.bf16 %v2248_v29, %v2247_v60 }
 0x686   : > { %16504 = vmatmul.mubr.msk.bf16.vlgmr.msra.gmra.mrb[16].mxu0 %vm2086_vm4, %v2263_v53  ;;  %v2212_v12 = vpop.xlane.xlu1 %2211 }
 0x687   : > { %16514 = vmatpush3.bf16.msra.mxu0 %v20250_v27  ;;  %16515 = vmatprep.mubr.msk.bf16.mxu0 %vm19083_vm2, %v24692_v20 }
 0x688   : > { %16525 = vmatprep.subr.bf16.mxu0 %v24692_v20  ;;  %v2191_v26 = vpop.xlane.xlu0 %2190 }
 0x689   : > { %17896 = vrcp.f32 %v2191_v26 }
 0x68a   : > { %2751 = vrot.lane.b32.xlu1 %v20076_v43, %s19086_s6 }
 0x68c   : > { %v2221_v9 = vpop.xlane.xlu0 %2220 }
 0x68e   : > { %2802 = vrot.lane.b32.xlu1 %v20072_v42, %s19086_s6 }
 0x690   : > { %v2194_v51 = vpop.xlane.xlu1 %2193 }
 0x691   : > { %17898 = vrcp.f32 %v2194_v51 }
 0x692   : > { %2853 = vrot.lane.b32.xlu1 %v20096_v17, %s19086_s6 }
 0x693   : > { %v17897_v41 = vpop.eup %17896 }
 0x694   : > { %v2224_v27 = vpop.xlane.xlu1 %2223  ;;  %v2197_v15 = vpop.xlane.xlu0 %2196  ;;  %v2249_v63 = vmul.f32 %v17897_v41, %v20278_v11 }
 0x695   : > { %17900 = vrcp.f32 %v2197_v15 }
 0x696   : > { %2904 = vrot.lane.b32.xlu1 %v20092_v56, %s19086_s6 }
 0x698   : > { %v2200_v48 = vpop.xlane.xlu1 %2199  ;;  %v2203_v14 = vpop.xlane.xlu0 %2202 }
 0x699   : > { %17902 = vrcp.f32 %v2200_v48 }
 0x69a   : > { %2955 = vrot.lane.b32.xlu1 %v20116_v25, %s19086_s6  ;;  %17904 = vrcp.f32 %v2203_v14 }
 0x69b   : > { %v17899_v18 = vpop.eup %17898  ;;  %17906 = vrcp.f32 %v2212_v12 }
 0x69c   : > { %v2250_v61 = vmul.f32 %v17899_v18, %v20289_v33  ;;  %v2206_v22 = vpop.xlane.xlu1 %2205 }
 0x69d   : > { %17908 = vrcp.f32 %v2206_v22 }
 0x69e   : > { %3006 = vrot.lane.b32.xlu1 %v20112_v2, %s19086_s6  ;;  %v2264_v38 = vpack.c.bf16 %v2250_v61, %v2249_v63  ;;  %17910 = vrcp.f32 %v2209_v5 }
 0x69f   : > { %v17901_v31 = vpop.eup %17900  ;;  %17912 = vrcp.f32 %v2224_v27 }
 0x6a0   : > { %16510 = vmatmul.mubr.msk.bf16.vlgmr.msra.gmra.mrb[32].mxu1 %vm2086_vm4, %v2264_v38  ;;  %v2251_v33 = vmul.f32 %v17901_v31, %v20295_v46  ;;  %17914 = vrcp.f32 %v2221_v9  ;;  %v2601_v51 = vpop.permute.xlu1 %2600 }
 0x6a1   : > { %16520 = vmatpush3.bf16.msra.mxu1 %v20248_v57  ;;  %16521 = vmatprep.mubr.msk.bf16.mxu1 %vm19083_vm2, %v24692_v20 }
 0x6a2   : > { %3004 = vrot.lane.b32.xlu1 %v20112_v2, %s19087_s27  ;;  %16531 = vmatprep.subr.bf16.mxu1 %v24692_v20 }
 0x6a3   : > { %v17903_v11 = vpop.eup %17902 }
 0x6a4   : > { %v2252_v52 = vmul.f32 %v17903_v11, %v20301_v36  ;;  %v17905_v10 = vpop.eup %17904  ;;  %v2215_v36 = vpop.xlane.xlu0 %2214 }
 0x6a5   : > { %v17907_v44 = vpop.eup %17906  ;;  %v2253_v57 = vmul.f32 %v17905_v10, %v20303_v40  ;;  %17916 = vrcp.f32 %v2215_v36 }
 0x6a6   : > { %v2265_v60 = vpack.c.bf16 %v2252_v52, %v2251_v33  ;;  %v2256_v46 = vmul.f32 %v17907_v44, %v20273_v4 }
 0x6a7   : > { %v17909_v29 = vpop.eup %17908 }
 0x6a8   : > { %v2254_v5 = vmul.f32 %v17909_v29, %v20309_v21  ;;  %16516 = vmatmul.mubr.msk.bf16.vlgmr.msra.gmra.mrb[20].mxu0 %vm2086_vm4, %v2265_v60  ;;  %v17911_v53 = vpop.eup %17910 }
 0x6a9   : > { %16526 = vmatpush3.bf16.msra.mxu0 %v20348_v45  ;;  %16527 = vmatprep.mubr.msk.bf16.mxu0 %vm19083_vm2, %v24692_v20  ;;  %v2255_v12 = vmul.f32 %v17911_v53, %v20268_v39  ;;  %v17913_v21 = vpop.eup %17912  ;;  %v2554_v45 = vpop.permute.xlu0 %2553 }
 0x6aa   : > { %v2266_v26 = vpack.c.bf16 %v2254_v5, %v2253_v57  ;;  %16537 = vmatprep.subr.bf16.mxu0 %v24692_v20  ;;  %v17915_v4 = vpop.eup %17914  ;;  %v2260_v39 = vmul.f32 %v17913_v21, %v20293_v16 }
 0x6ab   : > { %v2267_v40 = vpack.c.bf16 %v2256_v46, %v2255_v12 }
 0x6ac   : > { %16522 = vmatmul.mubr.msk.bf16.vlgmr.msra.gmra.mrb[36].mxu1 %vm2086_vm4, %v2266_v26 }
 0x6ad   : > { %16532 = vmatpush3.bf16.msra.mxu1 %v20335_v13  ;;  %16533 = vmatprep.mubr.msk.bf16.mxu1 %vm19083_vm2, %v24692_v20  ;;  %v2259_v13 = vmul.f32 %v17915_v4, %v20284_v37 }
 0x6ae   : > { %16543 = vmatprep.subr.bf16.mxu1 %v24692_v20 }
 0x6af   : > { %v2269_v9 = vpack.c.bf16 %v2260_v39, %v2259_v13  ;;  %v17917_v16 = vpop.eup %17916 }
 0x6b0   : > { %16528 = vmatmul.mubr.msk.bf16.vlgmr.msra.gmra.mrb[24].mxu0 %vm2086_vm4, %v2267_v40  ;;  %v2257_v37 = vmul.f32 %v17917_v16, %v20311_v8 }
 0x6b1   : > { %16538 = vmatpush3.bf16.msra.mxu0 %v2554_v45  ;;  %16539 = vmatprep.mubr.msk.bf16.mxu0 %vm19083_vm2, %v24692_v20 }
 0x6b2   : > { %16549 = vmatprep.subr.bf16.mxu0 %v24692_v20 }
 0x6b8   : > { %16540 = vmatmul.mubr.msk.bf16.vlgmr.msra.gmra.mrb[28].mxu0 %vm2086_vm4, %v2269_v9 }
 0x6b9   : > { %16551 = vmatprep.mubr.msk.bf16.mxu0 %vm19083_vm2, %v24692_v20 }
 0x6d1   : > { %v2218_v27 = vpop.xlane.xlu1 %2217  ;;  %v2227_v15 = vpop.xlane.xlu0 %2226 }
 0x6d2   : > { %17918 = vrcp.f32 %v2218_v27 }
 0x6d3   : > { %17920 = vrcp.f32 %v2227_v15 }
 0x6d5   : > { %v2650_v48 = vpop.permute.xlu0 %2649  ;;  %v2701_v22 = vpop.permute.xlu1 %2700 }
 0x6d6   : > { %v2655_v14 = vsel %vm1688_vm3, %v2650_v48, 0  ;;  %v2706_v46 = vsel %vm1688_vm3, %v2701_v22, 0 }
 0x6d7   : > { %16550 = vmatpush3.bf16.xpose.msra.mxu0 %v2655_v14 }
 0x6d8   : > { %16561 = vmatprep.subr.bf16.mxu0 %v24692_v20 }
 0x6d9   : > { %v2648_v63 = vpop.permute.xlu0 %2647 }
 0x6dc   : > { %v17919_v41 = vpop.eup %17918 }
 0x6dd   : > { %v2258_v18 = vmul.f32 %v17919_v41, %v20323_v19  ;;  %v2699_v38 = vpop.permute.xlu0 %2698  ;;  %v17921_v52 = vpop.eup %17920 }
 0x6de   : > { %16552 = vmatmul.mubr.msk.bf16.vlgmr.msra.gmra.mrb[32].mxu0 %vm1688_vm3, %v2648_v63  ;;  %v2261_v60 = vmul.f32 %v17921_v52, %v20325_v32 }
 0x6df   : > { %v2268_v61 = vpack.c.bf16 %v2258_v18, %v2257_v37  ;;  %16563 = vmatprep.mubr.msk.bf16.mxu0 %vm19083_vm2, %v24692_v20 }
 0x6e1   : > { %16534 = vmatmul.mubr.msk.bf16.vlgmr.msra.gmra.mrb[40].mxu1 %vm2086_vm4, %v2268_v61  ;;  %v2750_v19 = vpop.permute.xlu0 %2749 }
 0x6e2   : > { %16544 = vmatpush3.bf16.msra.mxu1 %v2601_v51  ;;  %16545 = vmatprep.mubr.msk.bf16.mxu1 %vm19083_vm2, %v24692_v20 }
 0x6e3   : > { %16555 = vmatprep.subr.bf16.mxu1 %v24692_v20 }
 0x6e5   : > { %v2801_v10 = vpop.permute.xlu0 %2800 }
 0x6e9   : > { %v2852_v36 = vpop.permute.xlu0 %2851 }
 0x6ed   : > { %v2903_v12 = vpop.permute.xlu0 %2902 }
 0x6f1   : > { %v2954_v21 = vpop.permute.xlu0 %2953 }
 0x706   : > { %v2230_v8 = vpop.xlane.xlu1 %2229 }
 0x707   : > { %17922 = vrcp.f32 %v2230_v8 }
 0x70a   : > { %v2752_v31 = vpop.permute.xlu1 %2751 }
 0x70b   : > { %v2757_v11 = vsel %vm1688_vm3, %v2752_v31, 0 }
 0x70c   : > { %16562 = vmatpush3.bf16.xpose.msra.mxu0 %v2757_v11 }
 0x70d   : > { %16573 = vmatprep.subr.bf16.mxu0 %v24692_v20 }
 0x70e   : > { %v2803_v33 = vpop.permute.xlu1 %2802 }
 0x70f   : > { %v2808_v40 = vsel %vm1688_vm3, %v2803_v33, 0 }
 0x711   : > { %v17923_v44 = vpop.eup %17922 }
 0x712   : > { %v2262_v29 = vmul.f32 %v17923_v44, %v20352_v3  ;;  %v2854_v57 = vpop.permute.xlu1 %2853 }
 0x713   : > { %v2859_v5 = vsel %vm1688_vm3, %v2854_v57, 0  ;;  %16564 = vmatmul.mubr.msk.bf16.vlgmr.msra.gmra.mrb[36].mxu0 %vm1688_vm3, %v2750_v19 }
 0x714   : > { %16574 = vmatpush3.bf16.xpose.msra.mxu0 %v2859_v5  ;;  %v2270_v53 = vpack.c.bf16 %v2262_v29, %v2261_v60  ;;  %16575 = vmatprep.mubr.msk.bf16.mxu0 %vm19083_vm2, %v24692_v20 }
 0x715   : > { %16585 = vmatprep.subr.bf16.mxu0 %v24692_v20 }
 0x716   : > { %v2905_v26 = vpop.permute.xlu1 %2904  ;;  %16546 = vmatmul.mubr.msk.bf16.vlgmr.msra.gmra.mrb[44].mxu1 %vm2086_vm4, %v2270_v53 }
 0x717   : > { %16556 = vmatpush3.bf16.xpose.msra.mxu1 %v2706_v46  ;;  %16557 = vmatprep.mubr.msk.bf16.mxu1 %vm19083_vm2, %v24692_v20  ;;  %v2910_v45 = vsel %vm1688_vm3, %v2905_v26, 0 }
 0x718   : > { %16567 = vmatprep.subr.bf16.mxu1 %v24692_v20 }
 0x71a   : > { %v2956_v32 = vpop.permute.xlu1 %2955 }
 0x71b   : > { %v2961_v3 = vsel %vm1688_vm3, %v2956_v32, 0  ;;  %16576 = vmatmul.mubr.msk.bf16.vlgmr.msra.gmra.mrb[40].mxu0 %vm1688_vm3, %v2852_v36 }
 0x71c   : > { %16586 = vmatpush3.bf16.xpose.msra.mxu0 %v2961_v3  ;;  %16587 = vmatprep.mubr.msk.bf16.mxu0 %vm19083_vm2, %v24692_v20 }
 0x71d   : > { %16597 = vmatprep.subr.bf16.mxu0 %v24692_v20 }
 0x71e   : > { %16558 = vmatmul.mubr.msk.bf16.vlgmr.msra.gmra.mrb[48].mxu1 %vm1688_vm3, %v2699_v38  ;;  %v3007_v4 = vpop.permute.xlu1 %3006 }
 0x71f   : > { %16568 = vmatpush3.bf16.xpose.msra.mxu1 %v2808_v40  ;;  %16569 = vmatprep.mubr.msk.bf16.mxu1 %vm19083_vm2, %v24692_v20  ;;  %v3012_v39 = vsel %vm1688_vm3, %v3007_v4, 0 }
 0x720   : > { %16579 = vmatprep.subr.bf16.mxu1 %v24692_v20 }
 0x722   : > { %v3005_v13 = vpop.permute.xlu1 %3004 }
 0x723   : > { %16588 = vmatmul.mubr.msk.bf16.vlgmr.msra.gmra.mrb[44].mxu0 %vm1688_vm3, %v2954_v21 }
 0x724   : > { %16599 = vmatprep.mubr.msk.bf16.mxu0 %vm19083_vm2, %v24692_v20 }
 0x726   : > { %16570 = vmatmul.mubr.msk.bf16.vlgmr.msra.gmra.mrb[52].mxu1 %vm1688_vm3, %v2801_v10 }
 0x727   : > { %16580 = vmatpush3.bf16.xpose.msra.mxu1 %v2910_v45  ;;  %16581 = vmatprep.mubr.msk.bf16.mxu1 %vm19083_vm2, %v24692_v20 }
 0x728   : > { %16591 = vmatprep.subr.bf16.mxu1 %v24692_v20 }
 0x72e   : > { %16582 = vmatmul.mubr.msk.bf16.vlgmr.msra.gmra.mrb[56].mxu1 %vm1688_vm3, %v2903_v12 }
 0x72f   : > { %16592 = vmatpush3.bf16.xpose.msra.mxu1 %v3012_v39  ;;  %16593 = vmatprep.mubr.msk.bf16.mxu1 %vm19083_vm2, %v24692_v20 }
 0x730   : > { %16603 = vmatprep.subr.bf16.mxu1 %v24692_v20 }
 0x736   : > { %16594 = vmatmul.mubr.msk.bf16.vlgmr.msra.gmra.mrb[60].mxu1 %vm1688_vm3, %v3005_v13 }
 0x737   : > { %16605 = vmatprep.mubr.msk.bf16.mxu1 %vm19083_vm2, %v24692_v20 }
 0x759   : > { %v20462_v9 = vpop.f32.mrb[16].mxu0 }
 0x75a   : > { %24784 = vst [vmem:[#allocation46_spill] sm:$0xff] %v20462_v9  ;;  %v16505_v51 = vpop.f32.mrb[17].mxu0 }
 0x75b   : > { %v20464_v27 = vpop.f32.mrb[18].mxu0 }
 0x75c   : > { %24785 = vst [vmem:[#allocation47_spill] sm:$0xff] %v20464_v27  ;;  %v16506_v15 = vpop.f32.mrb[19].mxu0 }
 0x773   : > { %v20466_v48 = vpop.f32.mrb[32].mxu1 }
 0x774   : > { %24786 = vst [vmem:[#allocation48_spill] sm:$0xff] %v20466_v48  ;;  %v16511_v14 = vpop.f32.mrb[33].mxu1 }
 0x775   : > { %v20468_v16 = vpop.f32.mrb[34].mxu1 }
 0x776   : > { %24787 = vst [vmem:[#allocation49_spill] sm:$0xff] %v20468_v16  ;;  %v16512_v41 = vpop.f32.mrb[35].mxu1 }
 0x77b   : > { %v20470_v37 = vpop.f32.mrb[20].mxu0 }
 0x77c   : > { %24788 = vst [vmem:[#allocation50_spill] sm:$0xff] %v20470_v37  ;;  %v16517_v18 = vpop.f32.mrb[21].mxu0 }
 0x77d   : > { %v20472_v63 = vpop.f32.mrb[22].mxu0 }
 0x77e   : > { %24789 = vst [vmem:[#allocation51_spill] sm:$0xff] %v20472_v63  ;;  %v16518_v61 = vpop.f32.mrb[23].mxu0 }
 0x77f   : > { %v20474_v22 = vpop.f32.mrb[36].mxu1 }
 0x780   : > { %24790 = vst [vmem:[#allocation52_spill] sm:$0xff] %v20474_v22  ;;  %v16523_v38 = vpop.f32.mrb[37].mxu1 }
 0x781   : > { %v20476_v8 = vpop.f32.mrb[38].mxu1 }
 0x782   : > { %24791 = vst [vmem:[#allocation53_spill] sm:$0xff] %v20476_v8  ;;  %v16524_v19 = vpop.f32.mrb[39].mxu1 }
 0x783   : > { %v20478_v31 = vpop.f32.mrb[24].mxu0 }
 0x784   : > { %24792 = vst [vmem:[#allocation54_spill] sm:$0xff] %v20478_v31  ;;  %v16529_v11 = vpop.f32.mrb[25].mxu0 }
 0x785   : > { %v20480_v33 = vpop.f32.mrb[26].mxu0 }
 0x786   : > { %24793 = vst [vmem:[#allocation55_spill] sm:$0xff] %v20480_v33  ;;  %v16530_v52 = vpop.f32.mrb[27].mxu0 }
 0x78b   : > { %v20482_v10 = vpop.f32.mrb[28].mxu0 }
 0x78c   : > { %24794 = vst [vmem:[#allocation56_spill] sm:$0xff] %v20482_v10  ;;  %v16541_v44 = vpop.f32.mrb[29].mxu0 }
 0x78d   : > { %v20484_v60 = vpop.f32.mrb[30].mxu0 }
 0x78e   : > { %24795 = vst [vmem:[#allocation57_spill] sm:$0xff] %v20484_v60  ;;  %v16542_v29 = vpop.f32.mrb[31].mxu0 }
 0x7b1   : > { %v20486_v57 = vpop.f32.mrb[32].mxu0 }
 0x7b2   : > { %v16553_v5 = vpop.f32.mrb[33].mxu0  ;;  %v3055_v53 = vsel %vm2086_vm4, %v20486_v57, -inf }
 0x7b3   : > { %3056 = vmax.xlane.f32.xlu0 %v3055_v53  ;;  %v20490_v46 = vpop.f32.mrb[34].mxu0 }
 0x7b4   : > { %v20492_v36 = vpop.f32.mrb[40].mxu1  ;;  %v16554_v26 = vpop.f32.mrb[35].mxu0  ;;  %v3058_v32 = vsel %vm2086_vm4, %v20490_v46, -inf }
 0x7b5   : > { %24796 = vst [vmem:[#allocation58_spill] sm:$0xff] %v20492_v36  ;;  %v16535_v3 = vpop.f32.mrb[41].mxu1  ;;  %3059 = vmax.xlane.f32.xlu1 %v3058_v32 }
 0x7b6   : > { %v20496_v12 = vpop.f32.mrb[42].mxu1 }
 0x7b7   : > { %24797 = vst [vmem:[#allocation59_spill] sm:$0xff] %v20496_v12  ;;  %v16536_v40 = vpop.f32.mrb[43].mxu1 }
 0x7c6   : > { %3286 = vrot.lane.b32.xlu1 %v20052_v6, %s19088_s25 }
 0x7ca   : > { %3333 = vrot.lane.b32.xlu1 %v20076_v43, %s19088_s25 }
 0x7ce   : > { %3380 = vrot.lane.b32.xlu1 %v20072_v42, %s19088_s25 }
 0x7e6   : > { %v20504_v21 = vpop.f32.mrb[36].mxu0 }
 0x7e7   : > { %v16565_v45 = vpop.f32.mrb[37].mxu0  ;;  %v3067_v26 = vsel %vm2086_vm4, %v20504_v21, -inf }
 0x7e8   : > { %v20506_v4 = vpop.f32.mrb[38].mxu0 }
 0x7e9   : > { %v20508_v39 = vpop.f32.mrb[44].mxu1  ;;  %v16566_v13 = vpop.f32.mrb[39].mxu0  ;;  %v3070_v11 = vsel %vm2086_vm4, %v20506_v4, -inf }
 0x7ea   : > { %24798 = vst [vmem:[#allocation60_spill] sm:$0xff] %v20508_v39  ;;  %v16547_v51 = vpop.f32.mrb[45].mxu1 }
 0x7eb   : > { %v20510_v15 = vpop.f32.mrb[46].mxu1 }
 0x7ec   : > { %24799 = vst [vmem:[#allocation61_spill] sm:$0xff] %v20510_v15  ;;  %v16548_v14 = vpop.f32.mrb[47].mxu1 }
 0x7ee   : > { %v20512_v41 = vpop.f32.mrb[40].mxu0 }
 0x7ef   : > { %v16577_v18 = vpop.f32.mrb[41].mxu0 }
 0x7f0   : > { %v20514_v61 = vpop.f32.mrb[42].mxu0 }
 0x7f1   : > { %v20516_v38 = vpop.f32.mrb[48].mxu1  ;;  %v16578_v19 = vpop.f32.mrb[43].mxu0 }
 0x7f2   : > { %v16559_v52 = vpop.f32.mrb[49].mxu1  ;;  %3071 = vmax.xlane.f32.xlu1 %v3070_v11  ;;  %v3061_v44 = vsel %vm2086_vm4, %v20516_v38, -inf  ;;  %v3082_v11 = vsel %vm2086_vm4, %v20514_v61, -inf }
 0x7f3   : > { %3062 = vmax.xlane.f32.xlu0 %v3061_v44  ;;  %v20522_v29 = vpop.f32.mrb[50].mxu1 }
 0x7f4   : > { %v16560_v5 = vpop.f32.mrb[51].mxu1  ;;  %v3064_v51 = vsel %vm2086_vm4, %v20522_v29, -inf }
 0x7f6   : > { %v20524_v53 = vpop.f32.mrb[44].mxu0 }
 0x7f7   : > { %3068 = vmax.xlane.f32.xlu0 %v3067_v26  ;;  %v16589_v32 = vpop.f32.mrb[45].mxu0 }
 0x7f8   : > { %v20528_v3 = vpop.f32.mrb[46].mxu0 }
 0x7f9   : > { %v20530_v40 = vpop.f32.mrb[52].mxu1  ;;  %v16590_v45 = vpop.f32.mrb[47].mxu0 }
 0x7fa   : > { %v16571_v13 = vpop.f32.mrb[53].mxu1  ;;  %v3094_v45 = vsel %vm2086_vm4, %v20528_v3, -inf }
 0x7fb   : > { %3065 = vmax.xlane.f32.xlu0 %v3064_v51  ;;  %v20534_v14 = vpop.f32.mrb[54].mxu1 }
 0x7fc   : > { %v16572_v18 = vpop.f32.mrb[55].mxu1  ;;  %v3076_v19 = vsel %vm2086_vm4, %v20534_v14, -inf }
 0x7fd   : > { %3077 = vmax.xlane.f32.xlu1 %v3076_v19 }
 0x801   : > { %3083 = vmax.xlane.f32.xlu1 %v3082_v11  ;;  %v20540_v52 = vpop.f32.mrb[56].mxu1  ;;  %v3073_v11 = vsel %vm2086_vm4, %v20530_v40, -inf }
 0x802   : > { %v16583_v44 = vpop.f32.mrb[57].mxu1 }
 0x803   : > { %v20542_v5 = vpop.f32.mrb[58].mxu1  ;;  %v3079_v44 = vsel %vm2086_vm4, %v20512_v41, -inf }
 0x804   : > { %v16584_v26 = vpop.f32.mrb[59].mxu1  ;;  %v3088_v32 = vsel %vm2086_vm4, %v20542_v5, -inf }
 0x805   : > { %3089 = vmax.xlane.f32.xlu1 %v3088_v32  ;;  %v3085_v26 = vsel %vm2086_vm4, %v20540_v52, -inf  ;;  %v3091_v32 = vsel %vm2086_vm4, %v20524_v53, -inf }
 0x809   : > { %v20548_v13 = vpop.f32.mrb[60].mxu1  ;;  %3095 = vmax.xlane.f32.xlu1 %v3094_v45 }
 0x80a   : > { %v16595_v51 = vpop.f32.mrb[61].mxu1 }
 0x80b   : > { %v20550_v18 = vpop.f32.mrb[62].mxu1  ;;  %v3097_v51 = vsel %vm2086_vm4, %v20548_v13, -inf }
 0x80c   : > { %v16596_v19 = vpop.f32.mrb[63].mxu1  ;;  %v3100_v45 = vsel %vm2086_vm4, %v20550_v18, -inf }
 0x811   : > { %3239 = vrot.lane.b32.xlu0 %v20056_v30, %s19088_s25 }
 0x81a   : > { %3474 = vrot.lane.b32.xlu1 %v20092_v56, %s19088_s25 }
 0x830   : > { %3074 = vmax.xlane.f32.xlu0 %v3073_v11 }
 0x834   : > { %3080 = vmax.xlane.f32.xlu0 %v3079_v44 }
 0x838   : > { %3086 = vmax.xlane.f32.xlu0 %v3085_v26 }
 0x83c   : > { %3092 = vmax.xlane.f32.xlu0 %v3091_v32 }
 0x83e   : > { %3101 = vmax.xlane.f32.xlu1 %v3100_v45 }
 0x840   : > { %3098 = vmax.xlane.f32.xlu0 %v3097_v51  ;;  %v3057_v26 = vpop.xlane.xlu0 %3056 }
 0x841   : > { %v3103_v45 = vsub.f32 %v20486_v57, %v3057_v26 }
 0x842   : > { %v3060_v19 = vpop.xlane.xlu1 %3059 }
 0x843   : > { %v3104_v44 = vsub.f32 %v20490_v46, %v3060_v19  ;;  %v3119_v51 = vmul.f32 1.442695, %v3103_v45 }
 0x845   : > { %v3121_v32 = vmul.f32 1.442695, %v3104_v44 }
 0x846   : > { %v3287_v11 = vpop.permute.xlu1 %3286 }
 0x847   : > { %16604 = vmatpush3.bf16.msra.mxu1 %v3287_v11  ;;  %17924 = vpow2.f32 %v3121_v32 }
 0x848   : > { %16615 = vmatprep.subr.bf16.mxu1 %v24692_v20  ;;  %17926 = vpow2.f32 %v3119_v51 }
 0x84a   : > { %v20585_v46 = vpop.permute.xlu1 %3333 }
 0x84e   : > { %v20587_v19 = vpop.permute.xlu1 %3380 }
 0x84f   : > { %3568 = vrot.lane.b32.xlu1 %v20112_v2, %s19088_s25 }
 0x851   : > { %v20577_v11 = vpop.eup %17924 }
 0x852   : > { %v3154_v20 = vsel %vm2086_vm4, %v20577_v11, 0.0  ;;  %v20581_v15 = vpop.eup %17926 }
 0x853   : > { %v3151_v39 = vsel %vm2086_vm4, %v20581_v15, 0.0 }
 0x856   : > { %3427 = vrot.lane.b32.xlu0 %v20096_v17, %s19088_s25 }
 0x85a   : > { %3521 = vrot.lane.b32.xlu0 %v20116_v25, %s19088_s25 }
 0x873   : > { %3155 = vadd.xlane.f32.xlu1 %v3154_v20 }
 0x879   : > { %3152 = vadd.xlane.f32.xlu0 %v3151_v39 }
 0x87f   : > { %v3072_v32 = vpop.xlane.xlu1 %3071 }
 0x880   : > { %v3063_v57 = vpop.xlane.xlu0 %3062  ;;  %v3108_v20 = vsub.f32 %v20506_v4, %v3072_v32 }
 0x881   : > { %v3105_v44 = vsub.f32 %v20516_v38, %v3063_v57  ;;  %v24800_v57 = vmov 0.0  }
 0x882   : > { %v3129_v36 = vmul.f32 1.442695, %v3108_v20 }
 0x883   : > { %v3123_v26 = vmul.f32 1.442695, %v3105_v44 }
 0x884   : > { %v3069_v45 = vpop.xlane.xlu0 %3068 }
 0x885   : > { %17928 = vpow2.f32 %v3123_v26  ;;  %v3107_v51 = vsub.f32 %v20504_v21, %v3069_v45 }
 0x887   : > { %v3127_v60 = vmul.f32 1.442695, %v3107_v51 }
 0x888   : > { %v3066_v10 = vpop.xlane.xlu0 %3065 }
 0x889   : > { %17930 = vpow2.f32 %v3127_v60  ;;  %v3106_v39 = vsub.f32 %v20522_v29, %v3066_v10 }
 0x88a   : > { %v3078_v12 = vpop.xlane.xlu1 %3077 }
 0x88b   : > { %v3125_v33 = vmul.f32 1.442695, %v3106_v39  ;;  %v3110_v31 = vsub.f32 %v20534_v14, %v3078_v12 }
 0x88c   : > { %v3240_v8 = vpop.permute.xlu0 %3239 }
 0x88d   : > { %17932 = vpow2.f32 %v3125_v33  ;;  %16598 = vmatpush3.bf16.msra.mxu0 %v3240_v8  ;;  %v3133_v21 = vmul.f32 1.442695, %v3110_v31 }
 0x88e   : > { %v3084_v38 = vpop.xlane.xlu1 %3083  ;;  %16609 = vmatprep.subr.bf16.mxu0 %v24800_v57  ;;  %17934 = vpow2.f32 %v3129_v36 }
 0x88f   : > { %v20595_v44 = vpop.eup %17928  ;;  %v3112_v4 = vsub.f32 %v20514_v61, %v3084_v38  ;;  %17936 = vpow2.f32 %v3133_v21 }
 0x890   : > { %v3157_v10 = vsel %vm2086_vm4, %v20595_v44, 0.0 }
 0x891   : > { %3158 = vadd.xlane.f32.xlu0 %v3157_v10  ;;  %v3137_v12 = vmul.f32 1.442695, %v3112_v4 }
 0x892   : > { %v3090_v60 = vpop.xlane.xlu1 %3089 }
 0x893   : > { %v20600_v29 = vpop.eup %17930  ;;  %v3114_v8 = vsub.f32 %v20542_v5, %v3090_v60  ;;  %17938 = vpow2.f32 %v3137_v12 }
 0x894   : > { %v3163_v33 = vsel %vm2086_vm4, %v20600_v29, 0.0 }
 0x895   : > { %3164 = vadd.xlane.f32.xlu0 %v3163_v33  ;;  %v3141_v31 = vmul.f32 1.442695, %v3114_v8 }
 0x896   : > { %v3096_v14 = vpop.xlane.xlu1 %3095 }
 0x897   : > { %v20605_v36 = vpop.eup %17932  ;;  %v3116_v61 = vsub.f32 %v20528_v3, %v3096_v14  ;;  %17940 = vpow2.f32 %v3141_v31 }
 0x898   : > { %v3160_v26 = vsel %vm2086_vm4, %v20605_v36, 0.0  ;;  %v20610_v32 = vpop.eup %17934 }
 0x899   : > { %3161 = vadd.xlane.f32.xlu1 %v3160_v26  ;;  %v3145_v45 = vmul.f32 1.442695, %v3116_v61  ;;  %v3166_v5 = vsel %vm2086_vm4, %v20610_v32, 0.0  ;;  %v20614_v51 = vpop.eup %17936 }
 0x89a   : > { %v3172_v20 = vsel %vm2086_vm4, %v20614_v51, 0.0 }
 0x89b   : > { %17942 = vpow2.f32 %v3145_v45  ;;  %v20635_v45 = vpop.permute.xlu1 %3474 }
 0x89d   : > { %3167 = vadd.xlane.f32.xlu1 %v3166_v5  ;;  %v20618_v39 = vpop.eup %17938 }
 0x89e   : > { %v3178_v3 = vsel %vm2086_vm4, %v20618_v39, 0.0 }
 0x8a1   : > { %3173 = vadd.xlane.f32.xlu1 %v3172_v20  ;;  %v20622_v38 = vpop.eup %17940 }
 0x8a2   : > { %v3184_v21 = vsel %vm2086_vm4, %v20622_v38, 0.0 }
 0x8a5   : > { %3179 = vadd.xlane.f32.xlu1 %v3178_v3  ;;  %v20626_v4 = vpop.eup %17942 }
 0x8a6   : > { %v3190_v10 = vsel %vm2086_vm4, %v20626_v4, 0.0 }
 0x8a9   : > { %3185 = vadd.xlane.f32.xlu1 %v3184_v21 }
 0x8ad   : > { %3191 = vadd.xlane.f32.xlu1 %v3190_v10 }
 0x8bd   : > { %v3075_v60 = vpop.xlane.xlu0 %3074 }
 0x8be   : > { %v3109_v12 = vsub.f32 %v20530_v40, %v3075_v60  ;;  %3668 = vrot.lane.b32.xlu1 %v20052_v6, %s19089_s20 }
 0x8c0   : > { %v3131_v8 = vmul.f32 1.442695, %v3109_v12 }
 0x8c1   : > { %v3081_v33 = vpop.xlane.xlu0 %3080 }
 0x8c2   : > { %17944 = vpow2.f32 %v3131_v8  ;;  %v3111_v14 = vsub.f32 %v20512_v41, %v3081_v33 }
 0x8c4   : > { %v3135_v31 = vmul.f32 1.442695, %v3111_v14 }
 0x8c5   : > { %v3087_v61 = vpop.xlane.xlu0 %3086 }
 0x8c6   : > { %17946 = vpow2.f32 %v3135_v31  ;;  %v3113_v26 = vsub.f32 %v20540_v52, %v3087_v61 }
 0x8c8   : > { %v3139_v5 = vmul.f32 1.442695, %v3113_v26 }
 0x8c9   : > { %v3093_v20 = vpop.xlane.xlu0 %3092 }
 0x8ca   : > { %17948 = vpow2.f32 %v3139_v5  ;;  %v3115_v40 = vsub.f32 %v20524_v53, %v3093_v20 }
 0x8cb   : > { %v3102_v3 = vpop.xlane.xlu1 %3101 }
 0x8cc   : > { %v20638_v21 = vpop.eup %17944  ;;  %v3143_v10 = vmul.f32 1.442695, %v3115_v40  ;;  %v3118_v60 = vsub.f32 %v20550_v18, %v3102_v3 }
 0x8cd   : > { %v3099_v12 = vpop.xlane.xlu0 %3098  ;;  %v3169_v41 = vsel %vm2086_vm4, %v20638_v21, 0.0 }
 0x8ce   : > { %17950 = vpow2.f32 %v3143_v10  ;;  %v3117_v52 = vsub.f32 %v20548_v13, %v3099_v12  ;;  %3170 = vadd.xlane.f32.xlu0 %v3169_v41  ;;  %v3149_v33 = vmul.f32 1.442695, %v3118_v60 }
 0x8cf   : > { %v20676_v10 = vpop.permute.xlu1 %3568 }
 0x8d0   : > { %v20644_v8 = vpop.eup %17946  ;;  %v3147_v14 = vmul.f32 1.442695, %v3117_v52 }
 0x8d1   : > { %v3175_v53 = vsel %vm2086_vm4, %v20644_v8, 0.0  ;;  %v3428_v3 = vpop.permute.xlu0 %3427 }
 0x8d2   : > { %17952 = vpow2.f32 %v3147_v14  ;;  %3176 = vadd.xlane.f32.xlu0 %v3175_v53 }
 0x8d3   : > { %17954 = vpow2.f32 %v3149_v33 }
 0x8d4   : > { %v20648_v31 = vpop.eup %17948 }
 0x8d5   : > { %v3181_v18 = vsel %vm2086_vm4, %v20648_v31, 0.0  ;;  %v20682_v60 = vpop.permute.xlu0 %3521 }
 0x8d6   : > { %3182 = vadd.xlane.f32.xlu0 %v3181_v18 }
 0x8d8   : > { %v20652_v61 = vpop.eup %17950 }
 0x8d9   : > { %v3187_v13 = vsel %vm2086_vm4, %v20652_v61, 0.0 }
 0x8da   : > { %3188 = vadd.xlane.f32.xlu0 %v3187_v13 }
 0x8dc   : > { %v20656_v26 = vpop.eup %17952 }
 0x8dd   : > { %v3193_v5 = vsel %vm2086_vm4, %v20656_v26, 0.0  ;;  %v20660_v20 = vpop.eup %17954 }
 0x8de   : > { %3194 = vadd.xlane.f32.xlu0 %v3193_v5  ;;  %v3196_v40 = vsel %vm2086_vm4, %v20660_v20, 0.0 }
 0x8e2   : > { %3197 = vadd.xlane.f32.xlu1 %v3196_v40 }
 0x8f3   : > { %3719 = vrot.lane.b32.xlu1 %v20076_v43, %s19089_s20 }
 0x8f4   : > { %3617 = vrot.lane.b32.xlu0 %v20056_v30, %s19089_s20 }
 0x8f7   : > { %3770 = vrot.lane.b32.xlu1 %v20072_v42, %s19089_s20 }
 0x8f8   : > { %3615 = vrot.lane.b32.xlu0 %v20056_v30, %s19090_s28 }
 0x8fb   : > { %3821 = vrot.lane.b32.xlu1 %v20096_v17, %s19089_s20 }
 0x8fc   : > { %3666 = vrot.lane.b32.xlu0 %v20052_v6, %s19090_s28 }
 0x8ff   : > { %3872 = vrot.lane.b32.xlu1 %v20092_v56, %s19089_s20 }
 0x900   : > { %3717 = vrot.lane.b32.xlu0 %v20076_v43, %s19090_s28  ;;  %v3156_v12 = vpop.xlane.xlu1 %3155 }
 0x901   : > { %17956 = vrcp.f32 %v3156_v12 }
 0x903   : > { %3923 = vrot.lane.b32.xlu1 %v20116_v25, %s19089_s20 }
 0x904   : > { %3768 = vrot.lane.b32.xlu0 %v20072_v42, %s19090_s28 }
 0x906   : > { %v3153_v41 = vpop.xlane.xlu0 %3152 }
 0x907   : > { %17958 = vrcp.f32 %v3153_v41  ;;  %3974 = vrot.lane.b32.xlu1 %v20112_v2, %s19089_s20 }
 0x908   : > { %3819 = vrot.lane.b32.xlu0 %v20096_v17, %s19090_s28 }
 0x90b   : > { %3972 = vrot.lane.b32.xlu1 %v20112_v2, %s19090_s28  ;;  %v17957_v52 = vpop.eup %17956 }
 0x90c   : > { %3870 = vrot.lane.b32.xlu0 %v20092_v56, %s19090_s28  ;;  %v3216_v14 = vmul.f32 %v17957_v52, %v20577_v11 }
 0x910   : > { %3921 = vrot.lane.b32.xlu0 %v20116_v25, %s19090_s28 }
 0x911   : > { %v17959_v33 = vpop.eup %17958 }
 0x912   : > { %v3215_v53 = vmul.f32 %v17959_v33, %v20581_v15 }
 0x914   : > { %v3231_v18 = vpack.c.bf16 %v3216_v14, %v3215_v53 }
 0x916   : > { %16600 = vmatmul.mubr.msk.bf16.vlgmr.msra.gmra.mrb[48].mxu0 %vm2086_vm4, %v3231_v18 }
 0x917   : > { %16610 = vmatpush3.bf16.msra.mxu0 %v20585_v46  ;;  %16611 = vmatprep.mubr.msk.bf16.mxu0 %vm19083_vm2, %v24800_v57 }
 0x918   : > { %16621 = vmatprep.subr.bf16.mxu0 %v24800_v57 }
 0x91e   : > { %v3159_v13 = vpop.xlane.xlu0 %3158 }
 0x91f   : > { %17960 = vrcp.f32 %v3159_v13 }
 0x922   : > { %v3165_v5 = vpop.xlane.xlu0 %3164 }
 0x926   : > { %v3162_v40 = vpop.xlane.xlu1 %3161 }
 0x927   : > { %17962 = vrcp.f32 %v3162_v40 }
 0x928   : > { %17964 = vrcp.f32 %v3165_v5 }
 0x929   : > { %v17961_v11 = vpop.eup %17960 }
 0x92a   : > { %v3168_v12 = vpop.xlane.xlu1 %3167  ;;  %v3217_v41 = vmul.f32 %v17961_v11, %v20595_v44 }
 0x92b   : > { %17966 = vrcp.f32 %v3168_v12 }
 0x92e   : > { %v3174_v44 = vpop.xlane.xlu1 %3173 }
 0x92f   : > { %17968 = vrcp.f32 %v3174_v44 }
 0x931   : > { %v17963_v15 = vpop.eup %17962 }
 0x932   : > { %v3218_v52 = vmul.f32 %v17963_v15, %v20605_v36  ;;  %v17965_v46 = vpop.eup %17964 }
 0x933   : > { %v3219_v53 = vmul.f32 %v17965_v46, %v20600_v29  ;;  %v3180_v29 = vpop.xlane.xlu1 %3179 }
 0x934   : > { %v3232_v33 = vpack.c.bf16 %v3218_v52, %v3217_v41 }
 0x935   : > { %v17967_v14 = vpop.eup %17966 }
 0x936   : > { %v3220_v18 = vmul.f32 %v17967_v14, %v20610_v32  ;;  %16606 = vmatmul.mubr.msk.bf16.vlgmr.msra.gmra.mrb[64].mxu1 %vm2086_vm4, %v3232_v33 }
 0x937   : > { %16616 = vmatpush3.bf16.msra.mxu1 %v20587_v19  ;;  %16617 = vmatprep.mubr.msk.bf16.mxu1 %vm19083_vm2, %v24800_v57  ;;  %v3186_v19 = vpop.xlane.xlu1 %3185 }
 0x938   : > { %v3233_v13 = vpack.c.bf16 %v3220_v18, %v3219_v53  ;;  %16627 = vmatprep.subr.bf16.mxu1 %v24800_v57 }
 0x939   : > { %v17969_v12 = vpop.eup %17968 }
 0x93a   : > { %16612 = vmatmul.mubr.msk.bf16.vlgmr.msra.gmra.mrb[52].mxu0 %vm2086_vm4, %v3233_v13  ;;  %v3222_v11 = vmul.f32 %v17969_v12, %v20614_v51 }
 0x93b   : > { %16622 = vmatpush3.bf16.msra.mxu0 %v3428_v3  ;;  %16623 = vmatprep.mubr.msk.bf16.mxu0 %vm19083_vm2, %v24800_v57  ;;  %v3192_v5 = vpop.xlane.xlu1 %3191 }
 0x93c   : > { %16633 = vmatprep.subr.bf16.mxu0 %v24800_v57 }
 0x93f   : > { %v3669_v53 = vpop.permute.xlu1 %3668 }
 0x95b   : > { %v3171_v36 = vpop.xlane.xlu0 %3170 }
 0x95c   : > { %17970 = vrcp.f32 %v3171_v36 }
 0x95d   : > { %17972 = vrcp.f32 %v3180_v29 }
 0x95f   : > { %v3177_v32 = vpop.xlane.xlu0 %3176 }
 0x960   : > { %17974 = vrcp.f32 %v3177_v32 }
 0x961   : > { %17976 = vrcp.f32 %v3186_v19 }
 0x963   : > { %v3183_v40 = vpop.xlane.xlu0 %3182 }
 0x964   : > { %17978 = vrcp.f32 %v3183_v40 }
 0x965   : > { %17980 = vrcp.f32 %v3192_v5 }
 0x966   : > { %v17971_v3 = vpop.eup %17970 }
 0x967   : > { %v3221_v15 = vmul.f32 %v17971_v3, %v20638_v21  ;;  %v3189_v41 = vpop.xlane.xlu0 %3188  ;;  %v17973_v52 = vpop.eup %17972 }
 0x968   : > { %17982 = vrcp.f32 %v3189_v41  ;;  %v3224_v14 = vmul.f32 %v17973_v52, %v20618_v39  ;;  %v3674_v52 = vsel %vm1688_vm3, %v3669_v53, 0 }
 0x969   : > { %v3234_v46 = vpack.c.bf16 %v3222_v11, %v3221_v15 }
 0x96a   : > { %v17975_v33 = vpop.eup %17974 }
 0x96b   : > { %v3223_v18 = vmul.f32 %v17975_v33, %v20644_v8  ;;  %16618 = vmatmul.mubr.msk.bf16.vlgmr.msra.gmra.mrb[68].mxu1 %vm2086_vm4, %v3234_v46  ;;  %v3195_v13 = vpop.xlane.xlu0 %3194  ;;  %v17977_v44 = vpop.eup %17976 }
 0x96c   : > { %16628 = vmatpush3.bf16.msra.mxu1 %v20635_v45  ;;  %16629 = vmatprep.mubr.msk.bf16.mxu1 %vm19083_vm2, %v24800_v57  ;;  %17984 = vrcp.f32 %v3195_v13  ;;  %v3226_v29 = vmul.f32 %v17977_v44, %v20622_v38 }
 0x96d   : > { %v3235_v51 = vpack.c.bf16 %v3224_v14, %v3223_v18  ;;  %16639 = vmatprep.subr.bf16.mxu1 %v24800_v57 }
 0x96e   : > { %v17979_v21 = vpop.eup %17978 }
 0x96f   : > { %v3225_v39 = vmul.f32 %v17979_v21, %v20648_v31  ;;  %v3198_v36 = vpop.xlane.xlu1 %3197  ;;  %16624 = vmatmul.mubr.msk.bf16.vlgmr.msra.gmra.mrb[56].mxu0 %vm2086_vm4, %v3235_v51  ;;  %v3618_v8 = vpop.permute.xlu0 %3617 }
 0x970   : > { %v17981_v19 = vpop.eup %17980  ;;  %17986 = vrcp.f32 %v3198_v36  ;;  %16634 = vmatpush3.bf16.msra.mxu0 %v20682_v60  ;;  %16635 = vmatprep.mubr.msk.bf16.mxu0 %vm19083_vm2, %v24800_v57  ;;  %v3623_v3 = vsel %vm1688_vm3, %v3618_v8, 0 }
 0x971   : > { %v3236_v45 = vpack.c.bf16 %v3226_v29, %v3225_v39  ;;  %16645 = vmatprep.subr.bf16.mxu0 %v24800_v57  ;;  %v3228_v5 = vmul.f32 %v17981_v19, %v20626_v4 }
 0x972   : > { %v17983_v32 = vpop.eup %17982 }
 0x973   : > { %v3227_v38 = vmul.f32 %v17983_v32, %v20652_v61  ;;  %16630 = vmatmul.mubr.msk.bf16.vlgmr.msra.gmra.mrb[72].mxu1 %vm2086_vm4, %v3236_v45  ;;  %v3616_v31 = vpop.permute.xlu0 %3615  ;;  %v3720_v60 = vpop.permute.xlu1 %3719 }
 0x974   : > { %16640 = vmatpush3.bf16.msra.mxu1 %v20676_v10  ;;  %16641 = vmatprep.mubr.msk.bf16.mxu1 %vm19083_vm2, %v24800_v57  ;;  %v3725_v33 = vsel %vm1688_vm3, %v3720_v60, 0 }
 0x975   : > { %v3237_v40 = vpack.c.bf16 %v3228_v5, %v3227_v38  ;;  %16651 = vmatprep.subr.bf16.mxu1 %v24800_v57 }
 0x976   : > { %v17985_v12 = vpop.eup %17984 }
 0x977   : > { %16636 = vmatmul.mubr.msk.bf16.vlgmr.msra.gmra.mrb[60].mxu0 %vm2086_vm4, %v3237_v40  ;;  %v3667_v4 = vpop.permute.xlu0 %3666  ;;  %v3229_v10 = vmul.f32 %v17985_v12, %v20656_v26  ;;  %v3771_v15 = vpop.permute.xlu1 %3770 }
 0x978   : > { %16647 = vmatprep.mubr.msk.bf16.mxu0 %vm19083_vm2, %v24800_v57 }
 0x979   : > { %16646 = vmatpush3.bf16.xpose.msra.mxu0 %v3623_v3 }
 0x97a   : > { %v17987_v61 = vpop.eup %17986  ;;  %16657 = vmatprep.subr.bf16.mxu0 %v24800_v57 }
 0x97b   : > { %v3230_v11 = vmul.f32 %v17987_v61, %v20660_v20  ;;  %v3718_v46 = vpop.permute.xlu0 %3717  ;;  %v3822_v14 = vpop.permute.xlu1 %3821  ;;  %v3776_v20 = vsel %vm1688_vm3, %v3771_v15, 0 }
 0x97c   : > { %v3827_v18 = vsel %vm1688_vm3, %v3822_v14, 0 }
 0x97d   : > { %v3238_v41 = vpack.c.bf16 %v3230_v11, %v3229_v10 }
 0x97f   : > { %16642 = vmatmul.mubr.msk.bf16.vlgmr.msra.gmra.mrb[76].mxu1 %vm2086_vm4, %v3238_v41  ;;  %v3769_v26 = vpop.permute.xlu0 %3768  ;;  %v3873_v53 = vpop.permute.xlu1 %3872 }
 0x980   : > { %16648 = vmatmul.mubr.msk.bf16.vlgmr.msra.gmra.mrb[64].mxu0 %vm1688_vm3, %v3616_v31  ;;  %16652 = vmatpush3.bf16.xpose.msra.mxu1 %v3674_v52  ;;  %v3878_v51 = vsel %vm1688_vm3, %v3873_v53, 0 }
 0x981   : > { %16658 = vmatpush3.bf16.xpose.msra.mxu0 %v3725_v33  ;;  %16653 = vmatprep.mubr.msk.bf16.mxu1 %vm19083_vm2, %v24800_v57 }
 0x982   : > { %16659 = vmatprep.mubr.msk.bf16.mxu0 %vm19083_vm2, %v24800_v57  ;;  %16663 = vmatprep.subr.bf16.mxu1 %v24800_v57 }
 0x983   : > { %16669 = vmatprep.subr.bf16.mxu0 %v24800_v57  ;;  %v3820_v13 = vpop.permute.xlu0 %3819  ;;  %v3924_v44 = vpop.permute.xlu1 %3923 }
 0x984   : > { %v3929_v21 = vsel %vm1688_vm3, %v3924_v44, 0 }
 0x987   : > { %16654 = vmatmul.mubr.msk.bf16.vlgmr.msra.gmra.mrb[80].mxu1 %vm1688_vm3, %v3667_v4  ;;  %v3871_v29 = vpop.permute.xlu0 %3870  ;;  %v3975_v39 = vpop.permute.xlu1 %3974 }
 0x988   : > { %16660 = vmatmul.mubr.msk.bf16.vlgmr.msra.gmra.mrb[68].mxu0 %vm1688_vm3, %v3718_v46  ;;  %16664 = vmatpush3.bf16.xpose.msra.mxu1 %v3776_v20  ;;  %v3980_v36 = vsel %vm1688_vm3, %v3975_v39, 0 }
 0x989   : > { %16670 = vmatpush3.bf16.xpose.msra.mxu0 %v3827_v18  ;;  %16665 = vmatprep.mubr.msk.bf16.mxu1 %vm19083_vm2, %v24800_v57 }
 0x98a   : > { %16671 = vmatprep.mubr.msk.bf16.mxu0 %vm19083_vm2, %v24800_v57  ;;  %16675 = vmatprep.subr.bf16.mxu1 %v24800_v57 }
 0x98b   : > { %16681 = vmatprep.subr.bf16.mxu0 %v24800_v57  ;;  %v3922_v8 = vpop.permute.xlu0 %3921  ;;  %v3973_v19 = vpop.permute.xlu1 %3972 }
 0x98f   : > { %16666 = vmatmul.mubr.msk.bf16.vlgmr.msra.gmra.mrb[84].mxu1 %vm1688_vm3, %v3769_v26 }
 0x990   : > { %16672 = vmatmul.mubr.msk.bf16.vlgmr.msra.gmra.mrb[72].mxu0 %vm1688_vm3, %v3820_v13  ;;  %16676 = vmatpush3.bf16.xpose.msra.mxu1 %v3878_v51 }
 0x991   : > { %16682 = vmatpush3.bf16.xpose.msra.mxu0 %v3929_v21  ;;  %16677 = vmatprep.mubr.msk.bf16.mxu1 %vm19083_vm2, %v24800_v57 }
 0x992   : > { %16683 = vmatprep.mubr.msk.bf16.mxu0 %vm19083_vm2, %v24800_v57  ;;  %16687 = vmatprep.subr.bf16.mxu1 %v24800_v57 }
 0x993   : > { %16693 = vmatprep.subr.bf16.mxu0 %v24800_v57 }
 0x997   : > { %16678 = vmatmul.mubr.msk.bf16.vlgmr.msra.gmra.mrb[88].mxu1 %vm1688_vm3, %v3871_v29 }
 0x998   : > { %16684 = vmatmul.mubr.msk.bf16.vlgmr.msra.gmra.mrb[76].mxu0 %vm1688_vm3, %v3922_v8  ;;  %16688 = vmatpush3.bf16.xpose.msra.mxu1 %v3980_v36 }
 0x999   : > { %16689 = vmatprep.mubr.msk.bf16.mxu1 %vm19083_vm2, %v24800_v57  ;;  %16699 = vmatprep.subr.bf16.mxu1 %v24800_v57 }
 0x99a   : > { %16695 = vmatprep.mubr.msk.bf16.mxu0 %vm19083_vm2, %v24800_v57 }
 0x99f   : > { %16690 = vmatmul.mubr.msk.bf16.vlgmr.msra.gmra.mrb[92].mxu1 %vm1688_vm3, %v3973_v19 }
 0x9a0   : > { %16701 = vmatprep.mubr.msk.bf16.mxu1 %vm19083_vm2, %v24800_v57 }
 0x9e9   : > { %v20789_v45 = vpop.f32.mrb[48].mxu0 }
 0x9ea   : > { %v16601_v32 = vpop.f32.mrb[49].mxu0 }
 0x9eb   : > { %v20791_v5 = vpop.f32.mrb[50].mxu0 }
 0x9ec   : > { %v16602_v38 = vpop.f32.mrb[51].mxu0 }
 0xa09   : > { %v20793_v31 = vpop.f32.mrb[64].mxu1 }
 0xa0a   : > { %v16607_v60 = vpop.f32.mrb[65].mxu1 }
 0xa0b   : > { %v20795_v40 = vpop.f32.mrb[66].mxu1 }
 0xa0c   : > { %v16608_v12 = vpop.f32.mrb[67].mxu1 }
 0xa0d   : > { %v20797_v3 = vpop.f32.mrb[52].mxu0 }
 0xa0e   : > { %v16613_v4 = vpop.f32.mrb[53].mxu0 }
 0xa0f   : > { %v20799_v61 = vpop.f32.mrb[54].mxu0 }
 0xa10   : > { %v16614_v10 = vpop.f32.mrb[55].mxu0 }
 0xa3e   : > { %v20801_v11 = vpop.f32.mrb[68].mxu1 }
 0xa3f   : > { %v16619_v15 = vpop.f32.mrb[69].mxu1 }
 0xa40   : > { %v20803_v41 = vpop.f32.mrb[70].mxu1 }
 0xa41   : > { %24801 = vst [vmem:[#allocation62_spill] sm:$0xff] %v20803_v41  ;;  %v16620_v52 = vpop.f32.mrb[71].mxu1 }
 0xa42   : > { %v20805_v46 = vpop.f32.mrb[56].mxu0 }
 0xa43   : > { %v16625_v33 = vpop.f32.mrb[57].mxu0 }
 0xa44   : > { %v20807_v14 = vpop.f32.mrb[58].mxu0 }
 0xa45   : > { %24802 = vst [vmem:[#allocation63_spill] sm:$0xff] %v20807_v14  ;;  %v16626_v26 = vpop.f32.mrb[59].mxu0 }
 0xa46   : > { %v20809_v20 = vpop.f32.mrb[72].mxu1 }
 0xa47   : > { %v16631_v53 = vpop.f32.mrb[73].mxu1 }
 0xa48   : > { %v20811_v18 = vpop.f32.mrb[74].mxu1 }
 0xa49   : > { %24803 = vst [vmem:[#allocation64_spill] sm:$0xff] %v20811_v18  ;;  %v16632_v13 = vpop.f32.mrb[75].mxu1 }
 0xa4a   : > { %v20813_v44 = vpop.f32.mrb[60].mxu0 }
 0xa4b   : > { %v16637_v51 = vpop.f32.mrb[61].mxu0 }
 0xa4c   : > { %v20815_v21 = vpop.f32.mrb[62].mxu0 }
 0xa4d   : > { %24804 = vst [vmem:[#allocation65_spill] sm:$0xff] %v20815_v21  ;;  %v16638_v29 = vpop.f32.mrb[63].mxu0 }
 0xa52   : > { %v20817_v39 = vpop.f32.mrb[76].mxu1 }
 0xa53   : > { %v20819_v36 = vpop.f32.mrb[64].mxu0  ;;  %v16643_v8 = vpop.f32.mrb[77].mxu1 }
 0xa54   : > { %v16649_v19 = vpop.f32.mrb[65].mxu0  ;;  %v20821_v32 = vpop.f32.mrb[78].mxu1  ;;  %v4023_v38 = vsel %vm2086_vm4, %v20819_v36, -inf }
 0xa55   : > { %24805 = vst [vmem:[#allocation66_spill] sm:$0xff] %v20821_v32  ;;  %4024 = vmax.xlane.f32.xlu0 %v4023_v38  ;;  %v20825_v60 = vpop.f32.mrb[66].mxu0  ;;  %v16644_v12 = vpop.f32.mrb[79].mxu1 }
 0xa56   : > { %v16650_v4 = vpop.f32.mrb[67].mxu0  ;;  %v4026_v10 = vsel %vm2086_vm4, %v20825_v60, -inf }
 0xa57   : > { %4027 = vmax.xlane.f32.xlu1 %v4026_v10 }
 0xa5a   : > { %v20829_v15 = vpop.f32.mrb[80].mxu1 }
 0xa5b   : > { %v20831_v52 = vpop.f32.mrb[68].mxu0  ;;  %v16655_v33 = vpop.f32.mrb[81].mxu1  ;;  %v4029_v26 = vsel %vm2086_vm4, %v20829_v15, -inf }
 0xa5c   : > { %v16661_v53 = vpop.f32.mrb[69].mxu0  ;;  %4030 = vmax.xlane.f32.xlu0 %v4029_v26  ;;  %v20835_v13 = vpop.f32.mrb[82].mxu1  ;;  %v4035_v19 = vsel %vm2086_vm4, %v20831_v52, -inf }
 0xa5d   : > { %v20837_v51 = vpop.f32.mrb[70].mxu0  ;;  %v16656_v29 = vpop.f32.mrb[83].mxu1  ;;  %v4032_v10 = vsel %vm2086_vm4, %v20835_v13, -inf }
 0xa5e   : > { %v16662_v8 = vpop.f32.mrb[71].mxu0 }
 0xa60   : > { %4036 = vmax.xlane.f32.xlu0 %v4035_v19 }
 0xa62   : > { %v20841_v38 = vpop.f32.mrb[84].mxu1 }
 0xa63   : > { %v20843_v12 = vpop.f32.mrb[72].mxu0  ;;  %v16667_v4 = vpop.f32.mrb[85].mxu1 }
 0xa64   : > { %v16673_v33 = vpop.f32.mrb[73].mxu0  ;;  %4033 = vmax.xlane.f32.xlu0 %v4032_v10  ;;  %v20847_v26 = vpop.f32.mrb[86].mxu1 }
 0xa65   : > { %v20849_v53 = vpop.f32.mrb[74].mxu0  ;;  %v16668_v29 = vpop.f32.mrb[87].mxu1 }
 0xa66   : > { %v16674_v8 = vpop.f32.mrb[75].mxu0 }
 0xa68   : > { %4254 = vrot.lane.b32.xlu1 %v20052_v6, %s19091_s5 }
 0xa6a   : > { %v20853_v19 = vpop.f32.mrb[88].mxu1 }
 0xa6b   : > { %v20855_v22 = vpop.f32.mrb[76].mxu0  ;;  %v16679_v4 = vpop.f32.mrb[89].mxu1 }
 0xa6c   : > { %4301 = vrot.lane.b32.xlu1 %v20076_v43, %s19091_s5  ;;  %v16685_v33 = vpop.f32.mrb[77].mxu0  ;;  %v20859_v10 = vpop.f32.mrb[90].mxu1  ;;  %v4038_v4 = vsel %vm2086_vm4, %v20837_v51, -inf }
 0xa6d   : > { %v20861_v63 = vpop.f32.mrb[78].mxu0  ;;  %v16680_v37 = vpop.f32.mrb[91].mxu1  ;;  %v4041_v33 = vsel %vm2086_vm4, %v20841_v38, -inf }
 0xa6e   : > { %v16686_v29 = vpop.f32.mrb[79].mxu0  ;;  %v4044_v37 = vsel %vm2086_vm4, %v20847_v26, -inf }
 0xa6f   : > { %v4056_v29 = vsel %vm2086_vm4, %v20859_v10, -inf }
 0xa70   : > { %4348 = vrot.lane.b32.xlu1 %v20072_v42, %s19091_s5 }
 0xa72   : > { %v20865_v8 = vpop.f32.mrb[92].mxu1 }
 0xa73   : > { %v16691_v16 = vpop.f32.mrb[93].mxu1 }
 0xa74   : > { %v20867_v48 = vpop.f32.mrb[94].mxu1  ;;  %v4050_v16 = vsel %vm2086_vm4, %v20849_v53, -inf }
 0xa75   : > { %v16692_v27 = vpop.f32.mrb[95].mxu1 }
 0xa76   : > { %v4047_v27 = vsel %vm2086_vm4, %v20843_v12, -inf }
 0xa7a   : > { %4207 = vrot.lane.b32.xlu0 %v20056_v30, %s19091_s5 }
 0xa94   : > { %4039 = vmax.xlane.f32.xlu1 %v4038_v4  ;;  %v4053_v4 = vsel %vm2086_vm4, %v20853_v19, -inf }
 0xa98   : > { %4045 = vmax.xlane.f32.xlu1 %v4044_v37  ;;  %v4062_v37 = vsel %vm2086_vm4, %v20861_v63, -inf }
 0xa99   : > { %4042 = vmax.xlane.f32.xlu0 %v4041_v33  ;;  %v4059_v33 = vsel %vm2086_vm4, %v20855_v22, -inf }
 0xa9c   : > { %4051 = vmax.xlane.f32.xlu1 %v4050_v16  ;;  %v4065_v16 = vsel %vm2086_vm4, %v20865_v8, -inf }
 0xa9d   : > { %4048 = vmax.xlane.f32.xlu0 %v4047_v27  ;;  %v4068_v27 = vsel %vm2086_vm4, %v20867_v48, -inf }
 0xaa0   : > { %4057 = vmax.xlane.f32.xlu1 %v4056_v29 }
 0xaa1   : > { %4054 = vmax.xlane.f32.xlu0 %v4053_v4 }
 0xaa4   : > { %4063 = vmax.xlane.f32.xlu1 %v4062_v37 }
 0xaa5   : > { %4060 = vmax.xlane.f32.xlu0 %v4059_v33 }
 0xaa9   : > { %4066 = vmax.xlane.f32.xlu0 %v4065_v16 }
 0xab5   : > { %4442 = vrot.lane.b32.xlu1 %v20092_v56, %s19091_s5 }
 0xabf   : > { %4395 = vrot.lane.b32.xlu0 %v20096_v17, %s19091_s5 }
 0xac3   : > { %4489 = vrot.lane.b32.xlu0 %v20116_v25, %s19091_s5 }
 0xad9   : > { %4069 = vmax.xlane.f32.xlu1 %v4068_v27 }
 0xae2   : > { %v4025_v29 = vpop.xlane.xlu0 %4024 }
 0xae3   : > { %v4071_v4 = vsub.f32 %v20819_v36, %v4025_v29 }
 0xae4   : > { %v4028_v37 = vpop.xlane.xlu1 %4027 }
 0xae5   : > { %v4087_v33 = vmul.f32 1.442695, %v4071_v4 }
 0xae7   : > { %17988 = vpow2.f32 %v4087_v33 }
 0xae8   : > { %v4255_v16 = vpop.permute.xlu1 %4254 }
 0xae9   : > { %16700 = vmatpush3.bf16.msra.mxu1 %v4255_v16  ;;  %v4031_v9 = vpop.xlane.xlu0 %4030 }
 0xaea   : > { %4536 = vrot.lane.b32.xlu1 %v20112_v2, %s19091_s5  ;;  %v4073_v62 = vsub.f32 %v20829_v15, %v4031_v9  ;;  %16711 = vmatprep.subr.bf16.mxu1 %v24800_v57 }
 0xaec   : > { %v4091_v58 = vmul.f32 1.442695, %v4073_v62  ;;  %v4072_v62 = vsub.f32 %v20825_v60, %v4028_v37 }
 0xaed   : > { %v4037_v32 = vpop.xlane.xlu0 %4036 }
 0xaee   : > { %17990 = vpow2.f32 %v4091_v58  ;;  %v4075_v27 = vsub.f32 %v20831_v52, %v4037_v32  ;;  %v4089_v15 = vmul.f32 1.442695, %v4072_v62 }
 0xaf0   : > { %v4095_v21 = vmul.f32 1.442695, %v4075_v27 }
 0xaf1   : > { %v20905_v36 = vpop.eup %17988  ;;  %v4034_v29 = vpop.xlane.xlu0 %4033 }
 0xaf2   : > { %17992 = vpow2.f32 %v4095_v21  ;;  %v4119_v4 = vsel %vm2086_vm4, %v20905_v36, 0.0  ;;  %v4074_v21 = vsub.f32 %v20835_v13, %v4034_v29  ;;  %v20928_v13 = vpop.permute.xlu1 %4301 }
 0xaf3   : > { %4120 = vadd.xlane.f32.xlu0 %v4119_v4  ;;  %17994 = vpow2.f32 %v4089_v15 }
 0xaf4   : > { %v4093_v16 = vmul.f32 1.442695, %v4074_v21 }
 0xaf5   : > { %v4208_v33 = vpop.permute.xlu0 %4207 }
 0xaf6   : > { %16694 = vmatpush3.bf16.msra.mxu0 %v4208_v33  ;;  %17996 = vpow2.f32 %v4093_v16  ;;  %v20930_v29 = vpop.permute.xlu1 %4348 }
 0xaf7   : > { %16705 = vmatprep.subr.bf16.mxu0 %v24800_v57 }
 0xaf8   : > { %v20910_v9 = vpop.eup %17990 }
 0xaf9   : > { %v4125_v58 = vsel %vm2086_vm4, %v20910_v9, 0.0 }
 0xafa   : > { %4126 = vadd.xlane.f32.xlu0 %v4125_v58 }
 0xafc   : > { %v20915_v32 = vpop.eup %17992 }
 0xafd   : > { %v4131_v52 = vsel %vm2086_vm4, %v20915_v32, 0.0  ;;  %v20920_v27 = vpop.eup %17994 }
 0xafe   : > { %4132 = vadd.xlane.f32.xlu0 %v4131_v52  ;;  %v4122_v60 = vsel %vm2086_vm4, %v20920_v27, 0.0 }
 0xb00   : > { %v20924_v37 = vpop.eup %17996 }
 0xb01   : > { %v4128_v4 = vsel %vm2086_vm4, %v20924_v37, 0.0 }
 0xb0e   : > { %4123 = vadd.xlane.f32.xlu1 %v4122_v60 }
 0xb12   : > { %4129 = vadd.xlane.f32.xlu1 %v4128_v4 }
 0xb21   : > { %v4040_v33 = vpop.xlane.xlu1 %4039 }
 0xb22   : > { %v4076_v62 = vsub.f32 %v20837_v51, %v4040_v33 }
 0xb24   : > { %v4097_v58 = vmul.f32 1.442695, %v4076_v62 }
 0xb25   : > { %v4046_v15 = vpop.xlane.xlu1 %4045 }
 0xb26   : > { %17998 = vpow2.f32 %v4097_v58  ;;  %v4078_v21 = vsub.f32 %v20847_v26, %v4046_v15  ;;  %v4043_v52 = vpop.xlane.xlu0 %4042 }
 0xb27   : > { %v4077_v16 = vsub.f32 %v20841_v38, %v4043_v52 }
 0xb28   : > { %v4101_v60 = vmul.f32 1.442695, %v4078_v21 }
 0xb29   : > { %v4099_v1 = vmul.f32 1.442695, %v4077_v16  ;;  %v4052_v18 = vpop.xlane.xlu1 %4051 }
 0xb2a   : > { %18000 = vpow2.f32 %v4101_v60  ;;  %v4080_v4 = vsub.f32 %v20849_v53, %v4052_v18  ;;  %v4049_v14 = vpop.xlane.xlu0 %4048 }
 0xb2b   : > { %18002 = vpow2.f32 %v4099_v1  ;;  %v4079_v50 = vsub.f32 %v20843_v12, %v4049_v14 }
 0xb2c   : > { %v4105_v55 = vmul.f32 1.442695, %v4080_v4 }
 0xb2d   : > { %v4103_v51 = vmul.f32 1.442695, %v4079_v50  ;;  %v4058_v33 = vpop.xlane.xlu1 %4057 }
 0xb2e   : > { %18004 = vpow2.f32 %v4105_v55  ;;  %v4082_v62 = vsub.f32 %v20859_v10, %v4058_v33  ;;  %v4055_v26 = vpop.xlane.xlu0 %4054 }
 0xb2f   : > { %18006 = vpow2.f32 %v4103_v51  ;;  %v4081_v38 = vsub.f32 %v20853_v19, %v4055_v26 }
 0xb30   : > { %v20939_v58 = vpop.eup %17998  ;;  %v4109_v15 = vmul.f32 1.442695, %v4082_v62 }
 0xb31   : > { %v4107_v21 = vmul.f32 1.442695, %v4081_v38  ;;  %v4064_v52 = vpop.xlane.xlu1 %4063  ;;  %v4134_v1 = vsel %vm2086_vm4, %v20939_v58, 0.0 }
 0xb32   : > { %18008 = vpow2.f32 %v4109_v15  ;;  %v4084_v14 = vsub.f32 %v20861_v63, %v4064_v52  ;;  %4135 = vadd.xlane.f32.xlu1 %v4134_v1  ;;  %v4061_v50 = vpop.xlane.xlu0 %4060 }
 0xb33   : > { %18010 = vpow2.f32 %v4107_v21  ;;  %v4083_v55 = vsub.f32 %v20855_v22, %v4061_v50 }
 0xb34   : > { %v20945_v18 = vpop.eup %18000  ;;  %v4113_v12 = vmul.f32 1.442695, %v4084_v14 }
 0xb35   : > { %v20947_v53 = vpop.eup %18002  ;;  %v4111_v19 = vmul.f32 1.442695, %v4083_v55  ;;  %v4140_v10 = vsel %vm2086_vm4, %v20945_v18, 0.0 }
 0xb36   : > { %18012 = vpow2.f32 %v4113_v12  ;;  %4141 = vadd.xlane.f32.xlu1 %v4140_v10  ;;  %v4067_v16 = vpop.xlane.xlu0 %4066  ;;  %v4137_v63 = vsel %vm2086_vm4, %v20947_v53, 0.0  ;;  %v20988_v12 = vpop.permute.xlu1 %4442 }
 0xb37   : > { %18014 = vpow2.f32 %v4111_v19  ;;  %v4085_v60 = vsub.f32 %v20865_v8, %v4067_v16  ;;  %4138 = vadd.xlane.f32.xlu0 %v4137_v63 }
 0xb38   : > { %v20954_v22 = vpop.eup %18004 }
 0xb39   : > { %v20956_v4 = vpop.eup %18006  ;;  %v4115_v51 = vmul.f32 1.442695, %v4085_v60  ;;  %v4146_v33 = vsel %vm2086_vm4, %v20954_v22, 0.0 }
 0xb3a   : > { %4147 = vadd.xlane.f32.xlu1 %v4146_v33  ;;  %v4143_v62 = vsel %vm2086_vm4, %v20956_v4, 0.0 }
 0xb3b   : > { %18016 = vpow2.f32 %v4115_v51  ;;  %4144 = vadd.xlane.f32.xlu0 %v4143_v62 }
 0xb3c   : > { %v20962_v26 = vpop.eup %18008 }
 0xb3d   : > { %v20964_v38 = vpop.eup %18010  ;;  %v4152_v8 = vsel %vm2086_vm4, %v20962_v26, 0.0 }
 0xb3e   : > { %4153 = vadd.xlane.f32.xlu1 %v4152_v8  ;;  %v4149_v15 = vsel %vm2086_vm4, %v20964_v38, 0.0 }
 0xb3f   : > { %4150 = vadd.xlane.f32.xlu0 %v4149_v15 }
 0xb40   : > { %v20970_v21 = vpop.eup %18012 }
 0xb41   : > { %v20972_v52 = vpop.eup %18014  ;;  %v4158_v1 = vsel %vm2086_vm4, %v20970_v21, 0.0 }
 0xb42   : > { %4159 = vadd.xlane.f32.xlu1 %v4158_v1  ;;  %v4155_v14 = vsel %vm2086_vm4, %v20972_v52, 0.0 }
 0xb43   : > { %4156 = vadd.xlane.f32.xlu0 %v4155_v14 }
 0xb45   : > { %v20978_v50 = vpop.eup %18016 }
 0xb46   : > { %v4161_v55 = vsel %vm2086_vm4, %v20978_v50, 0.0 }
 0xb47   : > { %4162 = vadd.xlane.f32.xlu0 %v4161_v55 }
 0xb53   : > { %4636 = vrot.lane.b32.xlu1 %v20052_v6, %s19092_s1 }
 0xb5d   : > { %4585 = vrot.lane.b32.xlu0 %v20056_v30, %s19092_s1 }
 0xb61   : > { %4583 = vrot.lane.b32.xlu0 %v20056_v30, %s19093_s19 }
 0xb65   : > { %4634 = vrot.lane.b32.xlu0 %v20052_v6, %s19093_s19 }
 0xb66   : > { %v4070_v19 = vpop.xlane.xlu1 %4069 }
 0xb67   : > { %v4086_v10 = vsub.f32 %v20867_v48, %v4070_v19  ;;  %v4396_v48 = vpop.permute.xlu0 %4395 }
 0xb69   : > { %v4117_v16 = vmul.f32 1.442695, %v4086_v10  ;;  %4685 = vrot.lane.b32.xlu0 %v20076_v43, %s19093_s19 }
 0xb6a   : > { %v21017_v33 = vpop.permute.xlu1 %4536 }
 0xb6b   : > { %18018 = vpow2.f32 %v4117_v16  ;;  %v21013_v51 = vpop.permute.xlu0 %4489 }
 0xb6d   : > { %4736 = vrot.lane.b32.xlu0 %v20072_v42, %s19093_s19 }
 0xb71   : > { %4787 = vrot.lane.b32.xlu0 %v20096_v17, %s19093_s19 }
 0xb75   : > { %v20999_v63 = vpop.eup %18018  ;;  %4838 = vrot.lane.b32.xlu0 %v20092_v56, %s19093_s19 }
 0xb76   : > { %v4164_v60 = vsel %vm2086_vm4, %v20999_v63, 0.0 }
 0xb77   : > { %4165 = vadd.xlane.f32.xlu1 %v4164_v60 }
 0xb79   : > { %4889 = vrot.lane.b32.xlu0 %v20116_v25, %s19093_s19 }
 0xb80   : > { %v4121_v62 = vpop.xlane.xlu0 %4120 }
 0xb81   : > { %18020 = vrcp.f32 %v4121_v62 }
 0xb87   : > { %v4127_v8 = vpop.xlane.xlu0 %4126 }
 0xb88   : > { %4687 = vrot.lane.b32.xlu1 %v20076_v43, %s19092_s1 }
 0xb8b   : > { %v18021_v14 = vpop.eup %18020 }
 0xb8c   : > { %4738 = vrot.lane.b32.xlu1 %v20072_v42, %s19092_s1  ;;  %v4183_v19 = vmul.f32 %v18021_v14, %v20905_v36  ;;  %v4133_v36 = vpop.xlane.xlu0 %4132 }
 0xb90   : > { %4789 = vrot.lane.b32.xlu1 %v20096_v17, %s19092_s1 }
 0xb94   : > { %4840 = vrot.lane.b32.xlu1 %v20092_v56, %s19092_s1 }
 0xb98   : > { %4891 = vrot.lane.b32.xlu1 %v20116_v25, %s19092_s1 }
 0xb9b   : > { %v4124_v15 = vpop.xlane.xlu1 %4123 }
 0xb9c   : > { %18022 = vrcp.f32 %v4124_v15  ;;  %4942 = vrot.lane.b32.xlu1 %v20112_v2, %s19092_s1 }
 0xb9d   : > { %18024 = vrcp.f32 %v4127_v8 }
 0xb9f   : > { %v4130_v1 = vpop.xlane.xlu1 %4129 }
 0xba0   : > { %18026 = vrcp.f32 %v4130_v1  ;;  %4940 = vrot.lane.b32.xlu1 %v20112_v2, %s19093_s19 }
 0xba1   : > { %18028 = vrcp.f32 %v4133_v36 }
 0xba6   : > { %v18023_v55 = vpop.eup %18022 }
 0xba7   : > { %v4184_v10 = vmul.f32 %v18023_v55, %v20920_v27  ;;  %v18025_v16 = vpop.eup %18024 }
 0xba8   : > { %v4185_v15 = vmul.f32 %v18025_v16, %v20910_v9 }
 0xba9   : > { %v4199_v60 = vpack.c.bf16 %v4184_v10, %v4183_v19 }
 0xbaa   : > { %v18027_v62 = vpop.eup %18026 }
 0xbab   : > { %v4186_v41 = vmul.f32 %v18027_v62, %v20924_v37  ;;  %16696 = vmatmul.mubr.msk.bf16.vlgmr.msra.gmra.mrb[80].mxu0 %vm2086_vm4, %v4199_v60 }
 0xbac   : > { %16706 = vmatpush3.bf16.msra.mxu0 %v20928_v13  ;;  %16707 = vmatprep.mubr.msk.bf16.mxu0 %vm19083_vm2, %v24800_v57  ;;  %v18029_v13 = vpop.eup %18028 }
 0xbad   : > { %v4200_v8 = vpack.c.bf16 %v4186_v41, %v4185_v15  ;;  %16717 = vmatprep.subr.bf16.mxu0 %v24800_v57 }
 0xbaf   : > { %16702 = vmatmul.mubr.msk.bf16.vlgmr.msra.gmra.mrb[96].mxu1 %vm2086_vm4, %v4200_v8 }
 0xbb0   : > { %16712 = vmatpush3.bf16.msra.mxu1 %v20930_v29  ;;  %16713 = vmatprep.mubr.msk.bf16.mxu1 %vm19083_vm2, %v24800_v57  ;;  %v4187_v29 = vmul.f32 %v18029_v13, %v20915_v32 }
 0xbb1   : > { %16723 = vmatprep.subr.bf16.mxu1 %v24800_v57 }
 0xbbf   : > { %v4136_v9 = vpop.xlane.xlu1 %4135 }
 0xbc0   : > { %18030 = vrcp.f32 %v4136_v9 }
 0xbc3   : > { %v4142_v27 = vpop.xlane.xlu1 %4141 }
 0xbc4   : > { %18032 = vrcp.f32 %v4142_v27  ;;  %v4139_v37 = vpop.xlane.xlu0 %4138 }
 0xbc5   : > { %18034 = vrcp.f32 %v4139_v37 }
 0xbc7   : > { %v4148_v41 = vpop.xlane.xlu1 %4147 }
 0xbc8   : > { %18036 = vrcp.f32 %v4148_v41  ;;  %v4145_v1 = vpop.xlane.xlu0 %4144 }
 0xbc9   : > { %18038 = vrcp.f32 %v4145_v1 }
 0xbca   : > { %v18031_v14 = vpop.eup %18030 }
 0xbcb   : > { %v4188_v55 = vmul.f32 %v18031_v14, %v20939_v58  ;;  %v4154_v19 = vpop.xlane.xlu1 %4153 }
 0xbcc   : > { %18040 = vrcp.f32 %v4154_v19  ;;  %v4151_v10 = vpop.xlane.xlu0 %4150 }
 0xbcd   : > { %18042 = vrcp.f32 %v4151_v10  ;;  %v4201_v16 = vpack.c.bf16 %v4188_v55, %v4187_v29 }
 0xbce   : > { %v18033_v60 = vpop.eup %18032 }
 0xbcf   : > { %v18035_v62 = vpop.eup %18034  ;;  %v4160_v15 = vpop.xlane.xlu1 %4159  ;;  %16708 = vmatmul.mubr.msk.bf16.vlgmr.msra.gmra.mrb[84].mxu0 %vm2086_vm4, %v4201_v16  ;;  %v4190_v8 = vmul.f32 %v18033_v60, %v20945_v18 }
 0xbd0   : > { %v4189_v36 = vmul.f32 %v18035_v62, %v20947_v53  ;;  %18044 = vrcp.f32 %v4160_v15  ;;  %16718 = vmatpush3.bf16.msra.mxu0 %v4396_v48  ;;  %v4157_v9 = vpop.xlane.xlu0 %4156  ;;  %16719 = vmatprep.mubr.msk.bf16.mxu0 %vm19083_vm2, %v24800_v57 }
 0xbd1   : > { %18046 = vrcp.f32 %v4157_v9  ;;  %16729 = vmatprep.subr.bf16.mxu0 %v24800_v57 }
 0xbd2   : > { %v18037_v32 = vpop.eup %18036  ;;  %v4202_v58 = vpack.c.bf16 %v4190_v8, %v4189_v36 }
 0xbd3   : > { %v18039_v27 = vpop.eup %18038  ;;  %v4192_v37 = vmul.f32 %v18037_v32, %v20954_v22 }
 0xbd4   : > { %v4191_v41 = vmul.f32 %v18039_v27, %v20956_v4  ;;  %16714 = vmatmul.mubr.msk.bf16.vlgmr.msra.gmra.mrb[100].mxu1 %vm2086_vm4, %v4202_v58  ;;  %v4163_v14 = vpop.xlane.xlu0 %4162 }
 0xbd5   : > { %16724 = vmatpush3.bf16.msra.mxu1 %v20988_v12  ;;  %16725 = vmatprep.mubr.msk.bf16.mxu1 %vm19083_vm2, %v24800_v57  ;;  %18048 = vrcp.f32 %v4163_v14 }
 0xbd6   : > { %v18041_v18 = vpop.eup %18040  ;;  %v4203_v53 = vpack.c.bf16 %v4192_v37, %v4191_v41  ;;  %16735 = vmatprep.subr.bf16.mxu1 %v24800_v57 }
 0xbd7   : > { %v18043_v48 = vpop.eup %18042  ;;  %v4194_v13 = vmul.f32 %v18041_v18, %v20962_v26 }
 0xbd8   : > { %v4193_v1 = vmul.f32 %v18043_v48, %v20964_v38  ;;  %16720 = vmatmul.mubr.msk.bf16.vlgmr.msra.gmra.mrb[88].mxu0 %vm2086_vm4, %v4203_v53  ;;  %v4586_v26 = vpop.permute.xlu0 %4585 }
 0xbd9   : > { %16730 = vmatpush3.bf16.msra.mxu0 %v21013_v51  ;;  %16731 = vmatprep.mubr.msk.bf16.mxu0 %vm19083_vm2, %v24800_v57  ;;  %v4591_v51 = vsel %vm1688_vm3, %v4586_v26, 0 }
 0xbda   : > { %v18045_v22 = vpop.eup %18044  ;;  %v4204_v4 = vpack.c.bf16 %v4194_v13, %v4193_v1  ;;  %16741 = vmatprep.subr.bf16.mxu0 %v24800_v57 }
 0xbdb   : > { %v18047_v12 = vpop.eup %18046  ;;  %v4196_v29 = vmul.f32 %v18045_v22, %v20970_v21 }
 0xbdc   : > { %v4195_v55 = vmul.f32 %v18047_v12, %v20972_v52  ;;  %16726 = vmatmul.mubr.msk.bf16.vlgmr.msra.gmra.mrb[104].mxu1 %vm2086_vm4, %v4204_v4  ;;  %v4584_v21 = vpop.permute.xlu0 %4583  ;;  %v4637_v52 = vpop.permute.xlu1 %4636 }
 0xbdd   : > { %16736 = vmatpush3.bf16.msra.mxu1 %v21017_v33  ;;  %16737 = vmatprep.mubr.msk.bf16.mxu1 %vm19083_vm2, %v24800_v57  ;;  %v4642_v41 = vsel %vm1688_vm3, %v4637_v52, 0 }
 0xbde   : > { %v4205_v38 = vpack.c.bf16 %v4196_v29, %v4195_v55  ;;  %16747 = vmatprep.subr.bf16.mxu1 %v24800_v57 }
 0xbdf   : > { %v18049_v15 = vpop.eup %18048 }
 0xbe0   : > { %16732 = vmatmul.mubr.msk.bf16.vlgmr.msra.gmra.mrb[92].mxu0 %vm2086_vm4, %v4205_v38  ;;  %v4635_v33 = vpop.permute.xlu0 %4634  ;;  %v4197_v9 = vmul.f32 %v18049_v15, %v20978_v50 }
 0xbe1   : > { %16743 = vmatprep.mubr.msk.bf16.mxu0 %vm19083_vm2, %v24800_v57 }
 0xbe2   : > { %16742 = vmatpush3.bf16.xpose.msra.mxu0 %v4591_v51 }
 0xbe3   : > { %16753 = vmatprep.subr.bf16.mxu0 %v24800_v57 }
 0xbe4   : > { %v4686_v10 = vpop.permute.xlu0 %4685 }
 0xbe8   : > { %v4737_v8 = vpop.permute.xlu0 %4736 }
 0xbe9   : > { %16744 = vmatmul.mubr.msk.bf16.vlgmr.msra.gmra.mrb[96].mxu0 %vm1688_vm3, %v4584_v21 }
 0xbea   : > { %16755 = vmatprep.mubr.msk.bf16.mxu0 %vm19083_vm2, %v24800_v57 }
 0xbec   : > { %v4788_v18 = vpop.permute.xlu0 %4787 }
 0xbf0   : > { %v4839_v48 = vpop.permute.xlu0 %4838 }
 0xbf4   : > { %v4890_v1 = vpop.permute.xlu0 %4889 }
 0xc04   : > { %v4166_v19 = vpop.xlane.xlu1 %4165 }
 0xc05   : > { %18050 = vrcp.f32 %v4166_v19 }
 0xc08   : > { %v4688_v16 = vpop.permute.xlu1 %4687 }
 0xc09   : > { %v4693_v60 = vsel %vm1688_vm3, %v4688_v16, 0 }
 0xc0a   : > { %16754 = vmatpush3.bf16.xpose.msra.mxu0 %v4693_v60 }
 0xc0b   : > { %16765 = vmatprep.subr.bf16.mxu0 %v24800_v57 }
 0xc0c   : > { %v4739_v62 = vpop.permute.xlu1 %4738 }
 0xc0d   : > { %v4744_v13 = vsel %vm1688_vm3, %v4739_v62, 0 }
 0xc0f   : > { %v18051_v36 = vpop.eup %18050 }
 0xc10   : > { %v4198_v32 = vmul.f32 %v18051_v36, %v20999_v63  ;;  %v4790_v58 = vpop.permute.xlu1 %4789 }
 0xc11   : > { %v4795_v27 = vsel %vm1688_vm3, %v4790_v58, 0  ;;  %16756 = vmatmul.mubr.msk.bf16.vlgmr.msra.gmra.mrb[100].mxu0 %vm1688_vm3, %v4686_v10 }
 0xc12   : > { %16766 = vmatpush3.bf16.xpose.msra.mxu0 %v4795_v27  ;;  %v4206_v37 = vpack.c.bf16 %v4198_v32, %v4197_v9  ;;  %16767 = vmatprep.mubr.msk.bf16.mxu0 %vm19083_vm2, %v24800_v57 }
 0xc13   : > { %16777 = vmatprep.subr.bf16.mxu0 %v24800_v57 }
 0xc14   : > { %v4841_v53 = vpop.permute.xlu1 %4840  ;;  %16738 = vmatmul.mubr.msk.bf16.vlgmr.msra.gmra.mrb[108].mxu1 %vm2086_vm4, %v4206_v37 }
 0xc15   : > { %16748 = vmatpush3.bf16.xpose.msra.mxu1 %v4642_v41  ;;  %16749 = vmatprep.mubr.msk.bf16.mxu1 %vm19083_vm2, %v24800_v57  ;;  %v4846_v14 = vsel %vm1688_vm3, %v4841_v53, 0 }
 0xc16   : > { %16759 = vmatprep.subr.bf16.mxu1 %v24800_v57 }
 0xc18   : > { %v4892_v50 = vpop.permute.xlu1 %4891 }
 0xc19   : > { %v4897_v63 = vsel %vm1688_vm3, %v4892_v50, 0  ;;  %16768 = vmatmul.mubr.msk.bf16.vlgmr.msra.gmra.mrb[104].mxu0 %vm1688_vm3, %v4788_v18 }
 0xc1a   : > { %16778 = vmatpush3.bf16.xpose.msra.mxu0 %v4897_v63  ;;  %16779 = vmatprep.mubr.msk.bf16.mxu0 %vm19083_vm2, %v24800_v57 }
 0xc1b   : > { %16789 = vmatprep.subr.bf16.mxu0 %v24800_v57 }
 0xc1c   : > { %16750 = vmatmul.mubr.msk.bf16.vlgmr.msra.gmra.mrb[112].mxu1 %vm1688_vm3, %v4635_v33  ;;  %v4943_v22 = vpop.permute.xlu1 %4942 }
 0xc1d   : > { %16760 = vmatpush3.bf16.xpose.msra.mxu1 %v4744_v13  ;;  %16761 = vmatprep.mubr.msk.bf16.mxu1 %vm19083_vm2, %v24800_v57  ;;  %v4948_v4 = vsel %vm1688_vm3, %v4943_v22, 0 }
 0xc1e   : > { %16771 = vmatprep.subr.bf16.mxu1 %v24800_v57 }
 0xc20   : > { %v4941_v12 = vpop.permute.xlu1 %4940 }
 0xc21   : > { %16780 = vmatmul.mubr.msk.bf16.vlgmr.msra.gmra.mrb[108].mxu0 %vm1688_vm3, %v4890_v1 }
 0xc22   : > { %16791 = vmatprep.mubr.msk.bf16.mxu0 %vm19083_vm2, %v24800_v57 }
 0xc24   : > { %16762 = vmatmul.mubr.msk.bf16.vlgmr.msra.gmra.mrb[116].mxu1 %vm1688_vm3, %v4737_v8 }
 0xc25   : > { %16772 = vmatpush3.bf16.xpose.msra.mxu1 %v4846_v14  ;;  %16773 = vmatprep.mubr.msk.bf16.mxu1 %vm19083_vm2, %v24800_v57 }
 0xc26   : > { %16783 = vmatprep.subr.bf16.mxu1 %v24800_v57 }
 0xc2c   : > { %16774 = vmatmul.mubr.msk.bf16.vlgmr.msra.gmra.mrb[120].mxu1 %vm1688_vm3, %v4839_v48 }
 0xc2d   : > { %16784 = vmatpush3.bf16.xpose.msra.mxu1 %v4948_v4  ;;  %16785 = vmatprep.mubr.msk.bf16.mxu1 %vm19083_vm2, %v24800_v57 }
 0xc2e   : > { %16795 = vmatprep.subr.bf16.mxu1 %v24800_v57 }
 0xc34   : > { %16786 = vmatmul.mubr.msk.bf16.vlgmr.msra.gmra.mrb[124].mxu1 %vm1688_vm3, %v4941_v12 }
 0xc35   : > { %16797 = vmatprep.mubr.msk.bf16.mxu1 %vm19083_vm2, %v24800_v57 }
 0xc7e   : > { %v21116_v29 = vpop.f32.mrb[80].mxu0 }
 0xc7f   : > { %v16697_v55 = vpop.f32.mrb[81].mxu0 }
 0xc80   : > { %v21118_v26 = vpop.f32.mrb[82].mxu0 }
 0xc81   : > { %v16698_v38 = vpop.f32.mrb[83].mxu0 }
 0xc82   : > { %v21120_v51 = vpop.f32.mrb[96].mxu1 }
 0xc83   : > { %v16703_v21 = vpop.f32.mrb[97].mxu1 }
 0xc84   : > { %v21122_v52 = vpop.f32.mrb[98].mxu1 }
 0xc85   : > { %v16704_v33 = vpop.f32.mrb[99].mxu1 }
 0xca2   : > { %v21124_v19 = vpop.f32.mrb[84].mxu0 }
 0xca3   : > { %v16709_v10 = vpop.f32.mrb[85].mxu0 }
 0xca4   : > { %v21126_v16 = vpop.f32.mrb[86].mxu0 }
 0xca5   : > { %24806 = vst [vmem:[#allocation67_spill] sm:$0xff] %v21126_v16  ;;  %v16710_v60 = vpop.f32.mrb[87].mxu0 }
 0xca7   : > { %v21128_v62 = vpop.f32.mrb[100].mxu1 }
 0xca8   : > { %v16715_v15 = vpop.f32.mrb[101].mxu1 }
 0xca9   : > { %v21130_v8 = vpop.f32.mrb[102].mxu1 }
 0xcaa   : > { %24807 = vst [vmem:[#allocation68_spill] sm:$0xff] %v21130_v8  ;;  %v16716_v36 = vpop.f32.mrb[103].mxu1 }
 0xcab   : > { %v21132_v9 = vpop.f32.mrb[88].mxu0 }
 0xcac   : > { %v16721_v32 = vpop.f32.mrb[89].mxu0 }
 0xcad   : > { %v21134_v58 = vpop.f32.mrb[90].mxu0 }
 0xcae   : > { %24808 = vst [vmem:[#allocation69_spill] sm:$0xff] %v21134_v58  ;;  %v16722_v27 = vpop.f32.mrb[91].mxu0 }
 0xcaf   : > { %v21136_v37 = vpop.f32.mrb[104].mxu1 }
 0xcb0   : > { %v16727_v41 = vpop.f32.mrb[105].mxu1 }
 0xcb1   : > { %v21138_v18 = vpop.f32.mrb[106].mxu1 }
 0xcb2   : > { %24809 = vst [vmem:[#allocation70_spill] sm:$0xff] %v21138_v18  ;;  %v16728_v53 = vpop.f32.mrb[107].mxu1 }
 0xcb3   : > { %v21140_v50 = vpop.f32.mrb[92].mxu0 }
 0xcb4   : > { %24810 = vst [vmem:[#allocation71_spill] sm:$0xff] %v21140_v50  ;;  %v16733_v63 = vpop.f32.mrb[93].mxu0 }
 0xcb5   : > { %v21142_v48 = vpop.f32.mrb[94].mxu0 }
 0xcb6   : > { %24811 = vst [vmem:[#allocation72_spill] sm:$0xff] %v21142_v48  ;;  %v16734_v13 = vpop.f32.mrb[95].mxu0 }
 0xcbc   : > { %v21144_v1 = vpop.f32.mrb[96].mxu0 }
 0xcbd   : > { %v16745_v14 = vpop.f32.mrb[97].mxu0  ;;  %v4991_v22 = vsel %vm2086_vm4, %v21144_v1, -inf }
 0xcbe   : > { %4992 = vmax.xlane.f32.xlu0 %v4991_v22  ;;  %v21148_v4 = vpop.f32.mrb[98].mxu0 }
 0xcbf   : > { %v16746_v12 = vpop.f32.mrb[99].mxu0  ;;  %v4994_v55 = vsel %vm2086_vm4, %v21148_v4, -inf }
 0xcc0   : > { %4995 = vmax.xlane.f32.xlu1 %v4994_v55 }
 0xce4   : > { %v21152_v38 = vpop.f32.mrb[100].mxu0 }
 0xce5   : > { %v16757_v21 = vpop.f32.mrb[101].mxu0 }
 0xce6   : > { %v21154_v33 = vpop.f32.mrb[102].mxu0 }
 0xce7   : > { %v21156_v10 = vpop.f32.mrb[108].mxu1  ;;  %v16758_v60 = vpop.f32.mrb[103].mxu0  ;;  %v5006_v15 = vsel %vm2086_vm4, %v21154_v33, -inf }
 0xce8   : > { %24812 = vst [vmem:[#allocation73_spill] sm:$0xff] %v21156_v10  ;;  %v16739_v36 = vpop.f32.mrb[109].mxu1  ;;  %5007 = vmax.xlane.f32.xlu1 %v5006_v15 }
 0xce9   : > { %v21160_v32 = vpop.f32.mrb[110].mxu1 }
 0xcea   : > { %24813 = vst [vmem:[#allocation74_spill] sm:$0xff] %v21160_v32  ;;  %v16740_v27 = vpop.f32.mrb[111].mxu1  ;;  %v5003_v32 = vsel %vm2086_vm4, %v21152_v38, -inf }
 0xcec   : > { %v21162_v41 = vpop.f32.mrb[104].mxu0 }
 0xced   : > { %v16769_v53 = vpop.f32.mrb[105].mxu0 }
 0xcee   : > { %v21164_v63 = vpop.f32.mrb[106].mxu0 }
 0xcef   : > { %v21166_v13 = vpop.f32.mrb[112].mxu1  ;;  %v16770_v14 = vpop.f32.mrb[107].mxu0 }
 0xcf0   : > { %v16751_v22 = vpop.f32.mrb[113].mxu1  ;;  %v4997_v12 = vsel %vm2086_vm4, %v21166_v13, -inf }
 0xcf1   : > { %4998 = vmax.xlane.f32.xlu0 %v4997_v12  ;;  %v21170_v55 = vpop.f32.mrb[114].mxu1 }
 0xcf2   : > { %v16752_v21 = vpop.f32.mrb[115].mxu1  ;;  %v5000_v15 = vsel %vm2086_vm4, %v21170_v55, -inf }
 0xcf4   : > { %v21172_v60 = vpop.f32.mrb[108].mxu0 }
 0xcf5   : > { %5001 = vmax.xlane.f32.xlu0 %v5000_v15  ;;  %v16781_v36 = vpop.f32.mrb[109].mxu0 }
 0xcf6   : > { %v21176_v27 = vpop.f32.mrb[110].mxu0  ;;  %v5018_v36 = vsel %vm2086_vm4, %v21164_v63, -inf }
 0xcf7   : > { %v21178_v53 = vpop.f32.mrb[116].mxu1  ;;  %v16782_v14 = vpop.f32.mrb[111].mxu0 }
 0xcf8   : > { %v16763_v22 = vpop.f32.mrb[117].mxu1  ;;  %v5009_v15 = vsel %vm2086_vm4, %v21178_v53, -inf }
 0xcf9   : > { %5004 = vmax.xlane.f32.xlu0 %v5003_v32  ;;  %v21182_v12 = vpop.f32.mrb[118].mxu1  ;;  %v5015_v32 = vsel %vm2086_vm4, %v21162_v41, -inf }
 0xcfa   : > { %v16764_v21 = vpop.f32.mrb[119].mxu1  ;;  %v5012_v48 = vsel %vm2086_vm4, %v21182_v12, -inf }
 0xcfb   : > { %5013 = vmax.xlane.f32.xlu1 %v5012_v48 }
 0xcfd   : > { %5010 = vmax.xlane.f32.xlu0 %v5009_v15 }
 0xcff   : > { %5019 = vmax.xlane.f32.xlu1 %v5018_v36  ;;  %v21190_v14 = vpop.f32.mrb[120].mxu1  ;;  %v5030_v36 = vsel %vm2086_vm4, %v21176_v27, -inf }
 0xd00   : > { %v16775_v22 = vpop.f32.mrb[121].mxu1  ;;  %v5021_v15 = vsel %vm2086_vm4, %v21190_v14, -inf }
 0xd01   : > { %5016 = vmax.xlane.f32.xlu0 %v5015_v32  ;;  %v21194_v21 = vpop.f32.mrb[122].mxu1  ;;  %v5027_v32 = vsel %vm2086_vm4, %v21172_v60, -inf }
 0xd02   : > { %v16776_v18 = vpop.f32.mrb[123].mxu1  ;;  %v5024_v48 = vsel %vm2086_vm4, %v21194_v21, -inf }
 0xd03   : > { %5025 = vmax.xlane.f32.xlu1 %v5024_v48 }
 0xd05   : > { %5022 = vmax.xlane.f32.xlu0 %v5021_v15 }
 0xd07   : > { %v21202_v58 = vpop.f32.mrb[124].mxu1  ;;  %5031 = vmax.xlane.f32.xlu1 %v5030_v36 }
 0xd08   : > { %v16787_v22 = vpop.f32.mrb[125].mxu1  ;;  %v5033_v48 = vsel %vm2086_vm4, %v21202_v58, -inf }
 0xd09   : > { %v21206_v8 = vpop.f32.mrb[126].mxu1  ;;  %5028 = vmax.xlane.f32.xlu0 %v5027_v32 }
 0xd0a   : > { %v16788_v18 = vpop.f32.mrb[127].mxu1  ;;  %v5036_v15 = vsel %vm2086_vm4, %v21206_v8, -inf }
 0xd0d   : > { %5034 = vmax.xlane.f32.xlu0 %v5033_v48 }
 0xd18   : > { %5222 = vrot.lane.b32.xlu1 %v20052_v6, %s19094_s9 }
 0xd1c   : > { %5269 = vrot.lane.b32.xlu1 %v20076_v43, %s19094_s9 }
 0xd20   : > { %5316 = vrot.lane.b32.xlu1 %v20072_v42, %s19094_s9 }
 0xd23   : > { %5175 = vrot.lane.b32.xlu0 %v20056_v30, %s19094_s9 }
 0xd27   : > { %5363 = vrot.lane.b32.xlu0 %v20096_v17, %s19094_s9 }
 0xd44   : > { %5037 = vmax.xlane.f32.xlu1 %v5036_v15 }
 0xd4b   : > { %v4993_v36 = vpop.xlane.xlu0 %4992 }
 0xd4c   : > { %v5039_v22 = vsub.f32 %v21144_v1, %v4993_v36 }
 0xd4d   : > { %v4996_v42 = vpop.xlane.xlu1 %4995 }
 0xd4e   : > { %v5055_v6 = vmul.f32 1.442695, %v5039_v22  ;;  %v5040_v17 = vsub.f32 %v21148_v4, %v4996_v42 }
 0xd50   : > { %18052 = vpow2.f32 %v5055_v6  ;;  %v5057_v32 = vmul.f32 1.442695, %v5040_v17 }
 0xd52   : > { %18054 = vpow2.f32 %v5057_v32 }
 0xd55   : > { %5410 = vrot.lane.b32.xlu1 %v20092_v56, %s19094_s9 }
 0xd5a   : > { %v21225_v43 = vpop.eup %18052 }
 0xd5b   : > { %v5087_v30 = vsel %vm2086_vm4, %v21225_v43, 0.0 }
 0xd5c   : > { %5088 = vadd.xlane.f32.xlu0 %v5087_v30  ;;  %v21230_v18 = vpop.eup %18054 }
 0xd5d   : > { %v5090_v1 = vsel %vm2086_vm4, %v21230_v18, 0.0 }
 0xd75   : > { %v5008_v48 = vpop.xlane.xlu1 %5007 }
 0xd76   : > { %v5044_v36 = vsub.f32 %v21154_v33, %v5008_v48 }
 0xd78   : > { %v5065_v4 = vmul.f32 1.442695, %v5044_v36 }
 0xd79   : > { %5091 = vadd.xlane.f32.xlu1 %v5090_v1 }
 0xd7e   : > { %v4999_v15 = vpop.xlane.xlu0 %4998 }
 0xd7f   : > { %v5041_v56 = vsub.f32 %v21166_v13, %v4999_v15 }
 0xd81   : > { %v5059_v22 = vmul.f32 1.442695, %v5041_v56 }
 0xd82   : > { %v5002_v6 = vpop.xlane.xlu0 %5001 }
 0xd83   : > { %18056 = vpow2.f32 %v5059_v22  ;;  %v5042_v30 = vsub.f32 %v21170_v55, %v5002_v6 }
 0xd85   : > { %v5061_v42 = vmul.f32 1.442695, %v5042_v30 }
 0xd86   : > { %v5005_v17 = vpop.xlane.xlu0 %5004 }
 0xd87   : > { %18058 = vpow2.f32 %v5061_v42  ;;  %v5043_v32 = vsub.f32 %v21152_v38, %v5005_v17 }
 0xd88   : > { %v5014_v10 = vpop.xlane.xlu1 %5013  ;;  %18060 = vpow2.f32 %v5065_v4 }
 0xd89   : > { %v5063_v1 = vmul.f32 1.442695, %v5043_v32  ;;  %v5046_v16 = vsub.f32 %v21182_v12, %v5014_v10 }
 0xd8a   : > { %v5011_v50 = vpop.xlane.xlu0 %5010 }
 0xd8b   : > { %18062 = vpow2.f32 %v5063_v1  ;;  %v5069_v13 = vmul.f32 1.442695, %v5046_v16  ;;  %v5045_v33 = vsub.f32 %v21178_v53, %v5011_v50 }
 0xd8c   : > { %v5020_v48 = vpop.xlane.xlu1 %5019 }
 0xd8d   : > { %v21240_v15 = vpop.eup %18056  ;;  %18064 = vpow2.f32 %v5069_v13  ;;  %v5067_v55 = vmul.f32 1.442695, %v5045_v33  ;;  %v5048_v56 = vsub.f32 %v21164_v63, %v5020_v48 }
 0xd8e   : > { %v5017_v36 = vpop.xlane.xlu0 %5016  ;;  %v5093_v38 = vsel %vm2086_vm4, %v21240_v15, 0.0 }
 0xd8f   : > { %18066 = vpow2.f32 %v5067_v55  ;;  %v5073_v22 = vmul.f32 1.442695, %v5048_v56  ;;  %v5047_v10 = vsub.f32 %v21162_v41, %v5017_v36  ;;  %5094 = vadd.xlane.f32.xlu0 %v5093_v38 }
 0xd90   : > { %v5026_v12 = vpop.xlane.xlu1 %5025 }
 0xd91   : > { %v21246_v16 = vpop.eup %18058  ;;  %18068 = vpow2.f32 %v5073_v22  ;;  %v5071_v50 = vmul.f32 1.442695, %v5047_v10  ;;  %v5050_v53 = vsub.f32 %v21194_v21, %v5026_v12 }
 0xd92   : > { %v5023_v6 = vpop.xlane.xlu0 %5022  ;;  %v5096_v63 = vsel %vm2086_vm4, %v21246_v16, 0.0  ;;  %v21251_v30 = vpop.eup %18060 }
 0xd93   : > { %18070 = vpow2.f32 %v5071_v50  ;;  %v5077_v4 = vmul.f32 1.442695, %v5050_v53  ;;  %v5049_v42 = vsub.f32 %v21190_v14, %v5023_v6  ;;  %5097 = vadd.xlane.f32.xlu1 %v5096_v63  ;;  %v5102_v21 = vsel %vm2086_vm4, %v21251_v30, 0.0 }
 0xd94   : > { %v5032_v41 = vpop.xlane.xlu1 %5031 }
 0xd95   : > { %v21254_v17 = vpop.eup %18062  ;;  %18072 = vpow2.f32 %v5077_v4  ;;  %v5075_v32 = vmul.f32 1.442695, %v5049_v42  ;;  %v5052_v1 = vsub.f32 %v21176_v27, %v5032_v41 }
 0xd96   : > { %v5029_v13 = vpop.xlane.xlu0 %5028  ;;  %v5099_v33 = vsel %vm2086_vm4, %v21254_v17, 0.0 }
 0xd97   : > { %v21261_v48 = vpop.eup %18064  ;;  %18074 = vpow2.f32 %v5075_v32  ;;  %v5081_v55 = vmul.f32 1.442695, %v5052_v1  ;;  %v5051_v14 = vsub.f32 %v21172_v60, %v5029_v13  ;;  %5103 = vadd.xlane.f32.xlu1 %v5102_v21  ;;  %5100 = vadd.xlane.f32.xlu0 %v5099_v33 }
 0xd98   : > { %v5223_v56 = vpop.permute.xlu1 %5222  ;;  %v5108_v22 = vsel %vm2086_vm4, %v21261_v48, 0.0 }
 0xd99   : > { %v21264_v36 = vpop.eup %18066  ;;  %18076 = vpow2.f32 %v5081_v55  ;;  %v5079_v27 = vmul.f32 1.442695, %v5051_v14  ;;  %16796 = vmatpush3.bf16.msra.mxu1 %v5223_v56  ;;  %v15660_v56 = vmul.f32 -1.442695, %v20042_v24 }
 0xd9a   : > { %v5035_v38 = vpop.xlane.xlu0 %5034  ;;  %v5105_v10 = vsel %vm2086_vm4, %v21264_v36, 0.0  ;;  %16807 = vmatprep.subr.bf16.mxu1 %v24800_v57 }
 0xd9b   : > { %v21271_v12 = vpop.eup %18068  ;;  %18078 = vpow2.f32 %v5079_v27  ;;  %v5053_v60 = vsub.f32 %v21202_v58, %v5035_v38  ;;  %5109 = vadd.xlane.f32.xlu1 %v5108_v22  ;;  %5106 = vadd.xlane.f32.xlu0 %v5105_v10  ;;  %v15662_v27 = vmul.f32 -1.442695, %v20038_v47  ;;  %v15664_v47 = vmul.f32 -1.442695, %v20066_v7 }
 0xd9c   : > { %v5114_v63 = vsel %vm2086_vm4, %v21271_v12, 0.0 }
 0xd9d   : > { %v21274_v50 = vpop.eup %18070  ;;  %v5083_v53 = vmul.f32 1.442695, %v5053_v60  ;;  %v21307_v60 = vpop.permute.xlu1 %5269 }
 0xd9e   : > { %v5176_v6 = vpop.permute.xlu0 %5175  ;;  %v5111_v4 = vsel %vm2086_vm4, %v21274_v50, 0.0 }
 0xd9f   : > { %v21280_v42 = vpop.eup %18072  ;;  %18080 = vpow2.f32 %v5083_v53  ;;  %5115 = vadd.xlane.f32.xlu1 %v5114_v63  ;;  %5112 = vadd.xlane.f32.xlu0 %v5111_v4 }
 0xda0   : > { %16790 = vmatpush3.bf16.msra.mxu0 %v5176_v6  ;;  %v5120_v58 = vsel %vm2086_vm4, %v21280_v42, 0.0  ;;  %18082 = vpow2.f32 %v15660_v56 }
 0xda1   : > { %v21282_v41 = vpop.eup %18074  ;;  %16801 = vmatprep.subr.bf16.mxu0 %v24800_v57  ;;  %18084 = vpow2.f32 %v15662_v27  ;;  %v21312_v53 = vpop.permute.xlu1 %5316  ;;  %v15672_v27 = vmul.f32 -1.442695, %v20106_v0 }
 0xda2   : > { %v5117_v32 = vsel %vm2086_vm4, %v21282_v41, 0.0 }
 0xda3   : > { %v21289_v1 = vpop.eup %18076  ;;  %5121 = vadd.xlane.f32.xlu1 %v5120_v58  ;;  %5118 = vadd.xlane.f32.xlu0 %v5117_v32  ;;  %v15668_v32 = vmul.f32 -1.442695, %v20084_v54 }
 0xda4   : > { %v5126_v21 = vsel %vm2086_vm4, %v21289_v1, 0.0 }
 0xda5   : > { %v21291_v13 = vpop.eup %18078 }
 0xda6   : > { %v5123_v33 = vsel %vm2086_vm4, %v21291_v13, 0.0 }
 0xda7   : > { %5127 = vadd.xlane.f32.xlu1 %v5126_v21  ;;  %5124 = vadd.xlane.f32.xlu0 %v5123_v33  ;;  %v15670_v21 = vmul.f32 -1.442695, %v20080_v49 }
 0xda9   : > { %v21297_v55 = vpop.eup %18080 }
 0xdaa   : > { %v5129_v14 = vsel %vm2086_vm4, %v21297_v55, 0.0  ;;  %v18083_v38 = vpop.eup %18082 }
 0xdab   : > { %5130 = vadd.xlane.f32.xlu0 %v5129_v14  ;;  %v1629_v22 = vadd.f32 1.0, %v18083_v38  ;;  %v18085_v10 = vpop.eup %18084 }
 0xdac   : > { %v1631_v24 = vadd.f32 1.0, %v18085_v10 }
 0xdad   : > { %18086 = vrcp.f32 %v1629_v22 }
 0xdae   : > { %18088 = vrcp.f32 %v1631_v24 }
 0xdaf   : > { %18090 = vpow2.f32 %v15664_v47 }
 0xdb7   : > { %v18087_v6 = vpop.eup %18086 }
 0xdb8   : > { %v18089_v7 = vpop.eup %18088 }
 0xdc1   : > { %5457 = vrot.lane.b32.xlu0 %v20116_v25, %s19094_s9  ;;  %v15666_v25 = vmul.f32 -1.442695, %v20062_v34 }
 0xdc3   : > { %18092 = vpow2.f32 %v15666_v25 }
 0xdc5   : > { %5567 = vrot.lane.b32.xlu0 %v20789_v45, %s19095_s21 }
 0xdc9   : > { %5571 = vrot.lane.b32.xlu0 %v20793_v31, %s19095_s21 }
 0xdcd   : > { %5631 = vrot.lane.b32.xlu0 %v21116_v29, %s19096_s26  ;;  %v18091_v29 = vpop.eup %18090 }
 0xdce   : > { %v1633_v34 = vadd.f32 1.0, %v18091_v29  ;;  %v18093_v4 = vpop.eup %18092 }
 0xdd1   : > { %v5038_v45 = vpop.xlane.xlu1 %5037  ;;  %5635 = vrot.lane.b32.xlu0 %v21120_v51, %s19096_s26 }
 0xdd2   : > { %v5054_v31 = vsub.f32 %v21206_v8, %v5038_v45  ;;  %v1635_v8 = vadd.f32 1.0, %v18093_v4  ;;  %v24820_v4 = vld [vmem:[#allocation68_spill] sm:$0xff] }
 0xdd4   : > { %v5085_v63 = vmul.f32 1.442695, %v5054_v31 }
 0xdd5   : > { %5808 = vrot.lane.b32.xlu0 %v18087_v6, %s19097_s7  ;;  %v24814_v6 = vld [vmem:[#allocation62_spill] sm:$0xff] }
 0xdd6   : > { %18094 = vpow2.f32 %v5085_v63 }
 0xdd7   : > { %18096 = vrcp.f32 %v1633_v34 }
 0xdd8   : > { %18098 = vrcp.f32 %v1635_v8 }
 0xdd9   : > { %5812 = vrot.lane.b32.xlu0 %v18089_v7, %s19097_s7  ;;  %18100 = vpow2.f32 %v15668_v32  ;;  %v24815_v7 = vld [vmem:[#allocation71_spill] sm:$0xff] }
 0xddd   : > { %5575 = vrot.lane.b32.xlu0 %v20797_v3, %s19095_s21  ;;  %v15661_v3 = vmul.f32 -1.442695, %v20044_v59 }
 0xddf   : > { %18102 = vpow2.f32 %v15661_v3 }
 0xde0   : > { %v21324_v58 = vpop.eup %18094  ;;  %18104 = vpow2.f32 %v15670_v21 }
 0xde1   : > { %5579 = vrot.lane.b32.xlu0 %v20801_v11, %s19095_s21  ;;  %v5132_v51 = vsel %vm2086_vm4, %v21324_v58, 0.0  ;;  %v15663_v11 = vmul.f32 -1.442695, %v20040_v23  ;;  %v18097_v33 = vpop.eup %18096 }
 0xde2   : > { %5133 = vadd.xlane.f32.xlu1 %v5132_v51  ;;  %v18099_v54 = vpop.eup %18098 }
 0xde3   : > { %18106 = vpow2.f32 %v15663_v11 }
 0xde5   : > { %5639 = vrot.lane.b32.xlu0 %v21124_v19, %s19096_s26  ;;  %v18101_v19 = vpop.eup %18100 }
 0xde6   : > { %v1637_v49 = vadd.f32 1.0, %v18101_v19 }
 0xde8   : > { %18108 = vrcp.f32 %v1637_v49 }
 0xde9   : > { %5643 = vrot.lane.b32.xlu0 %v21128_v62, %s19096_s26  ;;  %v18103_v59 = vpop.eup %18102 }
 0xdea   : > { %v18105_v62 = vpop.eup %18104  ;;  %v1630_v23 = vadd.f32 1.0, %v18103_v59 }
 0xdeb   : > { %v1639_v56 = vadd.f32 1.0, %v18105_v62 }
 0xdec   : > { %18110 = vrcp.f32 %v1630_v23 }
 0xded   : > { %5816 = vrot.lane.b32.xlu0 %v18097_v33, %s19097_s7  ;;  %v18107_v14 = vpop.eup %18106  ;;  %18112 = vrcp.f32 %v1639_v56  ;;  %v24822_v56 = vld [vmem:[#allocation64_spill] sm:$0xff] }
 0xdf1   : > { %5820 = vrot.lane.b32.xlu0 %v18099_v54, %s19097_s7  ;;  %v24821_v54 = vld [vmem:[#allocation63_spill] sm:$0xff] }
 0xdf3   : > { %5504 = vrot.lane.b32.xlu1 %v20112_v2, %s19094_s9  ;;  %v1632_v2 = vadd.f32 1.0, %v18107_v14 }
 0xdf5   : > { %5583 = vrot.lane.b32.xlu0 %v20805_v46, %s19095_s21  ;;  %v21353_v46 = vpop.permute.xlu0 %5363  ;;  %18114 = vrcp.f32 %v1632_v2 }
 0xdf6   : > { %18116 = vpow2.f32 %v15672_v27 }
 0xdf7   : > { %5569 = vrot.lane.b32.xlu1 %v20791_v5, %s19095_s21  ;;  %v15665_v5 = vmul.f32 -1.442695, %v20068_v28 }
 0xdf9   : > { %5587 = vrot.lane.b32.xlu0 %v20809_v20, %s19095_s21  ;;  %v21361_v20 = vpop.permute.xlu1 %5410  ;;  %v5089_v0 = vpop.xlane.xlu0 %5088  ;;  %18118 = vpow2.f32 %v15665_v5 }
 0xdfa   : > { %18120 = vrcp.f32 %v5089_v0 }
 0xdfb   : > { %5573 = vrot.lane.b32.xlu1 %v20795_v40, %s19095_s21  ;;  %v15667_v40 = vmul.f32 -1.442695, %v20064_v35 }
 0xdfd   : > { %5647 = vrot.lane.b32.xlu0 %v21132_v9, %s19096_s26  ;;  %v18109_v9 = vpop.eup %18108  ;;  %18122 = vpow2.f32 %v15667_v40 }
 0xdfe   : > { %v18111_v28 = vpop.eup %18110 }
 0xdff   : > { %5633 = vrot.lane.b32.xlu1 %v21118_v26, %s19096_s26 }
 0xe01   : > { %5651 = vrot.lane.b32.xlu0 %v21136_v37, %s19096_s26  ;;  %v18113_v37 = vpop.eup %18112 }
 0xe02   : > { %v18115_v35 = vpop.eup %18114 }
 0xe03   : > { %5637 = vrot.lane.b32.xlu1 %v21122_v52, %s19096_s26  ;;  %v18117_v38 = vpop.eup %18116 }
 0xe04   : > { %v18119_v22 = vpop.eup %18118  ;;  %v1641_v52 = vadd.f32 1.0, %v18117_v38 }
 0xe05   : > { %5824 = vrot.lane.b32.xlu0 %v18109_v9, %s19097_s7  ;;  %v18121_v10 = vpop.eup %18120  ;;  %v1634_v47 = vadd.f32 1.0, %v18119_v22 }
 0xe06   : > { %v5092_v26 = vpop.xlane.xlu1 %5091  ;;  %v5151_v45 = vmul.f32 %v18121_v10, %v21225_v43  ;;  %v24818_v43 = vld [vmem:[#allocation73_spill] sm:$0xff] }
 0xe07   : > { %18124 = vrcp.f32 %v5092_v26  ;;  %5810 = vrot.lane.b32.xlu1 %v18111_v28, %s19097_s7  ;;  %v18123_v24 = vpop.eup %18122  ;;  %v24823_v26 = vld [vmem:[#allocation45_spill] sm:$0xff] }
 0xe08   : > { %18126 = vrcp.f32 %v1641_v52 }
 0xe09   : > { %5828 = vrot.lane.b32.xlu0 %v18113_v37, %s19097_s7  ;;  %18128 = vrcp.f32 %v1634_v47  ;;  %v15673_v37 = vmul.f32 -1.442695, %v24823_v26 }
 0xe0b   : > { %5814 = vrot.lane.b32.xlu1 %v18115_v35, %s19097_s7  ;;  %v24824_v35 = vld [vmem:[#allocation69_spill] sm:$0xff] }
 0xe0d   : > { %5591 = vrot.lane.b32.xlu0 %v20813_v44, %s19095_s21  ;;  %v1636_v44 = vadd.f32 1.0, %v18123_v24  ;;  %v24825_v24 = vld [vmem:[#allocation70_spill] sm:$0xff] }
 0xe0f   : > { %5577 = vrot.lane.b32.xlu1 %v20799_v61, %s19095_s21  ;;  %v24816_v61 = vld [vmem:[#allocation42_spill] sm:$0xff]  ;;  %18130 = vrcp.f32 %v1636_v44 }
 0xe10   : > { %v15669_v29 = vmul.f32 -1.442695, %v24816_v61 }
 0xe11   : > { %v18125_v25 = vpop.eup %18124  ;;  %5595 = vrot.lane.b32.xlu0 %v20817_v39, %s19095_s21  ;;  %v24817_v39 = vld [vmem:[#allocation67_spill] sm:$0xff] }
 0xe12   : > { %v5152_v31 = vmul.f32 %v18125_v25, %v21230_v18  ;;  %v24819_v18 = vld [vmem:[#allocation41_spill] sm:$0xff]  ;;  %18132 = vpow2.f32 %v15669_v29  ;;  %v18127_v51 = vpop.eup %18126 }
 0xe13   : > { %5581 = vrot.lane.b32.xlu1 %v24814_v6, %s19095_s21  ;;  %v15671_v34 = vmul.f32 -1.442695, %v24819_v18  ;;  %v18129_v8 = vpop.eup %18128 }
 0xe14   : > { %v5167_v63 = vpack.c.bf16 %v5152_v31, %v5151_v45 }
 0xe15   : > { %5655 = vrot.lane.b32.xlu0 %v24815_v7, %s19096_s26  ;;  %18134 = vpow2.f32 %v15671_v34  ;;  %v24826_v34 = vld [vmem:[#allocation65_spill] sm:$0xff] }
 0xe16   : > { %16792 = vmatmul.mubr.msk.bf16.vlgmr.msra.gmra.mrb[112].mxu0 %vm2086_vm4, %v5167_v63 }
 0xe17   : > { %16802 = vmatpush3.bf16.msra.mxu0 %v21307_v60  ;;  %5641 = vrot.lane.b32.xlu1 %v24817_v39, %s19096_s26 }
 0xe18   : > { %16803 = vmatprep.mubr.msk.bf16.mxu0 %vm19083_vm2, %v24800_v57  ;;  %16813 = vmatprep.subr.bf16.mxu0 %v24800_v57 }
 0xe19   : > { %5659 = vrot.lane.b32.xlu0 %v24818_v43, %s19096_s26  ;;  %v18131_v3 = vpop.eup %18130 }
 0xe1b   : > { %5645 = vrot.lane.b32.xlu1 %v24820_v4, %s19096_s26 }
 0xe1c   : > { %v5095_v60 = vpop.xlane.xlu0 %5094  ;;  %v18133_v33 = vpop.eup %18132 }
 0xe1d   : > { %5832 = vrot.lane.b32.xlu0 %v18127_v51, %s19097_s7  ;;  %18136 = vrcp.f32 %v5095_v60  ;;  %v1638_v59 = vadd.f32 1.0, %v18133_v33 }
 0xe1f   : > { %5818 = vrot.lane.b32.xlu1 %v18129_v8, %s19097_s7  ;;  %v18135_v19 = vpop.eup %18134 }
 0xe20   : > { %v5098_v32 = vpop.xlane.xlu1 %5097  ;;  %v1640_v2 = vadd.f32 1.0, %v18135_v19 }
 0xe21   : > { %18138 = vrcp.f32 %v5098_v32 }
 0xe23   : > { %5822 = vrot.lane.b32.xlu1 %v18131_v3, %s19097_s7  ;;  %v24828_v3 = vld [vmem:[#allocation72_spill] sm:$0xff] }
 0xe24   : > { %v5104_v21 = vpop.xlane.xlu1 %5103  ;;  %v5101_v11 = vpop.xlane.xlu0 %5100 }
 0xe25   : > { %18140 = vrcp.f32 %v5104_v21  ;;  %v24829_v21 = vld [vmem:[#allocation74_spill] sm:$0xff] }
 0xe26   : > { %18142 = vrcp.f32 %v5101_v11 }
 0xe27   : > { %5585 = vrot.lane.b32.xlu1 %v24821_v54, %s19095_s21  ;;  %v18137_v23 = vpop.eup %18136 }
 0xe28   : > { %v5110_v49 = vpop.xlane.xlu1 %5109  ;;  %v5107_v62 = vpop.xlane.xlu0 %5106  ;;  %v5153_v27 = vmul.f32 %v18137_v23, %v21240_v15 }
 0xe29   : > { %18144 = vrcp.f32 %v5110_v49 }
 0xe2a   : > { %18146 = vrcp.f32 %v5107_v62 }
 0xe2b   : > { %v18139_v14 = vpop.eup %18138  ;;  %5589 = vrot.lane.b32.xlu1 %v24822_v56, %s19095_s21  ;;  %18148 = vrcp.f32 %v1638_v59 }
 0xe2c   : > { %v5154_v5 = vmul.f32 %v18139_v14, %v21246_v16  ;;  %v5116_v40 = vpop.xlane.xlu1 %5115  ;;  %v5113_v0 = vpop.xlane.xlu0 %5112 }
 0xe2d   : > { %18150 = vrcp.f32 %v5116_v40 }
 0xe2e   : > { %18152 = vrcp.f32 %v5113_v0  ;;  %v5168_v9 = vpack.c.bf16 %v5154_v5, %v5153_v27  ;;  %v17812_v5 = vld [vmem:[%s24830_s30] sm:$0xff]   ;;  %s24850_s30 = scalar_lea.vmem [#allocation10], %s19672_s23 }
 0xe2f   : > { %v18141_v28 = vpop.eup %18140  ;;  %5649 = vrot.lane.b32.xlu1 %v24824_v35, %s19096_s26  ;;  %18154 = vrcp.f32 %v1640_v2 }
 0xe30   : > { %v18143_v38 = vpop.eup %18142  ;;  %v5156_v22 = vmul.f32 %v18141_v28, %v21251_v30  ;;  %v5122_v52 = vpop.xlane.xlu1 %5121  ;;  %16798 = vmatmul.mubr.msk.bf16.vlgmr.msra.gmra.mrb[128].mxu1 %vm2086_vm4, %v5168_v9 }
 0xe31   : > { %v5119_v15 = vpop.xlane.xlu0 %5118  ;;  %v5155_v16 = vmul.f32 %v18143_v38, %v21254_v17  ;;  %18156 = vrcp.f32 %v5122_v52  ;;  %16808 = vmatpush3.bf16.msra.mxu1 %v21312_v53  ;;  %16809 = vmatprep.mubr.msk.bf16.mxu1 %vm19083_vm2, %v24800_v57 }
 0xe32   : > { %18158 = vrcp.f32 %v5119_v15  ;;  %16819 = vmatprep.subr.bf16.mxu1 %v24800_v57  ;;  %v17813_v15 = vld [vmem:[%s24831_s17 + $0x8] sm:$0xff]   ;;  %s24870_s17 = scalar_lea.vmem [#allocation13], %s19672_s23 }
 0xe33   : > { %v18145_v10 = vpop.eup %18144  ;;  %18160 = vpow2.f32 %v15673_v37  ;;  %5653 = vrot.lane.b32.xlu1 %v24825_v24, %s19096_s26  ;;  %v5169_v30 = vpack.c.bf16 %v5156_v22, %v5155_v16 }
 0xe34   : > { %v18147_v47 = vpop.eup %18146  ;;  %v5158_v25 = vmul.f32 %v18145_v10, %v21261_v48  ;;  %v5128_v45 = vpop.xlane.xlu1 %5127 }
 0xe35   : > { %v5125_v17 = vpop.xlane.xlu0 %5124  ;;  %v5157_v31 = vmul.f32 %v18147_v47, %v21264_v36  ;;  %18162 = vrcp.f32 %v5128_v45  ;;  %16804 = vmatmul.mubr.msk.bf16.vlgmr.msra.gmra.mrb[116].mxu0 %vm2086_vm4, %v5169_v30  ;;  %v18149_v53 = vpop.eup %18148 }
 0xe36   : > { %16814 = vmatpush3.bf16.msra.mxu0 %v21353_v46  ;;  %18164 = vrcp.f32 %v5125_v17  ;;  %16815 = vmatprep.mubr.msk.bf16.mxu0 %vm19083_vm2, %v24800_v57 }
 0xe37   : > { %v18151_v6 = vpop.eup %18150  ;;  %5826 = vrot.lane.b32.xlu1 %v18149_v53, %s19097_s7  ;;  %v5170_v44 = vpack.c.bf16 %v5158_v25, %v5157_v31  ;;  %16825 = vmatprep.subr.bf16.mxu0 %v24800_v57 }
 0xe38   : > { %v18153_v48 = vpop.eup %18152  ;;  %v5160_v63 = vmul.f32 %v18151_v6, %v21271_v12 }
 0xe39   : > { %v5131_v36 = vpop.xlane.xlu0 %5130  ;;  %v5159_v7 = vmul.f32 %v18153_v48, %v21274_v50  ;;  %16810 = vmatmul.mubr.msk.bf16.vlgmr.msra.gmra.mrb[132].mxu1 %vm2086_vm4, %v5170_v44  ;;  %v18155_v61 = vpop.eup %18154 }
 0xe3a   : > { %16820 = vmatpush3.bf16.msra.mxu1 %v21361_v20  ;;  %16821 = vmatprep.mubr.msk.bf16.mxu1 %vm19083_vm2, %v24800_v57 }
 0xe3b   : > { %v18157_v46 = vpop.eup %18156  ;;  %5830 = vrot.lane.b32.xlu1 %v18155_v61, %s19097_s7  ;;  %v5171_v29 = vpack.c.bf16 %v5160_v63, %v5159_v7  ;;  %16831 = vmatprep.subr.bf16.mxu1 %v24800_v57 }
 0xe3c   : > { %v18159_v39 = vpop.eup %18158  ;;  %v5162_v12 = vmul.f32 %v18157_v46, %v21280_v42 }
 0xe3d   : > { %v5458_v43 = vpop.permute.xlu0 %5457  ;;  %v18161_v18 = vpop.eup %18160  ;;  %v5161_v50 = vmul.f32 %v18159_v39, %v21282_v41  ;;  %16816 = vmatmul.mubr.msk.bf16.vlgmr.msra.gmra.mrb[120].mxu0 %vm2086_vm4, %v5171_v29  ;;  %v24827_v41 = vld [vmem:[#allocation66_spill] sm:$0xff] }
 0xe3e   : > { %16826 = vmatpush3.bf16.msra.mxu0 %v5458_v43  ;;  %16827 = vmatprep.mubr.msk.bf16.mxu0 %vm19083_vm2, %v24800_v57  ;;  %v1642_v60 = vadd.f32 1.0, %v18161_v18 }
 0xe3f   : > { %v18163_v20 = vpop.eup %18162  ;;  %5593 = vrot.lane.b32.xlu1 %v24826_v34, %s19095_s21  ;;  %v5172_v4 = vpack.c.bf16 %v5162_v12, %v5161_v50  ;;  %16837 = vmatprep.subr.bf16.mxu0 %v17812_v5 }
 0xe40   : > { %v18165_v51 = vpop.eup %18164  ;;  %v5164_v8 = vmul.f32 %v18163_v20, %v21289_v1  ;;  %18166 = vrcp.f32 %v1642_v60 }
 0xe41   : > { %v5163_v42 = vmul.f32 %v18165_v51, %v21291_v13  ;;  %16822 = vmatmul.mubr.msk.bf16.vlgmr.msra.gmra.mrb[136].mxu1 %vm2086_vm4, %v5172_v4  ;;  %18168 = vrcp.f32 %v5131_v36  ;;  %v21454_v62 = vpop.permute.xlu0 %5567 }
 0xe42   : > { %16833 = vmatprep.mubr.msk.bf16.mxu1 %vm19083_vm2, %v24800_v57 }
 0xe43   : > { %5597 = vrot.lane.b32.xlu1 %v24827_v41, %s19095_s21  ;;  %v5173_v32 = vpack.c.bf16 %v5164_v8, %v5163_v42 }
 0xe45   : > { %16828 = vmatmul.mubr.msk.bf16.vlgmr.msra.gmra.mrb[124].mxu0 %vm2086_vm4, %v5173_v32  ;;  %v21458_v14 = vpop.permute.xlu0 %5571 }
 0xe46   : > { %16838 = vmatpush3.bf16.msra.mxu0 %v17812_v5 }
 0xe47   : > { %5657 = vrot.lane.b32.xlu1 %v24828_v3, %s19096_s26  ;;  %16839 = vmatprep.subr.bf16.mxu0 %v17813_v15 }
 0xe49   : > { %v21462_v2 = vpop.permute.xlu0 %5631 }
 0xe4a   : > { %v18167_v1 = vpop.eup %18166  ;;  %16840 = vmatpush3.bf16.msra.mxu0 %v17813_v15 }
 0xe4b   : > { %5661 = vrot.lane.b32.xlu1 %v24829_v21, %s19096_s26  ;;  %v18169_v33 = vpop.eup %18168  ;;  %16877 = vmatprep.subr.bf16.mxu0 %v24800_v57 }
 0xe4c   : > { %v5165_v19 = vmul.f32 %v18169_v33, %v21297_v55 }
 0xe4d   : > { %v21468_v55 = vpop.permute.xlu0 %5635 }
 0xe4f   : > { %5834 = vrot.lane.b32.xlu1 %v18167_v1, %s19097_s7 }
 0xe51   : > { %v21473_v28 = vpop.permute.xlu0 %5808 }
 0xe55   : > { %v21478_v35 = vpop.permute.xlu0 %5812 }
 0xe59   : > { %v21482_v22 = vpop.permute.xlu0 %5575 }
 0xe5d   : > { %v21488_v16 = vpop.permute.xlu0 %5579 }
 0xe61   : > { %v21493_v30 = vpop.permute.xlu0 %5639 }
 0xe65   : > { %v21500_v6 = vpop.permute.xlu0 %5643 }
 0xe69   : > { %v21507_v29 = vpop.permute.xlu0 %5816 }
 0xe6d   : > { %v21514_v4 = vpop.permute.xlu0 %5820 }
 0xe6f   : > { %v5134_v13 = vpop.xlane.xlu1 %5133 }
 0xe70   : > { %18170 = vrcp.f32 %v5134_v13 }
 0xe71   : > { %v21521_v21 = vpop.permute.xlu0 %5583 }
 0xe73   : > { %v5505_v11 = vpop.permute.xlu1 %5504 }
 0xe74   : > { %16832 = vmatpush3.bf16.msra.mxu1 %v5505_v11 }
 0xe75   : > { %v21525_v13 = vpop.permute.xlu0 %5587 }
 0xe77   : > { %v21456_v23 = vpop.permute.xlu1 %5569 }
 0xe79   : > { %v21529_v33 = vpop.permute.xlu0 %5647 }
 0xe7a   : > { %v18171_v54 = vpop.eup %18170 }
 0xe7b   : > { %v5166_v59 = vmul.f32 %v18171_v54, %v21324_v58  ;;  %v21460_v56 = vpop.permute.xlu1 %5573 }
 0xe7d   : > { %v5174_v49 = vpack.c.bf16 %v5166_v59, %v5165_v19  ;;  %v21533_v19 = vpop.permute.xlu0 %5651 }
 0xe7f   : > { %16834 = vmatmul.mubr.msk.bf16.vlgmr.msra.gmra.mrb[140].mxu1 %vm2086_vm4, %v5174_v49  ;;  %v21464_v27 = vpop.permute.xlu1 %5633 }
 0xe81   : > { %v21537_v49 = vpop.permute.xlu0 %5824 }
 0xe83   : > { %v21470_v58 = vpop.permute.xlu1 %5637 }
 0xe85   : > { %v21543_v15 = vpop.permute.xlu0 %5828 }
 0xe87   : > { %v21476_v37 = vpop.permute.xlu1 %5810 }
 0xe8b   : > { %v21480_v38 = vpop.permute.xlu1 %5814 }
 0xe8f   : > { %v21484_v52 = vpop.permute.xlu1 %5577 }
 0xe93   : > { %v21491_v10 = vpop.permute.xlu1 %5581 }
 0xe97   : > { %v21496_v45 = vpop.permute.xlu1 %5641 }
 0xe9b   : > { %v21503_v63 = vpop.permute.xlu1 %5645 }
 0xe9f   : > { %v21510_v43 = vpop.permute.xlu1 %5818 }
 0xea3   : > { %v21517_v8 = vpop.permute.xlu1 %5822 }
 0xea7   : > { %v21523_v1 = vpop.permute.xlu1 %5585 }
 0xeab   : > { %v21527_v11 = vpop.permute.xlu1 %5589 }
 0xeaf   : > { %v21531_v54 = vpop.permute.xlu1 %5649 }
 0xeb3   : > { %v21535_v59 = vpop.permute.xlu1 %5653 }
 0xeb7   : > { %v21539_v5 = vpop.permute.xlu1 %5826 }
 0xee9   : > { %v5215_v40 = vpop.f32.mrb[112].mxu0 }
 0xeea   : > { %5695 = vrot.lane.b32.xlu0 %v5215_v40, %s19098_s12  ;;  %v16793_v0 = vpop.f32.mrb[113].mxu0  ;;  %v24832_v40 = vld [vmem:[#allocation43_spill] sm:$0xff] }
 0xeeb   : > { %v5218_v9 = vpop.f32.mrb[114].mxu0  ;;  %v15674_v0 = vmul.f32 -1.442695, %v24832_v40 }
 0xeec   : > { %5697 = vrot.lane.b32.xlu1 %v5218_v9, %s19098_s12  ;;  %v16794_v26 = vpop.f32.mrb[115].mxu0  ;;  %v24833_v9 = vld [vmem:[#allocation44_spill] sm:$0xff] }
 0xeed   : > { %v15675_v26 = vmul.f32 -1.442695, %v24833_v9  ;;  %18172 = vpow2.f32 %v15674_v0  ;;  %v24835_v0 = vld [vmem:[#allocation47_spill] sm:$0xff] }
 0xeee   : > { %v5744_v9 = vsel %vm1688_vm3, %v24835_v0, %v21456_v23 }
 0xeef   : > { %18174 = vpow2.f32 %v15675_v26 }
 0xf03   : > { %v5262_v24 = vpop.f32.mrb[128].mxu1 }
 0xf04   : > { %5699 = vrot.lane.b32.xlu0 %v5262_v24, %s19098_s12  ;;  %v16799_v47 = vpop.f32.mrb[129].mxu1  ;;  %v21545_v24 = vpop.permute.xlu1 %5830 }
 0xf05   : > { %v5265_v25 = vpop.f32.mrb[130].mxu1  ;;  %v21547_v47 = vpop.permute.xlu0 %5591 }
 0xf06   : > { %5701 = vrot.lane.b32.xlu1 %v5265_v25, %s19098_s12  ;;  %v16800_v17 = vpop.f32.mrb[131].mxu1 }
 0xf07   : > { %v18173_v17 = vpop.eup %18172 }
 0xf08   : > { %v5309_v31 = vpop.f32.mrb[116].mxu0  ;;  %v21549_v25 = vpop.permute.xlu1 %5593 }
 0xf09   : > { %5703 = vrot.lane.b32.xlu0 %v5309_v31, %s19098_s12  ;;  %v16805_v53 = vpop.f32.mrb[117].mxu0  ;;  %v21551_v31 = vpop.permute.xlu0 %5595 }
 0xf0a   : > { %v5312_v44 = vpop.f32.mrb[118].mxu0  ;;  %v18175_v53 = vpop.eup %18174 }
 0xf0b   : > { %5705 = vrot.lane.b32.xlu1 %v5312_v44, %s19098_s12  ;;  %v16806_v48 = vpop.f32.mrb[119].mxu0  ;;  %v1643_v44 = vadd.f32 1.0, %v18173_v17  ;;  %v5760_v17 = vsel %vm2086_vm4, %v5744_v9, %v21464_v27  ;;  %v24837_v27 = vld [vmem:[#allocation49_spill] sm:$0xff] }
 0xf0c   : > { %v5356_v36 = vpop.f32.mrb[132].mxu1  ;;  %v21553_v48 = vpop.permute.xlu1 %5597 }
 0xf0d   : > { %5707 = vrot.lane.b32.xlu0 %v5356_v36, %s19098_s12  ;;  %v16811_v7 = vpop.f32.mrb[133].mxu1  ;;  %v1644_v36 = vadd.f32 1.0, %v18175_v53  ;;  %18176 = vrcp.f32 %v1643_v44 }
 0xf0e   : > { %v5359_v61 = vpop.f32.mrb[134].mxu1  ;;  %v21555_v7 = vpop.permute.xlu0 %5655 }
 0xf0f   : > { %5709 = vrot.lane.b32.xlu1 %v5359_v61, %s19098_s12  ;;  %v16812_v46 = vpop.f32.mrb[135].mxu1  ;;  %18178 = vrcp.f32 %v1644_v36 }
 0xf10   : > { %v5403_v39 = vpop.f32.mrb[120].mxu0  ;;  %v21557_v61 = vpop.permute.xlu1 %5657 }
 0xf11   : > { %5711 = vrot.lane.b32.xlu0 %v5403_v39, %s19098_s12  ;;  %v16817_v12 = vpop.f32.mrb[121].mxu0 }
 0xf12   : > { %v5406_v18 = vpop.f32.mrb[122].mxu0  ;;  %v21559_v46 = vpop.permute.xlu0 %5659 }
 0xf13   : > { %5713 = vrot.lane.b32.xlu1 %v5406_v18, %s19098_s12  ;;  %v16818_v50 = vpop.f32.mrb[123].mxu0 }
 0xf14   : > { %v5450_v20 = vpop.f32.mrb[136].mxu1  ;;  %v21562_v18 = vpop.permute.xlu1 %5661 }
 0xf15   : > { %5715 = vrot.lane.b32.xlu0 %v5450_v20, %s19098_s12  ;;  %v16823_v34 = vpop.f32.mrb[137].mxu1 }
 0xf16   : > { %v5453_v51 = vpop.f32.mrb[138].mxu1 }
 0xf17   : > { %5717 = vrot.lane.b32.xlu1 %v5453_v51, %s19098_s12  ;;  %v16824_v60 = vpop.f32.mrb[139].mxu1  ;;  %v18177_v34 = vpop.eup %18176 }
 0xf18   : > { %v5497_v42 = vpop.f32.mrb[124].mxu0  ;;  %v21566_v60 = vpop.permute.xlu0 %5832 }
 0xf19   : > { %5719 = vrot.lane.b32.xlu0 %v5497_v42, %s19098_s12  ;;  %v16829_v41 = vpop.f32.mrb[125].mxu0  ;;  %v18179_v51 = vpop.eup %18178 }
 0xf1a   : > { %v5500_v32 = vpop.f32.mrb[126].mxu0  ;;  %v21569_v42 = vpop.permute.xlu1 %5834  ;;  %v24834_v41 = vld [vmem:[#allocation46_spill] sm:$0xff] }
 0xf1b   : > { %5721 = vrot.lane.b32.xlu1 %v5500_v32, %s19098_s12  ;;  %v16830_v3 = vpop.f32.mrb[127].mxu0  ;;  %v5743_v32 = vsel %vm1688_vm3, %v24834_v41, %v21454_v62  ;;  %v24838_v41 = vld [vmem:[#allocation50_spill] sm:$0xff] }
 0xf1c   : > { %v5759_v3 = vsel %vm2086_vm4, %v5743_v32, %v21462_v2  ;;  %v24836_v2 = vld [vmem:[#allocation48_spill] sm:$0xff] }
 0xf52   : > { %v5544_v39 = vpop.f32.mrb[140].mxu1 }
 0xf53   : > { %v16835_v12 = vpop.f32.mrb[141].mxu1  ;;  %5723 = vrot.lane.b32.xlu0 %v5544_v39, %s19098_s12 }
 0xf54   : > { %v5547_v50 = vpop.f32.mrb[142].mxu1  ;;  %v5745_v12 = vsel %vm1688_vm3, %v24836_v2, %v21458_v14  ;;  %v5747_v14 = vsel %vm1688_vm3, %v24838_v41, %v21482_v22  ;;  %v24840_v22 = vld [vmem:[#allocation52_spill] sm:$0xff] }
 0xf55   : > { %v16836_v20 = vpop.f32.mrb[143].mxu1  ;;  %5725 = vrot.lane.b32.xlu1 %v5547_v50, %s19098_s12  ;;  %v5761_v23 = vsel %vm2086_vm4, %v5745_v12, %v21468_v55  ;;  %v24842_v12 = vld [vmem:[#allocation54_spill] sm:$0xff] }
 0xf56   : > { %v5746_v20 = vsel %vm1688_vm3, %v24837_v27, %v21460_v56 }
 0xf57   : > { %5836 = vrot.lane.b32.xlu0 %v18177_v34, %s19097_s7 }
 0xf59   : > { %5838 = vrot.lane.b32.xlu1 %v18179_v51, %s19097_s7 }
 0xf5c   : > { %v5696_v40 = vpop.permute.xlu0 %5695 }
 0xf5d   : > { %v5776_v26 = vsel %vm5775_vm5, %v5759_v3, %v5696_v40  ;;  %v5763_v3 = vsel %vm2086_vm4, %v5747_v14, %v21493_v30  ;;  %v24839_v40 = vld [vmem:[#allocation51_spill] sm:$0xff] }
 0xf5e   : > { %v5698_v53 = vpop.permute.xlu1 %5697  ;;  %v5856_v36 = vmul.f32 %v21473_v28, %v5776_v26  ;;  %v5762_v28 = vsel %vm2086_vm4, %v5746_v20, %v21470_v58  ;;  %v5748_v0 = vsel %vm1688_vm3, %v24839_v40, %v21484_v52 }
 0xf5f   : > { %v5777_v44 = vsel %vm5775_vm5, %v5760_v17, %v5698_v53  ;;  %v5764_v26 = vsel %vm2086_vm4, %v5748_v0, %v21496_v45 }
 0xf60   : > { %v5857_v62 = vmul.f32 %v21476_v37, %v5777_v44 }
 0xf62   : > { %v5872_v39 = vpack.c.bf16 %v5857_v62, %v5856_v36  ;;  %v24841_v36 = vld [vmem:[#allocation53_spill] sm:$0xff] }
 0xf63   : > { %v5750_v45 = vsel %vm1688_vm3, %v24841_v36, %v21491_v10 }
 0xf64   : > { %16841 = vmatprep.mubr.msk.bf16.mxu0 %vm1175_vm1, %v5872_v39 }
 0xf76   : > { %v5700_v50 = vpop.permute.xlu0 %5699 }
 0xf77   : > { %v5778_v34 = vsel %vm5775_vm5, %v5761_v23, %v5700_v50 }
 0xf78   : > { %v5702_v37 = vpop.permute.xlu1 %5701  ;;  %v5858_v32 = vmul.f32 %v21478_v35, %v5778_v34  ;;  %v5749_v35 = vsel %vm1688_vm3, %v24840_v22, %v21488_v16  ;;  %v5766_v16 = vsel %vm2086_vm4, %v5750_v45, %v21503_v63  ;;  %v24843_v63 = vld [vmem:[#allocation55_spill] sm:$0xff] }
 0xf79   : > { %v5779_v51 = vsel %vm5775_vm5, %v5762_v28, %v5702_v37  ;;  %v5765_v30 = vsel %vm2086_vm4, %v5749_v35, %v21500_v6  ;;  %v5751_v6 = vsel %vm1688_vm3, %v24842_v12, %v21521_v21  ;;  %v5752_v27 = vsel %vm1688_vm3, %v24843_v63, %v21523_v1 }
 0xf7a   : > { %v5859_v55 = vmul.f32 %v21480_v38, %v5779_v51  ;;  %v5768_v21 = vsel %vm2086_vm4, %v5752_v27, %v21531_v54  ;;  %v24845_v54 = vld [vmem:[#allocation59_spill] sm:$0xff]  ;;  %v19099_v12 = vmov 1983009808  }
 0xf7b   : > { %v5704_v56 = vpop.permute.xlu0 %5703  ;;  %v5754_v14 = vsel %vm1688_vm3, %v24845_v54, %v21527_v11 }
 0xf7c   : > { %v5873_v58 = vpack.c.bf16 %v5859_v55, %v5858_v32  ;;  %v5780_v9 = vsel %vm5775_vm5, %v5763_v3, %v5704_v56 }
 0xf7d   : > { %v5706_v17 = vpop.permute.xlu1 %5705  ;;  %v5860_v52 = vmul.f32 %v21507_v29, %v5780_v9 }
 0xf7e   : > { %v5781_v38 = vsel %vm5775_vm5, %v5764_v26, %v5706_v17  ;;  %16842 = vmatmul.mubr.msk.bf16.vlgmr.msra.gmra.mrb[128].mxu0 %vm1175_vm1, %v5873_v58 }
 0xf7f   : > { %v5861_v53 = vmul.f32 %v21510_v43, %v5781_v38  ;;  %v5708_v44 = vpop.permute.xlu0 %5707  ;;  %v5767_v43 = vsel %vm2086_vm4, %v5751_v6, %v21529_v33  ;;  %v24844_v33 = vld [vmem:[#allocation58_spill] sm:$0xff]  ;;  %v24848_v38 = vld [vmem:[#allocation60_spill] sm:$0xff]  ;;  %v6045_v6 = vlaneseq }
 0xf80   : > { %v5782_v62 = vsel %vm5775_vm5, %v5765_v30, %v5708_v44  ;;  %v5757_v30 = vsel %vm1688_vm3, %v24848_v38, %v21551_v31 }
 0xf81   : > { %v5874_v39 = vpack.c.bf16 %v5861_v53, %v5860_v52  ;;  %v5710_v2 = vpop.permute.xlu1 %5709  ;;  %v5862_v23 = vmul.f32 %v21514_v4, %v5782_v62  ;;  %v5753_v4 = vsel %vm1688_vm3, %v24844_v33, %v21525_v13  ;;  %v5770_v13 = vsel %vm2086_vm4, %v5754_v14, %v21535_v59  ;;  %v24847_v59 = vld [vmem:[#allocation57_spill] sm:$0xff] }
 0xf82   : > { %v5783_v29 = vsel %vm5775_vm5, %v5766_v16, %v5710_v2  ;;  %v5769_v37 = vsel %vm2086_vm4, %v5753_v4, %v21533_v19  ;;  %v24846_v19 = vld [vmem:[#allocation56_spill] sm:$0xff]  ;;  %v5756_v58 = vsel %vm1688_vm3, %v24847_v59, %v21549_v25  ;;  %v18564_v4 = vld [vmem:[#allocation25 + $0x10] sm:$0xff]  ;;  %v18566_v14 = vld [vmem:[#allocation25] sm:$0xff] }
 0xf83   : > { %v5863_v10 = vmul.f32 %v21517_v8, %v5783_v29  ;;  %16845 = vmatprep.mubr.msk.bf16.mxu0 %vm1175_vm1, %v5874_v39  ;;  %v5712_v50 = vpop.permute.xlu0 %5711  ;;  %v21693_v29 = vld [vmem:[%s24850_s30] ss:$0 sm:$0xff]  ;;  %s24871_s30 = scalar_lea.vmem [#allocation14], %s19672_s23 }
 0xf84   : > { %v5784_v20 = vsel %vm5775_vm5, %v5767_v43, %v5712_v50 }
 0xf85   : > { %v5875_v34 = vpack.c.bf16 %v5863_v10, %v5862_v23  ;;  %v5714_v28 = vpop.permute.xlu1 %5713  ;;  %v5864_v51 = vmul.f32 %v21537_v49, %v5784_v20  ;;  %v5755_v49 = vsel %vm1688_vm3, %v24846_v19, %v21547_v47  ;;  %v5772_v47 = vsel %vm2086_vm4, %v5756_v58, %v21557_v61  ;;  %v24849_v61 = vld [vmem:[#allocation61_spill] sm:$0xff]  ;;  %v18568_v19 = vld [vmem:[#allocation25 + $0x18] sm:$0xff] }
 0xf86   : > { %v5785_v8 = vsel %vm5775_vm5, %v5768_v21, %v5714_v28  ;;  %v5771_v56 = vsel %vm2086_vm4, %v5755_v49, %v21555_v7  ;;  %v5758_v52 = vsel %vm1688_vm3, %v24849_v61, %v21553_v48  ;;  %v21696_v10 = vshrl.u32 %v6045_v6, 7 }
 0xf87   : > { %v5865_v1 = vmul.f32 %v21539_v5, %v5785_v8  ;;  %16846 = vmatmul.mubr.msk.bf16.gmra.mrb[132].mxu0 %vm1175_vm1, %v5875_v34  ;;  %v5716_v41 = vpop.permute.xlu0 %5715 }
 0xf88   : > { %v5786_v32 = vsel %vm5775_vm5, %v5769_v37, %v5716_v41  ;;  %v18565_v37 = vld [vmem:[#allocation25 + $0x30] sm:$0xff] }
 0xf89   : > { %v5876_v55 = vpack.c.bf16 %v5865_v1, %v5864_v51  ;;  %v5718_v3 = vpop.permute.xlu1 %5717  ;;  %v5866_v40 = vmul.f32 %v21543_v15, %v5786_v32 }
 0xf8a   : > { %v5787_v5 = vsel %vm5775_vm5, %v5770_v13, %v5718_v3  ;;  %v18567_v13 = vld [vmem:[#allocation25 + $0x20] sm:$0xff] }
 0xf8b   : > { %v5867_v11 = vmul.f32 %v21545_v24, %v5787_v5  ;;  %16849 = vmatprep.mubr.msk.bf16.mxu0 %vm1175_vm1, %v5876_v55  ;;  %v5720_v0 = vpop.permute.xlu0 %5719 }
 0xf8c   : > { %v5788_v9 = vsel %vm5775_vm5, %v5771_v56, %v5720_v0  ;;  %v18570_v0 = vld [vmem:[#allocation25 + $0x8] sm:$0xff] }
 0xf8d   : > { %v5877_v26 = vpack.c.bf16 %v5867_v11, %v5866_v40  ;;  %v5722_v17 = vpop.permute.xlu1 %5721  ;;  %v5868_v15 = vmul.f32 %v21566_v60, %v5788_v9  ;;  %v5773_v60 = vsel %vm2086_vm4, %v5757_v30, %v21559_v46  ;;  %v18569_v40 = vld [vmem:[#allocation25 + $0x38] sm:$0xff] }
 0xf8e   : > { %v5789_v7 = vsel %vm5775_vm5, %v5772_v47, %v5722_v17  ;;  %v18571_v47 = vld [vmem:[#allocation25 + $0x28] sm:$0xff] }
 0xf8f   : > { %v5869_v24 = vmul.f32 %v21569_v42, %v5789_v7  ;;  %16850 = vmatmul.mubr.msk.bf16.gmra.mrb[136].mxu0 %vm1175_vm1, %v5877_v26  ;;  %v5774_v42 = vsel %vm2086_vm4, %v5758_v52, %v21562_v18  ;;  %v6043_v18 = vunpack.c.l.s4 %v19099_v12  ;;  %v19100_v12 = vmov 1934713408  }
 0xf91   : > { %v5878_v22 = vpack.c.bf16 %v5869_v24, %v5868_v15  ;;  %v6044_v23 = vunpack.c.0.s8 %v6043_v18  ;;  %v6107_v18 = vunpack.c.l.s4 %v19100_v12 }
 0xf93   : > { %16853 = vmatprep.mubr.msk.bf16.mxu0 %vm1175_vm1, %v5878_v22  ;;  %v21704_v1 = vsub.s32 %v6044_v23, %v21696_v10  ;;  %v6108_v6 = vunpack.c.0.s8 %v6107_v18 }
 0xf95   : > { %24851 = vst [vmem:[#allocation62_spill] sm:$0xff] %v21704_v1 }
 0xfc5   : > { %v5724_v35 = vpop.permute.xlu0 %5723 }
 0xfc6   : > { %v5790_v44 = vsel %vm5775_vm5, %v5773_v60, %v5724_v35 }
 0xfc7   : > { %v5726_v25 = vpop.permute.xlu1 %5725 }
 0xfc8   : > { %v5791_v36 = vsel %vm5775_vm5, %v5774_v42, %v5726_v25 }
 0xfc9   : > { %v5837_v53 = vpop.permute.xlu0 %5836 }
 0xfca   : > { %v5870_v62 = vmul.f32 %v5837_v53, %v5790_v44 }
 0xfcb   : > { %v5839_v45 = vpop.permute.xlu1 %5838 }
 0xfcc   : > { %v5871_v16 = vmul.f32 %v5839_v45, %v5791_v36 }
 0xfce   : > { %v5879_v31 = vpack.c.bf16 %v5871_v16, %v5870_v62 }
 0xfd0   : > { %16854 = vmatmul.mubr.msk.bf16.gmra.mrb[140].mxu0 %vm1175_vm1, %v5879_v31 }
 0xfd1   : > { %16879 = vmatprep.mubr.msk.bf16.mxu0 %vm19083_vm2, %v24800_v57 }
0x1051   : > { %v16843_v48 = vpop.f32.mrb[128].mxu0 }
0x1052   : > { %v5961_v39 = vpop.f32.mrb[129].mxu0  ;;  %v5970_v43 = vadd.f32 %v16843_v48, %v21693_v29 }
0x1053   : > { %v16844_v46 = vpop.f32.mrb[130].mxu0  ;;  %v5962_v50 = vadd.f32 %v21693_v29, %v5961_v39 }
0x1054   : > { %v5964_v2 = vpop.f32.mrb[131].mxu0  ;;  %v5973_v27 = vadd.f32 %v16844_v46, %v21693_v29  ;;  %v6026_v8 = vadd.f32 %v18564_v4, %v5970_v43  ;;  %v18572_v4 = vld [vmem:[#allocation25 + $0x50] sm:$0xff] }
0x1055   : > { %v5965_v34 = vadd.f32 %v21693_v29, %v5964_v2  ;;  %v6024_v32 = vadd.f32 %v18566_v14, %v5962_v50  ;;  %v18574_v14 = vld [vmem:[#allocation25 + $0x40] sm:$0xff] }
0x1056   : > { %v6027_v49 = vadd.f32 %v18568_v19, %v5973_v27  ;;  %v18576_v19 = vld [vmem:[#allocation25 + $0x58] sm:$0xff] }
0x1057   : > { %v6025_v59 = vadd.f32 %v18570_v0, %v5965_v34  ;;  %v18578_v0 = vld [vmem:[#allocation25 + $0x48] sm:$0xff] }
0x105a   : > { %v16847_v63 = vpop.f32.mrb[132].mxu0 }
0x105b   : > { %v5986_v20 = vadd.f32 %v16847_v63, %v21693_v29  ;;  %v5977_v21 = vpop.f32.mrb[133].mxu0  ;;  %v21751_v63 = vsub.s32 %v6108_v6, %v21696_v10 }
0x105c   : > { %v5978_v28 = vadd.f32 %v21693_v29, %v5977_v21  ;;  %v16848_v33 = vpop.f32.mrb[134].mxu0 }
0x105d   : > { %v6030_v51 = vadd.f32 %v18565_v37, %v5986_v20  ;;  %v5989_v41 = vadd.f32 %v16848_v33, %v21693_v29  ;;  %v5980_v54 = vpop.f32.mrb[135].mxu0  ;;  %24852 = vst [vmem:[#allocation71_spill] sm:$0xff] %v21751_v63  ;;  %v18573_v37 = vld [vmem:[#allocation25 + $0x70] sm:$0xff] }
0x105e   : > { %v6028_v55 = vadd.f32 %v18567_v13, %v5978_v28  ;;  %v5981_v3 = vadd.f32 %v21693_v29, %v5980_v54 }
0x105f   : > { %v6056_v5 = vcombine.low %v6026_v8, %v6030_v51  ;;  %v6057_v56 = vcombine.high %v6026_v8, %v6030_v51  ;;  %v6031_v11 = vadd.f32 %v18569_v40, %v5989_v41  ;;  %v18577_v40 = vld [vmem:[#allocation25 + $0x78] sm:$0xff] }
0x1060   : > { %v6040_v58 = vcombine.low %v6024_v32, %v6028_v55  ;;  %v6041_v9 = vcombine.high %v6024_v32, %v6028_v55  ;;  %v6029_v26 = vadd.f32 %v18571_v47, %v5981_v3  ;;  %v18575_v32 = vld [vmem:[#allocation25 + $0x60] sm:$0xff]  ;;  %v18579_v47 = vld [vmem:[#allocation25 + $0x68] sm:$0xff] }
0x1061   : > { %v21709_v17 = vrot.slane %v6056_v5, %v21704_v1  ;;  %v21712_v7 = vrot.slane %v6057_v56, %v21704_v1  ;;  %v6192_v15 = vcombine.low %v6027_v49, %v6031_v11  ;;  %v6193_v24 = vcombine.high %v6027_v49, %v6031_v11 }
0x1062   : > { %v21715_v22 = vrot.slane %v6040_v58, %v21704_v1  ;;  %v21718_v35 = vrot.slane %v6041_v9, %v21704_v1  ;;  %v6176_v25 = vcombine.low %v6025_v59, %v6029_v26  ;;  %v6177_v38 = vcombine.high %v6025_v59, %v6029_v26  ;;  %v16851_v30 = vpop.f32.mrb[136].mxu0 }
0x1063   : > { %v21721_v61 = vrot.slane %v6192_v15, %v21704_v1  ;;  %v5993_v52 = vpop.f32.mrb[137].mxu0  ;;  %v21724_v53 = vrot.slane %v6193_v24, %v21704_v1  ;;  %v6002_v43 = vadd.f32 %v16851_v30, %v21693_v29 }
0x1064   : > { %v21727_v60 = vrot.slane %v6176_v25, %v21704_v1  ;;  %v21730_v42 = vrot.slane %v6177_v38, %v21704_v1  ;;  %v16852_v44 = vpop.f32.mrb[138].mxu0  ;;  %v6104_v36 = vcombine.low %v21715_v22, %v21709_v17  ;;  %v6120_v62 = vcombine.low %v21718_v35, %v21712_v7 }
0x1065   : > { %v5996_v45 = vpop.f32.mrb[139].mxu0  ;;  %v6105_v16 = vcombine.high %v21715_v22, %v21709_v17  ;;  %v6121_v31 = vcombine.high %v21718_v35, %v21712_v7  ;;  %v5994_v23 = vadd.f32 %v21693_v29, %v5993_v52  ;;  %v6005_v27 = vadd.f32 %v16852_v44, %v21693_v29 }
0x1066   : > { %v6240_v48 = vcombine.low %v21727_v60, %v21721_v61  ;;  %v6241_v39 = vcombine.high %v21727_v60, %v21721_v61  ;;  %v6256_v46 = vcombine.low %v21730_v42, %v21724_v53  ;;  %v6257_v2 = vcombine.high %v21730_v42, %v21724_v53 }
0x1067   : > { %v5997_v34 = vadd.f32 %v21693_v29, %v5996_v45  ;;  %v6034_v8 = vadd.f32 %v18572_v4, %v6002_v43  ;;  %v6032_v10 = vadd.f32 %v18574_v14, %v5994_v23  ;;  %v6112_v3 = vrot.slane %v6104_v36, %v21751_v63 }
0x1068   : > { %v6035_v49 = vadd.f32 %v18576_v19, %v6005_v27  ;;  %v6128_v52 = vrot.slane %v6120_v62, %v21751_v63  ;;  %v6119_v44 = vrot.slane %v6105_v16, %v21751_v63  ;;  %v6135_v43 = vrot.slane %v6121_v31, %v21751_v63 }
0x1069   : > { %v6033_v59 = vadd.f32 %v18578_v0, %v5997_v34  ;;  %v6264_v19 = vrot.slane %v6256_v46, %v21751_v63  ;;  %v6271_v61 = vrot.slane %v6257_v2, %v21751_v63 }
0x10a3   : > { %v16855_v50 = vpop.f32.mrb[140].mxu0 }
0x10a4   : > { %v6018_v20 = vadd.f32 %v16855_v50, %v21693_v29  ;;  %v6009_v21 = vpop.f32.mrb[141].mxu0  ;;  %v6248_v50 = vrot.slane %v6240_v48, %v21751_v63 }
0x10a5   : > { %v6010_v28 = vadd.f32 %v21693_v29, %v6009_v21  ;;  %v16856_v33 = vpop.f32.mrb[142].mxu0 }
0x10a6   : > { %v6038_v51 = vadd.f32 %v18573_v37, %v6018_v20  ;;  %v6021_v41 = vadd.f32 %v16856_v33, %v21693_v29  ;;  %v6012_v54 = vpop.f32.mrb[143].mxu0 }
0x10a7   : > { %v6036_v13 = vadd.f32 %v18575_v32, %v6010_v28  ;;  %v6013_v55 = vadd.f32 %v21693_v29, %v6012_v54 }
0x10a8   : > { %v6088_v5 = vcombine.low %v6034_v8, %v6038_v51  ;;  %v6089_v56 = vcombine.high %v6034_v8, %v6038_v51  ;;  %v6039_v11 = vadd.f32 %v18577_v40, %v6021_v41 }
0x10a9   : > { %v6072_v58 = vcombine.low %v6032_v10, %v6036_v13  ;;  %v6073_v9 = vcombine.high %v6032_v10, %v6036_v13  ;;  %v6037_v26 = vadd.f32 %v18579_v47, %v6013_v55  ;;  %v6255_v13 = vrot.slane %v6241_v39, %v21751_v63 }
0x10aa   : > { %v6096_v17 = vrot.slane %v6088_v5, %v21704_v1  ;;  %v6103_v7 = vrot.slane %v6089_v56, %v21704_v1  ;;  %v6224_v15 = vcombine.low %v6035_v49, %v6039_v11  ;;  %v6225_v29 = vcombine.high %v6035_v49, %v6039_v11 }
0x10ab   : > { %v6080_v24 = vrot.slane %v6072_v58, %v21704_v1  ;;  %v6087_v22 = vrot.slane %v6073_v9, %v21704_v1  ;;  %v6208_v35 = vcombine.low %v6033_v59, %v6037_v26  ;;  %v6209_v25 = vcombine.high %v6033_v59, %v6037_v26 }
0x10ac   : > { %v6232_v38 = vrot.slane %v6224_v15, %v21704_v1  ;;  %v6239_v30 = vrot.slane %v6225_v29, %v21704_v1 }
0x10ad   : > { %v6216_v36 = vrot.slane %v6208_v35, %v21704_v1  ;;  %v6223_v45 = vrot.slane %v6209_v25, %v21704_v1  ;;  %v6136_v12 = vcombine.low %v6080_v24, %v6096_v17  ;;  %v6152_v18 = vcombine.low %v6087_v22, %v6103_v7 }
0x10ae   : > { %v6137_v6 = vcombine.high %v6080_v24, %v6096_v17  ;;  %v6153_v23 = vcombine.high %v6087_v22, %v6103_v7 }
0x10af   : > { %v6144_v27 = vrot.slane %v6136_v12, %v21751_v63  ;;  %v6160_v20 = vrot.slane %v6152_v18, %v21751_v63  ;;  %v6272_v21 = vcombine.low %v6216_v36, %v6232_v38  ;;  %v6273_v62 = vcombine.high %v6216_v36, %v6232_v38 }
0x10b0   : > { %v6151_v16 = vrot.slane %v6137_v6, %v21751_v63  ;;  %v6167_v34 = vrot.slane %v6153_v23, %v21751_v63  ;;  %v6288_v28 = vcombine.low %v6223_v45, %v6239_v30  ;;  %v6289_v33 = vcombine.high %v6223_v45, %v6239_v30 }
0x10b1   : > { %v21776_v4 = vcombine.high %v6112_v3, %v6144_v27  ;;  %v21778_v8 = vcombine.low %v6112_v3, %v6144_v27  ;;  %v21780_v31 = vcombine.high %v6128_v52, %v6160_v20  ;;  %v6280_v48 = vrot.slane %v6272_v21, %v21751_v63 }
0x10b2   : > { %v21783_v37 = vcombine.low %v6119_v44, %v6151_v16  ;;  %v21785_v51 = vcombine.high %v6135_v43, %v6167_v34  ;;  %v21787_v41 = vcombine.high %v6119_v44, %v6151_v16  ;;  %v21789_v54 = vcombine.low %v6128_v52, %v6160_v20 }
0x10b3   : > { %24853 = vst [vmem:[#allocation42_spill] sm:$0xff] %v21776_v4  ;;  %24854 = vst [vmem:[#allocation67_spill] sm:$0xff] %v21778_v8  ;;  %v6317_v14 = vsel %vm1175_vm1, %v21776_v4, 0.0  ;;  %v6314_v10 = vsel %vm1175_vm1, %v21778_v8, 0.0  ;;  %v21795_v32 = vcombine.high %v6248_v50, %v6280_v48  ;;  %v6287_v55 = vrot.slane %v6273_v62, %v21751_v63 }
0x10b4   : > { %24855 = vst [vmem:[#allocation73_spill] sm:$0xff] %v21780_v31  ;;  %24856 = vst [vmem:[#allocation41_spill] sm:$0xff] %v21783_v37  ;;  %6318 = vadd.xlane.f32.xlu1 %v6317_v14  ;;  %6315 = vadd.xlane.f32.xlu0 %v6314_v10  ;;  %v21802_v3 = vcombine.low %v6135_v43, %v6167_v34  ;;  %v6296_v49 = vrot.slane %v6288_v28, %v21751_v63  ;;  %v6329_v5 = vsel %vm1175_vm1, %v21780_v31, 0.0 }
0x10b5   : > { %24857 = vst [vmem:[#allocation68_spill] sm:$0xff] %v21785_v51  ;;  %24858 = vst [vmem:[#allocation63_spill] sm:$0xff] %v21787_v41  ;;  %v21811_v56 = vcombine.low %v6248_v50, %v6280_v48  ;;  %v6303_v60 = vrot.slane %v6289_v33, %v21751_v63  ;;  %v6320_v39 = vsel %vm1175_vm1, %v21783_v37, 0.0  ;;  %v21820_v40 = vcombine.high %v6255_v13, %v6287_v55 }
0x10b6   : > { %24859 = vst [vmem:[#allocation64_spill] sm:$0xff] %v21789_v54  ;;  %24860 = vst [vmem:[#allocation45_spill] sm:$0xff] %v21795_v32  ;;  %v21822_v46 = vcombine.high %v6264_v19, %v6296_v49  ;;  %v21824_v11 = vcombine.low %v6255_v13, %v6287_v55  ;;  %v21828_v59 = vcombine.low %v6264_v19, %v6296_v49  ;;  %v6335_v53 = vsel %vm1175_vm1, %v21785_v51, 0.0 }
0x10b7   : > { %24861 = vst [vmem:[#allocation69_spill] sm:$0xff] %v21802_v3  ;;  %24862 = vst [vmem:[#allocation70_spill] sm:$0xff] %v21811_v56  ;;  %v21826_v0 = vcombine.high %v6271_v61, %v6303_v60  ;;  %v21830_v58 = vcombine.low %v6271_v61, %v6303_v60  ;;  %v6323_v42 = vsel %vm1175_vm1, %v21787_v41, 0.0  ;;  %v6341_v2 = vsel %vm1175_vm1, %v21795_v32, 0.0 }
0x10b8   : > { %24863 = vst [vmem:[#allocation65_spill] sm:$0xff] %v21820_v40  ;;  %24864 = vst [vmem:[#allocation66_spill] sm:$0xff] %v21822_v46  ;;  %6330 = vadd.xlane.f32.xlu1 %v6329_v5  ;;  %6321 = vadd.xlane.f32.xlu0 %v6320_v39  ;;  %v6326_v9 = vsel %vm1175_vm1, %v21789_v54, 0.0  ;;  %v6347_v47 = vsel %vm1175_vm1, %v21820_v40, 0.0  ;;  %v6332_v26 = vsel %vm1175_vm1, %v21802_v3, 0.0  ;;  %v6353_v17 = vsel %vm1175_vm1, %v21822_v46, 0.0 }
0x10b9   : > { %24865 = vst [vmem:[#allocation72_spill] sm:$0xff] %v21824_v11  ;;  %24866 = vst [vmem:[#allocation74_spill] sm:$0xff] %v21826_v0  ;;  %v6338_v7 = vsel %vm1175_vm1, %v21811_v56, 0.0  ;;  %v6359_v15 = vsel %vm1175_vm1, %v21826_v0, 0.0  ;;  %v6344_v29 = vsel %vm1175_vm1, %v21824_v11, 0.0  ;;  %v6350_v24 = vsel %vm1175_vm1, %v21828_v59, 0.0 }
0x10ba   : > { %24867 = vst [vmem:[#allocation43_spill] sm:$0xff] %v21828_v59  ;;  %24868 = vst [vmem:[#allocation44_spill] sm:$0xff] %v21830_v58  ;;  %v6356_v22 = vsel %vm1175_vm1, %v21830_v58, 0.0 }
0x10bc   : > { %6336 = vadd.xlane.f32.xlu1 %v6335_v53  ;;  %6324 = vadd.xlane.f32.xlu0 %v6323_v42 }
0x10c0   : > { %6342 = vadd.xlane.f32.xlu1 %v6341_v2  ;;  %6327 = vadd.xlane.f32.xlu0 %v6326_v9 }
0x10c4   : > { %6348 = vadd.xlane.f32.xlu1 %v6347_v47  ;;  %6333 = vadd.xlane.f32.xlu0 %v6332_v26 }
0x10c8   : > { %6354 = vadd.xlane.f32.xlu1 %v6353_v17  ;;  %6339 = vadd.xlane.f32.xlu0 %v6338_v7 }
0x10cc   : > { %6360 = vadd.xlane.f32.xlu1 %v6359_v15  ;;  %6345 = vadd.xlane.f32.xlu0 %v6344_v29 }
0x10d0   : > { %6351 = vadd.xlane.f32.xlu0 %v6350_v24 }
0x10d4   : > { %6357 = vadd.xlane.f32.xlu0 %v6356_v22 }
0x1141   : > { %v6319_v35 = vpop.xlane.xlu1 %6318  ;;  %v6316_v25 = vpop.xlane.xlu0 %6315 }
0x1142   : > { %v6363_v38 = vmul.f32 0.03125, %v6319_v35  ;;  %v6362_v30 = vmul.f32 0.03125, %v6316_v25 }
0x1144   : > { %v21857_v52 = vsub.f32 %v21776_v4, %v6363_v38  ;;  %v21860_v44 = vsub.f32 %v21778_v8, %v6362_v30 }
0x1145   : > { %v6331_v36 = vpop.xlane.xlu1 %6330  ;;  %v6322_v45 = vpop.xlane.xlu0 %6321 }
0x1146   : > { %v6364_v12 = vmul.f32 0.03125, %v6322_v45  ;;  %v6395_v18 = vmul.f32 %v21857_v52, %v21857_v52  ;;  %v6394_v6 = vmul.f32 %v21860_v44, %v21860_v44  ;;  %v6367_v43 = vmul.f32 0.03125, %v6331_v36 }
0x1148   : > { %v21867_v23 = vsub.f32 %v21783_v37, %v6364_v12  ;;  %v6413_v50 = vsel %vm1175_vm1, %v6395_v18, 0.0  ;;  %v6410_v27 = vsel %vm1175_vm1, %v6394_v6, 0.0  ;;  %v21874_v34 = vsub.f32 %v21780_v31, %v6367_v43 }
0x1149   : > { %6414 = vadd.xlane.f32.xlu1 %v6413_v50  ;;  %v6337_v20 = vpop.xlane.xlu1 %6336  ;;  %6411 = vadd.xlane.f32.xlu0 %v6410_v27  ;;  %v6325_v21 = vpop.xlane.xlu0 %6324 }
0x114a   : > { %v6365_v62 = vmul.f32 0.03125, %v6325_v21  ;;  %v6396_v16 = vmul.f32 %v21867_v23, %v21867_v23  ;;  %v6369_v28 = vmul.f32 0.03125, %v6337_v20  ;;  %v6399_v60 = vmul.f32 %v21874_v34, %v21874_v34 }
0x114c   : > { %v21877_v33 = vsub.f32 %v21787_v41, %v6365_v62  ;;  %v6416_v48 = vsel %vm1175_vm1, %v6396_v16, 0.0  ;;  %v21883_v49 = vsub.f32 %v21785_v51, %v6369_v28  ;;  %v6425_v17 = vsel %vm1175_vm1, %v6399_v60, 0.0 }
0x114d   : > { %v6343_v14 = vpop.xlane.xlu1 %6342  ;;  %6417 = vadd.xlane.f32.xlu0 %v6416_v48  ;;  %v6328_v10 = vpop.xlane.xlu0 %6327 }
0x114e   : > { %v6366_v13 = vmul.f32 0.03125, %v6328_v10  ;;  %v6397_v55 = vmul.f32 %v21877_v33, %v21877_v33  ;;  %v6371_v19 = vmul.f32 0.03125, %v6343_v14  ;;  %v6401_v15 = vmul.f32 %v21883_v49, %v21883_v49 }
0x1150   : > { %v21886_v5 = vsub.f32 %v21789_v54, %v6366_v13  ;;  %v6419_v61 = vsel %vm1175_vm1, %v6397_v55, 0.0  ;;  %v21894_v9 = vsub.f32 %v21795_v32, %v6371_v19  ;;  %v6431_v45 = vsel %vm1175_vm1, %v6401_v15, 0.0 }
0x1151   : > { %v6349_v39 = vpop.xlane.xlu1 %6348  ;;  %6420 = vadd.xlane.f32.xlu1 %v6419_v61  ;;  %v6334_v53 = vpop.xlane.xlu0 %6333 }
0x1152   : > { %v6368_v42 = vmul.f32 0.03125, %v6334_v53  ;;  %v6398_v2 = vmul.f32 %v21886_v5, %v21886_v5  ;;  %v6373_v47 = vmul.f32 0.03125, %v6349_v39  ;;  %v6403_v38 = vmul.f32 %v21894_v9, %v21894_v9 }
0x1154   : > { %v21897_v26 = vsub.f32 %v21802_v3, %v6368_v42  ;;  %v6422_v7 = vsel %vm1175_vm1, %v6398_v2, 0.0  ;;  %v21906_v25 = vsub.f32 %v21820_v40, %v6373_v47  ;;  %v6437_v27 = vsel %vm1175_vm1, %v6403_v38, 0.0 }
0x1155   : > { %v6355_v29 = vpop.xlane.xlu1 %6354  ;;  %6426 = vadd.xlane.f32.xlu1 %v6425_v17  ;;  %6423 = vadd.xlane.f32.xlu0 %v6422_v7  ;;  %v6340_v24 = vpop.xlane.xlu0 %6339 }
0x1156   : > { %v6370_v22 = vmul.f32 0.03125, %v6340_v24  ;;  %v6400_v35 = vmul.f32 %v21897_v26, %v21897_v26  ;;  %v6375_v30 = vmul.f32 0.03125, %v6355_v29  ;;  %v6405_v20 = vmul.f32 %v21906_v25, %v21906_v25 }
0x1158   : > { %v21911_v36 = vsub.f32 %v21811_v56, %v6370_v22  ;;  %v6428_v12 = vsel %vm1175_vm1, %v6400_v35, 0.0  ;;  %v21921_v21 = vsub.f32 %v21822_v46, %v6375_v30  ;;  %v6443_v13 = vsel %vm1175_vm1, %v6405_v20, 0.0  ;;  %v17814_v22 = vld [vmem:[%s19748_s22] sm:$0xff]   ;;  %v17815_v35 = vld [vmem:[%s19748_s22 + $0x8] sm:$0xff]   ;;  %s24869_s22 = scalar_lea.vmem [#allocation11], %s19672_s23 }
0x1159   : > { %v6361_v18 = vpop.xlane.xlu1 %6360  ;;  %6432 = vadd.xlane.f32.xlu1 %v6431_v45  ;;  %6429 = vadd.xlane.f32.xlu0 %v6428_v12  ;;  %v6346_v6 = vpop.xlane.xlu0 %6345 }
0x115a   : > { %v6372_v43 = vmul.f32 0.03125, %v6346_v6  ;;  %v6402_v50 = vmul.f32 %v21911_v36, %v21911_v36  ;;  %v6377_v62 = vmul.f32 0.03125, %v6361_v18  ;;  %v6407_v60 = vmul.f32 %v21921_v21, %v21921_v21  ;;  %16857 = vmatprep.subr.bf16.mxu1 %v17814_v22 }
0x115b   : > { %16858 = vmatpush3.bf16.msra.mxu1 %v17814_v22 }
0x115c   : > { %v21924_v16 = vsub.f32 %v21824_v11, %v6372_v43  ;;  %v6434_v28 = vsel %vm1175_vm1, %v6402_v50, 0.0  ;;  %v21931_v55 = vsub.f32 %v21826_v0, %v6377_v62  ;;  %v6449_v47 = vsel %vm1175_vm1, %v6407_v60, 0.0  ;;  %16859 = vmatprep.subr.bf16.mxu1 %v17815_v35  ;;  %v21957_v60 = vld [vmem:[%s24869_s22] ss:$0 sm:$0xff] }
0x115d   : > { %6438 = vadd.xlane.f32.xlu1 %v6437_v27  ;;  %6435 = vadd.xlane.f32.xlu0 %v6434_v28  ;;  %v6352_v48 = vpop.xlane.xlu0 %6351 }
0x115e   : > { %v6374_v14 = vmul.f32 0.03125, %v6352_v48  ;;  %v6404_v10 = vmul.f32 %v21924_v16, %v21924_v16  ;;  %v6409_v7 = vmul.f32 %v21931_v55, %v21931_v55 }
0x115f   : > { %16860 = vmatpush3.bf16.msra.mxu1 %v17815_v35 }
0x1160   : > { %v21934_v19 = vsub.f32 %v21828_v59, %v6374_v14  ;;  %v6440_v61 = vsel %vm1175_vm1, %v6404_v10, 0.0  ;;  %v6455_v29 = vsel %vm1175_vm1, %v6409_v7, 0.0  ;;  %16883 = vmatprep.subr.bf16.mxu1 %v24800_v57 }
0x1161   : > { %6444 = vadd.xlane.f32.xlu1 %v6443_v13  ;;  %6441 = vadd.xlane.f32.xlu0 %v6440_v61  ;;  %v6358_v39 = vpop.xlane.xlu0 %6357 }
0x1162   : > { %v6376_v53 = vmul.f32 0.03125, %v6358_v39  ;;  %v6406_v42 = vmul.f32 %v21934_v19, %v21934_v19 }
0x1164   : > { %v21942_v2 = vsub.f32 %v21830_v58, %v6376_v53  ;;  %v6446_v17 = vsel %vm1175_vm1, %v6406_v42, 0.0 }
0x1165   : > { %6450 = vadd.xlane.f32.xlu1 %v6449_v47  ;;  %6447 = vadd.xlane.f32.xlu0 %v6446_v17 }
0x1166   : > { %v6408_v15 = vmul.f32 %v21942_v2, %v21942_v2 }
0x1168   : > { %v6452_v24 = vsel %vm1175_vm1, %v6408_v15, 0.0 }
0x1169   : > { %6456 = vadd.xlane.f32.xlu1 %v6455_v29  ;;  %6453 = vadd.xlane.f32.xlu0 %v6452_v24  ;;  %v21962_v24 = vld [vmem:[%s24870_s17] ss:$0 sm:$0xff] }
0x11d6   : > { %v6415_v38 = vpop.xlane.xlu1 %6414  ;;  %v6412_v30 = vpop.xlane.xlu0 %6411 }
0x11d7   : > { %v6459_v45 = vmul.f32 0.03125, %v6415_v38  ;;  %v6458_v12 = vmul.f32 0.03125, %v6412_v30 }
0x11d9   : > { %v6475_v18 = vadd.f32 1e-05, %v6459_v45  ;;  %v6474_v6 = vadd.f32 1e-05, %v6458_v12 }
0x11da   : > { %v6418_v43 = vpop.xlane.xlu0 %6417 }
0x11db   : > { %18180 = vrsqrt.f32 %v6475_v18  ;;  %v6460_v50 = vmul.f32 0.03125, %v6418_v43 }
0x11dc   : > { %18182 = vrsqrt.f32 %v6474_v6 }
0x11dd   : > { %v6476_v27 = vadd.f32 1e-05, %v6460_v50 }
0x11de   : > { %v6421_v20 = vpop.xlane.xlu1 %6420 }
0x11df   : > { %18184 = vrsqrt.f32 %v6476_v27  ;;  %v6461_v62 = vmul.f32 0.03125, %v6421_v20 }
0x11e1   : > { %v6477_v28 = vadd.f32 1e-05, %v6461_v62 }
0x11e2   : > { %v6427_v48 = vpop.xlane.xlu1 %6426  ;;  %v6424_v14 = vpop.xlane.xlu0 %6423 }
0x11e3   : > { %18186 = vrsqrt.f32 %v6477_v28  ;;  %v6463_v10 = vmul.f32 0.03125, %v6427_v48  ;;  %v6462_v13 = vmul.f32 0.03125, %v6424_v14 }
0x11e5   : > { %v18181_v61 = vpop.eup %18180  ;;  %v6479_v39 = vadd.f32 1e-05, %v6463_v10  ;;  %v6478_v53 = vadd.f32 1e-05, %v6462_v13 }
0x11e6   : > { %v18183_v42 = vpop.eup %18182  ;;  %v6433_v47 = vpop.xlane.xlu1 %6432  ;;  %v6507_v7 = vmul.f32 %v18181_v61, %v21857_v52 }
0x11e7   : > { %v6430_v17 = vpop.xlane.xlu0 %6429  ;;  %18188 = vrsqrt.f32 %v6479_v39  ;;  %v6465_v15 = vmul.f32 0.03125, %v6433_v47  ;;  %v6506_v22 = vmul.f32 %v18183_v42, %v21860_v44 }
0x11e8   : > { %v6464_v29 = vmul.f32 0.03125, %v6430_v17  ;;  %18190 = vrsqrt.f32 %v6478_v53  ;;  %v6529_v35 = vmul.f32 %v21957_v60, %v6507_v7 }
0x11e9   : > { %v18185_v38 = vpop.eup %18184  ;;  %v6481_v30 = vadd.f32 1e-05, %v6465_v15  ;;  %v6528_v12 = vmul.f32 %v21957_v60, %v6506_v22 }
0x11ea   : > { %v6480_v45 = vadd.f32 1e-05, %v6464_v29  ;;  %v6508_v18 = vmul.f32 %v18185_v38, %v21867_v23  ;;  %v6439_v6 = vpop.xlane.xlu1 %6438  ;;  %v6551_v43 = vadd.f32 %v21962_v24, %v6529_v35 }
0x11eb   : > { %v6436_v52 = vpop.xlane.xlu0 %6435  ;;  %18192 = vrsqrt.f32 %v6481_v30  ;;  %v6467_v50 = vmul.f32 0.03125, %v6439_v6  ;;  %v6550_v20 = vadd.f32 %v21962_v24, %v6528_v12 }
0x11ec   : > { %v6466_v27 = vmul.f32 0.03125, %v6436_v52  ;;  %18194 = vrsqrt.f32 %v6480_v45  ;;  %v6530_v14 = vmul.f32 %v21957_v60, %v6508_v18 }
0x11ed   : > { %v18187_v44 = vpop.eup %18186  ;;  %v6483_v62 = vadd.f32 1e-05, %v6467_v50  ;;  %v6566_v48 = vpack.c.bf16 %v6551_v43, %v6550_v20 }
0x11ee   : > { %v6482_v28 = vadd.f32 1e-05, %v6466_v27  ;;  %v6509_v10 = vmul.f32 %v18187_v44, %v21877_v33  ;;  %v6445_v13 = vpop.xlane.xlu1 %6444  ;;  %v6552_v22 = vadd.f32 %v21962_v24, %v6530_v14 }
0x11ef   : > { %v6442_v23 = vpop.xlane.xlu0 %6441  ;;  %18196 = vrsqrt.f32 %v6483_v62  ;;  %v6469_v61 = vmul.f32 0.03125, %v6445_v13  ;;  %16861 = vmatprep.mubr.msk.bf16.mxu1 %vm1175_vm1, %v6566_v48 }
0x11f0   : > { %v6468_v39 = vmul.f32 0.03125, %v6442_v23  ;;  %v6531_v53 = vmul.f32 %v21957_v60, %v6509_v10  ;;  %18198 = vrsqrt.f32 %v6482_v28 }
0x11f1   : > { %v18189_v42 = vpop.eup %18188  ;;  %v6485_v47 = vadd.f32 1e-05, %v6469_v61 }
0x11f2   : > { %v6484_v17 = vadd.f32 1e-05, %v6468_v39  ;;  %v18191_v7 = vpop.eup %18190  ;;  %v6451_v15 = vpop.xlane.xlu1 %6450  ;;  %v6553_v33 = vadd.f32 %v21962_v24, %v6531_v53  ;;  %v6511_v35 = vmul.f32 %v18189_v42, %v21874_v34 }
0x11f3   : > { %v6448_v29 = vpop.xlane.xlu0 %6447  ;;  %18200 = vrsqrt.f32 %v6485_v47  ;;  %v6471_v38 = vmul.f32 0.03125, %v6451_v15  ;;  %v6510_v45 = vmul.f32 %v18191_v7, %v21886_v5 }
0x11f4   : > { %v6470_v30 = vmul.f32 0.03125, %v6448_v29  ;;  %18202 = vrsqrt.f32 %v6484_v17  ;;  %v6567_v12 = vpack.c.bf16 %v6553_v33, %v6552_v22  ;;  %v6533_v18 = vmul.f32 %v21957_v60, %v6511_v35 }
0x11f5   : > { %v18193_v6 = vpop.eup %18192  ;;  %v6487_v52 = vadd.f32 1e-05, %v6471_v38  ;;  %v6532_v50 = vmul.f32 %v21957_v60, %v6510_v45 }
0x11f6   : > { %v6486_v43 = vadd.f32 1e-05, %v6470_v30  ;;  %v18195_v27 = vpop.eup %18194  ;;  %v6457_v20 = vpop.xlane.xlu1 %6456  ;;  %16862 = vmatmul.mubr.msk.bf16.vlgmr.msra.gmra.mrb[144].mxu1 %vm1175_vm1, %v6567_v12  ;;  %v6555_v34 = vadd.f32 %v21962_v24, %v6533_v18  ;;  %v6513_v62 = vmul.f32 %v18193_v6, %v21883_v49 }
0x11f7   : > { %v6454_v44 = vpop.xlane.xlu0 %6453  ;;  %18204 = vrsqrt.f32 %v6487_v52  ;;  %v6473_v5 = vmul.f32 0.03125, %v6457_v20  ;;  %v6554_v48 = vadd.f32 %v21962_v24, %v6532_v50  ;;  %v6512_v14 = vmul.f32 %v18195_v27, %v21897_v26 }
0x11f8   : > { %v6472_v28 = vmul.f32 0.03125, %v6454_v44  ;;  %18206 = vrsqrt.f32 %v6486_v43  ;;  %v6535_v10 = vmul.f32 %v21957_v60, %v6513_v62 }
0x11f9   : > { %v18197_v13 = vpop.eup %18196  ;;  %v6489_v23 = vadd.f32 1e-05, %v6473_v5  ;;  %v6568_v39 = vpack.c.bf16 %v6555_v34, %v6554_v48  ;;  %v6534_v42 = vmul.f32 %v21957_v60, %v6512_v14 }
0x11fa   : > { %v6488_v61 = vadd.f32 1e-05, %v6472_v28  ;;  %v18199_v53 = vpop.eup %18198  ;;  %v6557_v47 = vadd.f32 %v21962_v24, %v6535_v10  ;;  %v6515_v49 = vmul.f32 %v18197_v13, %v21894_v9 }
0x11fb   : > { %18208 = vrsqrt.f32 %v6489_v23  ;;  %16865 = vmatprep.mubr.msk.bf16.mxu1 %vm1175_vm1, %v6568_v39  ;;  %v6514_v17 = vmul.f32 %v18199_v53, %v21911_v36  ;;  %v6556_v26 = vadd.f32 %v21962_v24, %v6534_v42 }
0x11fc   : > { %18210 = vrsqrt.f32 %v6488_v61  ;;  %v6537_v7 = vmul.f32 %v21957_v60, %v6515_v49 }
0x11fd   : > { %v18201_v15 = vpop.eup %18200  ;;  %v6536_v29 = vmul.f32 %v21957_v60, %v6514_v17  ;;  %v6569_v33 = vpack.c.bf16 %v6557_v47, %v6556_v26 }
0x11fe   : > { %v18203_v22 = vpop.eup %18202  ;;  %v6559_v35 = vadd.f32 %v21962_v24, %v6537_v7  ;;  %v6517_v38 = vmul.f32 %v18201_v15, %v21906_v25 }
0x11ff   : > { %v6558_v9 = vadd.f32 %v21962_v24, %v6536_v29  ;;  %v6516_v30 = vmul.f32 %v18203_v22, %v21924_v16  ;;  %16866 = vmatmul.mubr.msk.bf16.gmra.mrb[148].mxu1 %vm1175_vm1, %v6569_v33 }
0x1200   : > { %v6539_v36 = vmul.f32 %v21957_v60, %v6517_v38 }
0x1201   : > { %v18205_v45 = vpop.eup %18204  ;;  %v6570_v12 = vpack.c.bf16 %v6559_v35, %v6558_v9  ;;  %v6538_v18 = vmul.f32 %v21957_v60, %v6516_v30 }
0x1202   : > { %v18207_v6 = vpop.eup %18206  ;;  %v6561_v52 = vadd.f32 %v21962_v24, %v6539_v36  ;;  %v6519_v43 = vmul.f32 %v18205_v45, %v21921_v21 }
0x1203   : > { %16869 = vmatprep.mubr.msk.bf16.mxu1 %vm1175_vm1, %v6570_v12  ;;  %v6560_v25 = vadd.f32 %v21962_v24, %v6538_v18  ;;  %v6518_v50 = vmul.f32 %v18207_v6, %v21934_v19 }
0x1204   : > { %v6541_v16 = vmul.f32 %v21957_v60, %v6519_v43 }
0x1205   : > { %v18209_v27 = vpop.eup %18208  ;;  %v6571_v20 = vpack.c.bf16 %v6561_v52, %v6560_v25  ;;  %v6540_v44 = vmul.f32 %v21957_v60, %v6518_v50 }
0x1206   : > { %v18211_v34 = vpop.eup %18210  ;;  %v6563_v62 = vadd.f32 %v21962_v24, %v6541_v16  ;;  %v6521_v5 = vmul.f32 %v18209_v27, %v21931_v55  ;;  %v15753_v55 = vld [vmem:[%s24871_s30] ss:$0 sm:$0xff] }
0x1207   : > { %v6562_v21 = vadd.f32 %v21962_v24, %v6540_v44  ;;  %v6520_v28 = vmul.f32 %v18211_v34, %v21942_v2  ;;  %16870 = vmatmul.mubr.msk.bf16.gmra.mrb[152].mxu1 %vm1175_vm1, %v6571_v20 }
0x1208   : > { %v6543_v19 = vmul.f32 %v21957_v60, %v6521_v5 }
0x1209   : > { %v6572_v48 = vpack.c.bf16 %v6563_v62, %v6562_v21  ;;  %v6542_v14 = vmul.f32 %v21957_v60, %v6520_v28 }
0x120a   : > { %v6565_v10 = vadd.f32 %v21962_v24, %v6543_v19 }
0x120b   : > { %16873 = vmatprep.mubr.msk.bf16.mxu1 %vm1175_vm1, %v6572_v48  ;;  %v6564_v13 = vadd.f32 %v21962_v24, %v6542_v14 }
0x120d   : > { %v6573_v23 = vpack.c.bf16 %v6565_v10, %v6564_v13 }
0x120f   : > { %16874 = vmatmul.mubr.msk.bf16.gmra.mrb[156].mxu1 %vm1175_vm1, %v6573_v23 }
0x1210   : > { %16885 = vmatprep.mubr.msk.bf16.mxu1 %vm19083_vm2, %v24800_v57 }
0x12c9   : > { %v16863_v2 = vpop.f32.mrb[144].mxu1 }
0x12ca   : > { %v6655_v61 = vpop.f32.mrb[145].mxu1  ;;  %v22031_v24 = vadd.f32 %v16863_v2, %v15753_v55 }
0x12cb   : > { %v22023_v39 = vadd.f32 %v15753_v55, %v6655_v61  ;;  %v16864_v53 = vpop.f32.mrb[146].mxu1 }
0x12cc   : > { %v6658_v60 = vpop.f32.mrb[147].mxu1  ;;  %v22043_v17 = vpack.c.bf16 %v22031_v24, %v22031_v24  ;;  %v22045_v26 = vadd.f32 %v16864_v53, %v15753_v55 }
0x12cd   : > { %v22027_v42 = vpack.c.bf16 %v22023_v39, %v22023_v39  ;;  %v22029_v47 = vadd.f32 %v15753_v55, %v6658_v60 }
0x12ce   : > { %v22053_v35 = vpack.c.bf16 %v22045_v26, %v22045_v26 }
0x12cf   : > { %v22035_v49 = vpack.c.bf16 %v22029_v47, %v22029_v47  ;;  %6862 = vrot.lane.b32.xlu0 %v22027_v42, %s19084_s2 }
0x12d1   : > { %6910 = vrot.lane.b32.xlu1 %v22035_v49, %s19084_s2 }
0x12d2   : > { %v16867_v7 = vpop.f32.mrb[148].mxu1 }
0x12d3   : > { %v6671_v15 = vpop.f32.mrb[149].mxu1  ;;  %v22055_v38 = vadd.f32 %v16867_v7, %v15753_v55 }
0x12d4   : > { %v22047_v29 = vadd.f32 %v15753_v55, %v6671_v15  ;;  %v16868_v22 = vpop.f32.mrb[150].mxu1 }
0x12d5   : > { %6958 = vrot.lane.b32.xlu1 %v22043_v17, %s19084_s2  ;;  %v6674_v33 = vpop.f32.mrb[151].mxu1  ;;  %24873 = vst [vmem:[#allocation47_spill] sm:$0xff] %v22055_v38  ;;  %v22069_v36 = vpack.c.bf16 %v22055_v38, %v22055_v38  ;;  %v22071_v45 = vadd.f32 %v16868_v22, %v15753_v55 }
0x12d6   : > { %24872 = vst [vmem:[#allocation46_spill] sm:$0xff] %v22047_v29  ;;  %v22059_v9 = vpack.c.bf16 %v22047_v29, %v22047_v29  ;;  %v22061_v30 = vadd.f32 %v15753_v55, %v6674_v33 }
0x12d7   : > { %24874 = vst [vmem:[#allocation48_spill] sm:$0xff] %v22071_v45  ;;  %v22085_v50 = vpack.c.bf16 %v22071_v45, %v22071_v45 }
0x12d8   : > { %7054 = vrot.lane.b32.xlu0 %v22059_v9, %s19084_s2  ;;  %v22075_v12 = vpack.c.bf16 %v22061_v30, %v22061_v30 }
0x12d9   : > { %7006 = vrot.lane.b32.xlu1 %v22053_v35, %s19084_s2 }
0x12da   : > { %v16871_v18 = vpop.f32.mrb[152].mxu1 }
0x12db   : > { %v6687_v6 = vpop.f32.mrb[153].mxu1  ;;  %v22087_v16 = vadd.f32 %v16871_v18, %v15753_v55 }
0x12dc   : > { %v22077_v52 = vadd.f32 %v15753_v55, %v6687_v6  ;;  %7150 = vrot.lane.b32.xlu0 %v22069_v36, %s19084_s2  ;;  %v16872_v43 = vpop.f32.mrb[154].mxu1 }
0x12dd   : > { %7102 = vrot.lane.b32.xlu1 %v22075_v12, %s19084_s2  ;;  %v6690_v25 = vpop.f32.mrb[155].mxu1  ;;  %24876 = vst [vmem:[#allocation50_spill] sm:$0xff] %v22087_v16  ;;  %v22101_v44 = vpack.c.bf16 %v22087_v16, %v22087_v16  ;;  %v22103_v34 = vadd.f32 %v16872_v43, %v15753_v55 }
0x12de   : > { %24875 = vst [vmem:[#allocation49_spill] sm:$0xff] %v22077_v52  ;;  %v22091_v27 = vpack.c.bf16 %v22077_v52, %v22077_v52  ;;  %v22093_v20 = vadd.f32 %v15753_v55, %v6690_v25 }
0x12df   : > { %24878 = vst [vmem:[#allocation52_spill] sm:$0xff] %v22103_v34  ;;  %v22117_v14 = vpack.c.bf16 %v22103_v34, %v22103_v34 }
0x12e0   : > { %24877 = vst [vmem:[#allocation51_spill] sm:$0xff] %v22093_v20  ;;  %7246 = vrot.lane.b32.xlu0 %v22091_v27, %s19084_s2  ;;  %v22107_v62 = vpack.c.bf16 %v22093_v20, %v22093_v20 }
0x12e1   : > { %7198 = vrot.lane.b32.xlu1 %v22085_v50, %s19084_s2 }
0x12e2   : > { %v16875_v5 = vpop.f32.mrb[156].mxu1 }
0x12e3   : > { %v6703_v21 = vpop.f32.mrb[157].mxu1  ;;  %v22119_v10 = vadd.f32 %v16875_v5, %v15753_v55 }
0x12e4   : > { %v22109_v28 = vadd.f32 %v15753_v55, %v6703_v21  ;;  %7342 = vrot.lane.b32.xlu0 %v22101_v44, %s19084_s2  ;;  %v16876_v19 = vpop.f32.mrb[158].mxu1 }
0x12e5   : > { %7294 = vrot.lane.b32.xlu1 %v22107_v62, %s19084_s2  ;;  %v6706_v48 = vpop.f32.mrb[159].mxu1  ;;  %24880 = vst [vmem:[#allocation54_spill] sm:$0xff] %v22119_v10  ;;  %v22133_v2 = vpack.c.bf16 %v22119_v10, %v22119_v10  ;;  %v22135_v61 = vadd.f32 %v16876_v19, %v15753_v55 }
0x12e6   : > { %24879 = vst [vmem:[#allocation53_spill] sm:$0xff] %v22109_v28  ;;  %v22123_v13 = vpack.c.bf16 %v22109_v28, %v22109_v28  ;;  %v22125_v23 = vadd.f32 %v15753_v55, %v6706_v48 }
0x12e7   : > { %24882 = vst [vmem:[#allocation58_spill] sm:$0xff] %v22135_v61  ;;  %v22147_v60 = vpack.c.bf16 %v22135_v61, %v22135_v61 }
0x12e8   : > { %24881 = vst [vmem:[#allocation55_spill] sm:$0xff] %v22125_v23  ;;  %7438 = vrot.lane.b32.xlu0 %v22123_v13, %s19084_s2  ;;  %v22139_v53 = vpack.c.bf16 %v22125_v23, %v22125_v23 }
0x12e9   : > { %7390 = vrot.lane.b32.xlu1 %v22117_v14, %s19084_s2 }
0x12ec   : > { %7534 = vrot.lane.b32.xlu0 %v22133_v2, %s19084_s2 }
0x12ed   : > { %7486 = vrot.lane.b32.xlu1 %v22139_v53, %s19084_s2 }
0x12f0   : > { %7822 = vrot.lane.b32.xlu0 %v22027_v42, %s19085_s3 }
0x12f1   : > { %7582 = vrot.lane.b32.xlu1 %v22147_v60, %s19084_s2  ;;  %s24952_s2 = scalar_lea.vmem [#allocation16], %s19690_s10 }
0x12f4   : > { %7919 = vrot.lane.b32.xlu0 %v22043_v17, %s19085_s3 }
0x12f5   : > { %7871 = vrot.lane.b32.xlu1 %v22035_v49, %s19085_s3 }
0x12f8   : > { %8015 = vrot.lane.b32.xlu0 %v22059_v9, %s19085_s3 }
0x12f9   : > { %7967 = vrot.lane.b32.xlu1 %v22053_v35, %s19085_s3 }
0x12fc   : > { %8111 = vrot.lane.b32.xlu0 %v22069_v36, %s19085_s3 }
0x12fd   : > { %8063 = vrot.lane.b32.xlu1 %v22075_v12, %s19085_s3 }
0x1300   : > { %8207 = vrot.lane.b32.xlu0 %v22091_v27, %s19085_s3 }
0x1301   : > { %8159 = vrot.lane.b32.xlu1 %v22085_v50, %s19085_s3 }
0x1305   : > { %8255 = vrot.lane.b32.xlu1 %v22107_v62, %s19085_s3 }
0x1309   : > { %8303 = vrot.lane.b32.xlu1 %v22101_v44, %s19085_s3 }
0x130d   : > { %8351 = vrot.lane.b32.xlu1 %v22117_v14, %s19085_s3 }
0x1341   : > { %v6863_v55 = vpop.permute.xlu0 %6862 }
0x1342   : > { %v6868_v7 = vsel %vm1688_vm3, %v6863_v55, 0 }
0x1343   : > { %v6911_v15 = vpop.permute.xlu1 %6910  ;;  %16878 = vmatpush3.bf16.xpose.msra.mxu0 %v6868_v7 }
0x1344   : > { %v6916_v22 = vsel %vm1688_vm3, %v6911_v15, 0  ;;  %16889 = vmatprep.subr.bf16.mxu0 %v24800_v57 }
0x1345   : > { %16884 = vmatpush3.bf16.xpose.msra.mxu1 %v6916_v22 }
0x1346   : > { %16895 = vmatprep.subr.bf16.mxu1 %v24800_v57 }
0x1347   : > { %v6959_v33 = vpop.permute.xlu1 %6958 }
0x1348   : > { %v6964_v18 = vsel %vm1688_vm3, %v6959_v33, 0 }
0x134a   : > { %16880 = vmatmul.mubr.msk.bf16.vlgmr.msra.gmra.mrb[144].mxu0 %vm1688_vm3, %v22027_v42  ;;  %v7055_v25 = vpop.permute.xlu0 %7054 }
0x134b   : > { %v7007_v6 = vpop.permute.xlu1 %7006  ;;  %16890 = vmatpush3.bf16.xpose.msra.mxu0 %v6964_v18  ;;  %16891 = vmatprep.mubr.msk.bf16.mxu0 %vm19083_vm2, %v24800_v57  ;;  %v7060_v21 = vsel %vm1688_vm3, %v7055_v25, 0 }
0x134c   : > { %v7012_v43 = vsel %vm1688_vm3, %v7007_v6, 0  ;;  %16886 = vmatmul.mubr.msk.bf16.vlgmr.msra.gmra.mrb[160].mxu1 %vm1688_vm3, %v22035_v49  ;;  %16901 = vmatprep.subr.bf16.mxu0 %v24800_v57 }
0x134d   : > { %16896 = vmatpush3.bf16.xpose.msra.mxu1 %v7012_v43  ;;  %16897 = vmatprep.mubr.msk.bf16.mxu1 %vm19083_vm2, %v24800_v57 }
0x134e   : > { %16907 = vmatprep.subr.bf16.mxu1 %v24800_v57  ;;  %v7151_v48 = vpop.permute.xlu0 %7150 }
0x134f   : > { %v7103_v5 = vpop.permute.xlu1 %7102  ;;  %v7156_v7 = vsel %vm1688_vm3, %v7151_v48, 0 }
0x1350   : > { %v7108_v19 = vsel %vm1688_vm3, %v7103_v5, 0 }
0x1352   : > { %16892 = vmatmul.mubr.msk.bf16.vlgmr.msra.gmra.mrb[148].mxu0 %vm1688_vm3, %v22043_v17  ;;  %v7247_v22 = vpop.permute.xlu0 %7246 }
0x1353   : > { %16902 = vmatpush3.bf16.xpose.msra.mxu0 %v7060_v21  ;;  %16903 = vmatprep.mubr.msk.bf16.mxu0 %vm19083_vm2, %v24800_v57  ;;  %v7199_v55 = vpop.permute.xlu1 %7198  ;;  %v7252_v18 = vsel %vm1688_vm3, %v7247_v22, 0 }
0x1354   : > { %16898 = vmatmul.mubr.msk.bf16.vlgmr.msra.gmra.mrb[164].mxu1 %vm1688_vm3, %v22053_v35  ;;  %16913 = vmatprep.subr.bf16.mxu0 %v24800_v57  ;;  %v7204_v15 = vsel %vm1688_vm3, %v7199_v55, 0 }
0x1355   : > { %16908 = vmatpush3.bf16.xpose.msra.mxu1 %v7108_v19  ;;  %16909 = vmatprep.mubr.msk.bf16.mxu1 %vm19083_vm2, %v24800_v57 }
0x1356   : > { %16919 = vmatprep.subr.bf16.mxu1 %v24800_v57  ;;  %v7343_v43 = vpop.permute.xlu0 %7342 }
0x1357   : > { %v7295_v33 = vpop.permute.xlu1 %7294  ;;  %v7348_v5 = vsel %vm1688_vm3, %v7343_v43, 0 }
0x1358   : > { %v7300_v6 = vsel %vm1688_vm3, %v7295_v33, 0 }
0x135a   : > { %16904 = vmatmul.mubr.msk.bf16.vlgmr.msra.gmra.mrb[152].mxu0 %vm1688_vm3, %v22059_v9  ;;  %v7439_v19 = vpop.permute.xlu0 %7438 }
0x135b   : > { %16914 = vmatpush3.bf16.xpose.msra.mxu0 %v7156_v7  ;;  %16915 = vmatprep.mubr.msk.bf16.mxu0 %vm19083_vm2, %v24800_v57  ;;  %v7391_v25 = vpop.permute.xlu1 %7390  ;;  %v7444_v55 = vsel %vm1688_vm3, %v7439_v19, 0 }
0x135c   : > { %16910 = vmatmul.mubr.msk.bf16.vlgmr.msra.gmra.mrb[168].mxu1 %vm1688_vm3, %v22075_v12  ;;  %16925 = vmatprep.subr.bf16.mxu0 %v24800_v57  ;;  %v7396_v21 = vsel %vm1688_vm3, %v7391_v25, 0 }
0x135d   : > { %16920 = vmatpush3.bf16.xpose.msra.mxu1 %v7204_v15  ;;  %16921 = vmatprep.mubr.msk.bf16.mxu1 %vm19083_vm2, %v24800_v57 }
0x135e   : > { %16931 = vmatprep.subr.bf16.mxu1 %v24800_v57  ;;  %v7535_v15 = vpop.permute.xlu0 %7534 }
0x135f   : > { %v7487_v48 = vpop.permute.xlu1 %7486  ;;  %v7540_v33 = vsel %vm1688_vm3, %v7535_v15, 0 }
0x1360   : > { %v7492_v7 = vsel %vm1688_vm3, %v7487_v48, 0 }
0x1362   : > { %16916 = vmatmul.mubr.msk.bf16.vlgmr.msra.gmra.mrb[156].mxu0 %vm1688_vm3, %v22069_v36 }
0x1363   : > { %16926 = vmatpush3.bf16.xpose.msra.mxu0 %v7252_v18  ;;  %16927 = vmatprep.mubr.msk.bf16.mxu0 %vm19083_vm2, %v24800_v57  ;;  %v7583_v22 = vpop.permute.xlu1 %7582 }
0x1364   : > { %16922 = vmatmul.mubr.msk.bf16.vlgmr.msra.gmra.mrb[172].mxu1 %vm1688_vm3, %v22085_v50  ;;  %16937 = vmatprep.subr.bf16.mxu0 %v24800_v57  ;;  %v7588_v18 = vsel %vm1688_vm3, %v7583_v22, 0 }
0x1365   : > { %16932 = vmatpush3.bf16.xpose.msra.mxu1 %v7300_v6  ;;  %16933 = vmatprep.mubr.msk.bf16.mxu1 %vm19083_vm2, %v24800_v57  ;;  %v7823_v6 = vpop.permute.xlu0 %7822 }
0x1366   : > { %16943 = vmatprep.subr.bf16.mxu1 %v24800_v57  ;;  %v7829_v25 = vsel %vm7827_vm6, %v7823_v6, 0 }
0x1367   : > { %v7872_v43 = vpop.permute.xlu1 %7871 }
0x136a   : > { %16928 = vmatmul.mubr.msk.bf16.vlgmr.msra.gmra.mrb[160].mxu0 %vm1688_vm3, %v22091_v27 }
0x136b   : > { %16938 = vmatpush3.bf16.xpose.msra.mxu0 %v7348_v5  ;;  %16939 = vmatprep.mubr.msk.bf16.mxu0 %vm19083_vm2, %v24800_v57  ;;  %v7877_v5 = vsel %vm7827_vm6, %v7872_v43, 0 }
0x136c   : > { %16934 = vmatmul.mubr.msk.bf16.vlgmr.msra.gmra.mrb[176].mxu1 %vm1688_vm3, %v22107_v62  ;;  %16949 = vmatprep.subr.bf16.mxu0 %v24800_v57 }
0x136d   : > { %16944 = vmatpush3.bf16.xpose.msra.mxu1 %v7396_v21  ;;  %16945 = vmatprep.mubr.msk.bf16.mxu1 %vm19083_vm2, %v24800_v57 }
0x136e   : > { %16955 = vmatprep.subr.bf16.mxu1 %v24800_v57 }
0x1372   : > { %16940 = vmatmul.mubr.msk.bf16.vlgmr.msra.gmra.mrb[164].mxu0 %vm1688_vm3, %v22101_v44 }
0x1373   : > { %16950 = vmatpush3.bf16.xpose.msra.mxu0 %v7444_v55  ;;  %16951 = vmatprep.mubr.msk.bf16.mxu0 %vm19083_vm2, %v24800_v57 }
0x1374   : > { %16946 = vmatmul.mubr.msk.bf16.vlgmr.msra.gmra.mrb[180].mxu1 %vm1688_vm3, %v22117_v14  ;;  %16961 = vmatprep.subr.bf16.mxu0 %v24800_v57 }
0x1375   : > { %16956 = vmatpush3.bf16.xpose.msra.mxu1 %v7492_v7  ;;  %16957 = vmatprep.mubr.msk.bf16.mxu1 %vm19083_vm2, %v24800_v57 }
0x1376   : > { %16967 = vmatprep.subr.bf16.mxu1 %v24800_v57 }
0x137a   : > { %16952 = vmatmul.mubr.msk.bf16.vlgmr.msra.gmra.mrb[168].mxu0 %vm1688_vm3, %v22123_v13 }
0x137b   : > { %16962 = vmatpush3.bf16.xpose.msra.mxu0 %v7540_v33  ;;  %16963 = vmatprep.mubr.msk.bf16.mxu0 %vm19083_vm2, %v24800_v57 }
0x137c   : > { %16958 = vmatmul.mubr.msk.bf16.vlgmr.msra.gmra.mrb[184].mxu1 %vm1688_vm3, %v22139_v53  ;;  %16973 = vmatprep.subr.bf16.mxu0 %v24800_v57 }
0x137d   : > { %16968 = vmatpush3.bf16.xpose.msra.mxu1 %v7588_v18  ;;  %16969 = vmatprep.mubr.msk.bf16.mxu1 %vm19083_vm2, %v24800_v57 }
0x137e   : > { %16979 = vmatprep.subr.bf16.mxu1 %v24800_v57 }
0x1382   : > { %16964 = vmatmul.mubr.msk.bf16.vlgmr.msra.gmra.mrb[172].mxu0 %vm1688_vm3, %v22133_v2 }
0x1383   : > { %16974 = vmatpush3.bf16.msra.mxu0 %v7829_v25  ;;  %16975 = vmatprep.mubr.msk.bf16.mxu0 %vm19083_vm2, %v24800_v57 }
0x1384   : > { %16970 = vmatmul.mubr.msk.bf16.vlgmr.msra.gmra.mrb[188].mxu1 %vm1688_vm3, %v22147_v60  ;;  %16985 = vmatprep.subr.bf16.mxu0 %v24800_v57 }
0x1385   : > { %16980 = vmatpush3.bf16.msra.mxu1 %v7877_v5  ;;  %16981 = vmatprep.mubr.msk.bf16.mxu1 %vm19083_vm2, %v24800_v57 }
0x1386   : > { %16991 = vmatprep.subr.bf16.mxu1 %v24800_v57 }
0x141d   : > { %v22275_v21 = vpop.f32.mrb[144].mxu0 }
0x141e   : > { %v16881_v19 = vpop.f32.mrb[145].mxu0  ;;  %v7630_v48 = vsel %vm1688_vm3, %v22275_v21, -inf }
0x141f   : > { %v22279_v55 = vpop.f32.mrb[160].mxu1  ;;  %7631 = vmax.xlane.f32.xlu0 %v7630_v48  ;;  %v6907_v7 = vpop.f32.mrb[146].mxu0 }
0x1420   : > { %v16882_v15 = vpop.f32.mrb[147].mxu0  ;;  %v16887_v22 = vpop.f32.mrb[161].mxu1  ;;  %v7633_v33 = vsel %vm1688_vm3, %v22279_v55, -inf }
0x1421   : > { %v6955_v18 = vpop.f32.mrb[162].mxu1  ;;  %7634 = vmax.xlane.f32.xlu1 %v7633_v33 }
0x1422   : > { %v16888_v6 = vpop.f32.mrb[163].mxu1 }
0x1425   : > { %v22283_v43 = vpop.f32.mrb[148].mxu0 }
0x1426   : > { %v16893_v25 = vpop.f32.mrb[149].mxu0  ;;  %v7636_v5 = vsel %vm1688_vm3, %v22283_v43, -inf }
0x1427   : > { %v22287_v19 = vpop.f32.mrb[164].mxu1  ;;  %7637 = vmax.xlane.f32.xlu0 %v7636_v5  ;;  %v7003_v46 = vpop.f32.mrb[150].mxu0 }
0x1428   : > { %v16894_v48 = vpop.f32.mrb[151].mxu0  ;;  %v16899_v7 = vpop.f32.mrb[165].mxu1  ;;  %v7639_v0 = vsel %vm1688_vm3, %v22287_v19, -inf }
0x1429   : > { %v7051_v15 = vpop.f32.mrb[166].mxu1 }
0x142a   : > { %v16900_v22 = vpop.f32.mrb[167].mxu1 }
0x142b   : > { %7640 = vmax.xlane.f32.xlu0 %v7639_v0 }
0x142d   : > { %v22291_v33 = vpop.f32.mrb[152].mxu0 }
0x142e   : > { %v16905_v18 = vpop.f32.mrb[153].mxu0  ;;  %v7642_v6 = vsel %vm1688_vm3, %v22291_v33, -inf }
0x142f   : > { %v22295_v25 = vpop.f32.mrb[168].mxu1  ;;  %7643 = vmax.xlane.f32.xlu0 %v7642_v6  ;;  %v7099_v59 = vpop.f32.mrb[154].mxu0 }
0x1430   : > { %v16906_v5 = vpop.f32.mrb[155].mxu0  ;;  %v16911_v46 = vpop.f32.mrb[169].mxu1  ;;  %v7645_v48 = vsel %vm1688_vm3, %v22295_v25, -inf }
0x1431   : > { %v7147_v7 = vpop.f32.mrb[170].mxu1  ;;  %7646 = vmax.xlane.f32.xlu1 %v7645_v48 }
0x1432   : > { %v16912_v15 = vpop.f32.mrb[171].mxu1 }
0x1435   : > { %v22299_v22 = vpop.f32.mrb[156].mxu0 }
0x1436   : > { %v16917_v0 = vpop.f32.mrb[157].mxu0  ;;  %v7648_v18 = vsel %vm1688_vm3, %v22299_v22, -inf }
0x1437   : > { %v22303_v58 = vpop.f32.mrb[172].mxu1  ;;  %7649 = vmax.xlane.f32.xlu0 %v7648_v18  ;;  %v7195_v32 = vpop.f32.mrb[158].mxu0 }
0x1438   : > { %v16918_v6 = vpop.f32.mrb[159].mxu0  ;;  %v16923_v59 = vpop.f32.mrb[173].mxu1  ;;  %v7651_v5 = vsel %vm1688_vm3, %v22303_v58, -inf }
0x1439   : > { %v7243_v46 = vpop.f32.mrb[174].mxu1  ;;  %7652 = vmax.xlane.f32.xlu1 %v7651_v5 }
0x143a   : > { %v16924_v7 = vpop.f32.mrb[175].mxu1 }
0x143d   : > { %v22307_v48 = vpop.f32.mrb[160].mxu0 }
0x143e   : > { %v16929_v15 = vpop.f32.mrb[161].mxu0  ;;  %v7654_v0 = vsel %vm1688_vm3, %v22307_v48, -inf }
0x143f   : > { %v22311_v40 = vpop.f32.mrb[176].mxu1  ;;  %7655 = vmax.xlane.f32.xlu0 %v7654_v0  ;;  %v7291_v56 = vpop.f32.mrb[162].mxu0 }
0x1440   : > { %v16930_v18 = vpop.f32.mrb[163].mxu0  ;;  %v16935_v32 = vpop.f32.mrb[177].mxu1  ;;  %v7657_v6 = vsel %vm1688_vm3, %v22311_v40, -inf }
0x1441   : > { %v7339_v59 = vpop.f32.mrb[178].mxu1  ;;  %7658 = vmax.xlane.f32.xlu1 %v7657_v6 }
0x1442   : > { %v16936_v46 = vpop.f32.mrb[179].mxu1 }
0x1445   : > { %v22315_v5 = vpop.f32.mrb[164].mxu0 }
0x1446   : > { %v16941_v7 = vpop.f32.mrb[165].mxu0  ;;  %v7660_v15 = vsel %vm1688_vm3, %v22315_v5, -inf }
0x1447   : > { %v22319_v11 = vpop.f32.mrb[180].mxu1  ;;  %7661 = vmax.xlane.f32.xlu0 %v7660_v15  ;;  %v7387_v63 = vpop.f32.mrb[166].mxu0 }
0x1448   : > { %v16942_v0 = vpop.f32.mrb[167].mxu0  ;;  %v16947_v56 = vpop.f32.mrb[181].mxu1  ;;  %v7663_v18 = vsel %vm1688_vm3, %v22319_v11, -inf }
0x1449   : > { %v7435_v32 = vpop.f32.mrb[182].mxu1  ;;  %7664 = vmax.xlane.f32.xlu1 %v7663_v18 }
0x144a   : > { %v16948_v59 = vpop.f32.mrb[183].mxu1 }
0x144d   : > { %v22323_v6 = vpop.f32.mrb[168].mxu0 }
0x144e   : > { %v16953_v46 = vpop.f32.mrb[169].mxu0  ;;  %v7666_v7 = vsel %vm1688_vm3, %v22323_v6, -inf }
0x144f   : > { %v22327_v31 = vpop.f32.mrb[184].mxu1  ;;  %7667 = vmax.xlane.f32.xlu0 %v7666_v7  ;;  %v7483_v51 = vpop.f32.mrb[170].mxu0 }
0x1450   : > { %v16954_v15 = vpop.f32.mrb[171].mxu0  ;;  %v16959_v63 = vpop.f32.mrb[185].mxu1  ;;  %v7669_v0 = vsel %vm1688_vm3, %v22327_v31, -inf }
0x1451   : > { %7670 = vmax.xlane.f32.xlu1 %v7669_v0  ;;  %v7531_v56 = vpop.f32.mrb[186].mxu1 }
0x1452   : > { %v16960_v32 = vpop.f32.mrb[187].mxu1  ;;  %v22343_v56 = vpop.permute.xlu1 %7967 }
0x1455   : > { %v22331_v18 = vpop.f32.mrb[172].mxu0 }
0x1456   : > { %v16965_v59 = vpop.f32.mrb[173].mxu0  ;;  %v7672_v46 = vsel %vm1688_vm3, %v22331_v18, -inf  ;;  %v22345_v32 = vpop.permute.xlu1 %8063 }
0x1457   : > { %v22335_v54 = vpop.f32.mrb[188].mxu1  ;;  %7673 = vmax.xlane.f32.xlu0 %v7672_v46  ;;  %v7579_v3 = vpop.f32.mrb[174].mxu0 }
0x1458   : > { %v16966_v7 = vpop.f32.mrb[175].mxu0  ;;  %v16971_v51 = vpop.f32.mrb[189].mxu1  ;;  %v7675_v0 = vsel %vm1688_vm3, %v22335_v54, -inf }
0x1459   : > { %v7627_v15 = vpop.f32.mrb[190].mxu1  ;;  %v22347_v59 = vpop.permute.xlu0 %7919 }
0x145a   : > { %v16972_v63 = vpop.f32.mrb[191].mxu1  ;;  %v22349_v3 = vpop.permute.xlu1 %8159 }
0x145d   : > { %v22351_v46 = vpop.permute.xlu0 %8015 }
0x145e   : > { %v22353_v7 = vpop.permute.xlu1 %8255 }
0x1461   : > { %v22355_v51 = vpop.permute.xlu0 %8111 }
0x1462   : > { %8447 = vrot.lane.b32.xlu1 %v22139_v53, %s19085_s3  ;;  %v22357_v15 = vpop.permute.xlu1 %8303 }
0x1465   : > { %v22359_v63 = vpop.permute.xlu0 %8207 }
0x1466   : > { %v22361_v1 = vpop.permute.xlu1 %8351 }
0x146d   : > { %8399 = vrot.lane.b32.xlu0 %v22123_v13, %s19085_s3 }
0x1486   : > { %7676 = vmax.xlane.f32.xlu1 %v7675_v0 }
0x14ac   : > { %v7632_v0 = vpop.xlane.xlu0 %7631 }
0x14ad   : > { %v7678_v4 = vsub.f32 %v22275_v21, %v7632_v0 }
0x14ae   : > { %v7635_v41 = vpop.xlane.xlu1 %7634 }
0x14af   : > { %v7694_v8 = vmul.f32 1.442695, %v7678_v4  ;;  %v7679_v37 = vsub.f32 %v22279_v55, %v7635_v41 }
0x14b1   : > { %18212 = vpow2.f32 %v7694_v8  ;;  %v7696_v61 = vmul.f32 1.442695, %v7679_v37 }
0x14b3   : > { %18214 = vpow2.f32 %v7696_v61 }
0x14b4   : > { %v7638_v10 = vpop.xlane.xlu0 %7637 }
0x14b5   : > { %v7680_v28 = vsub.f32 %v22283_v43, %v7638_v10 }
0x14b7   : > { %v7698_v23 = vmul.f32 1.442695, %v7680_v28 }
0x14b8   : > { %v7641_v16 = vpop.xlane.xlu0 %7640 }
0x14b9   : > { %18216 = vpow2.f32 %v7698_v23  ;;  %v7681_v52 = vsub.f32 %v22287_v19, %v7641_v16 }
0x14bb   : > { %v22367_v34 = vpop.eup %18212  ;;  %v7700_v20 = vmul.f32 1.442695, %v7681_v52 }
0x14bc   : > { %v7644_v38 = vpop.xlane.xlu0 %7643  ;;  %v7726_v4 = vsel %vm1688_vm3, %v22367_v34, 0.0 }
0x14bd   : > { %v22371_v21 = vpop.eup %18214  ;;  %18218 = vpow2.f32 %v7700_v20  ;;  %v7682_v8 = vsub.f32 %v22291_v33, %v7644_v38  ;;  %7727 = vadd.xlane.f32.xlu0 %v7726_v4 }
0x14be   : > { %v7647_v37 = vpop.xlane.xlu1 %7646  ;;  %v7729_v41 = vsel %vm1688_vm3, %v22371_v21, 0.0 }
0x14bf   : > { %v7702_v28 = vmul.f32 1.442695, %v7682_v8  ;;  %v7683_v16 = vsub.f32 %v22295_v25, %v7647_v37  ;;  %7730 = vadd.xlane.f32.xlu1 %v7729_v41 }
0x14c1   : > { %18220 = vpow2.f32 %v7702_v28  ;;  %v7704_v52 = vmul.f32 1.442695, %v7683_v16 }
0x14c3   : > { %v22377_v10 = vpop.eup %18216  ;;  %18222 = vpow2.f32 %v7704_v52 }
0x14c4   : > { %v7650_v23 = vpop.xlane.xlu0 %7649  ;;  %v7732_v20 = vsel %vm1688_vm3, %v22377_v10, 0.0 }
0x14c5   : > { %v7684_v38 = vsub.f32 %v22299_v22, %v7650_v23  ;;  %7733 = vadd.xlane.f32.xlu0 %v7732_v20 }
0x14c6   : > { %v7653_v61 = vpop.xlane.xlu1 %7652 }
0x14c7   : > { %v22382_v55 = vpop.eup %18218  ;;  %v7706_v43 = vmul.f32 1.442695, %v7684_v38  ;;  %v7685_v19 = vsub.f32 %v22303_v58, %v7653_v61 }
0x14c8   : > { %v7735_v33 = vsel %vm1688_vm3, %v22382_v55, 0.0 }
0x14c9   : > { %18224 = vpow2.f32 %v7706_v43  ;;  %v7708_v25 = vmul.f32 1.442695, %v7685_v19  ;;  %7736 = vadd.xlane.f32.xlu1 %v7735_v33 }
0x14cb   : > { %v22387_v0 = vpop.eup %18220  ;;  %18226 = vpow2.f32 %v7708_v25 }
0x14cc   : > { %v7656_v4 = vpop.xlane.xlu0 %7655  ;;  %v7738_v22 = vsel %vm1688_vm3, %v22387_v0, 0.0 }
0x14cd   : > { %v22391_v8 = vpop.eup %18222  ;;  %v7686_v37 = vsub.f32 %v22307_v48, %v7656_v4  ;;  %7739 = vadd.xlane.f32.xlu0 %v7738_v22 }
0x14ce   : > { %v7659_v41 = vpop.xlane.xlu1 %7658  ;;  %v7741_v58 = vsel %vm1688_vm3, %v22391_v8, 0.0 }
0x14cf   : > { %v7710_v28 = vmul.f32 1.442695, %v7686_v37  ;;  %v7687_v16 = vsub.f32 %v22311_v40, %v7659_v41  ;;  %7742 = vadd.xlane.f32.xlu1 %v7741_v58 }
0x14d1   : > { %18228 = vpow2.f32 %v7710_v28  ;;  %v7712_v52 = vmul.f32 1.442695, %v7687_v16 }
0x14d3   : > { %v22397_v23 = vpop.eup %18224  ;;  %18230 = vpow2.f32 %v7712_v52 }
0x14d4   : > { %v7662_v20 = vpop.xlane.xlu0 %7661  ;;  %v7744_v38 = vsel %vm1688_vm3, %v22397_v23, 0.0 }
0x14d5   : > { %v22401_v61 = vpop.eup %18226  ;;  %v7688_v48 = vsub.f32 %v22315_v5, %v7662_v20  ;;  %7745 = vadd.xlane.f32.xlu0 %v7744_v38 }
0x14d6   : > { %v7665_v43 = vpop.xlane.xlu1 %7664  ;;  %v7747_v19 = vsel %vm1688_vm3, %v22401_v61, 0.0 }
0x14d7   : > { %v7714_v40 = vmul.f32 1.442695, %v7688_v48  ;;  %v7689_v33 = vsub.f32 %v22319_v11, %v7665_v43  ;;  %7748 = vadd.xlane.f32.xlu1 %v7747_v19 }
0x14d9   : > { %18232 = vpow2.f32 %v7714_v40  ;;  %v7716_v25 = vmul.f32 1.442695, %v7689_v33 }
0x14db   : > { %v22407_v4 = vpop.eup %18228  ;;  %18234 = vpow2.f32 %v7716_v25 }
0x14dc   : > { %v7668_v22 = vpop.xlane.xlu0 %7667  ;;  %v7750_v37 = vsel %vm1688_vm3, %v22407_v4, 0.0 }
0x14dd   : > { %v22411_v41 = vpop.eup %18230  ;;  %v7690_v5 = vsub.f32 %v22323_v6, %v7668_v22  ;;  %7751 = vadd.xlane.f32.xlu1 %v7750_v37 }
0x14de   : > { %v7671_v58 = vpop.xlane.xlu1 %7670  ;;  %v7753_v28 = vsel %vm1688_vm3, %v22411_v41, 0.0 }
0x14df   : > { %v7718_v11 = vmul.f32 1.442695, %v7690_v5  ;;  %v7691_v16 = vsub.f32 %v22327_v31, %v7671_v58  ;;  %7754 = vadd.xlane.f32.xlu0 %v7753_v28 }
0x14e1   : > { %18236 = vpow2.f32 %v7718_v11  ;;  %v7720_v52 = vmul.f32 1.442695, %v7691_v16 }
0x14e2   : > { %v22438_v22 = vpop.permute.xlu1 %8447 }
0x14e3   : > { %v22417_v20 = vpop.eup %18232  ;;  %18238 = vpow2.f32 %v7720_v52 }
0x14e4   : > { %v7756_v38 = vsel %vm1688_vm3, %v22417_v20, 0.0  ;;  %v7674_v33 = vpop.xlane.xlu0 %7673 }
0x14e5   : > { %v22421_v48 = vpop.eup %18234  ;;  %7757 = vadd.xlane.f32.xlu1 %v7756_v38  ;;  %v7692_v25 = vsub.f32 %v22331_v18, %v7674_v33 }
0x14e6   : > { %v7759_v6 = vsel %vm1688_vm3, %v22421_v48, 0.0 }
0x14e7   : > { %7760 = vadd.xlane.f32.xlu0 %v7759_v6  ;;  %v7722_v37 = vmul.f32 1.442695, %v7692_v25 }
0x14e9   : > { %18240 = vpow2.f32 %v7722_v37 }
0x14eb   : > { %v22425_v43 = vpop.eup %18236 }
0x14ec   : > { %v7762_v31 = vsel %vm1688_vm3, %v22425_v43, 0.0 }
0x14ed   : > { %v22429_v19 = vpop.eup %18238  ;;  %7763 = vadd.xlane.f32.xlu1 %v7762_v31 }
0x14ee   : > { %v7765_v40 = vsel %vm1688_vm3, %v22429_v19, 0.0 }
0x14ef   : > { %7766 = vadd.xlane.f32.xlu0 %v7765_v40 }
0x14f3   : > { %v22441_v11 = vpop.eup %18240 }
0x14f4   : > { %v7768_v16 = vsel %vm1688_vm3, %v22441_v11, 0.0 }
0x14fe   : > { %8543 = vrot.lane.b32.xlu1 %v22147_v60, %s19085_s3 }
0x1505   : > { %8495 = vrot.lane.b32.xlu0 %v22133_v2, %s19085_s3  ;;  %s24953_s3 = smov %s24952_s2 }
0x1513   : > { %v7677_v5 = vpop.xlane.xlu1 %7676 }
0x1514   : > { %v7693_v58 = vsub.f32 %v22335_v54, %v7677_v5  ;;  %v22465_v54 = vpop.permute.xlu0 %8399 }
0x1516   : > { %v7724_v28 = vmul.f32 1.442695, %v7693_v58 }
0x1518   : > { %18242 = vpow2.f32 %v7724_v28  ;;  %v7925_v28 = vsel %vm7827_vm6, %v22347_v59, 0 }
0x1522   : > { %v22445_v52 = vpop.eup %18242  ;;  %7769 = vadd.xlane.f32.xlu1 %v7768_v16 }
0x1523   : > { %v7771_v18 = vsel %vm1688_vm3, %v22445_v52, 0.0 }
0x1524   : > { %7772 = vadd.xlane.f32.xlu0 %v7771_v18 }
0x1533   : > { %8643 = vrot.lane.b32.xlu1 %v22035_v49, %s19086_s6 }
0x1537   : > { %8641 = vrot.lane.b32.xlu1 %v22035_v49, %s19087_s27 }
0x153a   : > { %8593 = vrot.lane.b32.xlu0 %v22027_v42, %s19086_s6 }
0x153b   : > { %8743 = vrot.lane.b32.xlu1 %v22053_v35, %s19086_s6 }
0x153e   : > { %8591 = vrot.lane.b32.xlu0 %v22027_v42, %s19087_s27 }
0x153f   : > { %8741 = vrot.lane.b32.xlu1 %v22053_v35, %s19087_s27 }
0x1542   : > { %8693 = vrot.lane.b32.xlu0 %v22043_v17, %s19086_s6 }
0x1543   : > { %8843 = vrot.lane.b32.xlu1 %v22075_v12, %s19086_s6 }
0x1546   : > { %8691 = vrot.lane.b32.xlu0 %v22043_v17, %s19087_s27 }
0x1547   : > { %8841 = vrot.lane.b32.xlu1 %v22075_v12, %s19087_s27 }
0x154a   : > { %8793 = vrot.lane.b32.xlu0 %v22059_v9, %s19086_s6  ;;  %v7728_v38 = vpop.xlane.xlu0 %7727 }
0x154b   : > { %18244 = vrcp.f32 %v7728_v38  ;;  %8943 = vrot.lane.b32.xlu1 %v22085_v50, %s19086_s6 }
0x154c   : > { %v7731_v6 = vpop.xlane.xlu1 %7730 }
0x154d   : > { %18246 = vrcp.f32 %v7731_v6 }
0x154e   : > { %8791 = vrot.lane.b32.xlu0 %v22059_v9, %s19087_s27 }
0x154f   : > { %8941 = vrot.lane.b32.xlu1 %v22085_v50, %s19087_s27 }
0x1552   : > { %8893 = vrot.lane.b32.xlu0 %v22069_v36, %s19086_s6  ;;  %v7734_v31 = vpop.xlane.xlu0 %7733 }
0x1553   : > { %18248 = vrcp.f32 %v7734_v31  ;;  %9043 = vrot.lane.b32.xlu1 %v22107_v62, %s19086_s6  ;;  %v8021_v31 = vsel %vm7827_vm6, %v22351_v46, 0 }
0x1555   : > { %v18245_v40 = vpop.eup %18244 }
0x1556   : > { %v7737_v33 = vpop.xlane.xlu1 %7736  ;;  %8891 = vrot.lane.b32.xlu0 %v22069_v36, %s19087_s27  ;;  %v7790_v25 = vmul.f32 %v18245_v40, %v22367_v34  ;;  %v7973_v34 = vsel %vm7827_vm6, %v22343_v56, 0 }
0x1557   : > { %v18247_v37 = vpop.eup %18246  ;;  %18250 = vrcp.f32 %v7737_v33  ;;  %9041 = vrot.lane.b32.xlu1 %v22107_v62, %s19087_s27 }
0x1558   : > { %v7806_v5 = vpack.c.bf16 %v7790_v25, %v7790_v25  ;;  %v7791_v58 = vmul.f32 %v18247_v37, %v22371_v21  ;;  %v8069_v37 = vsel %vm7827_vm6, %v22345_v32, 0 }
0x155a   : > { %8993 = vrot.lane.b32.xlu0 %v22091_v27, %s19086_s6  ;;  %16976 = vmatmul.mubr.msk.bf16.vlgmr.msra.gmra.mrb[176].mxu0 %vm1688_vm3, %v7806_v5  ;;  %v7740_v16 = vpop.xlane.xlu0 %7739  ;;  %v7807_v18 = vpack.c.bf16 %v7791_v58, %v7791_v58 }
0x155b   : > { %16986 = vmatpush3.bf16.msra.mxu0 %v7925_v28  ;;  %18252 = vrcp.f32 %v7740_v16  ;;  %9143 = vrot.lane.b32.xlu1 %v22117_v14, %s19086_s6  ;;  %v8117_v28 = vsel %vm7827_vm6, %v22355_v51, 0  ;;  %v8165_v51 = vsel %vm7827_vm6, %v22349_v3, 0 }
0x155c   : > { %16982 = vmatmul.mubr.msk.bf16.vlgmr.msra.gmra.mrb[192].mxu1 %vm1688_vm3, %v7807_v18  ;;  %v7743_v21 = vpop.xlane.xlu1 %7742  ;;  %16987 = vmatprep.mubr.msk.bf16.mxu0 %vm19083_vm2, %v24800_v57 }
0x155d   : > { %v18249_v59 = vpop.eup %18248  ;;  %16992 = vmatpush3.bf16.msra.mxu1 %v7973_v34  ;;  %18254 = vrcp.f32 %v7743_v21  ;;  %16997 = vmatprep.subr.bf16.mxu0 %v24800_v57 }
0x155e   : > { %8991 = vrot.lane.b32.xlu0 %v22091_v27, %s19087_s27  ;;  %v7792_v38 = vmul.f32 %v18249_v59, %v22377_v10  ;;  %16993 = vmatprep.mubr.msk.bf16.mxu1 %vm19083_vm2, %v24800_v57 }
0x155f   : > { %9141 = vrot.lane.b32.xlu1 %v22117_v14, %s19087_s27  ;;  %17003 = vmatprep.subr.bf16.mxu1 %v24800_v57 }
0x1560   : > { %v7808_v56 = vpack.c.bf16 %v7792_v38, %v7792_v38  ;;  %v8213_v38 = vsel %vm7827_vm6, %v22359_v63, 0  ;;  %v8261_v63 = vsel %vm7827_vm6, %v22353_v7, 0 }
0x1561   : > { %v18251_v6 = vpop.eup %18250 }
0x1562   : > { %9093 = vrot.lane.b32.xlu0 %v22101_v44, %s19086_s6  ;;  %16988 = vmatmul.mubr.msk.bf16.vlgmr.msra.gmra.mrb[180].mxu0 %vm1688_vm3, %v7808_v56  ;;  %v7746_v40 = vpop.xlane.xlu0 %7745  ;;  %v7793_v10 = vmul.f32 %v18251_v6, %v22382_v55 }
0x1563   : > { %16998 = vmatpush3.bf16.msra.mxu0 %v8021_v31  ;;  %18256 = vrcp.f32 %v7746_v40  ;;  %9243 = vrot.lane.b32.xlu1 %v22139_v53, %s19086_s6 }
0x1564   : > { %v7749_v33 = vpop.xlane.xlu1 %7748  ;;  %v7809_v25 = vpack.c.bf16 %v7793_v10, %v7793_v10  ;;  %16999 = vmatprep.mubr.msk.bf16.mxu0 %vm19083_vm2, %v24800_v57  ;;  %17009 = vmatprep.subr.bf16.mxu0 %v24800_v57 }
0x1565   : > { %v18253_v46 = vpop.eup %18252  ;;  %18258 = vrcp.f32 %v7749_v33  ;;  %v8309_v33 = vsel %vm7827_vm6, %v22357_v15, 0  ;;  %v8357_v15 = vsel %vm7827_vm6, %v22361_v1, 0 }
0x1566   : > { %16994 = vmatmul.mubr.msk.bf16.vlgmr.msra.gmra.mrb[196].mxu1 %vm1688_vm3, %v7809_v25  ;;  %9091 = vrot.lane.b32.xlu0 %v22101_v44, %s19087_s27  ;;  %v7794_v55 = vmul.f32 %v18253_v46, %v22387_v0 }
0x1567   : > { %v18255_v5 = vpop.eup %18254  ;;  %17004 = vmatpush3.bf16.msra.mxu1 %v8069_v37  ;;  %9241 = vrot.lane.b32.xlu1 %v22139_v53, %s19087_s27 }
0x1568   : > { %v7810_v58 = vpack.c.bf16 %v7794_v55, %v7794_v55  ;;  %17005 = vmatprep.mubr.msk.bf16.mxu1 %vm19083_vm2, %v24800_v57  ;;  %17015 = vmatprep.subr.bf16.mxu1 %v24800_v57  ;;  %v7795_v32 = vmul.f32 %v18255_v5, %v22391_v8 }
0x156a   : > { %9193 = vrot.lane.b32.xlu0 %v22123_v13, %s19086_s6  ;;  %v7752_v0 = vpop.xlane.xlu1 %7751  ;;  %17000 = vmatmul.mubr.msk.bf16.vlgmr.msra.gmra.mrb[184].mxu0 %vm1688_vm3, %v7810_v58  ;;  %v7811_v18 = vpack.c.bf16 %v7795_v32, %v7795_v32  ;;  %v8405_v58 = vsel %vm7827_vm6, %v22465_v54, 0 }
0x156b   : > { %18260 = vrcp.f32 %v7752_v0  ;;  %17010 = vmatpush3.bf16.msra.mxu0 %v8117_v28  ;;  %9343 = vrot.lane.b32.xlu1 %v22147_v60, %s19086_s6 }
0x156c   : > { %v7755_v16 = vpop.xlane.xlu0 %7754  ;;  %17011 = vmatprep.mubr.msk.bf16.mxu0 %vm19083_vm2, %v24800_v57  ;;  %17021 = vmatprep.subr.bf16.mxu0 %v24800_v57 }
0x156d   : > { %v18257_v8 = vpop.eup %18256  ;;  %18262 = vrcp.f32 %v7755_v16 }
0x156e   : > { %17006 = vmatmul.mubr.msk.bf16.vlgmr.msra.gmra.mrb[200].mxu1 %vm1688_vm3, %v7811_v18  ;;  %9191 = vrot.lane.b32.xlu0 %v22123_v13, %s19087_s27  ;;  %v7796_v34 = vmul.f32 %v18257_v8, %v22397_v23 }
0x156f   : > { %v18259_v21 = vpop.eup %18258  ;;  %17016 = vmatpush3.bf16.msra.mxu1 %v8165_v51  ;;  %9341 = vrot.lane.b32.xlu1 %v22147_v60, %s19087_s27 }
0x1570   : > { %v7812_v59 = vpack.c.bf16 %v7796_v34, %v7796_v34  ;;  %17017 = vmatprep.mubr.msk.bf16.mxu1 %vm19083_vm2, %v24800_v57  ;;  %17027 = vmatprep.subr.bf16.mxu1 %v24800_v57  ;;  %v7797_v3 = vmul.f32 %v18259_v21, %v22401_v61 }
0x1572   : > { %9293 = vrot.lane.b32.xlu0 %v22133_v2, %s19086_s6  ;;  %v7758_v23 = vpop.xlane.xlu1 %7757  ;;  %17012 = vmatmul.mubr.msk.bf16.vlgmr.msra.gmra.mrb[188].mxu0 %vm1688_vm3, %v7812_v59  ;;  %v7813_v6 = vpack.c.bf16 %v7797_v3, %v7797_v3  ;;  %s24956_s6 = scalar_lea.vmem [#allocation17], %s19672_s23 }
0x1573   : > { %18264 = vrcp.f32 %v7758_v23  ;;  %17022 = vmatpush3.bf16.msra.mxu0 %v8213_v38  ;;  %9631 = vrot.lane.b32.xlu1 %v22035_v49, %s19088_s25 }
0x1574   : > { %v7761_v56 = vpop.xlane.xlu0 %7760  ;;  %17023 = vmatprep.mubr.msk.bf16.mxu0 %vm19083_vm2, %v24800_v57  ;;  %17033 = vmatprep.subr.bf16.mxu0 %v24800_v57 }
0x1575   : > { %v18261_v61 = vpop.eup %18260  ;;  %18266 = vrcp.f32 %v7761_v56 }
0x1576   : > { %17018 = vmatmul.mubr.msk.bf16.vlgmr.msra.gmra.mrb[204].mxu1 %vm1688_vm3, %v7813_v6  ;;  %9291 = vrot.lane.b32.xlu0 %v22133_v2, %s19087_s27  ;;  %v7798_v31 = vmul.f32 %v18261_v61, %v22407_v4  ;;  %s24975_s27 = scalar_lea.vmem [#allocation22], %s19690_s10  ;;  %s24977_s10 = scalar_lea.vmem [#allocation19], %s19672_s23 }
0x1577   : > { %v18263_v40 = vpop.eup %18262  ;;  %17028 = vmatpush3.bf16.msra.mxu1 %v8261_v63  ;;  %9727 = vrot.lane.b32.xlu1 %v22053_v35, %s19088_s25 }
0x1578   : > { %v7814_v10 = vpack.c.bf16 %v7798_v31, %v7798_v31  ;;  %17029 = vmatprep.mubr.msk.bf16.mxu1 %vm19083_vm2, %v24800_v57  ;;  %17039 = vmatprep.subr.bf16.mxu1 %v24800_v57  ;;  %v7799_v7 = vmul.f32 %v18263_v40, %v22411_v41 }
0x157a   : > { %9583 = vrot.lane.b32.xlu0 %v22027_v42, %s19088_s25  ;;  %v7764_v4 = vpop.xlane.xlu1 %7763  ;;  %17024 = vmatmul.mubr.msk.bf16.vlgmr.msra.gmra.mrb[192].mxu0 %vm1688_vm3, %v7814_v10  ;;  %v7815_v46 = vpack.c.bf16 %v7799_v7, %v7799_v7 }
0x157b   : > { %18268 = vrcp.f32 %v7764_v4  ;;  %17034 = vmatpush3.bf16.msra.mxu0 %v8309_v33  ;;  %9823 = vrot.lane.b32.xlu1 %v22075_v12, %s19088_s25 }
0x157c   : > { %v7767_v25 = vpop.xlane.xlu0 %7766  ;;  %17035 = vmatprep.mubr.msk.bf16.mxu0 %vm19083_vm2, %v24800_v57  ;;  %17045 = vmatprep.subr.bf16.mxu0 %v24800_v57 }
0x157d   : > { %v18265_v41 = vpop.eup %18264  ;;  %18270 = vrcp.f32 %v7767_v25 }
0x157e   : > { %9679 = vrot.lane.b32.xlu0 %v22043_v17, %s19088_s25  ;;  %17030 = vmatmul.mubr.msk.bf16.vlgmr.msra.gmra.mrb[208].mxu1 %vm1688_vm3, %v7815_v46  ;;  %v7800_v37 = vmul.f32 %v18265_v41, %v22417_v20 }
0x157f   : > { %v18267_v55 = vpop.eup %18266  ;;  %17040 = vmatpush3.bf16.msra.mxu1 %v8357_v15  ;;  %9919 = vrot.lane.b32.xlu1 %v22085_v50, %s19088_s25 }
0x1580   : > { %v7816_v5 = vpack.c.bf16 %v7800_v37, %v7800_v37  ;;  %17041 = vmatprep.mubr.msk.bf16.mxu1 %vm19083_vm2, %v24800_v57  ;;  %17051 = vmatprep.subr.bf16.mxu1 %v24800_v57  ;;  %v7801_v1 = vmul.f32 %v18267_v55, %v22421_v48  ;;  %v8453_v48 = vsel %vm7827_vm6, %v22438_v22, 0  ;;  %v8496_v0 = vpop.permute.xlu0 %8495 }
0x1581   : > { %v8501_v18 = vsel %vm7827_vm6, %v8496_v0, 0 }
0x1582   : > { %9775 = vrot.lane.b32.xlu0 %v22059_v9, %s19088_s25  ;;  %17036 = vmatmul.mubr.msk.bf16.vlgmr.msra.gmra.mrb[196].mxu0 %vm1688_vm3, %v7816_v5  ;;  %v7817_v20 = vpack.c.bf16 %v7801_v1, %v7801_v1 }
0x1583   : > { %17046 = vmatpush3.bf16.msra.mxu0 %v8405_v58  ;;  %10015 = vrot.lane.b32.xlu1 %v22107_v62, %s19088_s25 }
0x1584   : > { %17047 = vmatprep.mubr.msk.bf16.mxu0 %vm19083_vm2, %v24800_v57  ;;  %17057 = vmatprep.subr.bf16.mxu0 %v24800_v57 }
0x1585   : > { %v18269_v32 = vpop.eup %18268 }
0x1586   : > { %9871 = vrot.lane.b32.xlu0 %v22069_v36, %s19088_s25  ;;  %17042 = vmatmul.mubr.msk.bf16.vlgmr.msra.gmra.mrb[212].mxu1 %vm1688_vm3, %v7817_v20  ;;  %v7802_v54 = vmul.f32 %v18269_v32, %v22425_v43  ;;  %v8544_v43 = vpop.permute.xlu1 %8543 }
0x1587   : > { %v18271_v28 = vpop.eup %18270  ;;  %17052 = vmatpush3.bf16.msra.mxu1 %v8453_v48  ;;  %10063 = vrot.lane.b32.xlu1 %v22101_v44, %s19088_s25 }
0x1588   : > { %v7818_v16 = vpack.c.bf16 %v7802_v54, %v7802_v54  ;;  %17053 = vmatprep.mubr.msk.bf16.mxu1 %vm19083_vm2, %v24800_v57  ;;  %17063 = vmatprep.subr.bf16.mxu1 %v24800_v57  ;;  %v7803_v22 = vmul.f32 %v18271_v28, %v22429_v19  ;;  %v8549_v19 = vsel %vm7827_vm6, %v8544_v43, 0 }
0x158a   : > { %9967 = vrot.lane.b32.xlu0 %v22091_v27, %s19088_s25  ;;  %17048 = vmatmul.mubr.msk.bf16.vlgmr.msra.gmra.mrb[200].mxu0 %vm1688_vm3, %v7818_v16  ;;  %v7819_v8 = vpack.c.bf16 %v7803_v22, %v7803_v22 }
0x158b   : > { %17058 = vmatpush3.bf16.msra.mxu0 %v8501_v18  ;;  %10111 = vrot.lane.b32.xlu1 %v22117_v14, %s19088_s25 }
0x158c   : > { %17059 = vmatprep.mubr.msk.bf16.mxu0 %vm19083_vm2, %v24800_v57  ;;  %17069 = vmatprep.subr.bf16.mxu0 %v24800_v57 }
0x158e   : > { %17054 = vmatmul.mubr.msk.bf16.vlgmr.msra.gmra.mrb[216].mxu1 %vm1688_vm3, %v7819_v8 }
0x158f   : > { %17064 = vmatpush3.bf16.msra.mxu1 %v8549_v19  ;;  %17065 = vmatprep.mubr.msk.bf16.mxu1 %vm19083_vm2, %v24800_v57 }
0x1590   : > { %17075 = vmatprep.subr.bf16.mxu1 %v24800_v57 }
0x15af   : > { %v7770_v51 = vpop.xlane.xlu1 %7769 }
0x15b0   : > { %18272 = vrcp.f32 %v7770_v51 }
0x15b1   : > { %v7773_v34 = vpop.xlane.xlu0 %7772 }
0x15b2   : > { %18274 = vrcp.f32 %v7773_v34 }
0x15b3   : > { %v8644_v21 = vpop.permute.xlu1 %8643 }
0x15b4   : > { %v8649_v4 = vsel %vm1688_vm3, %v8644_v21, 0 }
0x15b5   : > { %v8594_v59 = vpop.permute.xlu0 %8593 }
0x15b6   : > { %v8599_v10 = vsel %vm1688_vm3, %v8594_v59, 0 }
0x15b7   : > { %v8642_v3 = vpop.permute.xlu1 %8641 }
0x15b9   : > { %v8592_v38 = vpop.permute.xlu0 %8591 }
0x15ba   : > { %v18273_v23 = vpop.eup %18272 }
0x15bb   : > { %v8744_v56 = vpop.permute.xlu1 %8743  ;;  %v7804_v6 = vmul.f32 %v18273_v23, %v22441_v11 }
0x15bc   : > { %v18275_v61 = vpop.eup %18274  ;;  %v8749_v15 = vsel %vm1688_vm3, %v8744_v56, 0 }
0x15bd   : > { %v8694_v63 = vpop.permute.xlu0 %8693  ;;  %v7820_v31 = vpack.c.bf16 %v7804_v6, %v7804_v6  ;;  %v7805_v40 = vmul.f32 %v18275_v61, %v22445_v52 }
0x15be   : > { %v8699_v46 = vsel %vm1688_vm3, %v8694_v63, 0 }
0x15bf   : > { %v8742_v7 = vpop.permute.xlu1 %8741  ;;  %17060 = vmatmul.mubr.msk.bf16.vlgmr.msra.gmra.mrb[204].mxu0 %vm1688_vm3, %v7820_v31  ;;  %v7821_v33 = vpack.c.bf16 %v7805_v40, %v7805_v40 }
0x15c0   : > { %17070 = vmatpush3.bf16.xpose.msra.mxu0 %v8599_v10  ;;  %17071 = vmatprep.mubr.msk.bf16.mxu0 %vm19083_vm2, %v24800_v57 }
0x15c1   : > { %17066 = vmatmul.mubr.msk.bf16.vlgmr.msra.gmra.mrb[220].mxu1 %vm1688_vm3, %v7821_v33  ;;  %v8692_v11 = vpop.permute.xlu0 %8691  ;;  %17081 = vmatprep.subr.bf16.mxu0 %v24800_v57 }
0x15c2   : > { %17076 = vmatpush3.bf16.xpose.msra.mxu1 %v8649_v4  ;;  %17077 = vmatprep.mubr.msk.bf16.mxu1 %vm19083_vm2, %v24800_v57 }
0x15c3   : > { %v8844_v52 = vpop.permute.xlu1 %8843  ;;  %17087 = vmatprep.subr.bf16.mxu1 %v24800_v57 }
0x15c4   : > { %v8849_v20 = vsel %vm1688_vm3, %v8844_v52, 0 }
0x15c5   : > { %v8794_v25 = vpop.permute.xlu0 %8793 }
0x15c6   : > { %v8799_v1 = vsel %vm1688_vm3, %v8794_v25, 0 }
0x15c7   : > { %v8842_v41 = vpop.permute.xlu1 %8841  ;;  %17072 = vmatmul.mubr.msk.bf16.vlgmr.msra.gmra.mrb[208].mxu0 %vm1688_vm3, %v8592_v38 }
0x15c8   : > { %17082 = vmatpush3.bf16.xpose.msra.mxu0 %v8699_v46  ;;  %17083 = vmatprep.mubr.msk.bf16.mxu0 %vm19083_vm2, %v24800_v57 }
0x15c9   : > { %17078 = vmatmul.mubr.msk.bf16.vlgmr.msra.gmra.mrb[224].mxu1 %vm1688_vm3, %v8642_v3  ;;  %v8792_v37 = vpop.permute.xlu0 %8791  ;;  %17093 = vmatprep.subr.bf16.mxu0 %v24800_v57 }
0x15ca   : > { %17088 = vmatpush3.bf16.xpose.msra.mxu1 %v8749_v15  ;;  %17089 = vmatprep.mubr.msk.bf16.mxu1 %vm19083_vm2, %v24800_v57 }
0x15cb   : > { %v8944_v55 = vpop.permute.xlu1 %8943  ;;  %17099 = vmatprep.subr.bf16.mxu1 %v24800_v57 }
0x15cc   : > { %v8949_v16 = vsel %vm1688_vm3, %v8944_v55, 0 }
0x15cd   : > { %v8894_v5 = vpop.permute.xlu0 %8893 }
0x15ce   : > { %v8899_v28 = vsel %vm1688_vm3, %v8894_v5, 0 }
0x15cf   : > { %v8942_v58 = vpop.permute.xlu1 %8941  ;;  %17084 = vmatmul.mubr.msk.bf16.vlgmr.msra.gmra.mrb[212].mxu0 %vm1688_vm3, %v8692_v11 }
0x15d0   : > { %17094 = vmatpush3.bf16.xpose.msra.mxu0 %v8799_v1  ;;  %17095 = vmatprep.mubr.msk.bf16.mxu0 %vm19083_vm2, %v24800_v57 }
0x15d1   : > { %17090 = vmatmul.mubr.msk.bf16.vlgmr.msra.gmra.mrb[228].mxu1 %vm1688_vm3, %v8742_v7  ;;  %v8892_v32 = vpop.permute.xlu0 %8891  ;;  %17105 = vmatprep.subr.bf16.mxu0 %v24800_v57 }
0x15d2   : > { %17100 = vmatpush3.bf16.xpose.msra.mxu1 %v8849_v20  ;;  %17101 = vmatprep.mubr.msk.bf16.mxu1 %vm19083_vm2, %v24800_v57 }
0x15d3   : > { %v9044_v48 = vpop.permute.xlu1 %9043  ;;  %17111 = vmatprep.subr.bf16.mxu1 %v24800_v57 }
0x15d4   : > { %v9049_v51 = vsel %vm1688_vm3, %v9044_v48, 0 }
0x15d5   : > { %v8994_v54 = vpop.permute.xlu0 %8993 }
0x15d6   : > { %v8999_v8 = vsel %vm1688_vm3, %v8994_v54, 0 }
0x15d7   : > { %v9042_v0 = vpop.permute.xlu1 %9041  ;;  %17096 = vmatmul.mubr.msk.bf16.vlgmr.msra.gmra.mrb[216].mxu0 %vm1688_vm3, %v8792_v37 }
0x15d8   : > { %17106 = vmatpush3.bf16.xpose.msra.mxu0 %v8899_v28  ;;  %17107 = vmatprep.mubr.msk.bf16.mxu0 %vm19083_vm2, %v24800_v57 }
0x15d9   : > { %17102 = vmatmul.mubr.msk.bf16.vlgmr.msra.gmra.mrb[232].mxu1 %vm1688_vm3, %v8842_v41  ;;  %v8992_v22 = vpop.permute.xlu0 %8991  ;;  %17117 = vmatprep.subr.bf16.mxu0 %v24800_v57 }
0x15da   : > { %17112 = vmatpush3.bf16.xpose.msra.mxu1 %v8949_v16  ;;  %17113 = vmatprep.mubr.msk.bf16.mxu1 %vm19083_vm2, %v24800_v57 }
0x15db   : > { %v9144_v18 = vpop.permute.xlu1 %9143  ;;  %17123 = vmatprep.subr.bf16.mxu1 %v24800_v57 }
0x15dc   : > { %v9149_v38 = vsel %vm1688_vm3, %v9144_v18, 0 }
0x15dd   : > { %v9094_v43 = vpop.permute.xlu0 %9093 }
0x15de   : > { %v9099_v3 = vsel %vm1688_vm3, %v9094_v43, 0 }
0x15df   : > { %17108 = vmatmul.mubr.msk.bf16.vlgmr.msra.gmra.mrb[220].mxu0 %vm1688_vm3, %v8892_v32  ;;  %v9142_v19 = vpop.permute.xlu1 %9141 }
0x15e0   : > { %17118 = vmatpush3.bf16.xpose.msra.mxu0 %v8999_v8  ;;  %17119 = vmatprep.mubr.msk.bf16.mxu0 %vm19083_vm2, %v24800_v57 }
0x15e1   : > { %17114 = vmatmul.mubr.msk.bf16.vlgmr.msra.gmra.mrb[236].mxu1 %vm1688_vm3, %v8942_v58  ;;  %v9092_v34 = vpop.permute.xlu0 %9091  ;;  %17129 = vmatprep.subr.bf16.mxu0 %v24800_v57 }
0x15e2   : > { %17124 = vmatpush3.bf16.xpose.msra.mxu1 %v9049_v51  ;;  %17125 = vmatprep.mubr.msk.bf16.mxu1 %vm19083_vm2, %v24800_v57 }
0x15e3   : > { %17135 = vmatprep.subr.bf16.mxu1 %v24800_v57  ;;  %v9244_v59 = vpop.permute.xlu1 %9243 }
0x15e4   : > { %v9249_v63 = vsel %vm1688_vm3, %v9244_v59, 0 }
0x15e5   : > { %v9194_v21 = vpop.permute.xlu0 %9193 }
0x15e6   : > { %v9199_v6 = vsel %vm1688_vm3, %v9194_v21, 0 }
0x15e7   : > { %17120 = vmatmul.mubr.msk.bf16.vlgmr.msra.gmra.mrb[224].mxu0 %vm1688_vm3, %v8992_v22  ;;  %v9242_v56 = vpop.permute.xlu1 %9241 }
0x15e8   : > { %17130 = vmatpush3.bf16.xpose.msra.mxu0 %v9099_v3  ;;  %17131 = vmatprep.mubr.msk.bf16.mxu0 %vm19083_vm2, %v24800_v57 }
0x15e9   : > { %17126 = vmatmul.mubr.msk.bf16.vlgmr.msra.gmra.mrb[240].mxu1 %vm1688_vm3, %v9042_v0  ;;  %17141 = vmatprep.subr.bf16.mxu0 %v24800_v57  ;;  %v9192_v23 = vpop.permute.xlu0 %9191 }
0x15ea   : > { %17136 = vmatpush3.bf16.xpose.msra.mxu1 %v9149_v38  ;;  %17137 = vmatprep.mubr.msk.bf16.mxu1 %vm19083_vm2, %v24800_v57 }
0x15eb   : > { %17147 = vmatprep.subr.bf16.mxu1 %v24800_v57  ;;  %v9344_v31 = vpop.permute.xlu1 %9343 }
0x15ec   : > { %v9349_v33 = vsel %vm1688_vm3, %v9344_v31, 0 }
0x15ed   : > { %v9294_v61 = vpop.permute.xlu0 %9293 }
0x15ee   : > { %v9299_v10 = vsel %vm1688_vm3, %v9294_v61, 0 }
0x15ef   : > { %17132 = vmatmul.mubr.msk.bf16.vlgmr.msra.gmra.mrb[228].mxu0 %vm1688_vm3, %v9092_v34  ;;  %v9342_v7 = vpop.permute.xlu1 %9341 }
0x15f0   : > { %17142 = vmatpush3.bf16.xpose.msra.mxu0 %v9199_v6  ;;  %17143 = vmatprep.mubr.msk.bf16.mxu0 %vm19083_vm2, %v24800_v57 }
0x15f1   : > { %17138 = vmatmul.mubr.msk.bf16.vlgmr.msra.gmra.mrb[244].mxu1 %vm1688_vm3, %v9142_v19  ;;  %17153 = vmatprep.subr.bf16.mxu0 %v24800_v57  ;;  %v9292_v40 = vpop.permute.xlu0 %9291 }
0x15f2   : > { %17148 = vmatpush3.bf16.xpose.msra.mxu1 %v9249_v63  ;;  %17149 = vmatprep.mubr.msk.bf16.mxu1 %vm19083_vm2, %v24800_v57 }
0x15f3   : > { %17159 = vmatprep.subr.bf16.mxu1 %v24800_v57  ;;  %v9632_v11 = vpop.permute.xlu1 %9631 }
0x15f4   : > { %v9637_v25 = vsel %vm7827_vm6, %v9632_v11, 0 }
0x15f5   : > { %v9584_v4 = vpop.permute.xlu0 %9583 }
0x15f6   : > { %v9589_v52 = vsel %vm7827_vm6, %v9584_v4, 0 }
0x15f7   : > { %17144 = vmatmul.mubr.msk.bf16.vlgmr.msra.gmra.mrb[232].mxu0 %vm1688_vm3, %v9192_v23 }
0x15f8   : > { %17154 = vmatpush3.bf16.xpose.msra.mxu0 %v9299_v10  ;;  %17155 = vmatprep.mubr.msk.bf16.mxu0 %vm19083_vm2, %v24800_v57 }
0x15f9   : > { %17150 = vmatmul.mubr.msk.bf16.vlgmr.msra.gmra.mrb[248].mxu1 %vm1688_vm3, %v9242_v56  ;;  %17165 = vmatprep.subr.bf16.mxu0 %v24800_v57 }
0x15fa   : > { %17160 = vmatpush3.bf16.xpose.msra.mxu1 %v9349_v33  ;;  %17161 = vmatprep.mubr.msk.bf16.mxu1 %vm19083_vm2, %v24800_v57 }
0x15fb   : > { %17171 = vmatprep.subr.bf16.mxu1 %v24800_v57 }
0x15ff   : > { %17156 = vmatmul.mubr.msk.bf16.vlgmr.msra.gmra.mrb[236].mxu0 %vm1688_vm3, %v9292_v40 }
0x1600   : > { %17166 = vmatpush3.bf16.msra.mxu0 %v9589_v52  ;;  %17167 = vmatprep.mubr.msk.bf16.mxu0 %vm19083_vm2, %v24800_v57 }
0x1601   : > { %17162 = vmatmul.mubr.msk.bf16.vlgmr.msra.gmra.mrb[252].mxu1 %vm1688_vm3, %v9342_v7  ;;  %17177 = vmatprep.subr.bf16.mxu0 %v24800_v57 }
0x1602   : > { %17172 = vmatpush3.bf16.msra.mxu1 %v9637_v25  ;;  %17173 = vmatprep.mubr.msk.bf16.mxu1 %vm19083_vm2, %v24800_v57 }
0x1603   : > { %17183 = vmatprep.subr.bf16.mxu1 %v24800_v57 }
0x162d   : > { %v22727_v46 = vpop.f32.mrb[176].mxu0 }
0x162e   : > { %24883 = vst [vmem:[#allocation59_spill] sm:$0xff] %v22727_v46  ;;  %v16977_v41 = vpop.f32.mrb[177].mxu0 }
0x162f   : > { %v7868_v15 = vpop.f32.mrb[178].mxu0  ;;  %v22729_v37 = vpop.f32.mrb[192].mxu1 }
0x1630   : > { %24884 = vst [vmem:[#allocation56_spill] sm:$0xff] %v22729_v37  ;;  %v16978_v55 = vpop.f32.mrb[179].mxu0  ;;  %v16983_v5 = vpop.f32.mrb[193].mxu1 }
0x1631   : > { %v7916_v1 = vpop.f32.mrb[194].mxu1 }
0x1632   : > { %v16984_v58 = vpop.f32.mrb[195].mxu1 }
0x1635   : > { %v22731_v20 = vpop.f32.mrb[180].mxu0 }
0x1636   : > { %24885 = vst [vmem:[#allocation57_spill] sm:$0xff] %v22731_v20  ;;  %v16989_v32 = vpop.f32.mrb[181].mxu0 }
0x1637   : > { %v7964_v48 = vpop.f32.mrb[182].mxu0 }
0x1638   : > { %v16990_v54 = vpop.f32.mrb[183].mxu0 }
0x1639   : > { %v22733_v28 = vpop.f32.mrb[196].mxu1 }
0x163a   : > { %24886 = vst [vmem:[#allocation60_spill] sm:$0xff] %v22733_v28  ;;  %v16995_v0 = vpop.f32.mrb[197].mxu1 }
0x163b   : > { %v8012_v16 = vpop.f32.mrb[198].mxu1 }
0x163c   : > { %v16996_v22 = vpop.f32.mrb[199].mxu1 }
0x163d   : > { %v22735_v18 = vpop.f32.mrb[184].mxu0 }
0x163e   : > { %24887 = vst [vmem:[#allocation61_spill] sm:$0xff] %v22735_v18  ;;  %v17001_v43 = vpop.f32.mrb[185].mxu0 }
0x163f   : > { %v8060_v8 = vpop.f32.mrb[186].mxu0 }
0x1640   : > { %v17002_v19 = vpop.f32.mrb[187].mxu0 }
0x1641   : > { %v22737_v51 = vpop.f32.mrb[200].mxu1 }
0x1642   : > { %24888 = vst [vmem:[#allocation75_spill] sm:$0xff] %v22737_v51  ;;  %v17007_v34 = vpop.f32.mrb[201].mxu1 }
0x1643   : > { %v8108_v21 = vpop.f32.mrb[202].mxu1 }
0x1644   : > { %v17008_v59 = vpop.f32.mrb[203].mxu1 }
0x1645   : > { %v22739_v3 = vpop.f32.mrb[188].mxu0 }
0x1646   : > { %24889 = vst [vmem:[#allocation76_spill] sm:$0xff] %v22739_v3  ;;  %v17013_v38 = vpop.f32.mrb[189].mxu0 }
0x1647   : > { %v8156_v23 = vpop.f32.mrb[190].mxu0 }
0x1648   : > { %v17014_v56 = vpop.f32.mrb[191].mxu0 }
0x1649   : > { %v22741_v6 = vpop.f32.mrb[204].mxu1 }
0x164a   : > { %24890 = vst [vmem:[#allocation77_spill] sm:$0xff] %v22741_v6  ;;  %v17019_v61 = vpop.f32.mrb[205].mxu1 }
0x164b   : > { %v8204_v63 = vpop.f32.mrb[206].mxu1 }
0x164c   : > { %v17020_v31 = vpop.f32.mrb[207].mxu1 }
0x164d   : > { %v22743_v40 = vpop.f32.mrb[192].mxu0 }
0x164e   : > { %24891 = vst [vmem:[#allocation78_spill] sm:$0xff] %v22743_v40  ;;  %v17025_v10 = vpop.f32.mrb[193].mxu0 }
0x164f   : > { %v8252_v7 = vpop.f32.mrb[194].mxu0 }
0x1650   : > { %v17026_v33 = vpop.f32.mrb[195].mxu0 }
0x1651   : > { %v22745_v4 = vpop.f32.mrb[208].mxu1 }
0x1652   : > { %24892 = vst [vmem:[#allocation79_spill] sm:$0xff] %v22745_v4  ;;  %v17031_v11 = vpop.f32.mrb[209].mxu1 }
0x1653   : > { %v8300_v52 = vpop.f32.mrb[210].mxu1 }
0x1654   : > { %v17032_v25 = vpop.f32.mrb[211].mxu1 }
0x1655   : > { %v22747_v41 = vpop.f32.mrb[196].mxu0 }
0x1656   : > { %24893 = vst [vmem:[#allocation80_spill] sm:$0xff] %v22747_v41  ;;  %v17037_v15 = vpop.f32.mrb[197].mxu0 }
0x1657   : > { %v8348_v55 = vpop.f32.mrb[198].mxu0 }
0x1658   : > { %v17038_v5 = vpop.f32.mrb[199].mxu0 }
0x1659   : > { %v22749_v1 = vpop.f32.mrb[212].mxu1 }
0x165a   : > { %24894 = vst [vmem:[#allocation81_spill] sm:$0xff] %v22749_v1  ;;  %v17043_v58 = vpop.f32.mrb[213].mxu1 }
0x165b   : > { %v8396_v32 = vpop.f32.mrb[214].mxu1 }
0x165c   : > { %v17044_v48 = vpop.f32.mrb[215].mxu1 }
0x165d   : > { %v22751_v54 = vpop.f32.mrb[200].mxu0 }
0x165e   : > { %24895 = vst [vmem:[#allocation82_spill] sm:$0xff] %v22751_v54  ;;  %v17049_v0 = vpop.f32.mrb[201].mxu0 }
0x165f   : > { %v8444_v16 = vpop.f32.mrb[202].mxu0 }
0x1660   : > { %v17050_v22 = vpop.f32.mrb[203].mxu0 }
0x1661   : > { %v22753_v43 = vpop.f32.mrb[216].mxu1 }
0x1662   : > { %24896 = vst [vmem:[#allocation83_spill] sm:$0xff] %v22753_v43  ;;  %v17055_v8 = vpop.f32.mrb[217].mxu1 }
0x1663   : > { %v8492_v19 = vpop.f32.mrb[218].mxu1 }
0x1664   : > { %v17056_v34 = vpop.f32.mrb[219].mxu1 }
0x1692   : > { %v22755_v21 = vpop.f32.mrb[204].mxu0 }
0x1693   : > { %24897 = vst [vmem:[#allocation84_spill] sm:$0xff] %v22755_v21  ;;  %v17061_v59 = vpop.f32.mrb[205].mxu0 }
0x1694   : > { %v8540_v38 = vpop.f32.mrb[206].mxu0  ;;  %v22757_v23 = vpop.f32.mrb[220].mxu1 }
0x1695   : > { %24898 = vst [vmem:[#allocation85_spill] sm:$0xff] %v22757_v23  ;;  %v17062_v56 = vpop.f32.mrb[207].mxu0  ;;  %v17067_v61 = vpop.f32.mrb[221].mxu1 }
0x1696   : > { %v8588_v63 = vpop.f32.mrb[222].mxu1 }
0x1697   : > { %v17068_v31 = vpop.f32.mrb[223].mxu1 }
0x169a   : > { %v22759_v10 = vpop.f32.mrb[208].mxu0 }
0x169b   : > { %v17073_v7 = vpop.f32.mrb[209].mxu0  ;;  %v9391_v33 = vsel %vm1688_vm3, %v22759_v10, -inf }
0x169c   : > { %v22763_v11 = vpop.f32.mrb[224].mxu1  ;;  %9392 = vmax.xlane.f32.xlu0 %v9391_v33  ;;  %v8638_v52 = vpop.f32.mrb[210].mxu0 }
0x169d   : > { %v17074_v25 = vpop.f32.mrb[211].mxu0  ;;  %v17079_v15 = vpop.f32.mrb[225].mxu1  ;;  %v9394_v55 = vsel %vm1688_vm3, %v22763_v11, -inf }
0x169e   : > { %9395 = vmax.xlane.f32.xlu1 %v9394_v55  ;;  %v8688_v5 = vpop.f32.mrb[226].mxu1 }
0x169f   : > { %v17080_v58 = vpop.f32.mrb[227].mxu1 }
0x16a2   : > { %v22767_v32 = vpop.f32.mrb[212].mxu0 }
0x16a3   : > { %v17085_v48 = vpop.f32.mrb[213].mxu0  ;;  %v9397_v0 = vsel %vm1688_vm3, %v22767_v32, -inf }
0x16a4   : > { %v22771_v16 = vpop.f32.mrb[228].mxu1  ;;  %9398 = vmax.xlane.f32.xlu0 %v9397_v0  ;;  %v8738_v22 = vpop.f32.mrb[214].mxu0 }
0x16a5   : > { %v17086_v8 = vpop.f32.mrb[215].mxu0  ;;  %v17091_v19 = vpop.f32.mrb[229].mxu1  ;;  %v9400_v38 = vsel %vm1688_vm3, %v22771_v16, -inf }
0x16a6   : > { %v8788_v34 = vpop.f32.mrb[230].mxu1 }
0x16a7   : > { %v17092_v59 = vpop.f32.mrb[231].mxu1 }
0x16a8   : > { %9401 = vmax.xlane.f32.xlu0 %v9400_v38 }
0x16aa   : > { %v22775_v56 = vpop.f32.mrb[216].mxu0 }
0x16ab   : > { %v17097_v61 = vpop.f32.mrb[217].mxu0  ;;  %v9403_v63 = vsel %vm1688_vm3, %v22775_v56, -inf }
0x16ac   : > { %v22779_v31 = vpop.f32.mrb[232].mxu1  ;;  %9404 = vmax.xlane.f32.xlu0 %v9403_v63  ;;  %v8838_v7 = vpop.f32.mrb[218].mxu0 }
0x16ad   : > { %v17098_v33 = vpop.f32.mrb[219].mxu0  ;;  %v17103_v52 = vpop.f32.mrb[233].mxu1  ;;  %v9406_v25 = vsel %vm1688_vm3, %v22779_v31, -inf }
0x16ae   : > { %9407 = vmax.xlane.f32.xlu1 %v9406_v25  ;;  %v8888_v15 = vpop.f32.mrb[234].mxu1 }
0x16af   : > { %v17104_v55 = vpop.f32.mrb[235].mxu1 }
0x16b2   : > { %v22783_v5 = vpop.f32.mrb[220].mxu0 }
0x16b3   : > { %v17109_v58 = vpop.f32.mrb[221].mxu0  ;;  %v9409_v48 = vsel %vm1688_vm3, %v22783_v5, -inf }
0x16b4   : > { %v22787_v0 = vpop.f32.mrb[236].mxu1  ;;  %9410 = vmax.xlane.f32.xlu0 %v9409_v48  ;;  %v8938_v22 = vpop.f32.mrb[222].mxu0 }
0x16b5   : > { %v17110_v8 = vpop.f32.mrb[223].mxu0  ;;  %v17115_v19 = vpop.f32.mrb[237].mxu1  ;;  %v9412_v34 = vsel %vm1688_vm3, %v22787_v0, -inf }
0x16b6   : > { %9413 = vmax.xlane.f32.xlu1 %v9412_v34  ;;  %v8988_v59 = vpop.f32.mrb[238].mxu1 }
0x16b7   : > { %v17116_v38 = vpop.f32.mrb[239].mxu1 }
0x16ba   : > { %v22791_v61 = vpop.f32.mrb[224].mxu0 }
0x16bb   : > { %v17121_v63 = vpop.f32.mrb[225].mxu0  ;;  %v9415_v7 = vsel %vm1688_vm3, %v22791_v61, -inf }
0x16bc   : > { %v22795_v33 = vpop.f32.mrb[240].mxu1  ;;  %9416 = vmax.xlane.f32.xlu0 %v9415_v7  ;;  %v9038_v52 = vpop.f32.mrb[226].mxu0 }
0x16bd   : > { %v17122_v25 = vpop.f32.mrb[227].mxu0  ;;  %v17127_v15 = vpop.f32.mrb[241].mxu1  ;;  %v9418_v55 = vsel %vm1688_vm3, %v22795_v33, -inf }
0x16be   : > { %9419 = vmax.xlane.f32.xlu1 %v9418_v55  ;;  %v9088_v58 = vpop.f32.mrb[242].mxu1 }
0x16bf   : > { %v17128_v48 = vpop.f32.mrb[243].mxu1 }
0x16c2   : > { %v22799_v22 = vpop.f32.mrb[228].mxu0 }
0x16c3   : > { %v17133_v8 = vpop.f32.mrb[229].mxu0  ;;  %v9421_v19 = vsel %vm1688_vm3, %v22799_v22, -inf }
0x16c4   : > { %v22803_v34 = vpop.f32.mrb[244].mxu1  ;;  %9422 = vmax.xlane.f32.xlu0 %v9421_v19  ;;  %v9138_v59 = vpop.f32.mrb[230].mxu0 }
0x16c5   : > { %v17134_v38 = vpop.f32.mrb[231].mxu0  ;;  %v17139_v63 = vpop.f32.mrb[245].mxu1  ;;  %v9424_v7 = vsel %vm1688_vm3, %v22803_v34, -inf }
0x16c6   : > { %9425 = vmax.xlane.f32.xlu1 %v9424_v7  ;;  %v9188_v52 = vpop.f32.mrb[246].mxu1 }
0x16c7   : > { %v17140_v25 = vpop.f32.mrb[247].mxu1 }
0x16ca   : > { %v22807_v15 = vpop.f32.mrb[232].mxu0 }
0x16cb   : > { %v17145_v55 = vpop.f32.mrb[233].mxu0  ;;  %v9427_v58 = vsel %vm1688_vm3, %v22807_v15, -inf }
0x16cc   : > { %v22811_v48 = vpop.f32.mrb[248].mxu1  ;;  %9428 = vmax.xlane.f32.xlu0 %v9427_v58  ;;  %v9238_v8 = vpop.f32.mrb[234].mxu0 }
0x16cd   : > { %v17146_v19 = vpop.f32.mrb[235].mxu0  ;;  %v17151_v59 = vpop.f32.mrb[249].mxu1  ;;  %v9430_v38 = vsel %vm1688_vm3, %v22811_v48, -inf }
0x16ce   : > { %9431 = vmax.xlane.f32.xlu1 %v9430_v38  ;;  %v9288_v63 = vpop.f32.mrb[250].mxu1 }
0x16cf   : > { %v17152_v7 = vpop.f32.mrb[251].mxu1  ;;  %v22827_v63 = vpop.permute.xlu1 %9727 }
0x16d2   : > { %v22815_v52 = vpop.f32.mrb[236].mxu0 }
0x16d3   : > { %v17157_v25 = vpop.f32.mrb[237].mxu0  ;;  %v9433_v55 = vsel %vm1688_vm3, %v22815_v52, -inf  ;;  %v22829_v7 = vpop.permute.xlu1 %9823 }
0x16d4   : > { %v22819_v21 = vpop.f32.mrb[252].mxu1  ;;  %9434 = vmax.xlane.f32.xlu0 %v9433_v55  ;;  %v9338_v54 = vpop.f32.mrb[238].mxu0 }
0x16d5   : > { %v17158_v58 = vpop.f32.mrb[239].mxu0  ;;  %v17163_v8 = vpop.f32.mrb[253].mxu1  ;;  %v9436_v38 = vsel %vm1688_vm3, %v22819_v21, -inf }
0x16d6   : > { %v9388_v19 = vpop.f32.mrb[254].mxu1  ;;  %v22831_v25 = vpop.permute.xlu0 %9679 }
0x16d7   : > { %v17164_v59 = vpop.f32.mrb[255].mxu1  ;;  %v22833_v54 = vpop.permute.xlu1 %9919 }
0x16da   : > { %v22835_v55 = vpop.permute.xlu0 %9775 }
0x16db   : > { %v22837_v58 = vpop.permute.xlu1 %10015 }
0x16de   : > { %v22839_v8 = vpop.permute.xlu0 %9871 }
0x16df   : > { %10207 = vrot.lane.b32.xlu1 %v22139_v53, %s19088_s25  ;;  %v22841_v19 = vpop.permute.xlu1 %10063 }
0x16e2   : > { %v22843_v59 = vpop.permute.xlu0 %9967 }
0x16e3   : > { %v22845_v23 = vpop.permute.xlu1 %10111 }
0x16ea   : > { %10159 = vrot.lane.b32.xlu0 %v22123_v13, %s19088_s25 }
0x1703   : > { %9437 = vmax.xlane.f32.xlu1 %v9436_v38 }
0x1729   : > { %v9393_v38 = vpop.xlane.xlu0 %9392 }
0x172a   : > { %v9439_v43 = vsub.f32 %v22759_v10, %v9393_v38 }
0x172b   : > { %v9396_v41 = vpop.xlane.xlu1 %9395 }
0x172c   : > { %v9455_v40 = vmul.f32 1.442695, %v9439_v43  ;;  %v9440_v1 = vsub.f32 %v22763_v11, %v9396_v41 }
0x172e   : > { %18276 = vpow2.f32 %v9455_v40  ;;  %v9457_v4 = vmul.f32 1.442695, %v9440_v1 }
0x1730   : > { %18278 = vpow2.f32 %v9457_v4 }
0x1731   : > { %v9399_v3 = vpop.xlane.xlu0 %9398 }
0x1732   : > { %v9441_v18 = vsub.f32 %v22767_v32, %v9399_v3 }
0x1734   : > { %v9459_v6 = vmul.f32 1.442695, %v9441_v18 }
0x1735   : > { %v9402_v51 = vpop.xlane.xlu0 %9401 }
0x1736   : > { %18280 = vpow2.f32 %v9459_v6  ;;  %v9442_v20 = vsub.f32 %v22771_v16, %v9402_v51 }
0x1738   : > { %v22851_v46 = vpop.eup %18276  ;;  %v9461_v28 = vmul.f32 1.442695, %v9442_v20 }
0x1739   : > { %v9405_v37 = vpop.xlane.xlu0 %9404  ;;  %v9487_v43 = vsel %vm1688_vm3, %v22851_v46, 0.0 }
0x173a   : > { %v22855_v10 = vpop.eup %18278  ;;  %18282 = vpow2.f32 %v9461_v28  ;;  %v9443_v40 = vsub.f32 %v22775_v56, %v9405_v37  ;;  %9488 = vadd.xlane.f32.xlu0 %v9487_v43 }
0x173b   : > { %v9408_v4 = vpop.xlane.xlu1 %9407  ;;  %v9490_v18 = vsel %vm1688_vm3, %v22855_v10, 0.0 }
0x173c   : > { %v9463_v3 = vmul.f32 1.442695, %v9443_v40  ;;  %v9444_v51 = vsub.f32 %v22779_v31, %v9408_v4  ;;  %9491 = vadd.xlane.f32.xlu1 %v9490_v18 }
0x173e   : > { %18284 = vpow2.f32 %v9463_v3  ;;  %v9465_v20 = vmul.f32 1.442695, %v9444_v51 }
0x1740   : > { %v22861_v6 = vpop.eup %18280  ;;  %18286 = vpow2.f32 %v9465_v20 }
0x1741   : > { %v9411_v41 = vpop.xlane.xlu0 %9410  ;;  %v9493_v28 = vsel %vm1688_vm3, %v22861_v6, 0.0 }
0x1742   : > { %v9445_v37 = vsub.f32 %v22783_v5, %v9411_v41  ;;  %9494 = vadd.xlane.f32.xlu0 %v9493_v28 }
0x1743   : > { %v9414_v1 = vpop.xlane.xlu1 %9413 }
0x1744   : > { %v22866_v11 = vpop.eup %18282  ;;  %v9467_v32 = vmul.f32 1.442695, %v9445_v37  ;;  %v9446_v16 = vsub.f32 %v22787_v0, %v9414_v1 }
0x1745   : > { %v9496_v56 = vsel %vm1688_vm3, %v22866_v11, 0.0 }
0x1746   : > { %18288 = vpow2.f32 %v9467_v32  ;;  %v9469_v31 = vmul.f32 1.442695, %v9446_v16  ;;  %9497 = vadd.xlane.f32.xlu1 %v9496_v56 }
0x1748   : > { %v22871_v38 = vpop.eup %18284  ;;  %18290 = vpow2.f32 %v9469_v31 }
0x1749   : > { %v9417_v43 = vpop.xlane.xlu0 %9416  ;;  %v9499_v5 = vsel %vm1688_vm3, %v22871_v38, 0.0 }
0x174a   : > { %v22875_v40 = vpop.eup %18286  ;;  %v9447_v4 = vsub.f32 %v22791_v61, %v9417_v43  ;;  %9500 = vadd.xlane.f32.xlu0 %v9499_v5 }
0x174b   : > { %v9420_v18 = vpop.xlane.xlu1 %9419  ;;  %v9502_v0 = vsel %vm1688_vm3, %v22875_v40, 0.0 }
0x174c   : > { %v9471_v3 = vmul.f32 1.442695, %v9447_v4  ;;  %v9448_v51 = vsub.f32 %v22795_v33, %v9420_v18  ;;  %9503 = vadd.xlane.f32.xlu1 %v9502_v0 }
0x174e   : > { %18292 = vpow2.f32 %v9471_v3  ;;  %v9473_v20 = vmul.f32 1.442695, %v9448_v51 }
0x1750   : > { %v22881_v41 = vpop.eup %18288  ;;  %18294 = vpow2.f32 %v9473_v20 }
0x1751   : > { %v9423_v28 = vpop.xlane.xlu0 %9422  ;;  %v9505_v37 = vsel %vm1688_vm3, %v22881_v41, 0.0 }
0x1752   : > { %v22885_v1 = vpop.eup %18290  ;;  %v9449_v61 = vsub.f32 %v22799_v22, %v9423_v28  ;;  %9506 = vadd.xlane.f32.xlu0 %v9505_v37 }
0x1753   : > { %v9426_v32 = vpop.xlane.xlu1 %9425  ;;  %v9508_v16 = vsel %vm1688_vm3, %v22885_v1, 0.0 }
0x1754   : > { %v9475_v33 = vmul.f32 1.442695, %v9449_v61  ;;  %v9450_v56 = vsub.f32 %v22803_v34, %v9426_v32  ;;  %9509 = vadd.xlane.f32.xlu1 %v9508_v16 }
0x1756   : > { %18296 = vpow2.f32 %v9475_v33  ;;  %v9477_v31 = vmul.f32 1.442695, %v9450_v56 }
0x1758   : > { %v22891_v43 = vpop.eup %18292  ;;  %18298 = vpow2.f32 %v9477_v31 }
0x1759   : > { %v9429_v5 = vpop.xlane.xlu0 %9428  ;;  %v9511_v4 = vsel %vm1688_vm3, %v22891_v43, 0.0 }
0x175a   : > { %v22895_v18 = vpop.eup %18294  ;;  %v9451_v22 = vsub.f32 %v22807_v15, %v9429_v5  ;;  %9512 = vadd.xlane.f32.xlu1 %v9511_v4 }
0x175b   : > { %v9432_v0 = vpop.xlane.xlu1 %9431  ;;  %v9514_v3 = vsel %vm1688_vm3, %v22895_v18, 0.0 }
0x175c   : > { %v9479_v34 = vmul.f32 1.442695, %v9451_v22  ;;  %v9452_v51 = vsub.f32 %v22811_v48, %v9432_v0  ;;  %9515 = vadd.xlane.f32.xlu0 %v9514_v3 }
0x175e   : > { %18300 = vpow2.f32 %v9479_v34  ;;  %v9481_v20 = vmul.f32 1.442695, %v9452_v51 }
0x175f   : > { %v22922_v5 = vpop.permute.xlu1 %10207 }
0x1760   : > { %v22901_v28 = vpop.eup %18296  ;;  %18302 = vpow2.f32 %v9481_v20 }
0x1761   : > { %v9517_v37 = vsel %vm1688_vm3, %v22901_v28, 0.0  ;;  %v9435_v56 = vpop.xlane.xlu0 %9434 }
0x1762   : > { %v22905_v61 = vpop.eup %18298  ;;  %9518 = vadd.xlane.f32.xlu1 %v9517_v37  ;;  %v9453_v31 = vsub.f32 %v22815_v52, %v9435_v56 }
0x1763   : > { %v9520_v15 = vsel %vm1688_vm3, %v22905_v61, 0.0 }
0x1764   : > { %9521 = vadd.xlane.f32.xlu0 %v9520_v15  ;;  %v9483_v4 = vmul.f32 1.442695, %v9453_v31 }
0x1766   : > { %18304 = vpow2.f32 %v9483_v4 }
0x1768   : > { %v22909_v32 = vpop.eup %18300 }
0x1769   : > { %v9523_v48 = vsel %vm1688_vm3, %v22909_v32, 0.0 }
0x176a   : > { %v22913_v16 = vpop.eup %18302  ;;  %9524 = vadd.xlane.f32.xlu1 %v9523_v48 }
0x176b   : > { %v9526_v33 = vsel %vm1688_vm3, %v22913_v16, 0.0 }
0x176c   : > { %9527 = vadd.xlane.f32.xlu0 %v9526_v33 }
0x1770   : > { %v22925_v34 = vpop.eup %18304 }
0x1771   : > { %v9529_v51 = vsel %vm1688_vm3, %v22925_v34, 0.0 }
0x177b   : > { %10303 = vrot.lane.b32.xlu1 %v22147_v60, %s19088_s25 }
0x1782   : > { %10255 = vrot.lane.b32.xlu0 %v22133_v2, %s19088_s25  ;;  %s24976_s25 = smov %s24975_s27 }
0x1790   : > { %v9438_v22 = vpop.xlane.xlu1 %9437 }
0x1791   : > { %v9454_v0 = vsub.f32 %v22819_v21, %v9438_v22  ;;  %v22949_v21 = vpop.permute.xlu0 %10159 }
0x1793   : > { %v9485_v3 = vmul.f32 1.442695, %v9454_v0 }
0x1795   : > { %18306 = vpow2.f32 %v9485_v3  ;;  %v9685_v3 = vsel %vm7827_vm6, %v22831_v25, 0 }
0x179f   : > { %v22929_v20 = vpop.eup %18306  ;;  %9530 = vadd.xlane.f32.xlu1 %v9529_v51 }
0x17a0   : > { %v9532_v52 = vsel %vm1688_vm3, %v22929_v20, 0.0 }
0x17a1   : > { %9533 = vadd.xlane.f32.xlu0 %v9532_v52 }
0x17b0   : > { %10403 = vrot.lane.b32.xlu1 %v22035_v49, %s19089_s20 }
0x17b4   : > { %10401 = vrot.lane.b32.xlu1 %v22035_v49, %s19090_s28 }
0x17b7   : > { %10353 = vrot.lane.b32.xlu0 %v22027_v42, %s19089_s20 }
0x17b8   : > { %10503 = vrot.lane.b32.xlu1 %v22053_v35, %s19089_s20 }
0x17bb   : > { %10351 = vrot.lane.b32.xlu0 %v22027_v42, %s19090_s28 }
0x17bc   : > { %10501 = vrot.lane.b32.xlu1 %v22053_v35, %s19090_s28 }
0x17bf   : > { %10453 = vrot.lane.b32.xlu0 %v22043_v17, %s19089_s20 }
0x17c0   : > { %10603 = vrot.lane.b32.xlu1 %v22075_v12, %s19089_s20 }
0x17c3   : > { %10451 = vrot.lane.b32.xlu0 %v22043_v17, %s19090_s28 }
0x17c4   : > { %10601 = vrot.lane.b32.xlu1 %v22075_v12, %s19090_s28 }
0x17c7   : > { %10553 = vrot.lane.b32.xlu0 %v22059_v9, %s19089_s20  ;;  %v9489_v37 = vpop.xlane.xlu0 %9488 }
0x17c8   : > { %18308 = vrcp.f32 %v9489_v37  ;;  %10703 = vrot.lane.b32.xlu1 %v22085_v50, %s19089_s20 }
0x17c9   : > { %v9492_v15 = vpop.xlane.xlu1 %9491 }
0x17ca   : > { %18310 = vrcp.f32 %v9492_v15 }
0x17cb   : > { %10551 = vrot.lane.b32.xlu0 %v22059_v9, %s19090_s28 }
0x17cc   : > { %10701 = vrot.lane.b32.xlu1 %v22085_v50, %s19090_s28 }
0x17cf   : > { %10653 = vrot.lane.b32.xlu0 %v22069_v36, %s19089_s20  ;;  %v9495_v48 = vpop.xlane.xlu0 %9494 }
0x17d0   : > { %18312 = vrcp.f32 %v9495_v48  ;;  %10803 = vrot.lane.b32.xlu1 %v22107_v62, %s19089_s20  ;;  %v9781_v48 = vsel %vm7827_vm6, %v22835_v55, 0 }
0x17d2   : > { %v18309_v33 = vpop.eup %18308 }
0x17d3   : > { %v9498_v56 = vpop.xlane.xlu1 %9497  ;;  %10651 = vrot.lane.b32.xlu0 %v22069_v36, %s19090_s28  ;;  %v9551_v31 = vmul.f32 %v18309_v33, %v22851_v46  ;;  %v9733_v46 = vsel %vm7827_vm6, %v22827_v63, 0 }
0x17d4   : > { %v18311_v4 = vpop.eup %18310  ;;  %18314 = vrcp.f32 %v9498_v56  ;;  %10801 = vrot.lane.b32.xlu1 %v22107_v62, %s19090_s28 }
0x17d5   : > { %v9552_v22 = vmul.f32 %v18311_v4, %v22855_v10  ;;  %v9567_v0 = vpack.c.bf16 %v9551_v31, %v9551_v31 }
0x17d7   : > { %v9568_v51 = vpack.c.bf16 %v9552_v22, %v9552_v22  ;;  %10753 = vrot.lane.b32.xlu0 %v22091_v27, %s19089_s20  ;;  %17168 = vmatmul.mubr.msk.bf16.vlgmr.msra.gmra.mrb[240].mxu0 %vm1688_vm3, %v9567_v0  ;;  %v9501_v52 = vpop.xlane.xlu0 %9500 }
0x17d8   : > { %17178 = vmatpush3.bf16.msra.mxu0 %v9685_v3  ;;  %18316 = vrcp.f32 %v9501_v52  ;;  %10903 = vrot.lane.b32.xlu1 %v22117_v14, %s19089_s20 }
0x17d9   : > { %17174 = vmatmul.mubr.msk.bf16.vlgmr.msra.gmra.mrb[0].mxu1 %vm1688_vm3, %v9568_v51  ;;  %v9504_v10 = vpop.xlane.xlu1 %9503  ;;  %17179 = vmatprep.mubr.msk.bf16.mxu0 %vm19083_vm2, %v24800_v57 }
0x17da   : > { %v18313_v25 = vpop.eup %18312  ;;  %17184 = vmatpush3.bf16.msra.mxu1 %v9733_v46  ;;  %18318 = vrcp.f32 %v9504_v10  ;;  %17189 = vmatprep.subr.bf16.mxu0 %v24800_v57 }
0x17db   : > { %10751 = vrot.lane.b32.xlu0 %v22091_v27, %s19090_s28  ;;  %v9553_v37 = vmul.f32 %v18313_v25, %v22861_v6  ;;  %17185 = vmatprep.mubr.msk.bf16.mxu1 %vm19083_vm2, %v24800_v57 }
0x17dc   : > { %10901 = vrot.lane.b32.xlu1 %v22117_v14, %s19090_s28  ;;  %17195 = vmatprep.subr.bf16.mxu1 %v24800_v57 }
0x17dd   : > { %v9569_v63 = vpack.c.bf16 %v9553_v37, %v9553_v37 }
0x17de   : > { %v18315_v15 = vpop.eup %18314 }
0x17df   : > { %v9554_v33 = vmul.f32 %v18315_v15, %v22866_v11  ;;  %10853 = vrot.lane.b32.xlu0 %v22101_v44, %s19089_s20  ;;  %17180 = vmatmul.mubr.msk.bf16.vlgmr.msra.gmra.mrb[244].mxu0 %vm1688_vm3, %v9569_v63  ;;  %v9507_v6 = vpop.xlane.xlu0 %9506  ;;  %v9829_v11 = vsel %vm7827_vm6, %v22829_v7, 0  ;;  %v9877_v7 = vsel %vm7827_vm6, %v22839_v8, 0  ;;  %v9925_v8 = vsel %vm7827_vm6, %v22833_v54, 0 }
0x17e0   : > { %17190 = vmatpush3.bf16.msra.mxu0 %v9781_v48  ;;  %18320 = vrcp.f32 %v9507_v6  ;;  %11003 = vrot.lane.b32.xlu1 %v22139_v53, %s19089_s20  ;;  %v9973_v54 = vsel %vm7827_vm6, %v22843_v59, 0  ;;  %v10021_v59 = vsel %vm7827_vm6, %v22837_v58, 0  ;;  %v10069_v58 = vsel %vm7827_vm6, %v22841_v19, 0 }
0x17e1   : > { %v9570_v56 = vpack.c.bf16 %v9554_v33, %v9554_v33  ;;  %v9510_v31 = vpop.xlane.xlu1 %9509  ;;  %17191 = vmatprep.mubr.msk.bf16.mxu0 %vm19083_vm2, %v24800_v57  ;;  %17201 = vmatprep.subr.bf16.mxu0 %v24800_v57  ;;  %v10117_v19 = vsel %vm7827_vm6, %v22845_v23, 0  ;;  %v10165_v23 = vsel %vm7827_vm6, %v22949_v21, 0 }
0x17e2   : > { %v18317_v55 = vpop.eup %18316  ;;  %18322 = vrcp.f32 %v9510_v31 }
0x17e3   : > { %17186 = vmatmul.mubr.msk.bf16.vlgmr.msra.gmra.mrb[4].mxu1 %vm1688_vm3, %v9570_v56  ;;  %10851 = vrot.lane.b32.xlu0 %v22101_v44, %s19090_s28  ;;  %v9555_v4 = vmul.f32 %v18317_v55, %v22871_v38 }
0x17e4   : > { %v18319_v22 = vpop.eup %18318  ;;  %17196 = vmatpush3.bf16.msra.mxu1 %v9829_v11  ;;  %11001 = vrot.lane.b32.xlu1 %v22139_v53, %s19090_s28 }
0x17e5   : > { %v9556_v0 = vmul.f32 %v18319_v22, %v22875_v40  ;;  %v9571_v3 = vpack.c.bf16 %v9555_v4, %v9555_v4  ;;  %17197 = vmatprep.mubr.msk.bf16.mxu1 %vm19083_vm2, %v24800_v57  ;;  %17207 = vmatprep.subr.bf16.mxu1 %v24800_v57 }
0x17e7   : > { %10953 = vrot.lane.b32.xlu0 %v22123_v13, %s19089_s20  ;;  %v9513_v38 = vpop.xlane.xlu1 %9512  ;;  %17192 = vmatmul.mubr.msk.bf16.vlgmr.msra.gmra.mrb[248].mxu0 %vm1688_vm3, %v9571_v3  ;;  %v9572_v40 = vpack.c.bf16 %v9556_v0, %v9556_v0  ;;  %v10213_v3 = vsel %vm7827_vm6, %v22922_v5, 0 }
0x17e8   : > { %18324 = vrcp.f32 %v9513_v38  ;;  %17202 = vmatpush3.bf16.msra.mxu0 %v9877_v7  ;;  %11103 = vrot.lane.b32.xlu1 %v22147_v60, %s19089_s20 }
0x17e9   : > { %v9516_v51 = vpop.xlane.xlu0 %9515  ;;  %17203 = vmatprep.mubr.msk.bf16.mxu0 %vm19083_vm2, %v24800_v57  ;;  %17213 = vmatprep.subr.bf16.mxu0 %v24800_v57 }
0x17ea   : > { %v18321_v52 = vpop.eup %18320  ;;  %18326 = vrcp.f32 %v9516_v51 }
0x17eb   : > { %17198 = vmatmul.mubr.msk.bf16.vlgmr.msra.gmra.mrb[8].mxu1 %vm1688_vm3, %v9572_v40  ;;  %10951 = vrot.lane.b32.xlu0 %v22123_v13, %s19090_s28  ;;  %v9557_v46 = vmul.f32 %v18321_v52, %v22881_v41 }
0x17ec   : > { %v18323_v10 = vpop.eup %18322  ;;  %17208 = vmatpush3.bf16.msra.mxu1 %v9925_v8  ;;  %11101 = vrot.lane.b32.xlu1 %v22147_v60, %s19090_s28 }
0x17ed   : > { %v9558_v25 = vmul.f32 %v18323_v10, %v22885_v1  ;;  %v9573_v37 = vpack.c.bf16 %v9557_v46, %v9557_v46  ;;  %17209 = vmatprep.mubr.msk.bf16.mxu1 %vm19083_vm2, %v24800_v57  ;;  %17219 = vmatprep.subr.bf16.mxu1 %v24800_v57 }
0x17ef   : > { %11053 = vrot.lane.b32.xlu0 %v22133_v2, %s19089_s20  ;;  %v9519_v41 = vpop.xlane.xlu1 %9518  ;;  %17204 = vmatmul.mubr.msk.bf16.vlgmr.msra.gmra.mrb[252].mxu0 %vm1688_vm3, %v9573_v37  ;;  %v9574_v1 = vpack.c.bf16 %v9558_v25, %v9558_v25  ;;  %s24978_s20 = scalar_lea.vmem [#allocation20], %s19672_s23 }
0x17f0   : > { %18328 = vrcp.f32 %v9519_v41  ;;  %17214 = vmatpush3.bf16.msra.mxu0 %v9973_v54  ;;  %11391 = vrot.lane.b32.xlu1 %v22035_v49, %s19091_s5 }
0x17f1   : > { %v9522_v63 = vpop.xlane.xlu0 %9521  ;;  %17215 = vmatprep.mubr.msk.bf16.mxu0 %vm19083_vm2, %v24800_v57  ;;  %17225 = vmatprep.subr.bf16.mxu0 %v24800_v57 }
0x17f2   : > { %v18325_v15 = vpop.eup %18324  ;;  %18330 = vrcp.f32 %v9522_v63 }
0x17f3   : > { %v9559_v48 = vmul.f32 %v18325_v15, %v22891_v43  ;;  %17210 = vmatmul.mubr.msk.bf16.vlgmr.msra.gmra.mrb[12].mxu1 %vm1688_vm3, %v9574_v1  ;;  %11051 = vrot.lane.b32.xlu0 %v22133_v2, %s19090_s28  ;;  %s24979_s28 = scalar_lea.vmem [#allocation23], %s19672_s23 }
0x17f4   : > { %v18327_v33 = vpop.eup %18326  ;;  %17220 = vmatpush3.bf16.msra.mxu1 %v10021_v59  ;;  %11487 = vrot.lane.b32.xlu1 %v22053_v35, %s19091_s5 }
0x17f5   : > { %v9575_v6 = vpack.c.bf16 %v9559_v48, %v9559_v48  ;;  %v9560_v56 = vmul.f32 %v18327_v33, %v22895_v18  ;;  %17221 = vmatprep.mubr.msk.bf16.mxu1 %vm19083_vm2, %v24800_v57  ;;  %17231 = vmatprep.subr.bf16.mxu1 %v24800_v57 }
0x17f7   : > { %11343 = vrot.lane.b32.xlu0 %v22027_v42, %s19091_s5  ;;  %v9525_v43 = vpop.xlane.xlu1 %9524  ;;  %17216 = vmatmul.mubr.msk.bf16.vlgmr.msra.gmra.mrb[0].mxu0 %vm1688_vm3, %v9575_v6  ;;  %v9576_v18 = vpack.c.bf16 %v9560_v56, %v9560_v56 }
0x17f8   : > { %18332 = vrcp.f32 %v9525_v43  ;;  %17226 = vmatpush3.bf16.msra.mxu0 %v10069_v58  ;;  %11583 = vrot.lane.b32.xlu1 %v22075_v12, %s19091_s5 }
0x17f9   : > { %v9528_v31 = vpop.xlane.xlu0 %9527  ;;  %17227 = vmatprep.mubr.msk.bf16.mxu0 %vm19083_vm2, %v24800_v57  ;;  %17237 = vmatprep.subr.bf16.mxu0 %v24800_v57 }
0x17fa   : > { %v18329_v55 = vpop.eup %18328  ;;  %18334 = vrcp.f32 %v9528_v31 }
0x17fb   : > { %v9561_v11 = vmul.f32 %v18329_v55, %v22901_v28  ;;  %11439 = vrot.lane.b32.xlu0 %v22043_v17, %s19091_s5  ;;  %17222 = vmatmul.mubr.msk.bf16.vlgmr.msra.gmra.mrb[16].mxu1 %vm1688_vm3, %v9576_v18  ;;  %v10304_v5 = vpop.permute.xlu1 %10303 }
0x17fc   : > { %v18331_v4 = vpop.eup %18330  ;;  %17232 = vmatpush3.bf16.msra.mxu1 %v10117_v19  ;;  %11679 = vrot.lane.b32.xlu1 %v22085_v50, %s19091_s5 }
0x17fd   : > { %v9577_v22 = vpack.c.bf16 %v9561_v11, %v9561_v11  ;;  %v9562_v0 = vmul.f32 %v18331_v4, %v22905_v61  ;;  %17233 = vmatprep.mubr.msk.bf16.mxu1 %vm19083_vm2, %v24800_v57  ;;  %17243 = vmatprep.subr.bf16.mxu1 %v24800_v57  ;;  %v10256_v38 = vpop.permute.xlu0 %10255 }
0x17ff   : > { %11535 = vrot.lane.b32.xlu0 %v22059_v9, %s19091_s5  ;;  %17228 = vmatmul.mubr.msk.bf16.vlgmr.msra.gmra.mrb[4].mxu0 %vm1688_vm3, %v9577_v22  ;;  %v9578_v28 = vpack.c.bf16 %v9562_v0, %v9562_v0 }
0x1800   : > { %17238 = vmatpush3.bf16.msra.mxu0 %v10165_v23  ;;  %11775 = vrot.lane.b32.xlu1 %v22107_v62, %s19091_s5 }
0x1801   : > { %17239 = vmatprep.mubr.msk.bf16.mxu0 %vm19083_vm2, %v24800_v57  ;;  %17249 = vmatprep.subr.bf16.mxu0 %v24800_v57 }
0x1802   : > { %v18333_v61 = vpop.eup %18332 }
0x1803   : > { %v9563_v21 = vmul.f32 %v18333_v61, %v22909_v32  ;;  %11631 = vrot.lane.b32.xlu0 %v22069_v36, %s19091_s5  ;;  %17234 = vmatmul.mubr.msk.bf16.vlgmr.msra.gmra.mrb[20].mxu1 %vm1688_vm3, %v9578_v28  ;;  %v10261_v32 = vsel %vm7827_vm6, %v10256_v38, 0 }
0x1804   : > { %v18335_v7 = vpop.eup %18334  ;;  %17244 = vmatpush3.bf16.msra.mxu1 %v10213_v3  ;;  %11823 = vrot.lane.b32.xlu1 %v22101_v44, %s19091_s5 }
0x1805   : > { %v9579_v40 = vpack.c.bf16 %v9563_v21, %v9563_v21  ;;  %v9564_v51 = vmul.f32 %v18335_v7, %v22913_v16  ;;  %17245 = vmatprep.mubr.msk.bf16.mxu1 %vm19083_vm2, %v24800_v57  ;;  %17255 = vmatprep.subr.bf16.mxu1 %v24800_v57  ;;  %v10309_v16 = vsel %vm7827_vm6, %v10304_v5, 0 }
0x1807   : > { %11727 = vrot.lane.b32.xlu0 %v22091_v27, %s19091_s5  ;;  %17240 = vmatmul.mubr.msk.bf16.vlgmr.msra.gmra.mrb[8].mxu0 %vm1688_vm3, %v9579_v40  ;;  %v9580_v52 = vpack.c.bf16 %v9564_v51, %v9564_v51 }
0x1808   : > { %17250 = vmatpush3.bf16.msra.mxu0 %v10261_v32  ;;  %11871 = vrot.lane.b32.xlu1 %v22117_v14, %s19091_s5 }
0x1809   : > { %17251 = vmatprep.mubr.msk.bf16.mxu0 %vm19083_vm2, %v24800_v57  ;;  %17261 = vmatprep.subr.bf16.mxu0 %v24800_v57 }
0x180b   : > { %17246 = vmatmul.mubr.msk.bf16.vlgmr.msra.gmra.mrb[24].mxu1 %vm1688_vm3, %v9580_v52 }
0x180c   : > { %17256 = vmatpush3.bf16.msra.mxu1 %v10309_v16  ;;  %17257 = vmatprep.mubr.msk.bf16.mxu1 %vm19083_vm2, %v24800_v57 }
0x180d   : > { %17267 = vmatprep.subr.bf16.mxu1 %v24800_v57 }
0x182c   : > { %v9531_v8 = vpop.xlane.xlu1 %9530 }
0x182d   : > { %18336 = vrcp.f32 %v9531_v8 }
0x182e   : > { %v9534_v46 = vpop.xlane.xlu0 %9533 }
0x182f   : > { %18338 = vrcp.f32 %v9534_v46 }
0x1830   : > { %v10404_v10 = vpop.permute.xlu1 %10403 }
0x1831   : > { %v10409_v43 = vsel %vm1688_vm3, %v10404_v10, 0 }
0x1832   : > { %v10354_v25 = vpop.permute.xlu0 %10353 }
0x1833   : > { %v10359_v56 = vsel %vm1688_vm3, %v10354_v25, 0 }
0x1834   : > { %v10402_v37 = vpop.permute.xlu1 %10401 }
0x1836   : > { %v10352_v54 = vpop.permute.xlu0 %10351 }
0x1837   : > { %v18337_v41 = vpop.eup %18336 }
0x1838   : > { %v9565_v1 = vmul.f32 %v18337_v41, %v22925_v34  ;;  %v10504_v63 = vpop.permute.xlu1 %10503 }
0x1839   : > { %v18339_v15 = vpop.eup %18338  ;;  %v10509_v19 = vsel %vm1688_vm3, %v10504_v63, 0 }
0x183a   : > { %v9581_v59 = vpack.c.bf16 %v9565_v1, %v9565_v1  ;;  %v9566_v48 = vmul.f32 %v18339_v15, %v22929_v20  ;;  %v10454_v33 = vpop.permute.xlu0 %10453 }
0x183b   : > { %v10459_v31 = vsel %vm1688_vm3, %v10454_v33, 0 }
0x183c   : > { %v9582_v6 = vpack.c.bf16 %v9566_v48, %v9566_v48  ;;  %v10502_v58 = vpop.permute.xlu1 %10501  ;;  %17252 = vmatmul.mubr.msk.bf16.vlgmr.msra.gmra.mrb[12].mxu0 %vm1688_vm3, %v9581_v59 }
0x183d   : > { %17262 = vmatpush3.bf16.xpose.msra.mxu0 %v10359_v56  ;;  %17263 = vmatprep.mubr.msk.bf16.mxu0 %vm19083_vm2, %v24800_v57 }
0x183e   : > { %17258 = vmatmul.mubr.msk.bf16.vlgmr.msra.gmra.mrb[28].mxu1 %vm1688_vm3, %v9582_v6  ;;  %v10452_v34 = vpop.permute.xlu0 %10451  ;;  %17273 = vmatprep.subr.bf16.mxu0 %v24800_v57 }
0x183f   : > { %17268 = vmatpush3.bf16.xpose.msra.mxu1 %v10409_v43  ;;  %17269 = vmatprep.mubr.msk.bf16.mxu1 %vm19083_vm2, %v24800_v57 }
0x1840   : > { %v10604_v20 = vpop.permute.xlu1 %10603  ;;  %17279 = vmatprep.subr.bf16.mxu1 %v24800_v57 }
0x1841   : > { %v10609_v28 = vsel %vm1688_vm3, %v10604_v20, 0 }
0x1842   : > { %v10554_v18 = vpop.permute.xlu0 %10553 }
0x1843   : > { %v10559_v0 = vsel %vm1688_vm3, %v10554_v18, 0 }
0x1844   : > { %v10602_v55 = vpop.permute.xlu1 %10601  ;;  %17264 = vmatmul.mubr.msk.bf16.vlgmr.msra.gmra.mrb[16].mxu0 %vm1688_vm3, %v10352_v54 }
0x1845   : > { %17274 = vmatpush3.bf16.xpose.msra.mxu0 %v10459_v31  ;;  %17275 = vmatprep.mubr.msk.bf16.mxu0 %vm19083_vm2, %v24800_v57 }
0x1846   : > { %17270 = vmatmul.mubr.msk.bf16.vlgmr.msra.gmra.mrb[32].mxu1 %vm1688_vm3, %v10402_v37  ;;  %v10552_v11 = vpop.permute.xlu0 %10551  ;;  %17285 = vmatprep.subr.bf16.mxu0 %v24800_v57 }
0x1847   : > { %17280 = vmatpush3.bf16.xpose.msra.mxu1 %v10509_v19  ;;  %17281 = vmatprep.mubr.msk.bf16.mxu1 %vm19083_vm2, %v24800_v57 }
0x1848   : > { %v10704_v4 = vpop.permute.xlu1 %10703  ;;  %17291 = vmatprep.subr.bf16.mxu1 %v24800_v57 }
0x1849   : > { %v10709_v40 = vsel %vm1688_vm3, %v10704_v4, 0 }
0x184a   : > { %v10654_v22 = vpop.permute.xlu0 %10653 }
0x184b   : > { %v10659_v7 = vsel %vm1688_vm3, %v10654_v22, 0 }
0x184c   : > { %v10702_v23 = vpop.permute.xlu1 %10701  ;;  %17276 = vmatmul.mubr.msk.bf16.vlgmr.msra.gmra.mrb[20].mxu0 %vm1688_vm3, %v10452_v34 }
0x184d   : > { %17286 = vmatpush3.bf16.xpose.msra.mxu0 %v10559_v0  ;;  %17287 = vmatprep.mubr.msk.bf16.mxu0 %vm19083_vm2, %v24800_v57 }
0x184e   : > { %17282 = vmatmul.mubr.msk.bf16.vlgmr.msra.gmra.mrb[36].mxu1 %vm1688_vm3, %v10502_v58  ;;  %v10652_v61 = vpop.permute.xlu0 %10651  ;;  %17297 = vmatprep.subr.bf16.mxu0 %v24800_v57 }
0x184f   : > { %17292 = vmatpush3.bf16.xpose.msra.mxu1 %v10609_v28  ;;  %17293 = vmatprep.mubr.msk.bf16.mxu1 %vm19083_vm2, %v24800_v57 }
0x1850   : > { %v10804_v3 = vpop.permute.xlu1 %10803  ;;  %17303 = vmatprep.subr.bf16.mxu1 %v24800_v57 }
0x1851   : > { %v10809_v8 = vsel %vm1688_vm3, %v10804_v3, 0 }
0x1852   : > { %v10754_v21 = vpop.permute.xlu0 %10753 }
0x1853   : > { %v10759_v52 = vsel %vm1688_vm3, %v10754_v21, 0 }
0x1854   : > { %v10802_v38 = vpop.permute.xlu1 %10801  ;;  %17288 = vmatmul.mubr.msk.bf16.vlgmr.msra.gmra.mrb[24].mxu0 %vm1688_vm3, %v10552_v11 }
0x1855   : > { %17298 = vmatpush3.bf16.xpose.msra.mxu0 %v10659_v7  ;;  %17299 = vmatprep.mubr.msk.bf16.mxu0 %vm19083_vm2, %v24800_v57 }
0x1856   : > { %17294 = vmatmul.mubr.msk.bf16.vlgmr.msra.gmra.mrb[40].mxu1 %vm1688_vm3, %v10602_v55  ;;  %v10752_v51 = vpop.permute.xlu0 %10751  ;;  %17309 = vmatprep.subr.bf16.mxu0 %v24800_v57 }
0x1857   : > { %17304 = vmatpush3.bf16.xpose.msra.mxu1 %v10709_v40  ;;  %17305 = vmatprep.mubr.msk.bf16.mxu1 %vm19083_vm2, %v24800_v57 }
0x1858   : > { %v10904_v32 = vpop.permute.xlu1 %10903  ;;  %17315 = vmatprep.subr.bf16.mxu1 %v24800_v57 }
0x1859   : > { %v10909_v54 = vsel %vm1688_vm3, %v10904_v32, 0 }
0x185a   : > { %v10854_v5 = vpop.permute.xlu0 %10853 }
0x185b   : > { %v10859_v37 = vsel %vm1688_vm3, %v10854_v5, 0 }
0x185c   : > { %17300 = vmatmul.mubr.msk.bf16.vlgmr.msra.gmra.mrb[28].mxu0 %vm1688_vm3, %v10652_v61  ;;  %v10902_v16 = vpop.permute.xlu1 %10901 }
0x185d   : > { %17310 = vmatpush3.bf16.xpose.msra.mxu0 %v10759_v52  ;;  %17311 = vmatprep.mubr.msk.bf16.mxu0 %vm19083_vm2, %v24800_v57 }
0x185e   : > { %17306 = vmatmul.mubr.msk.bf16.vlgmr.msra.gmra.mrb[44].mxu1 %vm1688_vm3, %v10702_v23  ;;  %v10852_v46 = vpop.permute.xlu0 %10851  ;;  %17321 = vmatprep.subr.bf16.mxu0 %v24800_v57 }
0x185f   : > { %17316 = vmatpush3.bf16.xpose.msra.mxu1 %v10809_v8  ;;  %17317 = vmatprep.mubr.msk.bf16.mxu1 %vm19083_vm2, %v24800_v57 }
0x1860   : > { %17327 = vmatprep.subr.bf16.mxu1 %v24800_v57  ;;  %v11004_v25 = vpop.permute.xlu1 %11003 }
0x1861   : > { %v11009_v59 = vsel %vm1688_vm3, %v11004_v25, 0 }
0x1862   : > { %v10954_v10 = vpop.permute.xlu0 %10953 }
0x1863   : > { %v10959_v63 = vsel %vm1688_vm3, %v10954_v10, 0 }
0x1864   : > { %17312 = vmatmul.mubr.msk.bf16.vlgmr.msra.gmra.mrb[32].mxu0 %vm1688_vm3, %v10752_v51  ;;  %v11002_v1 = vpop.permute.xlu1 %11001 }
0x1865   : > { %17322 = vmatpush3.bf16.xpose.msra.mxu0 %v10859_v37  ;;  %17323 = vmatprep.mubr.msk.bf16.mxu0 %vm19083_vm2, %v24800_v57 }
0x1866   : > { %17318 = vmatmul.mubr.msk.bf16.vlgmr.msra.gmra.mrb[48].mxu1 %vm1688_vm3, %v10802_v38  ;;  %17333 = vmatprep.subr.bf16.mxu0 %v24800_v57  ;;  %v10952_v41 = vpop.permute.xlu0 %10951 }
0x1867   : > { %17328 = vmatpush3.bf16.xpose.msra.mxu1 %v10909_v54  ;;  %17329 = vmatprep.mubr.msk.bf16.mxu1 %vm19083_vm2, %v24800_v57 }
0x1868   : > { %17339 = vmatprep.subr.bf16.mxu1 %v24800_v57  ;;  %v11104_v48 = vpop.permute.xlu1 %11103 }
0x1869   : > { %v11109_v58 = vsel %vm1688_vm3, %v11104_v48, 0 }
0x186a   : > { %v11054_v15 = vpop.permute.xlu0 %11053 }
0x186b   : > { %v11059_v6 = vsel %vm1688_vm3, %v11054_v15, 0 }
0x186c   : > { %17324 = vmatmul.mubr.msk.bf16.vlgmr.msra.gmra.mrb[36].mxu0 %vm1688_vm3, %v10852_v46  ;;  %v11102_v56 = vpop.permute.xlu1 %11101 }
0x186d   : > { %17334 = vmatpush3.bf16.xpose.msra.mxu0 %v10959_v63  ;;  %17335 = vmatprep.mubr.msk.bf16.mxu0 %vm19083_vm2, %v24800_v57 }
0x186e   : > { %17330 = vmatmul.mubr.msk.bf16.vlgmr.msra.gmra.mrb[52].mxu1 %vm1688_vm3, %v10902_v16  ;;  %17345 = vmatprep.subr.bf16.mxu0 %v24800_v57  ;;  %v11052_v33 = vpop.permute.xlu0 %11051 }
0x186f   : > { %17340 = vmatpush3.bf16.xpose.msra.mxu1 %v11009_v59  ;;  %17341 = vmatprep.mubr.msk.bf16.mxu1 %vm19083_vm2, %v24800_v57 }
0x1870   : > { %17351 = vmatprep.subr.bf16.mxu1 %v24800_v57  ;;  %v11392_v34 = vpop.permute.xlu1 %11391 }
0x1871   : > { %v11397_v18 = vsel %vm7827_vm6, %v11392_v34, 0 }
0x1872   : > { %v11344_v43 = vpop.permute.xlu0 %11343 }
0x1873   : > { %v11349_v20 = vsel %vm7827_vm6, %v11344_v43, 0 }
0x1874   : > { %17336 = vmatmul.mubr.msk.bf16.vlgmr.msra.gmra.mrb[40].mxu0 %vm1688_vm3, %v10952_v41 }
0x1875   : > { %17346 = vmatpush3.bf16.xpose.msra.mxu0 %v11059_v6  ;;  %17347 = vmatprep.mubr.msk.bf16.mxu0 %vm19083_vm2, %v24800_v57 }
0x1876   : > { %17342 = vmatmul.mubr.msk.bf16.vlgmr.msra.gmra.mrb[56].mxu1 %vm1688_vm3, %v11002_v1  ;;  %17357 = vmatprep.subr.bf16.mxu0 %v24800_v57 }
0x1877   : > { %17352 = vmatpush3.bf16.xpose.msra.mxu1 %v11109_v58  ;;  %17353 = vmatprep.mubr.msk.bf16.mxu1 %vm19083_vm2, %v24800_v57 }
0x1878   : > { %17363 = vmatprep.subr.bf16.mxu1 %v24800_v57 }
0x187c   : > { %17348 = vmatmul.mubr.msk.bf16.vlgmr.msra.gmra.mrb[44].mxu0 %vm1688_vm3, %v11052_v33 }
0x187d   : > { %17358 = vmatpush3.bf16.msra.mxu0 %v11349_v20  ;;  %17359 = vmatprep.mubr.msk.bf16.mxu0 %vm19083_vm2, %v24800_v57 }
0x187e   : > { %17354 = vmatmul.mubr.msk.bf16.vlgmr.msra.gmra.mrb[60].mxu1 %vm1688_vm3, %v11102_v56  ;;  %17369 = vmatprep.subr.bf16.mxu0 %v24800_v57 }
0x187f   : > { %17364 = vmatpush3.bf16.msra.mxu1 %v11397_v18  ;;  %17365 = vmatprep.mubr.msk.bf16.mxu1 %vm19083_vm2, %v24800_v57 }
0x1880   : > { %17375 = vmatprep.subr.bf16.mxu1 %v24800_v57 }
0x18aa   : > { %v23211_v31 = vpop.f32.mrb[240].mxu0 }
0x18ab   : > { %24899 = vst [vmem:[#allocation86_spill] sm:$0xff] %v23211_v31  ;;  %v17169_v55 = vpop.f32.mrb[241].mxu0 }
0x18ac   : > { %v9628_v19 = vpop.f32.mrb[242].mxu0  ;;  %v23213_v11 = vpop.f32.mrb[0].mxu1 }
0x18ad   : > { %v17170_v4 = vpop.f32.mrb[243].mxu0  ;;  %v17175_v22 = vpop.f32.mrb[1].mxu1 }
0x18ae   : > { %v9676_v0 = vpop.f32.mrb[2].mxu1 }
0x18af   : > { %v17176_v23 = vpop.f32.mrb[3].mxu1 }
0x18b2   : > { %v23215_v28 = vpop.f32.mrb[244].mxu0 }
0x18b3   : > { %24900 = vst [vmem:[#allocation87_spill] sm:$0xff] %v23215_v28  ;;  %v17181_v61 = vpop.f32.mrb[245].mxu0 }
0x18b4   : > { %v9724_v3 = vpop.f32.mrb[246].mxu0 }
0x18b5   : > { %v17182_v21 = vpop.f32.mrb[247].mxu0 }
0x18b6   : > { %v23217_v7 = vpop.f32.mrb[4].mxu1 }
0x18b7   : > { %v17187_v38 = vpop.f32.mrb[5].mxu1 }
0x18b8   : > { %v9772_v40 = vpop.f32.mrb[6].mxu1 }
0x18b9   : > { %v17188_v51 = vpop.f32.mrb[7].mxu1 }
0x18ba   : > { %v23219_v32 = vpop.f32.mrb[248].mxu0 }
0x18bb   : > { %24901 = vst [vmem:[#allocation88_spill] sm:$0xff] %v23219_v32  ;;  %v17193_v5 = vpop.f32.mrb[249].mxu0 }
0x18bc   : > { %v9820_v52 = vpop.f32.mrb[250].mxu0 }
0x18bd   : > { %v17194_v16 = vpop.f32.mrb[251].mxu0 }
0x18be   : > { %v23221_v8 = vpop.f32.mrb[8].mxu1 }
0x18bf   : > { %24902 = vst [vmem:[#allocation89_spill] sm:$0xff] %v23221_v8  ;;  %v17199_v46 = vpop.f32.mrb[9].mxu1 }
0x18c0   : > { %v9868_v10 = vpop.f32.mrb[10].mxu1 }
0x18c1   : > { %v17200_v25 = vpop.f32.mrb[11].mxu1 }
0x18c2   : > { %v23223_v37 = vpop.f32.mrb[252].mxu0 }
0x18c3   : > { %24903 = vst [vmem:[#allocation90_spill] sm:$0xff] %v23223_v37  ;;  %v17205_v54 = vpop.f32.mrb[253].mxu0 }
0x18c4   : > { %v9916_v41 = vpop.f32.mrb[254].mxu0 }
0x18c5   : > { %v17206_v1 = vpop.f32.mrb[255].mxu0 }
0x18c6   : > { %v23225_v63 = vpop.f32.mrb[12].mxu1 }
0x18c7   : > { %24904 = vst [vmem:[#allocation91_spill] sm:$0xff] %v23225_v63  ;;  %v17211_v15 = vpop.f32.mrb[13].mxu1 }
0x18c8   : > { %v9964_v59 = vpop.f32.mrb[14].mxu1 }
0x18c9   : > { %v17212_v48 = vpop.f32.mrb[15].mxu1 }
0x18ca   : > { %v23227_v33 = vpop.f32.mrb[0].mxu0 }
0x18cb   : > { %24905 = vst [vmem:[#allocation92_spill] sm:$0xff] %v23227_v33  ;;  %v17217_v6 = vpop.f32.mrb[1].mxu0 }
0x18cc   : > { %v10012_v56 = vpop.f32.mrb[2].mxu0 }
0x18cd   : > { %v17218_v58 = vpop.f32.mrb[3].mxu0 }
0x18ce   : > { %v23229_v43 = vpop.f32.mrb[16].mxu1 }
0x18cf   : > { %24906 = vst [vmem:[#allocation93_spill] sm:$0xff] %v23229_v43  ;;  %v17223_v34 = vpop.f32.mrb[17].mxu1 }
0x18d0   : > { %v10060_v20 = vpop.f32.mrb[18].mxu1 }
0x18d1   : > { %v17224_v18 = vpop.f32.mrb[19].mxu1 }
0x18d2   : > { %v23231_v55 = vpop.f32.mrb[4].mxu0 }
0x18d3   : > { %24907 = vst [vmem:[#allocation94_spill] sm:$0xff] %v23231_v55  ;;  %v17229_v19 = vpop.f32.mrb[5].mxu0 }
0x18d4   : > { %v10108_v4 = vpop.f32.mrb[6].mxu0 }
0x18d5   : > { %v17230_v22 = vpop.f32.mrb[7].mxu0 }
0x18d6   : > { %v23233_v0 = vpop.f32.mrb[20].mxu1 }
0x18d7   : > { %24908 = vst [vmem:[#allocation95_spill] sm:$0xff] %v23233_v0  ;;  %v17235_v23 = vpop.f32.mrb[21].mxu1 }
0x18d8   : > { %v10156_v61 = vpop.f32.mrb[22].mxu1 }
0x18d9   : > { %v17236_v3 = vpop.f32.mrb[23].mxu1 }
0x18da   : > { %v23235_v21 = vpop.f32.mrb[8].mxu0 }
0x18db   : > { %24909 = vst [vmem:[#allocation96_spill] sm:$0xff] %v23235_v21  ;;  %v17241_v38 = vpop.f32.mrb[9].mxu0 }
0x18dc   : > { %v10204_v40 = vpop.f32.mrb[10].mxu0 }
0x18dd   : > { %v17242_v51 = vpop.f32.mrb[11].mxu0 }
0x18de   : > { %v23237_v5 = vpop.f32.mrb[24].mxu1 }
0x18df   : > { %24910 = vst [vmem:[#allocation97_spill] sm:$0xff] %v23237_v5  ;;  %v17247_v52 = vpop.f32.mrb[25].mxu1 }
0x18e0   : > { %v10252_v16 = vpop.f32.mrb[26].mxu1 }
0x18e1   : > { %v17248_v46 = vpop.f32.mrb[27].mxu1 }
0x190f   : > { %v23239_v10 = vpop.f32.mrb[12].mxu0 }
0x1910   : > { %24911 = vst [vmem:[#allocation98_spill] sm:$0xff] %v23239_v10  ;;  %v17253_v25 = vpop.f32.mrb[13].mxu0 }
0x1911   : > { %v10300_v54 = vpop.f32.mrb[14].mxu0  ;;  %v23241_v41 = vpop.f32.mrb[28].mxu1 }
0x1912   : > { %24912 = vst [vmem:[#allocation99_spill] sm:$0xff] %v23241_v41  ;;  %v17254_v1 = vpop.f32.mrb[15].mxu0  ;;  %v17259_v15 = vpop.f32.mrb[29].mxu1 }
0x1913   : > { %v10348_v59 = vpop.f32.mrb[30].mxu1 }
0x1914   : > { %v17260_v48 = vpop.f32.mrb[31].mxu1 }
0x1917   : > { %v23243_v6 = vpop.f32.mrb[16].mxu0 }
0x1918   : > { %v17265_v56 = vpop.f32.mrb[17].mxu0  ;;  %v11151_v58 = vsel %vm1688_vm3, %v23243_v6, -inf }
0x1919   : > { %v23247_v34 = vpop.f32.mrb[32].mxu1  ;;  %11152 = vmax.xlane.f32.xlu0 %v11151_v58  ;;  %v10398_v20 = vpop.f32.mrb[18].mxu0 }
0x191a   : > { %v17266_v18 = vpop.f32.mrb[19].mxu0  ;;  %v17271_v19 = vpop.f32.mrb[33].mxu1  ;;  %v11154_v4 = vsel %vm1688_vm3, %v23247_v34, -inf }
0x191b   : > { %11155 = vmax.xlane.f32.xlu1 %v11154_v4  ;;  %v10448_v22 = vpop.f32.mrb[34].mxu1 }
0x191c   : > { %v17272_v23 = vpop.f32.mrb[35].mxu1 }
0x191f   : > { %v23251_v61 = vpop.f32.mrb[20].mxu0 }
0x1920   : > { %v17277_v3 = vpop.f32.mrb[21].mxu0  ;;  %v11157_v38 = vsel %vm1688_vm3, %v23251_v61, -inf }
0x1921   : > { %v23255_v40 = vpop.f32.mrb[36].mxu1  ;;  %11158 = vmax.xlane.f32.xlu0 %v11157_v38  ;;  %v10498_v51 = vpop.f32.mrb[22].mxu0 }
0x1922   : > { %v17278_v52 = vpop.f32.mrb[23].mxu0  ;;  %v17283_v16 = vpop.f32.mrb[37].mxu1  ;;  %v11160_v54 = vsel %vm1688_vm3, %v23255_v40, -inf }
0x1923   : > { %v10548_v46 = vpop.f32.mrb[38].mxu1 }
0x1924   : > { %v17284_v25 = vpop.f32.mrb[39].mxu1 }
0x1925   : > { %11161 = vmax.xlane.f32.xlu0 %v11160_v54 }
0x1927   : > { %v23259_v1 = vpop.f32.mrb[24].mxu0 }
0x1928   : > { %v17289_v15 = vpop.f32.mrb[25].mxu0  ;;  %v11163_v59 = vsel %vm1688_vm3, %v23259_v1, -inf }
0x1929   : > { %v23263_v48 = vpop.f32.mrb[40].mxu1  ;;  %11164 = vmax.xlane.f32.xlu0 %v11163_v59  ;;  %v10598_v56 = vpop.f32.mrb[26].mxu0 }
0x192a   : > { %v17290_v58 = vpop.f32.mrb[27].mxu0  ;;  %v17295_v20 = vpop.f32.mrb[41].mxu1  ;;  %v11166_v18 = vsel %vm1688_vm3, %v23263_v48, -inf }
0x192b   : > { %11167 = vmax.xlane.f32.xlu1 %v11166_v18  ;;  %v10648_v19 = vpop.f32.mrb[42].mxu1 }
0x192c   : > { %v17296_v4 = vpop.f32.mrb[43].mxu1 }
0x192f   : > { %v23267_v22 = vpop.f32.mrb[28].mxu0 }
0x1930   : > { %v17301_v23 = vpop.f32.mrb[29].mxu0  ;;  %v11169_v3 = vsel %vm1688_vm3, %v23267_v22, -inf }
0x1931   : > { %v23271_v38 = vpop.f32.mrb[44].mxu1  ;;  %11170 = vmax.xlane.f32.xlu0 %v11169_v3  ;;  %v10698_v51 = vpop.f32.mrb[30].mxu0 }
0x1932   : > { %v17302_v52 = vpop.f32.mrb[31].mxu0  ;;  %v17307_v16 = vpop.f32.mrb[45].mxu1  ;;  %v11172_v46 = vsel %vm1688_vm3, %v23271_v38, -inf }
0x1933   : > { %11173 = vmax.xlane.f32.xlu1 %v11172_v46  ;;  %v10748_v25 = vpop.f32.mrb[46].mxu1 }
0x1934   : > { %v17308_v54 = vpop.f32.mrb[47].mxu1 }
0x1937   : > { %v23275_v15 = vpop.f32.mrb[32].mxu0 }
0x1938   : > { %v17313_v59 = vpop.f32.mrb[33].mxu0  ;;  %v11175_v56 = vsel %vm1688_vm3, %v23275_v15, -inf }
0x1939   : > { %v23279_v58 = vpop.f32.mrb[48].mxu1  ;;  %11176 = vmax.xlane.f32.xlu0 %v11175_v56  ;;  %v10798_v20 = vpop.f32.mrb[34].mxu0 }
0x193a   : > { %v17314_v18 = vpop.f32.mrb[35].mxu0  ;;  %v17319_v19 = vpop.f32.mrb[49].mxu1  ;;  %v11178_v4 = vsel %vm1688_vm3, %v23279_v58, -inf }
0x193b   : > { %11179 = vmax.xlane.f32.xlu1 %v11178_v4  ;;  %v10848_v23 = vpop.f32.mrb[50].mxu1 }
0x193c   : > { %v17320_v3 = vpop.f32.mrb[51].mxu1 }
0x193f   : > { %v23283_v51 = vpop.f32.mrb[36].mxu0 }
0x1940   : > { %v17325_v52 = vpop.f32.mrb[37].mxu0  ;;  %v11181_v16 = vsel %vm1688_vm3, %v23283_v51, -inf }
0x1941   : > { %v23287_v46 = vpop.f32.mrb[52].mxu1  ;;  %11182 = vmax.xlane.f32.xlu0 %v11181_v16  ;;  %v10898_v25 = vpop.f32.mrb[38].mxu0 }
0x1942   : > { %v17326_v54 = vpop.f32.mrb[39].mxu0  ;;  %v17331_v59 = vpop.f32.mrb[53].mxu1  ;;  %v11184_v56 = vsel %vm1688_vm3, %v23287_v46, -inf }
0x1943   : > { %11185 = vmax.xlane.f32.xlu1 %v11184_v56  ;;  %v10948_v20 = vpop.f32.mrb[54].mxu1 }
0x1944   : > { %v17332_v18 = vpop.f32.mrb[55].mxu1 }
0x1947   : > { %v23291_v19 = vpop.f32.mrb[40].mxu0 }
0x1948   : > { %v17337_v4 = vpop.f32.mrb[41].mxu0  ;;  %v11187_v23 = vsel %vm1688_vm3, %v23291_v19, -inf }
0x1949   : > { %v23295_v3 = vpop.f32.mrb[56].mxu1  ;;  %11188 = vmax.xlane.f32.xlu0 %v11187_v23  ;;  %v10998_v52 = vpop.f32.mrb[42].mxu0 }
0x194a   : > { %v17338_v16 = vpop.f32.mrb[43].mxu0  ;;  %v17343_v25 = vpop.f32.mrb[57].mxu1  ;;  %v11190_v54 = vsel %vm1688_vm3, %v23295_v3, -inf }
0x194b   : > { %11191 = vmax.xlane.f32.xlu1 %v11190_v54  ;;  %v11048_v59 = vpop.f32.mrb[58].mxu1 }
0x194c   : > { %v17344_v56 = vpop.f32.mrb[59].mxu1  ;;  %v23311_v59 = vpop.permute.xlu1 %11487 }
0x194f   : > { %v23299_v20 = vpop.f32.mrb[44].mxu0 }
0x1950   : > { %v17349_v18 = vpop.f32.mrb[45].mxu0  ;;  %v11193_v4 = vsel %vm1688_vm3, %v23299_v20, -inf  ;;  %v23313_v56 = vpop.permute.xlu1 %11583 }
0x1951   : > { %v23303_v10 = vpop.f32.mrb[60].mxu1  ;;  %11194 = vmax.xlane.f32.xlu0 %v11193_v4  ;;  %v11098_v21 = vpop.f32.mrb[46].mxu0 }
0x1952   : > { %v17350_v23 = vpop.f32.mrb[47].mxu0  ;;  %v17355_v52 = vpop.f32.mrb[61].mxu1  ;;  %v11196_v54 = vsel %vm1688_vm3, %v23303_v10, -inf }
0x1953   : > { %v11148_v16 = vpop.f32.mrb[62].mxu1  ;;  %v23315_v18 = vpop.permute.xlu0 %11439 }
0x1954   : > { %v17356_v25 = vpop.f32.mrb[63].mxu1  ;;  %v23317_v21 = vpop.permute.xlu1 %11679 }
0x1957   : > { %v23319_v4 = vpop.permute.xlu0 %11535 }
0x1958   : > { %v23321_v23 = vpop.permute.xlu1 %11775 }
0x195b   : > { %v23323_v52 = vpop.permute.xlu0 %11631 }
0x195c   : > { %11967 = vrot.lane.b32.xlu1 %v22139_v53, %s19091_s5  ;;  %v23325_v16 = vpop.permute.xlu1 %11823 }
0x195f   : > { %v23327_v25 = vpop.permute.xlu0 %11727 }
0x1960   : > { %v23329_v41 = vpop.permute.xlu1 %11871 }
0x1967   : > { %11919 = vrot.lane.b32.xlu0 %v22123_v13, %s19091_s5 }
0x1980   : > { %11197 = vmax.xlane.f32.xlu1 %v11196_v54 }
0x19a6   : > { %v11153_v54 = vpop.xlane.xlu0 %11152 }
0x19a7   : > { %v11199_v5 = vsub.f32 %v23243_v6, %v11153_v54 }
0x19a8   : > { %v11156_v55 = vpop.xlane.xlu1 %11155 }
0x19a9   : > { %v11215_v33 = vmul.f32 1.442695, %v11199_v5  ;;  %v11200_v0 = vsub.f32 %v23247_v34, %v11156_v55 }
0x19ab   : > { %18340 = vpow2.f32 %v11215_v33  ;;  %v11217_v43 = vmul.f32 1.442695, %v11200_v0 }
0x19ad   : > { %18342 = vpow2.f32 %v11217_v43 }
0x19ae   : > { %v11159_v37 = vpop.xlane.xlu0 %11158 }
0x19af   : > { %v11201_v32 = vsub.f32 %v23251_v61, %v11159_v37 }
0x19b1   : > { %v11219_v63 = vmul.f32 1.442695, %v11201_v32 }
0x19b2   : > { %v11162_v29 = vpop.xlane.xlu0 %11161 }
0x19b3   : > { %18344 = vpow2.f32 %v11219_v63  ;;  %v11202_v8 = vsub.f32 %v23255_v40, %v11162_v29 }
0x19b5   : > { %v23335_v28 = vpop.eup %18340  ;;  %v11221_v31 = vmul.f32 1.442695, %v11202_v8 }
0x19b6   : > { %v11165_v45 = vpop.xlane.xlu0 %11164  ;;  %v11247_v5 = vsel %vm1688_vm3, %v23335_v28, 0.0 }
0x19b7   : > { %v23339_v6 = vpop.eup %18342  ;;  %18346 = vpow2.f32 %v11221_v31  ;;  %v11203_v33 = vsub.f32 %v23259_v1, %v11165_v45  ;;  %11248 = vadd.xlane.f32.xlu0 %v11247_v5 }
0x19b8   : > { %v11168_v43 = vpop.xlane.xlu1 %11167  ;;  %v11250_v32 = vsel %vm1688_vm3, %v23339_v6, 0.0 }
0x19b9   : > { %v11223_v37 = vmul.f32 1.442695, %v11203_v33  ;;  %v11204_v29 = vsub.f32 %v23263_v48, %v11168_v43  ;;  %11251 = vadd.xlane.f32.xlu1 %v11250_v32 }
0x19bb   : > { %18348 = vpow2.f32 %v11223_v37  ;;  %v11225_v8 = vmul.f32 1.442695, %v11204_v29 }
0x19bd   : > { %v23345_v63 = vpop.eup %18344  ;;  %18350 = vpow2.f32 %v11225_v8 }
0x19be   : > { %v11171_v55 = vpop.xlane.xlu0 %11170  ;;  %v11253_v31 = vsel %vm1688_vm3, %v23345_v63, 0.0 }
0x19bf   : > { %v11205_v45 = vsub.f32 %v23267_v22, %v11171_v55  ;;  %11254 = vadd.xlane.f32.xlu0 %v11253_v31 }
0x19c0   : > { %v11174_v0 = vpop.xlane.xlu1 %11173 }
0x19c1   : > { %v23350_v34 = vpop.eup %18346  ;;  %v11227_v61 = vmul.f32 1.442695, %v11205_v45  ;;  %v11206_v40 = vsub.f32 %v23271_v38, %v11174_v0 }
0x19c2   : > { %v11256_v1 = vsel %vm1688_vm3, %v23350_v34, 0.0 }
0x19c3   : > { %18352 = vpow2.f32 %v11227_v61  ;;  %v11229_v48 = vmul.f32 1.442695, %v11206_v40  ;;  %11257 = vadd.xlane.f32.xlu1 %v11256_v1 }
0x19c5   : > { %v23355_v54 = vpop.eup %18348  ;;  %18354 = vpow2.f32 %v11229_v48 }
0x19c6   : > { %v11177_v5 = vpop.xlane.xlu0 %11176  ;;  %v11259_v22 = vsel %vm1688_vm3, %v23355_v54, 0.0 }
0x19c7   : > { %v23359_v33 = vpop.eup %18350  ;;  %v11207_v43 = vsub.f32 %v23275_v15, %v11177_v5  ;;  %11260 = vadd.xlane.f32.xlu0 %v11259_v22 }
0x19c8   : > { %v11180_v32 = vpop.xlane.xlu1 %11179  ;;  %v11262_v38 = vsel %vm1688_vm3, %v23359_v33, 0.0 }
0x19c9   : > { %v11231_v37 = vmul.f32 1.442695, %v11207_v43  ;;  %v11208_v29 = vsub.f32 %v23279_v58, %v11180_v32  ;;  %11263 = vadd.xlane.f32.xlu1 %v11262_v38 }
0x19cb   : > { %18356 = vpow2.f32 %v11231_v37  ;;  %v11233_v8 = vmul.f32 1.442695, %v11208_v29 }
0x19cd   : > { %v23365_v55 = vpop.eup %18352  ;;  %18358 = vpow2.f32 %v11233_v8 }
0x19ce   : > { %v11183_v31 = vpop.xlane.xlu0 %11182  ;;  %v11265_v45 = vsel %vm1688_vm3, %v23365_v55, 0.0 }
0x19cf   : > { %v23369_v0 = vpop.eup %18354  ;;  %v11209_v15 = vsub.f32 %v23283_v51, %v11183_v31  ;;  %11266 = vadd.xlane.f32.xlu0 %v11265_v45 }
0x19d0   : > { %v11186_v61 = vpop.xlane.xlu1 %11185  ;;  %v11268_v40 = vsel %vm1688_vm3, %v23369_v0, 0.0 }
0x19d1   : > { %v11235_v58 = vmul.f32 1.442695, %v11209_v15  ;;  %v11210_v1 = vsub.f32 %v23287_v46, %v11186_v61  ;;  %11269 = vadd.xlane.f32.xlu1 %v11268_v40 }
0x19d3   : > { %18360 = vpow2.f32 %v11235_v58  ;;  %v11237_v48 = vmul.f32 1.442695, %v11210_v1 }
0x19d5   : > { %v23375_v5 = vpop.eup %18356  ;;  %18362 = vpow2.f32 %v11237_v48 }
0x19d6   : > { %v11189_v22 = vpop.xlane.xlu0 %11188  ;;  %v11271_v43 = vsel %vm1688_vm3, %v23375_v5, 0.0 }
0x19d7   : > { %v23379_v32 = vpop.eup %18358  ;;  %v11211_v51 = vsub.f32 %v23291_v19, %v11189_v22  ;;  %11272 = vadd.xlane.f32.xlu1 %v11271_v43 }
0x19d8   : > { %v11192_v38 = vpop.xlane.xlu1 %11191  ;;  %v11274_v37 = vsel %vm1688_vm3, %v23379_v32, 0.0 }
0x19d9   : > { %v11239_v46 = vmul.f32 1.442695, %v11211_v51  ;;  %v11212_v29 = vsub.f32 %v23295_v3, %v11192_v38  ;;  %11275 = vadd.xlane.f32.xlu0 %v11274_v37 }
0x19db   : > { %18364 = vpow2.f32 %v11239_v46  ;;  %v11241_v8 = vmul.f32 1.442695, %v11212_v29 }
0x19dc   : > { %v23406_v22 = vpop.permute.xlu1 %11967 }
0x19dd   : > { %v23385_v31 = vpop.eup %18360  ;;  %18366 = vpow2.f32 %v11241_v8 }
0x19de   : > { %v11277_v45 = vsel %vm1688_vm3, %v23385_v31, 0.0  ;;  %v11195_v1 = vpop.xlane.xlu0 %11194 }
0x19df   : > { %v23389_v15 = vpop.eup %18362  ;;  %11278 = vadd.xlane.f32.xlu1 %v11277_v45  ;;  %v11213_v48 = vsub.f32 %v23299_v20, %v11195_v1 }
0x19e0   : > { %v11280_v19 = vsel %vm1688_vm3, %v23389_v15, 0.0 }
0x19e1   : > { %11281 = vadd.xlane.f32.xlu0 %v11280_v19  ;;  %v11243_v43 = vmul.f32 1.442695, %v11213_v48 }
0x19e3   : > { %18368 = vpow2.f32 %v11243_v43 }
0x19e5   : > { %v23393_v61 = vpop.eup %18364 }
0x19e6   : > { %v11283_v3 = vsel %vm1688_vm3, %v23393_v61, 0.0 }
0x19e7   : > { %v23397_v40 = vpop.eup %18366  ;;  %11284 = vadd.xlane.f32.xlu1 %v11283_v3 }
0x19e8   : > { %v11286_v58 = vsel %vm1688_vm3, %v23397_v40, 0.0 }
0x19e9   : > { %11287 = vadd.xlane.f32.xlu0 %v11286_v58 }
0x19ed   : > { %v23409_v46 = vpop.eup %18368 }
0x19ee   : > { %v11289_v29 = vsel %vm1688_vm3, %v23409_v46, 0.0 }
0x19f8   : > { %12063 = vrot.lane.b32.xlu1 %v22147_v60, %s19091_s5 }
0x19ff   : > { %12015 = vrot.lane.b32.xlu0 %v22133_v2, %s19091_s5 }
0x1a0d   : > { %v11198_v51 = vpop.xlane.xlu1 %11197 }
0x1a0e   : > { %v11214_v38 = vsub.f32 %v23303_v10, %v11198_v51  ;;  %v23433_v10 = vpop.permute.xlu0 %11919 }
0x1a10   : > { %v11245_v37 = vmul.f32 1.442695, %v11214_v38 }
0x1a12   : > { %18370 = vpow2.f32 %v11245_v37  ;;  %v11445_v37 = vsel %vm7827_vm6, %v23315_v18, 0 }
0x1a1c   : > { %v23413_v8 = vpop.eup %18370  ;;  %11290 = vadd.xlane.f32.xlu1 %v11289_v29 }
0x1a1d   : > { %v11292_v20 = vsel %vm1688_vm3, %v23413_v8, 0.0 }
0x1a1e   : > { %11293 = vadd.xlane.f32.xlu0 %v11292_v20  ;;  %v11493_v20 = vsel %vm7827_vm6, %v23311_v59, 0 }
0x1a2d   : > { %12163 = vrot.lane.b32.xlu1 %v22035_v49, %s19092_s1 }
0x1a31   : > { %12161 = vrot.lane.b32.xlu1 %v22035_v49, %s19093_s19 }
0x1a34   : > { %12113 = vrot.lane.b32.xlu0 %v22027_v42, %s19092_s1 }
0x1a35   : > { %12263 = vrot.lane.b32.xlu1 %v22053_v35, %s19092_s1 }
0x1a38   : > { %12111 = vrot.lane.b32.xlu0 %v22027_v42, %s19093_s19 }
0x1a39   : > { %12261 = vrot.lane.b32.xlu1 %v22053_v35, %s19093_s19 }
0x1a3c   : > { %12213 = vrot.lane.b32.xlu0 %v22043_v17, %s19092_s1 }
0x1a3d   : > { %12363 = vrot.lane.b32.xlu1 %v22075_v12, %s19092_s1 }
0x1a40   : > { %12211 = vrot.lane.b32.xlu0 %v22043_v17, %s19093_s19 }
0x1a41   : > { %12361 = vrot.lane.b32.xlu1 %v22075_v12, %s19093_s19 }
0x1a44   : > { %12313 = vrot.lane.b32.xlu0 %v22059_v9, %s19092_s1  ;;  %v11249_v45 = vpop.xlane.xlu0 %11248 }
0x1a45   : > { %18372 = vrcp.f32 %v11249_v45  ;;  %12463 = vrot.lane.b32.xlu1 %v22085_v50, %s19092_s1 }
0x1a46   : > { %v11252_v19 = vpop.xlane.xlu1 %11251 }
0x1a47   : > { %18374 = vrcp.f32 %v11252_v19 }
0x1a48   : > { %12311 = vrot.lane.b32.xlu0 %v22059_v9, %s19093_s19 }
0x1a49   : > { %12461 = vrot.lane.b32.xlu1 %v22085_v50, %s19093_s19 }
0x1a4c   : > { %12413 = vrot.lane.b32.xlu0 %v22069_v36, %s19092_s1  ;;  %v11255_v3 = vpop.xlane.xlu0 %11254 }
0x1a4d   : > { %18376 = vrcp.f32 %v11255_v3  ;;  %12563 = vrot.lane.b32.xlu1 %v22107_v62, %s19092_s1  ;;  %v11541_v3 = vsel %vm7827_vm6, %v23319_v4, 0 }
0x1a4f   : > { %v18373_v58 = vpop.eup %18372 }
0x1a50   : > { %v11311_v1 = vmul.f32 %v18373_v58, %v23335_v28  ;;  %v11258_v48 = vpop.xlane.xlu1 %11257  ;;  %12411 = vrot.lane.b32.xlu0 %v22069_v36, %s19093_s19 }
0x1a51   : > { %v18375_v43 = vpop.eup %18374  ;;  %18378 = vrcp.f32 %v11258_v48  ;;  %12561 = vrot.lane.b32.xlu1 %v22107_v62, %s19093_s19 }
0x1a52   : > { %v11327_v51 = vpack.c.bf16 %v11311_v1, %v11311_v1  ;;  %v11312_v38 = vmul.f32 %v18375_v43, %v23339_v6 }
0x1a54   : > { %v11328_v29 = vpack.c.bf16 %v11312_v38, %v11312_v38  ;;  %12513 = vrot.lane.b32.xlu0 %v22091_v27, %s19092_s1  ;;  %17360 = vmatmul.mubr.msk.bf16.vlgmr.msra.gmra.mrb[48].mxu0 %vm1688_vm3, %v11327_v51  ;;  %v11261_v28 = vpop.xlane.xlu0 %11260 }
0x1a55   : > { %17370 = vmatpush3.bf16.msra.mxu0 %v11445_v37  ;;  %18380 = vrcp.f32 %v11261_v28  ;;  %12663 = vrot.lane.b32.xlu1 %v22117_v14, %s19092_s1 }
0x1a56   : > { %17366 = vmatmul.mubr.msk.bf16.vlgmr.msra.gmra.mrb[64].mxu1 %vm1688_vm3, %v11328_v29  ;;  %v11264_v6 = vpop.xlane.xlu1 %11263  ;;  %17371 = vmatprep.mubr.msk.bf16.mxu0 %vm19083_vm2, %v24800_v57 }
0x1a57   : > { %v18377_v18 = vpop.eup %18376  ;;  %17376 = vmatpush3.bf16.msra.mxu1 %v11493_v20  ;;  %18382 = vrcp.f32 %v11264_v6  ;;  %17381 = vmatprep.subr.bf16.mxu0 %v24800_v57 }
0x1a58   : > { %v11313_v45 = vmul.f32 %v18377_v18, %v23345_v63  ;;  %12511 = vrot.lane.b32.xlu0 %v22091_v27, %s19093_s19  ;;  %17377 = vmatprep.mubr.msk.bf16.mxu1 %vm19083_vm2, %v24800_v57 }
0x1a59   : > { %12661 = vrot.lane.b32.xlu1 %v22117_v14, %s19093_s19  ;;  %17387 = vmatprep.subr.bf16.mxu1 %v24800_v57 }
0x1a5a   : > { %v11329_v59 = vpack.c.bf16 %v11313_v45, %v11313_v45 }
0x1a5b   : > { %v18379_v19 = vpop.eup %18378 }
0x1a5c   : > { %v11314_v58 = vmul.f32 %v18379_v19, %v23350_v34  ;;  %12613 = vrot.lane.b32.xlu0 %v22101_v44, %s19092_s1  ;;  %17372 = vmatmul.mubr.msk.bf16.vlgmr.msra.gmra.mrb[52].mxu0 %vm1688_vm3, %v11329_v59  ;;  %v11267_v63 = vpop.xlane.xlu0 %11266  ;;  %v11589_v34 = vsel %vm7827_vm6, %v23313_v56, 0  ;;  %v11637_v56 = vsel %vm7827_vm6, %v23323_v52, 0  ;;  %v11685_v52 = vsel %vm7827_vm6, %v23317_v21, 0 }
0x1a5d   : > { %17382 = vmatpush3.bf16.msra.mxu0 %v11541_v3  ;;  %18384 = vrcp.f32 %v11267_v63  ;;  %12763 = vrot.lane.b32.xlu1 %v22139_v53, %s19092_s1  ;;  %v11733_v21 = vsel %vm7827_vm6, %v23327_v25, 0  ;;  %v11781_v25 = vsel %vm7827_vm6, %v23321_v23, 0  ;;  %v11829_v23 = vsel %vm7827_vm6, %v23325_v16, 0 }
0x1a5e   : > { %v11330_v1 = vpack.c.bf16 %v11314_v58, %v11314_v58  ;;  %v11270_v48 = vpop.xlane.xlu1 %11269  ;;  %17383 = vmatprep.mubr.msk.bf16.mxu0 %vm19083_vm2, %v24800_v57  ;;  %17393 = vmatprep.subr.bf16.mxu0 %v24800_v57 }
0x1a5f   : > { %v18381_v4 = vpop.eup %18380  ;;  %18386 = vrcp.f32 %v11270_v48 }
0x1a60   : > { %v11315_v43 = vmul.f32 %v18381_v4, %v23355_v54  ;;  %17378 = vmatmul.mubr.msk.bf16.vlgmr.msra.gmra.mrb[68].mxu1 %vm1688_vm3, %v11330_v1  ;;  %12611 = vrot.lane.b32.xlu0 %v22101_v44, %s19093_s19 }
0x1a61   : > { %v18383_v51 = vpop.eup %18382  ;;  %17388 = vmatpush3.bf16.msra.mxu1 %v11589_v34  ;;  %12761 = vrot.lane.b32.xlu1 %v22139_v53, %s19093_s19 }
0x1a62   : > { %v11331_v38 = vpack.c.bf16 %v11315_v43, %v11315_v43  ;;  %v11316_v37 = vmul.f32 %v18383_v51, %v23359_v33  ;;  %17389 = vmatprep.mubr.msk.bf16.mxu1 %vm19083_vm2, %v24800_v57  ;;  %17399 = vmatprep.subr.bf16.mxu1 %v24800_v57 }
0x1a64   : > { %12713 = vrot.lane.b32.xlu0 %v22123_v13, %s19092_s1  ;;  %v11273_v54 = vpop.xlane.xlu1 %11272  ;;  %17384 = vmatmul.mubr.msk.bf16.vlgmr.msra.gmra.mrb[56].mxu0 %vm1688_vm3, %v11331_v38  ;;  %v11332_v33 = vpack.c.bf16 %v11316_v37, %v11316_v37 }
0x1a65   : > { %18388 = vrcp.f32 %v11273_v54  ;;  %17394 = vmatpush3.bf16.msra.mxu0 %v11637_v56  ;;  %12863 = vrot.lane.b32.xlu1 %v22147_v60, %s19092_s1 }
0x1a66   : > { %v11276_v29 = vpop.xlane.xlu0 %11275  ;;  %17395 = vmatprep.mubr.msk.bf16.mxu0 %vm19083_vm2, %v24800_v57  ;;  %17405 = vmatprep.subr.bf16.mxu0 %v24800_v57 }
0x1a67   : > { %v18385_v28 = vpop.eup %18384  ;;  %18390 = vrcp.f32 %v11276_v29 }
0x1a68   : > { %v11317_v20 = vmul.f32 %v18385_v28, %v23365_v55  ;;  %17390 = vmatmul.mubr.msk.bf16.vlgmr.msra.gmra.mrb[72].mxu1 %vm1688_vm3, %v11332_v33  ;;  %12711 = vrot.lane.b32.xlu0 %v22123_v13, %s19093_s19 }
0x1a69   : > { %v18387_v6 = vpop.eup %18386  ;;  %17400 = vmatpush3.bf16.msra.mxu1 %v11685_v52  ;;  %12861 = vrot.lane.b32.xlu1 %v22147_v60, %s19093_s19 }
0x1a6a   : > { %v11333_v18 = vpack.c.bf16 %v11317_v20, %v11317_v20  ;;  %v11318_v45 = vmul.f32 %v18387_v6, %v23369_v0  ;;  %17401 = vmatprep.mubr.msk.bf16.mxu1 %vm19083_vm2, %v24800_v57  ;;  %17411 = vmatprep.subr.bf16.mxu1 %v24800_v57 }
0x1a6c   : > { %12813 = vrot.lane.b32.xlu0 %v22133_v2, %s19092_s1  ;;  %v11279_v55 = vpop.xlane.xlu1 %11278  ;;  %17396 = vmatmul.mubr.msk.bf16.vlgmr.msra.gmra.mrb[60].mxu0 %vm1688_vm3, %v11333_v18  ;;  %v11334_v0 = vpack.c.bf16 %v11318_v45, %v11318_v45  ;;  %s15267_s1 = sshll.u32 %s19101_s24, 4  ;;  %s15268_s1 = int_to_ptr.vmem [resolvable:$true] %s15267_s1 }
0x1a6d   : > { %18392 = vrcp.f32 %v11279_v55  ;;  %17406 = vmatpush3.bf16.msra.mxu0 %v11733_v21  ;;  %13151 = vrot.lane.b32.xlu1 %v22035_v49, %s19094_s9  ;;  %p18979_p10 = scmp.lt.s32.totalorder %s15268_s1, %s15268_s1 }
0x1a6e   : > { %v11282_v59 = vpop.xlane.xlu0 %11281  ;;  %17407 = vmatprep.mubr.msk.bf16.mxu0 %vm19083_vm2, %v24800_v57  ;;  %17417 = vmatprep.subr.bf16.mxu0 %v24800_v57 }
0x1a6f   : > { %v18389_v19 = vpop.eup %18388  ;;  %18394 = vrcp.f32 %v11282_v59 }
0x1a70   : > { %v11319_v3 = vmul.f32 %v18389_v19, %v23375_v5  ;;  %17402 = vmatmul.mubr.msk.bf16.vlgmr.msra.gmra.mrb[76].mxu1 %vm1688_vm3, %v11334_v0  ;;  %12811 = vrot.lane.b32.xlu0 %v22133_v2, %s19093_s19  ;;  %s18972_s19 = scalar_lea.vmem %s15268_s1, 2048 }
0x1a71   : > { %v18391_v49 = vpop.eup %18390  ;;  %17412 = vmatpush3.bf16.msra.mxu1 %v11781_v25  ;;  %13247 = vrot.lane.b32.xlu1 %v22053_v35, %s19094_s9  ;;  %p18973_p5 = scmp.ne.s32.totalorder %s15268_s1, %s18972_s19  ;;  %p18980_p9 = scmp.lt.s32.totalorder %s18972_s19, %s18972_s19 }
0x1a72   : > { %v11335_v58 = vpack.c.bf16 %v11319_v3, %v11319_v3  ;;  %v11320_v63 = vmul.f32 %v18391_v49, %v23379_v32  ;;  %17413 = vmatprep.mubr.msk.bf16.mxu1 %vm19083_vm2, %v24800_v57  ;;  %17423 = vmatprep.subr.bf16.mxu1 %v24800_v57 }
0x1a73   : > { %p18981_p11 = por %p18980_p9, %p18979_p10 }
0x1a74   : > { %13103 = vrot.lane.b32.xlu0 %v22027_v42, %s19094_s9  ;;  %v11285_v5 = vpop.xlane.xlu1 %11284  ;;  %17408 = vmatmul.mubr.msk.bf16.vlgmr.msra.gmra.mrb[64].mxu0 %vm1688_vm3, %v11335_v58  ;;  %v11336_v35 = vpack.c.bf16 %v11320_v63, %v11320_v63  ;;  %v11877_v42 = vsel %vm7827_vm6, %v23329_v41, 0  ;;  %v11925_v41 = vsel %vm7827_vm6, %v23433_v10, 0 }
0x1a75   : > { %18396 = vrcp.f32 %v11285_v5  ;;  %17418 = vmatpush3.bf16.msra.mxu0 %v11829_v23  ;;  %13343 = vrot.lane.b32.xlu1 %v22075_v12, %s19094_s9 }
0x1a76   : > { %v11288_v32 = vpop.xlane.xlu0 %11287  ;;  %17419 = vmatprep.mubr.msk.bf16.mxu0 %vm19083_vm2, %v24800_v57  ;;  %17429 = vmatprep.subr.bf16.mxu0 %v24800_v57 }
0x1a77   : > { %v18393_v1 = vpop.eup %18392  ;;  %18398 = vrcp.f32 %v11288_v32 }
0x1a78   : > { %v11321_v16 = vmul.f32 %v18393_v1, %v23385_v31  ;;  %13199 = vrot.lane.b32.xlu0 %v22043_v17, %s19094_s9  ;;  %17414 = vmatmul.mubr.msk.bf16.vlgmr.msra.gmra.mrb[80].mxu1 %vm1688_vm3, %v11336_v35  ;;  %v11973_v31 = vsel %vm7827_vm6, %v23406_v22, 0 }
0x1a79   : > { %v18395_v12 = vpop.eup %18394  ;;  %17424 = vmatpush3.bf16.msra.mxu1 %v11877_v42  ;;  %13439 = vrot.lane.b32.xlu1 %v22085_v50, %s19094_s9 }
0x1a7a   : > { %v11337_v48 = vpack.c.bf16 %v11321_v16, %v11321_v16  ;;  %v11322_v4 = vmul.f32 %v18395_v12, %v23389_v15  ;;  %17425 = vmatprep.mubr.msk.bf16.mxu1 %vm19083_vm2, %v24800_v57  ;;  %17435 = vmatprep.subr.bf16.mxu1 %v24800_v57  ;;  %v12016_v10 = vpop.permute.xlu0 %12015 }
0x1a7b   : > { %v12021_v22 = vsel %vm7827_vm6, %v12016_v10, 0 }
0x1a7c   : > { %13295 = vrot.lane.b32.xlu0 %v22059_v9, %s19094_s9  ;;  %17420 = vmatmul.mubr.msk.bf16.vlgmr.msra.gmra.mrb[68].mxu0 %vm1688_vm3, %v11337_v48  ;;  %v11338_v17 = vpack.c.bf16 %v11322_v4, %v11322_v4 }
0x1a7d   : > { %17430 = vmatpush3.bf16.msra.mxu0 %v11925_v41  ;;  %17431 = vmatprep.mubr.msk.bf16.mxu0 %vm19083_vm2, %v24800_v57 }
0x1a7e   : > { %17441 = vmatprep.subr.bf16.mxu0 %v24800_v57 }
0x1a7f   : > { %v18397_v50 = vpop.eup %18396 }
0x1a80   : > { %v11323_v15 = vmul.f32 %v18397_v50, %v23393_v61  ;;  %13391 = vrot.lane.b32.xlu0 %v22069_v36, %s19094_s9  ;;  %17426 = vmatmul.mubr.msk.bf16.vlgmr.msra.gmra.mrb[84].mxu1 %vm1688_vm3, %v11338_v17  ;;  %v12064_v61 = vpop.permute.xlu1 %12063 }
0x1a81   : > { %v18399_v9 = vpop.eup %18398  ;;  %17436 = vmatpush3.bf16.msra.mxu1 %v11973_v31  ;;  %17437 = vmatprep.mubr.msk.bf16.mxu1 %vm19083_vm2, %v24800_v57  ;;  %v12069_v51 = vsel %vm7827_vm6, %v12064_v61, 0 }
0x1a82   : > { %v11339_v34 = vpack.c.bf16 %v11323_v15, %v11323_v15  ;;  %v11324_v43 = vmul.f32 %v18399_v9, %v23397_v40  ;;  %17447 = vmatprep.subr.bf16.mxu1 %v24800_v57 }
0x1a84   : > { %17432 = vmatmul.mubr.msk.bf16.vlgmr.msra.gmra.mrb[72].mxu0 %vm1688_vm3, %v11339_v34  ;;  %v11340_v36 = vpack.c.bf16 %v11324_v43, %v11324_v43 }
0x1a85   : > { %17442 = vmatpush3.bf16.msra.mxu0 %v12021_v22  ;;  %17443 = vmatprep.mubr.msk.bf16.mxu0 %vm19083_vm2, %v24800_v57 }
0x1a86   : > { %17453 = vmatprep.subr.bf16.mxu0 %v24800_v57 }
0x1a88   : > { %17438 = vmatmul.mubr.msk.bf16.vlgmr.msra.gmra.mrb[88].mxu1 %vm1688_vm3, %v11340_v36 }
0x1a89   : > { %17448 = vmatpush3.bf16.msra.mxu1 %v12069_v51  ;;  %17449 = vmatprep.mubr.msk.bf16.mxu1 %vm19083_vm2, %v24800_v57 }
0x1a8a   : > { %17459 = vmatprep.subr.bf16.mxu1 %v24800_v57 }
0x1aa9   : > { %v11291_v40 = vpop.xlane.xlu1 %11290 }
0x1aaa   : > { %18400 = vrcp.f32 %v11291_v40 }
0x1aab   : > { %v11294_v38 = vpop.xlane.xlu0 %11293 }
0x1aac   : > { %18402 = vrcp.f32 %v11294_v38 }
0x1aad   : > { %v12164_v37 = vpop.permute.xlu1 %12163 }
0x1aae   : > { %v12169_v59 = vsel %vm1688_vm3, %v12164_v37, 0 }
0x1aaf   : > { %v12114_v56 = vpop.permute.xlu0 %12113 }
0x1ab0   : > { %v12119_v55 = vsel %vm1688_vm3, %v12114_v56, 0 }
0x1ab1   : > { %v12162_v54 = vpop.permute.xlu1 %12161 }
0x1ab3   : > { %v12112_v33 = vpop.permute.xlu0 %12111 }
0x1ab4   : > { %v18401_v29 = vpop.eup %18400 }
0x1ab5   : > { %v11325_v28 = vmul.f32 %v18401_v29, %v23409_v46  ;;  %v12264_v52 = vpop.permute.xlu1 %12263 }
0x1ab6   : > { %v18403_v20 = vpop.eup %18402  ;;  %v12269_v49 = vsel %vm1688_vm3, %v12264_v52, 0 }
0x1ab7   : > { %v11341_v6 = vpack.c.bf16 %v11325_v28, %v11325_v28  ;;  %v11326_v18 = vmul.f32 %v18403_v20, %v23413_v8  ;;  %v12214_v45 = vpop.permute.xlu0 %12213 }
0x1ab8   : > { %v12219_v25 = vsel %vm1688_vm3, %v12214_v45, 0 }
0x1ab9   : > { %v11342_v21 = vpack.c.bf16 %v11326_v18, %v11326_v18  ;;  %v12262_v0 = vpop.permute.xlu1 %12261  ;;  %17444 = vmatmul.mubr.msk.bf16.vlgmr.msra.gmra.mrb[76].mxu0 %vm1688_vm3, %v11341_v6 }
0x1aba   : > { %17454 = vmatpush3.bf16.xpose.msra.mxu0 %v12119_v55  ;;  %17455 = vmatprep.mubr.msk.bf16.mxu0 %vm19083_vm2, %v24800_v57 }
0x1abb   : > { %17450 = vmatmul.mubr.msk.bf16.vlgmr.msra.gmra.mrb[92].mxu1 %vm1688_vm3, %v11342_v21  ;;  %v12212_v46 = vpop.permute.xlu0 %12211  ;;  %17465 = vmatprep.subr.bf16.mxu0 %v24800_v57 }
0x1abc   : > { %17460 = vmatpush3.bf16.xpose.msra.mxu1 %v12169_v59  ;;  %17461 = vmatprep.mubr.msk.bf16.mxu1 %vm19083_vm2, %v24800_v57 }
0x1abd   : > { %v12364_v8 = vpop.permute.xlu1 %12363  ;;  %17471 = vmatprep.subr.bf16.mxu1 %v24800_v57 }
0x1abe   : > { %v12369_v32 = vsel %vm1688_vm3, %v12364_v8, 0 }
0x1abf   : > { %v12314_v19 = vpop.permute.xlu0 %12313 }
0x1ac0   : > { %v12319_v5 = vsel %vm1688_vm3, %v12314_v19, 0 }
0x1ac1   : > { %v12362_v3 = vpop.permute.xlu1 %12361  ;;  %17456 = vmatmul.mubr.msk.bf16.vlgmr.msra.gmra.mrb[80].mxu0 %vm1688_vm3, %v12112_v33 }
0x1ac2   : > { %17466 = vmatpush3.bf16.xpose.msra.mxu0 %v12219_v25  ;;  %17467 = vmatprep.mubr.msk.bf16.mxu0 %vm19083_vm2, %v24800_v57 }
0x1ac3   : > { %17462 = vmatmul.mubr.msk.bf16.vlgmr.msra.gmra.mrb[96].mxu1 %vm1688_vm3, %v12162_v54  ;;  %v12312_v58 = vpop.permute.xlu0 %12311  ;;  %17477 = vmatprep.subr.bf16.mxu0 %v24800_v57 }
0x1ac4   : > { %17472 = vmatpush3.bf16.xpose.msra.mxu1 %v12269_v49  ;;  %17473 = vmatprep.mubr.msk.bf16.mxu1 %vm19083_vm2, %v24800_v57 }
0x1ac5   : > { %v12464_v63 = vpop.permute.xlu1 %12463  ;;  %17483 = vmatprep.subr.bf16.mxu1 %v24800_v57 }
0x1ac6   : > { %v12469_v4 = vsel %vm1688_vm3, %v12464_v63, 0 }
0x1ac7   : > { %v12414_v23 = vpop.permute.xlu0 %12413 }
0x1ac8   : > { %v12419_v12 = vsel %vm1688_vm3, %v12414_v23, 0 }
0x1ac9   : > { %v12462_v35 = vpop.permute.xlu1 %12461  ;;  %17468 = vmatmul.mubr.msk.bf16.vlgmr.msra.gmra.mrb[84].mxu0 %vm1688_vm3, %v12212_v46 }
0x1aca   : > { %17478 = vmatpush3.bf16.xpose.msra.mxu0 %v12319_v5  ;;  %17479 = vmatprep.mubr.msk.bf16.mxu0 %vm19083_vm2, %v24800_v57 }
0x1acb   : > { %17474 = vmatmul.mubr.msk.bf16.vlgmr.msra.gmra.mrb[100].mxu1 %vm1688_vm3, %v12262_v0  ;;  %v12412_v1 = vpop.permute.xlu0 %12411  ;;  %17489 = vmatprep.subr.bf16.mxu0 %v24800_v57 }
0x1acc   : > { %17484 = vmatpush3.bf16.xpose.msra.mxu1 %v12369_v32  ;;  %17485 = vmatprep.mubr.msk.bf16.mxu1 %vm19083_vm2, %v24800_v57 }
0x1acd   : > { %v12564_v42 = vpop.permute.xlu1 %12563  ;;  %17495 = vmatprep.subr.bf16.mxu1 %v24800_v57 }
0x1ace   : > { %v12569_v9 = vsel %vm1688_vm3, %v12564_v42, 0 }
0x1acf   : > { %v12514_v16 = vpop.permute.xlu0 %12513 }
0x1ad0   : > { %v12519_v31 = vsel %vm1688_vm3, %v12514_v16, 0 }
0x1ad1   : > { %v12562_v48 = vpop.permute.xlu1 %12561  ;;  %17480 = vmatmul.mubr.msk.bf16.vlgmr.msra.gmra.mrb[88].mxu0 %vm1688_vm3, %v12312_v58 }
0x1ad2   : > { %17490 = vmatpush3.bf16.xpose.msra.mxu0 %v12419_v12  ;;  %17491 = vmatprep.mubr.msk.bf16.mxu0 %vm19083_vm2, %v24800_v57 }
0x1ad3   : > { %17486 = vmatmul.mubr.msk.bf16.vlgmr.msra.gmra.mrb[104].mxu1 %vm1688_vm3, %v12362_v3  ;;  %v12512_v41 = vpop.permute.xlu0 %12511  ;;  %17501 = vmatprep.subr.bf16.mxu0 %v24800_v57 }
0x1ad4   : > { %17496 = vmatpush3.bf16.xpose.msra.mxu1 %v12469_v4  ;;  %17497 = vmatprep.mubr.msk.bf16.mxu1 %vm19083_vm2, %v24800_v57 }
0x1ad5   : > { %v12664_v17 = vpop.permute.xlu1 %12663  ;;  %17507 = vmatprep.subr.bf16.mxu1 %v24800_v57 }
0x1ad6   : > { %v12669_v61 = vsel %vm1688_vm3, %v12664_v17, 0 }
0x1ad7   : > { %v12614_v50 = vpop.permute.xlu0 %12613 }
0x1ad8   : > { %v12619_v22 = vsel %vm1688_vm3, %v12614_v50, 0 }
0x1ad9   : > { %17492 = vmatmul.mubr.msk.bf16.vlgmr.msra.gmra.mrb[92].mxu0 %vm1688_vm3, %v12412_v1  ;;  %v12662_v15 = vpop.permute.xlu1 %12661 }
0x1ada   : > { %17502 = vmatpush3.bf16.xpose.msra.mxu0 %v12519_v31  ;;  %17503 = vmatprep.mubr.msk.bf16.mxu0 %vm19083_vm2, %v24800_v57 }
0x1adb   : > { %17498 = vmatmul.mubr.msk.bf16.vlgmr.msra.gmra.mrb[108].mxu1 %vm1688_vm3, %v12462_v35  ;;  %v12612_v10 = vpop.permute.xlu0 %12611  ;;  %17513 = vmatprep.subr.bf16.mxu0 %v24800_v57 }
0x1adc   : > { %17508 = vmatpush3.bf16.xpose.msra.mxu1 %v12569_v9  ;;  %17509 = vmatprep.mubr.msk.bf16.mxu1 %vm19083_vm2, %v24800_v57 }
0x1add   : > { %17519 = vmatprep.subr.bf16.mxu1 %v24800_v57  ;;  %v12764_v43 = vpop.permute.xlu1 %12763 }
0x1ade   : > { %v12769_v37 = vsel %vm1688_vm3, %v12764_v43, 0 }
0x1adf   : > { %v12714_v34 = vpop.permute.xlu0 %12713 }
0x1ae0   : > { %v12719_v40 = vsel %vm1688_vm3, %v12714_v34, 0 }
0x1ae1   : > { %17504 = vmatmul.mubr.msk.bf16.vlgmr.msra.gmra.mrb[96].mxu0 %vm1688_vm3, %v12512_v41  ;;  %v12762_v51 = vpop.permute.xlu1 %12761 }
0x1ae2   : > { %17514 = vmatpush3.bf16.xpose.msra.mxu0 %v12619_v22  ;;  %17515 = vmatprep.mubr.msk.bf16.mxu0 %vm19083_vm2, %v24800_v57 }
0x1ae3   : > { %17510 = vmatmul.mubr.msk.bf16.vlgmr.msra.gmra.mrb[112].mxu1 %vm1688_vm3, %v12562_v48  ;;  %17525 = vmatprep.subr.bf16.mxu0 %v24800_v57  ;;  %v12712_v36 = vpop.permute.xlu0 %12711 }
0x1ae4   : > { %17520 = vmatpush3.bf16.xpose.msra.mxu1 %v12669_v61  ;;  %17521 = vmatprep.mubr.msk.bf16.mxu1 %vm19083_vm2, %v24800_v57 }
0x1ae5   : > { %17531 = vmatprep.subr.bf16.mxu1 %v24800_v57  ;;  %v12864_v56 = vpop.permute.xlu1 %12863 }
0x1ae6   : > { %v12869_v28 = vsel %vm1688_vm3, %v12864_v56, 0 }
0x1ae7   : > { %v12814_v38 = vpop.permute.xlu0 %12813 }
0x1ae8   : > { %v12819_v33 = vsel %vm1688_vm3, %v12814_v38, 0 }
0x1ae9   : > { %17516 = vmatmul.mubr.msk.bf16.vlgmr.msra.gmra.mrb[100].mxu0 %vm1688_vm3, %v12612_v10  ;;  %v12862_v29 = vpop.permute.xlu1 %12861 }
0x1aea   : > { %17526 = vmatpush3.bf16.xpose.msra.mxu0 %v12719_v40  ;;  %17527 = vmatprep.mubr.msk.bf16.mxu0 %vm19083_vm2, %v24800_v57 }
0x1aeb   : > { %17522 = vmatmul.mubr.msk.bf16.vlgmr.msra.gmra.mrb[116].mxu1 %vm1688_vm3, %v12662_v15  ;;  %17537 = vmatprep.subr.bf16.mxu0 %v24800_v57  ;;  %v12812_v54 = vpop.permute.xlu0 %12811 }
0x1aec   : > { %17532 = vmatpush3.bf16.xpose.msra.mxu1 %v12769_v37  ;;  %17533 = vmatprep.mubr.msk.bf16.mxu1 %vm19083_vm2, %v24800_v57 }
0x1aed   : > { %17543 = vmatprep.subr.bf16.mxu1 %v24800_v57  ;;  %v13152_v20 = vpop.permute.xlu1 %13151 }
0x1aee   : > { %v13157_v18 = vsel %vm7827_vm6, %v13152_v20, 0 }
0x1aef   : > { %v13104_v52 = vpop.permute.xlu0 %13103 }
0x1af0   : > { %v13109_v6 = vsel %vm7827_vm6, %v13104_v52, 0 }
0x1af1   : > { %17528 = vmatmul.mubr.msk.bf16.vlgmr.msra.gmra.mrb[104].mxu0 %vm1688_vm3, %v12712_v36 }
0x1af2   : > { %17538 = vmatpush3.bf16.xpose.msra.mxu0 %v12819_v33  ;;  %17539 = vmatprep.mubr.msk.bf16.mxu0 %vm19083_vm2, %v24800_v57 }
0x1af3   : > { %17534 = vmatmul.mubr.msk.bf16.vlgmr.msra.gmra.mrb[120].mxu1 %vm1688_vm3, %v12762_v51  ;;  %17549 = vmatprep.subr.bf16.mxu0 %v24800_v57 }
0x1af4   : > { %17544 = vmatpush3.bf16.xpose.msra.mxu1 %v12869_v28  ;;  %17545 = vmatprep.mubr.msk.bf16.mxu1 %vm19083_vm2, %v24800_v57 }
0x1af5   : > { %17555 = vmatprep.subr.bf16.mxu1 %v24800_v57 }
0x1af9   : > { %17540 = vmatmul.mubr.msk.bf16.vlgmr.msra.gmra.mrb[108].mxu0 %vm1688_vm3, %v12812_v54 }
0x1afa   : > { %17550 = vmatpush3.bf16.msra.mxu0 %v13109_v6  ;;  %17551 = vmatprep.mubr.msk.bf16.mxu0 %vm19083_vm2, %v24800_v57 }
0x1afb   : > { %17546 = vmatmul.mubr.msk.bf16.vlgmr.msra.gmra.mrb[124].mxu1 %vm1688_vm3, %v12862_v29  ;;  %17561 = vmatprep.subr.bf16.mxu0 %v24800_v57 }
0x1afc   : > { %17556 = vmatpush3.bf16.msra.mxu1 %v13157_v18  ;;  %17557 = vmatprep.mubr.msk.bf16.mxu1 %vm19083_vm2, %v24800_v57 }
0x1afd   : > { %17567 = vmatprep.subr.bf16.mxu1 %v24800_v57 }
0x1b27   : > { %v23687_v45 = vpop.f32.mrb[48].mxu0 }
0x1b28   : > { %v17361_v21 = vpop.f32.mrb[49].mxu0 }
0x1b29   : > { %v11388_v55 = vpop.f32.mrb[50].mxu0  ;;  %v23689_v0 = vpop.f32.mrb[64].mxu1 }
0x1b2a   : > { %v17362_v59 = vpop.f32.mrb[51].mxu0  ;;  %v17367_v46 = vpop.f32.mrb[65].mxu1 }
0x1b2b   : > { %v11436_v8 = vpop.f32.mrb[66].mxu1 }
0x1b2c   : > { %v17368_v19 = vpop.f32.mrb[67].mxu1 }
0x1b2f   : > { %v23691_v25 = vpop.f32.mrb[52].mxu0 }
0x1b30   : > { %v17373_v3 = vpop.f32.mrb[53].mxu0 }
0x1b31   : > { %v11484_v49 = vpop.f32.mrb[54].mxu0 }
0x1b32   : > { %v17374_v58 = vpop.f32.mrb[55].mxu0 }
0x1b33   : > { %v23693_v63 = vpop.f32.mrb[68].mxu1 }
0x1b34   : > { %v17379_v23 = vpop.f32.mrb[69].mxu1 }
0x1b35   : > { %v11532_v5 = vpop.f32.mrb[70].mxu1 }
0x1b36   : > { %v17380_v35 = vpop.f32.mrb[71].mxu1 }
0x1b37   : > { %v23695_v32 = vpop.f32.mrb[56].mxu0 }
0x1b38   : > { %v17385_v1 = vpop.f32.mrb[57].mxu0 }
0x1b39   : > { %v11580_v42 = vpop.f32.mrb[58].mxu0 }
0x1b3a   : > { %v17386_v16 = vpop.f32.mrb[59].mxu0 }
0x1b3b   : > { %v23697_v12 = vpop.f32.mrb[72].mxu1 }
0x1b3c   : > { %v17391_v48 = vpop.f32.mrb[73].mxu1 }
0x1b3d   : > { %v11628_v4 = vpop.f32.mrb[74].mxu1 }
0x1b3e   : > { %v17392_v41 = vpop.f32.mrb[75].mxu1 }
0x1b3f   : > { %v23699_v17 = vpop.f32.mrb[60].mxu0 }
0x1b40   : > { %v17397_v50 = vpop.f32.mrb[61].mxu0 }
0x1b41   : > { %v11676_v31 = vpop.f32.mrb[62].mxu0 }
0x1b42   : > { %v17398_v15 = vpop.f32.mrb[63].mxu0 }
0x1b43   : > { %v23701_v9 = vpop.f32.mrb[76].mxu1 }
0x1b44   : > { %v17403_v10 = vpop.f32.mrb[77].mxu1 }
0x1b45   : > { %v11724_v34 = vpop.f32.mrb[78].mxu1 }
0x1b46   : > { %v17404_v43 = vpop.f32.mrb[79].mxu1 }
0x1b47   : > { %v23703_v22 = vpop.f32.mrb[64].mxu0 }
0x1b48   : > { %v17409_v61 = vpop.f32.mrb[65].mxu0 }
0x1b49   : > { %v11772_v36 = vpop.f32.mrb[66].mxu0 }
0x1b4a   : > { %v17410_v51 = vpop.f32.mrb[67].mxu0 }
0x1b4b   : > { %v23705_v40 = vpop.f32.mrb[80].mxu1 }
0x1b4c   : > { %v17415_v38 = vpop.f32.mrb[81].mxu1 }
0x1b4d   : > { %v11820_v37 = vpop.f32.mrb[82].mxu1 }
0x1b4e   : > { %v17416_v56 = vpop.f32.mrb[83].mxu1 }
0x1b4f   : > { %v23707_v54 = vpop.f32.mrb[68].mxu0 }
0x1b50   : > { %v17421_v33 = vpop.f32.mrb[69].mxu0 }
0x1b51   : > { %v11868_v29 = vpop.f32.mrb[70].mxu0 }
0x1b52   : > { %v17422_v28 = vpop.f32.mrb[71].mxu0 }
0x1b53   : > { %v23709_v52 = vpop.f32.mrb[84].mxu1 }
0x1b54   : > { %v17427_v20 = vpop.f32.mrb[85].mxu1 }
0x1b55   : > { %v11916_v6 = vpop.f32.mrb[86].mxu1 }
0x1b56   : > { %v17428_v18 = vpop.f32.mrb[87].mxu1 }
0x1b57   : > { %v23711_v21 = vpop.f32.mrb[72].mxu0 }
0x1b58   : > { %v17433_v55 = vpop.f32.mrb[73].mxu0 }
0x1b59   : > { %v11964_v59 = vpop.f32.mrb[74].mxu0 }
0x1b5a   : > { %v17434_v46 = vpop.f32.mrb[75].mxu0 }
0x1b5b   : > { %v23713_v8 = vpop.f32.mrb[88].mxu1 }
0x1b5c   : > { %v17439_v19 = vpop.f32.mrb[89].mxu1 }
0x1b5d   : > { %v12012_v3 = vpop.f32.mrb[90].mxu1 }
0x1b5e   : > { %v17440_v49 = vpop.f32.mrb[91].mxu1 }
0x1b8c   : > { %v23715_v58 = vpop.f32.mrb[76].mxu0 }
0x1b8d   : > { %v17445_v23 = vpop.f32.mrb[77].mxu0 }
0x1b8e   : > { %v12060_v5 = vpop.f32.mrb[78].mxu0  ;;  %v23717_v35 = vpop.f32.mrb[92].mxu1 }
0x1b8f   : > { %v17446_v1 = vpop.f32.mrb[79].mxu0  ;;  %v17451_v42 = vpop.f32.mrb[93].mxu1 }
0x1b90   : > { %v12108_v16 = vpop.f32.mrb[94].mxu1 }
0x1b91   : > { %v17452_v48 = vpop.f32.mrb[95].mxu1 }
0x1b94   : > { %v23719_v4 = vpop.f32.mrb[80].mxu0 }
0x1b95   : > { %v17457_v41 = vpop.f32.mrb[81].mxu0  ;;  %v12911_v50 = vsel %vm1688_vm3, %v23719_v4, -inf }
0x1b96   : > { %v23723_v31 = vpop.f32.mrb[96].mxu1  ;;  %12912 = vmax.xlane.f32.xlu0 %v12911_v50  ;;  %v12158_v15 = vpop.f32.mrb[82].mxu0 }
0x1b97   : > { %v17458_v10 = vpop.f32.mrb[83].mxu0  ;;  %v17463_v34 = vpop.f32.mrb[97].mxu1  ;;  %v12914_v43 = vsel %vm1688_vm3, %v23723_v31, -inf }
0x1b98   : > { %12915 = vmax.xlane.f32.xlu1 %v12914_v43  ;;  %v12208_v61 = vpop.f32.mrb[98].mxu1 }
0x1b99   : > { %v17464_v36 = vpop.f32.mrb[99].mxu1 }
0x1b9c   : > { %v23727_v51 = vpop.f32.mrb[84].mxu0 }
0x1b9d   : > { %v17469_v38 = vpop.f32.mrb[85].mxu0  ;;  %v12917_v37 = vsel %vm1688_vm3, %v23727_v51, -inf }
0x1b9e   : > { %v23731_v56 = vpop.f32.mrb[100].mxu1  ;;  %12918 = vmax.xlane.f32.xlu0 %v12917_v37  ;;  %v12258_v33 = vpop.f32.mrb[86].mxu0 }
0x1b9f   : > { %v17470_v29 = vpop.f32.mrb[87].mxu0  ;;  %v17475_v28 = vpop.f32.mrb[101].mxu1  ;;  %v12920_v18 = vsel %vm1688_vm3, %v23731_v56, -inf }
0x1ba0   : > { %v12308_v20 = vpop.f32.mrb[102].mxu1 }
0x1ba1   : > { %v17476_v6 = vpop.f32.mrb[103].mxu1 }
0x1ba2   : > { %12921 = vmax.xlane.f32.xlu0 %v12920_v18 }
0x1ba4   : > { %v23735_v55 = vpop.f32.mrb[88].mxu0 }
0x1ba5   : > { %v17481_v59 = vpop.f32.mrb[89].mxu0  ;;  %v12923_v46 = vsel %vm1688_vm3, %v23735_v55, -inf }
0x1ba6   : > { %v23739_v19 = vpop.f32.mrb[104].mxu1  ;;  %12924 = vmax.xlane.f32.xlu0 %v12923_v46  ;;  %v12358_v3 = vpop.f32.mrb[90].mxu0 }
0x1ba7   : > { %v17482_v49 = vpop.f32.mrb[91].mxu0  ;;  %v17487_v23 = vpop.f32.mrb[105].mxu1  ;;  %v12926_v5 = vsel %vm1688_vm3, %v23739_v19, -inf }
0x1ba8   : > { %12927 = vmax.xlane.f32.xlu1 %v12926_v5  ;;  %v12408_v1 = vpop.f32.mrb[106].mxu1 }
0x1ba9   : > { %v17488_v42 = vpop.f32.mrb[107].mxu1 }
0x1bac   : > { %v23743_v16 = vpop.f32.mrb[92].mxu0 }
0x1bad   : > { %v17493_v48 = vpop.f32.mrb[93].mxu0  ;;  %v12929_v41 = vsel %vm1688_vm3, %v23743_v16, -inf }
0x1bae   : > { %v23747_v50 = vpop.f32.mrb[108].mxu1  ;;  %12930 = vmax.xlane.f32.xlu0 %v12929_v41  ;;  %v12458_v15 = vpop.f32.mrb[94].mxu0 }
0x1baf   : > { %v17494_v10 = vpop.f32.mrb[95].mxu0  ;;  %v17499_v34 = vpop.f32.mrb[109].mxu1  ;;  %v12932_v43 = vsel %vm1688_vm3, %v23747_v50, -inf }
0x1bb0   : > { %12933 = vmax.xlane.f32.xlu1 %v12932_v43  ;;  %v12508_v61 = vpop.f32.mrb[110].mxu1 }
0x1bb1   : > { %v17500_v36 = vpop.f32.mrb[111].mxu1 }
0x1bb4   : > { %v23751_v38 = vpop.f32.mrb[96].mxu0 }
0x1bb5   : > { %v17505_v37 = vpop.f32.mrb[97].mxu0  ;;  %v12935_v33 = vsel %vm1688_vm3, %v23751_v38, -inf }
0x1bb6   : > { %v23755_v29 = vpop.f32.mrb[112].mxu1  ;;  %12936 = vmax.xlane.f32.xlu0 %v12935_v33  ;;  %v12558_v28 = vpop.f32.mrb[98].mxu0 }
0x1bb7   : > { %v17506_v20 = vpop.f32.mrb[99].mxu0  ;;  %v17511_v6 = vpop.f32.mrb[113].mxu1  ;;  %v12938_v18 = vsel %vm1688_vm3, %v23755_v29, -inf }
0x1bb8   : > { %12939 = vmax.xlane.f32.xlu1 %v12938_v18  ;;  %v12608_v59 = vpop.f32.mrb[114].mxu1 }
0x1bb9   : > { %v17512_v46 = vpop.f32.mrb[115].mxu1 }
0x1bbc   : > { %v23759_v3 = vpop.f32.mrb[100].mxu0 }
0x1bbd   : > { %v17517_v49 = vpop.f32.mrb[101].mxu0  ;;  %v12941_v23 = vsel %vm1688_vm3, %v23759_v3, -inf }
0x1bbe   : > { %v23763_v5 = vpop.f32.mrb[116].mxu1  ;;  %12942 = vmax.xlane.f32.xlu0 %v12941_v23  ;;  %v12658_v1 = vpop.f32.mrb[102].mxu0 }
0x1bbf   : > { %v17518_v42 = vpop.f32.mrb[103].mxu0  ;;  %v17523_v48 = vpop.f32.mrb[117].mxu1  ;;  %v12944_v41 = vsel %vm1688_vm3, %v23763_v5, -inf }
0x1bc0   : > { %12945 = vmax.xlane.f32.xlu1 %v12944_v41  ;;  %v12708_v15 = vpop.f32.mrb[118].mxu1 }
0x1bc1   : > { %v17524_v10 = vpop.f32.mrb[119].mxu1 }
0x1bc4   : > { %v23767_v34 = vpop.f32.mrb[104].mxu0 }
0x1bc5   : > { %v17529_v43 = vpop.f32.mrb[105].mxu0  ;;  %v12947_v61 = vsel %vm1688_vm3, %v23767_v34, -inf }
0x1bc6   : > { %v23771_v36 = vpop.f32.mrb[120].mxu1  ;;  %12948 = vmax.xlane.f32.xlu0 %v12947_v61  ;;  %v12758_v37 = vpop.f32.mrb[106].mxu0 }
0x1bc7   : > { %v17530_v33 = vpop.f32.mrb[107].mxu0  ;;  %v17535_v28 = vpop.f32.mrb[121].mxu1  ;;  %v12950_v20 = vsel %vm1688_vm3, %v23771_v36, -inf }
0x1bc8   : > { %12951 = vmax.xlane.f32.xlu1 %v12950_v20  ;;  %v12808_v6 = vpop.f32.mrb[122].mxu1  ;;  %v23791_v43 = vpop.permute.xlu0 %13199 }
0x1bc9   : > { %v17536_v18 = vpop.f32.mrb[123].mxu1  ;;  %v23793_v61 = vpop.permute.xlu1 %13247 }
0x1bcc   : > { %v23775_v59 = vpop.f32.mrb[108].mxu0  ;;  %v23795_v37 = vpop.permute.xlu0 %13295 }
0x1bcd   : > { %v17541_v46 = vpop.f32.mrb[109].mxu0  ;;  %v12953_v49 = vsel %vm1688_vm3, %v23775_v59, -inf }
0x1bce   : > { %v23779_v23 = vpop.f32.mrb[124].mxu1  ;;  %12954 = vmax.xlane.f32.xlu0 %v12953_v49  ;;  %v12858_v1 = vpop.f32.mrb[110].mxu0 }
0x1bcf   : > { %v17542_v42 = vpop.f32.mrb[111].mxu0  ;;  %v17547_v48 = vpop.f32.mrb[125].mxu1  ;;  %v12956_v10 = vsel %vm1688_vm3, %v23779_v23, -inf }
0x1bd0   : > { %v12908_v41 = vpop.f32.mrb[126].mxu1  ;;  %v23799_v33 = vpop.permute.xlu0 %13391 }
0x1bd1   : > { %v17548_v15 = vpop.f32.mrb[127].mxu1 }
0x1bd9   : > { %13535 = vrot.lane.b32.xlu1 %v22107_v62, %s19094_s9  ;;  %v23797_v62 = vpop.permute.xlu1 %13343 }
0x1bdd   : > { %13583 = vrot.lane.b32.xlu1 %v22101_v44, %s19094_s9  ;;  %v23801_v44 = vpop.permute.xlu1 %13439 }
0x1be1   : > { %13631 = vrot.lane.b32.xlu1 %v22117_v14, %s19094_s9 }
0x1be4   : > { %13487 = vrot.lane.b32.xlu0 %v22091_v27, %s19094_s9 }
0x1c05   : > { %12957 = vmax.xlane.f32.xlu1 %v12956_v10 }
0x1c23   : > { %v12913_v14 = vpop.xlane.xlu0 %12912 }
0x1c24   : > { %v12959_v28 = vsub.f32 %v23719_v4, %v12913_v14 }
0x1c25   : > { %v12916_v27 = vpop.xlane.xlu1 %12915 }
0x1c26   : > { %v12975_v20 = vmul.f32 1.442695, %v12959_v28  ;;  %v12960_v6 = vsub.f32 %v23723_v31, %v12916_v27 }
0x1c28   : > { %18404 = vpow2.f32 %v12975_v20  ;;  %v12977_v18 = vmul.f32 1.442695, %v12960_v6 }
0x1c2a   : > { %18406 = vpow2.f32 %v12977_v18 }
0x1c2b   : > { %v12919_v46 = vpop.xlane.xlu0 %12918 }
0x1c2c   : > { %v12961_v49 = vsub.f32 %v23727_v51, %v12919_v46 }
0x1c2e   : > { %v12979_v1 = vmul.f32 1.442695, %v12961_v49 }
0x1c2f   : > { %v12922_v42 = vpop.xlane.xlu0 %12921 }
0x1c30   : > { %18408 = vpow2.f32 %v12979_v1  ;;  %v12962_v48 = vsub.f32 %v23731_v56, %v12922_v42 }
0x1c32   : > { %v23807_v41 = vpop.eup %18404  ;;  %v12981_v15 = vmul.f32 1.442695, %v12962_v48 }
0x1c33   : > { %v12925_v10 = vpop.xlane.xlu0 %12924  ;;  %v13007_v4 = vsel %vm1688_vm3, %v23807_v41, 0.0 }
0x1c34   : > { %v23811_v14 = vpop.eup %18406  ;;  %18410 = vpow2.f32 %v12981_v15  ;;  %v12963_v31 = vsub.f32 %v23735_v55, %v12925_v10  ;;  %13008 = vadd.xlane.f32.xlu0 %v13007_v4 }
0x1c35   : > { %v12928_v28 = vpop.xlane.xlu1 %12927  ;;  %v13010_v51 = vsel %vm1688_vm3, %v23811_v14, 0.0 }
0x1c36   : > { %v12983_v27 = vmul.f32 1.442695, %v12963_v31  ;;  %v12964_v56 = vsub.f32 %v23739_v19, %v12928_v28  ;;  %13011 = vadd.xlane.f32.xlu1 %v13010_v51 }
0x1c38   : > { %18412 = vpow2.f32 %v12983_v27  ;;  %v12985_v20 = vmul.f32 1.442695, %v12964_v56 }
0x1c3a   : > { %v23817_v6 = vpop.eup %18408  ;;  %18414 = vpow2.f32 %v12985_v20 }
0x1c3b   : > { %v12931_v18 = vpop.xlane.xlu0 %12930  ;;  %v13013_v46 = vsel %vm1688_vm3, %v23817_v6, 0.0 }
0x1c3c   : > { %v12965_v55 = vsub.f32 %v23743_v16, %v12931_v18  ;;  %13014 = vadd.xlane.f32.xlu0 %v13013_v46 }
0x1c3d   : > { %v12934_v49 = vpop.xlane.xlu1 %12933 }
0x1c3e   : > { %v23822_v1 = vpop.eup %18410  ;;  %v12987_v42 = vmul.f32 1.442695, %v12965_v55  ;;  %v12966_v48 = vsub.f32 %v23747_v50, %v12934_v49 }
0x1c3f   : > { %v13016_v19 = vsel %vm1688_vm3, %v23822_v1, 0.0 }
0x1c40   : > { %18416 = vpow2.f32 %v12987_v42  ;;  %v12989_v15 = vmul.f32 1.442695, %v12966_v48  ;;  %13017 = vadd.xlane.f32.xlu1 %v13016_v19 }
0x1c42   : > { %v23827_v10 = vpop.eup %18412  ;;  %18418 = vpow2.f32 %v12989_v15 }
0x1c43   : > { %v12937_v4 = vpop.xlane.xlu0 %12936  ;;  %v13019_v16 = vsel %vm1688_vm3, %v23827_v10, 0.0 }
0x1c44   : > { %v23831_v31 = vpop.eup %18414  ;;  %v12967_v28 = vsub.f32 %v23751_v38, %v12937_v4  ;;  %13020 = vadd.xlane.f32.xlu0 %v13019_v16 }
0x1c45   : > { %v12940_v51 = vpop.xlane.xlu1 %12939  ;;  %v13022_v50 = vsel %vm1688_vm3, %v23831_v31, 0.0 }
0x1c46   : > { %v12991_v27 = vmul.f32 1.442695, %v12967_v28  ;;  %v12968_v56 = vsub.f32 %v23755_v29, %v12940_v51  ;;  %13023 = vadd.xlane.f32.xlu1 %v13022_v50 }
0x1c48   : > { %18420 = vpow2.f32 %v12991_v27  ;;  %v12993_v20 = vmul.f32 1.442695, %v12968_v56 }
0x1c4a   : > { %v23837_v18 = vpop.eup %18416  ;;  %18422 = vpow2.f32 %v12993_v20 }
0x1c4b   : > { %v12943_v46 = vpop.xlane.xlu0 %12942  ;;  %v13025_v55 = vsel %vm1688_vm3, %v23837_v18, 0.0 }
0x1c4c   : > { %v23841_v49 = vpop.eup %18418  ;;  %v12969_v38 = vsub.f32 %v23759_v3, %v12943_v46  ;;  %13026 = vadd.xlane.f32.xlu0 %v13025_v55 }
0x1c4d   : > { %v12946_v42 = vpop.xlane.xlu1 %12945  ;;  %v13028_v48 = vsel %vm1688_vm3, %v23841_v49, 0.0 }
0x1c4e   : > { %v12995_v29 = vmul.f32 1.442695, %v12969_v38  ;;  %v12970_v19 = vsub.f32 %v23763_v5, %v12946_v42  ;;  %13029 = vadd.xlane.f32.xlu1 %v13028_v48 }
0x1c50   : > { %18424 = vpow2.f32 %v12995_v29  ;;  %v12997_v15 = vmul.f32 1.442695, %v12970_v19 }
0x1c52   : > { %v23847_v4 = vpop.eup %18420  ;;  %18426 = vpow2.f32 %v12997_v15 }
0x1c53   : > { %v13031_v16 = vsel %vm1688_vm3, %v23847_v4, 0.0  ;;  %v12949_v56 = vpop.xlane.xlu0 %12948 }
0x1c54   : > { %v23851_v28 = vpop.eup %18422  ;;  %13032 = vadd.xlane.f32.xlu1 %v13031_v16  ;;  %v12971_v46 = vsub.f32 %v23767_v34, %v12949_v56 }
0x1c55   : > { %v13034_v3 = vsel %vm1688_vm3, %v23851_v28, 0.0  ;;  %v12952_v20 = vpop.xlane.xlu1 %12951 }
0x1c56   : > { %13035 = vadd.xlane.f32.xlu0 %v13034_v3  ;;  %v12972_v38 = vsub.f32 %v23771_v36, %v12952_v20  ;;  %v12999_v42 = vmul.f32 1.442695, %v12971_v46  ;;  %v15765_v46 = vmul.f32 -1.442695, %v22029_v47  ;;  %v15764_v47 = vmul.f32 -1.442695, %v22023_v39 }
0x1c58   : > { %v13001_v29 = vmul.f32 1.442695, %v12972_v38  ;;  %18428 = vpow2.f32 %v12999_v42 }
0x1c59   : > { %v23870_v19 = vpop.permute.xlu1 %13535 }
0x1c5a   : > { %v23855_v51 = vpop.eup %18424  ;;  %18430 = vpow2.f32 %v13001_v29 }
0x1c5b   : > { %v13037_v5 = vsel %vm1688_vm3, %v23855_v51, 0.0  ;;  %v12955_v55 = vpop.xlane.xlu0 %12954 }
0x1c5c   : > { %v23859_v50 = vpop.eup %18426  ;;  %13038 = vadd.xlane.f32.xlu1 %v13037_v5  ;;  %v12973_v48 = vsub.f32 %v23775_v59, %v12955_v55  ;;  %v15767_v55 = vmul.f32 -1.442695, %v22045_v26 }
0x1c5d   : > { %v13040_v27 = vsel %vm1688_vm3, %v23859_v50, 0.0 }
0x1c5e   : > { %13041 = vadd.xlane.f32.xlu0 %v13040_v27  ;;  %v13003_v15 = vmul.f32 1.442695, %v12973_v48 }
0x1c60   : > { %18432 = vpow2.f32 %v13003_v15  ;;  %v15766_v15 = vmul.f32 -1.442695, %v22031_v24 }
0x1c6d   : > { %13727 = vrot.lane.b32.xlu1 %v22139_v53, %s19094_s9  ;;  %v23872_v53 = vpop.permute.xlu1 %13583 }
0x1c71   : > { %v23876_v16 = vpop.permute.xlu1 %13631 }
0x1c74   : > { %13679 = vrot.lane.b32.xlu0 %v22123_v13, %s19094_s9  ;;  %v23874_v13 = vpop.eup %18428 }
0x1c75   : > { %v23878_v34 = vpop.eup %18430  ;;  %v13043_v36 = vsel %vm1688_vm3, %v23874_v13, 0.0 }
0x1c76   : > { %v23882_v3 = vpop.eup %18432  ;;  %v13046_v5 = vsel %vm1688_vm3, %v23878_v34, 0.0 }
0x1c77   : > { %v13049_v56 = vsel %vm1688_vm3, %v23882_v3, 0.0 }
0x1c91   : > { %13044 = vadd.xlane.f32.xlu1 %v13043_v36  ;;  %v15769_v36 = vmul.f32 -1.442695, %v22061_v30 }
0x1c92   : > { %v12958_v59 = vpop.xlane.xlu1 %12957 }
0x1c93   : > { %v12974_v27 = vsub.f32 %v23779_v23, %v12958_v59  ;;  %13047 = vadd.xlane.f32.xlu0 %v13046_v5  ;;  %v23912_v59 = vpop.permute.xlu0 %13487 }
0x1c95   : > { %v13005_v20 = vmul.f32 1.442695, %v12974_v27  ;;  %13050 = vadd.xlane.f32.xlu1 %v13049_v56 }
0x1c97   : > { %18434 = vpow2.f32 %v13005_v20  ;;  %v24916_v20 = vld [vmem:[#allocation89_spill] sm:$0xff] }
0x1c98   : > { %18436 = vpow2.f32 %v15765_v46 }
0x1c99   : > { %18438 = vpow2.f32 %v15767_v55 }
0x1ca1   : > { %v23891_v38 = vpop.eup %18434 }
0x1ca2   : > { %v13052_v42 = vsel %vm1688_vm3, %v23891_v38, 0.0  ;;  %v18437_v23 = vpop.eup %18436 }
0x1ca3   : > { %13053 = vadd.xlane.f32.xlu0 %v13052_v42  ;;  %v6767_v48 = vadd.f32 1.0, %v18437_v23  ;;  %v18439_v29 = vpop.eup %18438  ;;  %v24917_v23 = vld [vmem:[#allocation46_spill] sm:$0xff] }
0x1ca4   : > { %v6769_v26 = vadd.f32 1.0, %v18439_v29  ;;  %v24918_v29 = vld [vmem:[#allocation91_spill] sm:$0xff] }
0x1ca5   : > { %18440 = vrcp.f32 %v6767_v48  ;;  %v15768_v48 = vmul.f32 -1.442695, %v24917_v23  ;;  %v24922_v23 = vld [vmem:[#allocation88_spill] sm:$0xff] }
0x1ca6   : > { %13823 = vrot.lane.b32.xlu1 %v22147_v60, %s19094_s9  ;;  %18442 = vpow2.f32 %v15764_v47  ;;  %v24913_v60 = vld [vmem:[#allocation48_spill] sm:$0xff] }
0x1ca7   : > { %18444 = vrcp.f32 %v6769_v26  ;;  %v24919_v26 = vld [vmem:[#allocation47_spill] sm:$0xff] }
0x1ca8   : > { %18446 = vpow2.f32 %v15766_v15  ;;  %v15770_v15 = vmul.f32 -1.442695, %v24919_v26  ;;  %v13301_v26 = vsel %vm7827_vm6, %v23795_v37, 0 }
0x1ca9   : > { %18448 = vpow2.f32 %v15769_v36  ;;  %v24920_v36 = vld [vmem:[#allocation51_spill] sm:$0xff] }
0x1caa   : > { %13889 = vrot.lane.b32.xlu1 %v23213_v11, %s19095_s21  ;;  %v15771_v11 = vmul.f32 -1.442695, %v24913_v60  ;;  %v15773_v60 = vmul.f32 -1.442695, %v24920_v36 }
0x1cac   : > { %18450 = vpow2.f32 %v15771_v11 }
0x1cae   : > { %13893 = vrot.lane.b32.xlu1 %v23217_v7, %s19095_s21 }
0x1caf   : > { %v18441_v39 = vpop.eup %18440 }
0x1cb0   : > { %v18443_v7 = vpop.eup %18442 }
0x1cb1   : > { %v18445_v24 = vpop.eup %18444  ;;  %v6766_v30 = vadd.f32 1.0, %v18443_v7  ;;  %v24921_v7 = vld [vmem:[#allocation52_spill] sm:$0xff] }
0x1cb2   : > { %13953 = vrot.lane.b32.xlu1 %v23689_v0, %s19096_s26  ;;  %v24914_v0 = vld [vmem:[#allocation86_spill] sm:$0xff]  ;;  %v18447_v5 = vpop.eup %18446 }
0x1cb3   : > { %v18449_v27 = vpop.eup %18448  ;;  %18452 = vrcp.f32 %v6766_v30  ;;  %v6768_v56 = vadd.f32 1.0, %v18447_v5 }
0x1cb4   : > { %v6771_v46 = vadd.f32 1.0, %v18449_v27 }
0x1cb6   : > { %13957 = vrot.lane.b32.xlu1 %v23693_v63, %s19096_s26  ;;  %v24915_v63 = vld [vmem:[#allocation87_spill] sm:$0xff]  ;;  %v18451_v42 = vpop.eup %18450 }
0x1cb7   : > { %v6773_v47 = vadd.f32 1.0, %v18451_v42 }
0x1cb9   : > { %13775 = vrot.lane.b32.xlu0 %v22133_v2, %s19094_s9 }
0x1cba   : > { %14129 = vrot.lane.b32.xlu1 %v18441_v39, %s19097_s7 }
0x1cbd   : > { %13887 = vrot.lane.b32.xlu0 %v24914_v0, %s19095_s21 }
0x1cbe   : > { %14133 = vrot.lane.b32.xlu1 %v18445_v24, %s19097_s7  ;;  %v15775_v24 = vmul.f32 -1.442695, %v24921_v7 }
0x1cc1   : > { %13891 = vrot.lane.b32.xlu0 %v24915_v63, %s19095_s21  ;;  %v13009_v2 = vpop.xlane.xlu0 %13008 }
0x1cc2   : > { %18454 = vrcp.f32 %v13009_v2  ;;  %13897 = vrot.lane.b32.xlu1 %v24916_v20, %s19095_s21  ;;  %v13205_v2 = vsel %vm7827_vm6, %v23791_v43, 0 }
0x1cc3   : > { %v13012_v55 = vpop.xlane.xlu1 %13011 }
0x1cc4   : > { %18456 = vrcp.f32 %v13012_v55 }
0x1cc5   : > { %13951 = vrot.lane.b32.xlu0 %v23687_v45, %s19096_s26  ;;  %18458 = vrcp.f32 %v6768_v56  ;;  %v18453_v45 = vpop.eup %18452 }
0x1cc6   : > { %13901 = vrot.lane.b32.xlu1 %v24918_v29, %s19095_s21  ;;  %18460 = vrcp.f32 %v6771_v46 }
0x1cc7   : > { %18462 = vpow2.f32 %v15768_v48 }
0x1cc9   : > { %13955 = vrot.lane.b32.xlu0 %v23691_v25, %s19096_s26  ;;  %v13015_v11 = vpop.xlane.xlu0 %13014 }
0x1cca   : > { %18464 = vrcp.f32 %v13015_v11  ;;  %13961 = vrot.lane.b32.xlu1 %v23697_v12, %s19096_s26  ;;  %v24924_v11 = vld [vmem:[#allocation93_spill] sm:$0xff] }
0x1ccb   : > { %18466 = vrcp.f32 %v6773_v47 }
0x1ccc   : > { %v18455_v39 = vpop.eup %18454  ;;  %18468 = vpow2.f32 %v15770_v15  ;;  %v24923_v15 = vld [vmem:[#allocation90_spill] sm:$0xff] }
0x1ccd   : > { %18470 = vpow2.f32 %v15773_v60  ;;  %v13071_v30 = vmul.f32 %v18455_v39, %v23807_v41  ;;  %v13018_v0 = vpop.xlane.xlu1 %13017  ;;  %14127 = vrot.lane.b32.xlu0 %v18453_v45, %s19097_s7 }
0x1cce   : > { %v18457_v5 = vpop.eup %18456  ;;  %18472 = vrcp.f32 %v13018_v0  ;;  %13965 = vrot.lane.b32.xlu1 %v23701_v9, %s19096_s26  ;;  %v13253_v9 = vsel %vm7827_vm6, %v23793_v61, 0  ;;  %v13349_v0 = vsel %vm7827_vm6, %v23797_v62, 0  ;;  %v24927_v62 = vld [vmem:[#allocation50_spill] sm:$0xff] }
0x1ccf   : > { %v13087_v25 = vpack.c.bf16 %v13071_v30, %v13071_v30  ;;  %v13072_v12 = vmul.f32 %v18457_v5, %v23811_v14  ;;  %v18459_v27 = vpop.eup %18458  ;;  %18474 = vpow2.f32 %v15775_v24 }
0x1cd0   : > { %v18461_v63 = vpop.eup %18460 }
0x1cd1   : > { %v13088_v56 = vpack.c.bf16 %v13072_v12, %v13072_v12  ;;  %14131 = vrot.lane.b32.xlu0 %v18459_v27, %s19097_s7  ;;  %17552 = vmatmul.mubr.msk.bf16.vlgmr.msra.gmra.mrb[112].mxu0 %vm1688_vm3, %v13087_v25  ;;  %v13021_v41 = vpop.xlane.xlu0 %13020  ;;  %v18463_v20 = vpop.eup %18462  ;;  %v24926_v12 = vld [vmem:[#allocation95_spill] sm:$0xff] }
0x1cd2   : > { %17562 = vmatpush3.bf16.msra.mxu0 %v13205_v2  ;;  %18476 = vrcp.f32 %v13021_v41  ;;  %14137 = vrot.lane.b32.xlu1 %v18461_v63, %s19097_s7  ;;  %v6770_v55 = vadd.f32 1.0, %v18463_v20  ;;  %v24928_v41 = vld [vmem:[#allocation55_spill] sm:$0xff] }
0x1cd3   : > { %17558 = vmatmul.mubr.msk.bf16.vlgmr.msra.gmra.mrb[128].mxu1 %vm1688_vm3, %v13088_v56  ;;  %v13024_v14 = vpop.xlane.xlu1 %13023  ;;  %17563 = vmatprep.mubr.msk.bf16.mxu0 %vm19083_vm2, %v24800_v57  ;;  %v15777_v20 = vmul.f32 -1.442695, %v24928_v41 }
0x1cd4   : > { %v18465_v43 = vpop.eup %18464  ;;  %17568 = vmatpush3.bf16.msra.mxu1 %v13253_v9  ;;  %18478 = vrcp.f32 %v13024_v14  ;;  %17573 = vmatprep.subr.bf16.mxu0 %v24800_v57 }
0x1cd5   : > { %v18467_v46 = vpop.eup %18466  ;;  %v13073_v42 = vmul.f32 %v18465_v43, %v23817_v6  ;;  %13895 = vrot.lane.b32.xlu0 %v24922_v23, %s19095_s21  ;;  %17569 = vmatprep.mubr.msk.bf16.mxu1 %vm19083_vm2, %v24800_v57  ;;  %18480 = vrcp.f32 %v6770_v55 }
0x1cd6   : > { %v18469_v61 = vpop.eup %18468  ;;  %14141 = vrot.lane.b32.xlu1 %v18467_v46, %s19097_s7  ;;  %17579 = vmatprep.subr.bf16.mxu1 %v24800_v57 }
0x1cd7   : > { %v18471_v48 = vpop.eup %18470  ;;  %v13089_v29 = vpack.c.bf16 %v13073_v42, %v13073_v42  ;;  %v6772_v60 = vadd.f32 1.0, %v18469_v61  ;;  %v13493_v42 = vsel %vm7827_vm6, %v23912_v59, 0 }
0x1cd8   : > { %v18473_v47 = vpop.eup %18472  ;;  %v6775_v39 = vadd.f32 1.0, %v18471_v48 }
0x1cd9   : > { %v13074_v6 = vmul.f32 %v18473_v47, %v23822_v1  ;;  %13899 = vrot.lane.b32.xlu0 %v24923_v15, %s19095_s21  ;;  %17564 = vmatmul.mubr.msk.bf16.vlgmr.msra.gmra.mrb[116].mxu0 %vm1688_vm3, %v13089_v29  ;;  %v13027_v36 = vpop.xlane.xlu0 %13026  ;;  %v18475_v45 = vpop.eup %18474  ;;  %v24925_v1 = vld [vmem:[#allocation49_spill] sm:$0xff]  ;;  %v13541_v29 = vsel %vm7827_vm6, %v23870_v19, 0  ;;  %v13589_v19 = vsel %vm7827_vm6, %v23872_v53, 0 }
0x1cda   : > { %17574 = vmatpush3.bf16.msra.mxu0 %v13301_v26  ;;  %18482 = vrcp.f32 %v13027_v36  ;;  %13905 = vrot.lane.b32.xlu1 %v24924_v11, %s19095_s21  ;;  %v15772_v30 = vmul.f32 -1.442695, %v24925_v1  ;;  %v6777_v27 = vadd.f32 1.0, %v18475_v45  ;;  %v24929_v26 = vld [vmem:[#allocation92_spill] sm:$0xff]  ;;  %v24930_v45 = vld [vmem:[#allocation94_spill] sm:$0xff]  ;;  %v24932_v53 = vld [vmem:[#allocation53_spill] sm:$0xff] }
0x1cdb   : > { %v13090_v7 = vpack.c.bf16 %v13074_v6, %v13074_v6  ;;  %v13030_v24 = vpop.xlane.xlu1 %13029  ;;  %17575 = vmatprep.mubr.msk.bf16.mxu0 %vm19083_vm2, %v24800_v57  ;;  %17585 = vmatprep.subr.bf16.mxu0 %v24800_v57  ;;  %v15776_v1 = vmul.f32 -1.442695, %v24932_v53 }
0x1cdc   : > { %v18477_v37 = vpop.eup %18476  ;;  %18484 = vrcp.f32 %v13030_v24 }
0x1cdd   : > { %v13075_v5 = vmul.f32 %v18477_v37, %v23827_v10  ;;  %17570 = vmatmul.mubr.msk.bf16.vlgmr.msra.gmra.mrb[132].mxu1 %vm1688_vm3, %v13090_v7  ;;  %13959 = vrot.lane.b32.xlu0 %v23695_v32, %s19096_s26  ;;  %18486 = vrcp.f32 %v6772_v60  ;;  %v15774_v10 = vmul.f32 -1.442695, %v24927_v62  ;;  %v13397_v32 = vsel %vm7827_vm6, %v23799_v33, 0  ;;  %v24931_v7 = vld [vmem:[#allocation97_spill] sm:$0xff] }
0x1cde   : > { %v18479_v25 = vpop.eup %18478  ;;  %17580 = vmatpush3.bf16.msra.mxu1 %v13349_v0  ;;  %13909 = vrot.lane.b32.xlu1 %v24926_v12, %s19095_s21  ;;  %18488 = vrcp.f32 %v6775_v39  ;;  %v13445_v33 = vsel %vm7827_vm6, %v23801_v44, 0  ;;  %v24933_v12 = vld [vmem:[#allocation99_spill] sm:$0xff] }
0x1cdf   : > { %v13091_v63 = vpack.c.bf16 %v13075_v5, %v13075_v5  ;;  %v13076_v2 = vmul.f32 %v18479_v25, %v23831_v31  ;;  %17581 = vmatprep.mubr.msk.bf16.mxu1 %vm19083_vm2, %v24800_v57  ;;  %17591 = vmatprep.subr.bf16.mxu1 %v24800_v57  ;;  %18490 = vpow2.f32 %v15772_v30  ;;  %v18481_v31 = vpop.eup %18480  ;;  %v13637_v30 = vsel %vm7827_vm6, %v23876_v16, 0 }
0x1ce1   : > { %13963 = vrot.lane.b32.xlu0 %v23699_v17, %s19096_s26  ;;  %v13033_v56 = vpop.xlane.xlu1 %13032  ;;  %17576 = vmatmul.mubr.msk.bf16.vlgmr.msra.gmra.mrb[120].mxu0 %vm1688_vm3, %v13091_v63  ;;  %v13092_v9 = vpack.c.bf16 %v13076_v2, %v13076_v2 }
0x1ce2   : > { %18492 = vrcp.f32 %v13033_v56  ;;  %17586 = vmatpush3.bf16.msra.mxu0 %v13397_v32  ;;  %13969 = vrot.lane.b32.xlu1 %v23705_v40, %s19096_s26  ;;  %v24935_v56 = vld [vmem:[#allocation98_spill] sm:$0xff] }
0x1ce3   : > { %18494 = vrcp.f32 %v6777_v27  ;;  %v13036_v14 = vpop.xlane.xlu0 %13035  ;;  %17587 = vmatprep.mubr.msk.bf16.mxu0 %vm19083_vm2, %v24800_v57  ;;  %17597 = vmatprep.subr.bf16.mxu0 %v24800_v57 }
0x1ce4   : > { %v18483_v17 = vpop.eup %18482  ;;  %18496 = vrcp.f32 %v13036_v14 }
0x1ce5   : > { %18498 = vpow2.f32 %v15774_v10  ;;  %v13077_v43 = vmul.f32 %v18483_v17, %v23837_v18  ;;  %17582 = vmatmul.mubr.msk.bf16.vlgmr.msra.gmra.mrb[136].mxu1 %vm1688_vm3, %v13092_v9  ;;  %14135 = vrot.lane.b32.xlu0 %v18481_v31, %s19097_s7  ;;  %v24934_v10 = vld [vmem:[#allocation96_spill] sm:$0xff] }
0x1ce6   : > { %v18485_v40 = vpop.eup %18484  ;;  %18500 = vpow2.f32 %v15777_v20  ;;  %17592 = vmatpush3.bf16.msra.mxu1 %v13445_v33  ;;  %13973 = vrot.lane.b32.xlu1 %v23709_v52, %s19096_s26 }
0x1ce7   : > { %v13093_v46 = vpack.c.bf16 %v13077_v43, %v13077_v43  ;;  %v13078_v55 = vmul.f32 %v18485_v40, %v23841_v49  ;;  %17593 = vmatprep.mubr.msk.bf16.mxu1 %vm19083_vm2, %v24800_v57  ;;  %17603 = vmatprep.subr.bf16.mxu1 %v24800_v57  ;;  %v18487_v44 = vpop.eup %18486  ;;  %v24936_v40 = vld [vmem:[#allocation56_spill] sm:$0xff] }
0x1ce8   : > { %v18489_v18 = vpop.eup %18488 }
0x1ce9   : > { %14139 = vrot.lane.b32.xlu0 %v18487_v44, %s19097_s7  ;;  %v13039_v23 = vpop.xlane.xlu1 %13038  ;;  %17588 = vmatmul.mubr.msk.bf16.vlgmr.msra.gmra.mrb[124].mxu0 %vm1688_vm3, %v13093_v46  ;;  %v18491_v52 = vpop.eup %18490  ;;  %v13094_v49 = vpack.c.bf16 %v13078_v55, %v13078_v55 }
0x1cea   : > { %18502 = vrcp.f32 %v13039_v23  ;;  %17598 = vmatpush3.bf16.msra.mxu0 %v13493_v42  ;;  %14145 = vrot.lane.b32.xlu1 %v18489_v18, %s19097_s7  ;;  %v6774_v15 = vadd.f32 1.0, %v18491_v52  ;;  %v24937_v18 = vld [vmem:[#allocation60_spill] sm:$0xff] }
0x1ceb   : > { %v13042_v61 = vpop.xlane.xlu0 %13041  ;;  %17599 = vmatprep.mubr.msk.bf16.mxu0 %vm19083_vm2, %v24800_v57  ;;  %17609 = vmatprep.subr.bf16.mxu0 %v24800_v57 }
0x1cec   : > { %v18493_v48 = vpop.eup %18492  ;;  %18504 = vrcp.f32 %v13042_v61 }
0x1ced   : > { %v18495_v59 = vpop.eup %18494  ;;  %v13079_v47 = vmul.f32 %v18493_v48, %v23847_v4  ;;  %17594 = vmatmul.mubr.msk.bf16.vlgmr.msra.gmra.mrb[140].mxu1 %vm1688_vm3, %v13094_v49  ;;  %13903 = vrot.lane.b32.xlu0 %v24929_v26, %s19095_s21  ;;  %18506 = vrcp.f32 %v6774_v15  ;;  %v24938_v15 = vld [vmem:[#allocation59_spill] sm:$0xff] }
0x1cee   : > { %v18497_v6 = vpop.eup %18496  ;;  %17604 = vmatpush3.bf16.msra.mxu1 %v13541_v29  ;;  %14149 = vrot.lane.b32.xlu1 %v18495_v59, %s19097_s7 }
0x1cef   : > { %v18499_v36 = vpop.eup %18498  ;;  %v13095_v60 = vpack.c.bf16 %v13079_v47, %v13079_v47  ;;  %v13080_v11 = vmul.f32 %v18497_v6, %v23851_v28  ;;  %17605 = vmatprep.mubr.msk.bf16.mxu1 %vm19083_vm2, %v24800_v57  ;;  %17615 = vmatprep.subr.bf16.mxu1 %v24800_v57  ;;  %v13680_v25 = vpop.permute.xlu0 %13679 }
0x1cf0   : > { %v18501_v4 = vpop.eup %18500  ;;  %v6776_v39 = vadd.f32 1.0, %v18499_v36 }
0x1cf1   : > { %13907 = vrot.lane.b32.xlu0 %v24930_v45, %s19095_s21  ;;  %17600 = vmatmul.mubr.msk.bf16.vlgmr.msra.gmra.mrb[128].mxu0 %vm1688_vm3, %v13095_v60  ;;  %v6779_v28 = vadd.f32 1.0, %v18501_v4  ;;  %v13096_v24 = vpack.c.bf16 %v13080_v11, %v13080_v11  ;;  %v24939_v4 = vld [vmem:[#allocation57_spill] sm:$0xff] }
0x1cf2   : > { %17610 = vmatpush3.bf16.msra.mxu0 %v13589_v19  ;;  %13913 = vrot.lane.b32.xlu1 %v24931_v7, %s19095_s21  ;;  %18508 = vrcp.f32 %v6776_v39 }
0x1cf3   : > { %17611 = vmatprep.mubr.msk.bf16.mxu0 %vm19083_vm2, %v24800_v57  ;;  %17621 = vmatprep.subr.bf16.mxu0 %v24800_v57  ;;  %18510 = vrcp.f32 %v6779_v28 }
0x1cf4   : > { %v18503_v37 = vpop.eup %18502  ;;  %18512 = vpow2.f32 %v15776_v1 }
0x1cf5   : > { %v13081_v0 = vmul.f32 %v18503_v37, %v23855_v51  ;;  %13967 = vrot.lane.b32.xlu0 %v23703_v22, %s19096_s26  ;;  %17606 = vmatmul.mubr.msk.bf16.vlgmr.msra.gmra.mrb[144].mxu1 %vm1688_vm3, %v13096_v24  ;;  %v13685_v22 = vsel %vm7827_vm6, %v13680_v25, 0  ;;  %v13728_v51 = vpop.permute.xlu1 %13727  ;;  %v24940_v37 = vld [vmem:[#allocation75_spill] sm:$0xff] }
0x1cf6   : > { %v18505_v5 = vpop.eup %18504  ;;  %17616 = vmatpush3.bf16.msra.mxu1 %v13637_v30  ;;  %13917 = vrot.lane.b32.xlu1 %v24933_v12, %s19095_s21  ;;  %v13733_v2 = vsel %vm7827_vm6, %v13728_v51, 0 }
0x1cf7   : > { %v13097_v27 = vpack.c.bf16 %v13081_v0, %v13081_v0  ;;  %v13082_v63 = vmul.f32 %v18505_v5, %v23859_v50  ;;  %17617 = vmatprep.mubr.msk.bf16.mxu1 %vm19083_vm2, %v24800_v57  ;;  %17627 = vmatprep.subr.bf16.mxu1 %v24800_v57  ;;  %v18507_v50 = vpop.eup %18506  ;;  %v24941_v0 = vld [vmem:[#allocation77_spill] sm:$0xff] }
0x1cf9   : > { %13971 = vrot.lane.b32.xlu0 %v23707_v54, %s19096_s26  ;;  %17612 = vmatmul.mubr.msk.bf16.vlgmr.msra.gmra.mrb[132].mxu0 %vm1688_vm3, %v13097_v27  ;;  %v13098_v16 = vpack.c.bf16 %v13082_v63, %v13082_v63 }
0x1cfa   : > { %17622 = vmatpush3.bf16.msra.mxu0 %v13685_v22  ;;  %13977 = vrot.lane.b32.xlu1 %v23713_v8, %s19096_s26 }
0x1cfb   : > { %17623 = vmatprep.mubr.msk.bf16.mxu0 %vm19083_vm2, %v24800_v57  ;;  %17633 = vmatprep.subr.bf16.mxu0 %v24800_v57 }
0x1cfc   : > { %v18509_v54 = vpop.eup %18508 }
0x1cfd   : > { %14143 = vrot.lane.b32.xlu0 %v18507_v50, %s19097_s7  ;;  %17618 = vmatmul.mubr.msk.bf16.vlgmr.msra.gmra.mrb[148].mxu1 %vm1688_vm3, %v13098_v16  ;;  %v18511_v8 = vpop.eup %18510  ;;  %v24942_v50 = vld [vmem:[#allocation61_spill] sm:$0xff] }
0x1cfe   : > { %17628 = vmatpush3.bf16.msra.mxu1 %v13733_v2  ;;  %13981 = vrot.lane.b32.xlu1 %v23717_v35, %s19096_s26  ;;  %v18513_v62 = vpop.eup %18512 }
0x1cff   : > { %17629 = vmatprep.mubr.msk.bf16.mxu1 %vm19083_vm2, %v24800_v57  ;;  %17639 = vmatprep.subr.bf16.mxu1 %v24800_v57  ;;  %v6778_v32 = vadd.f32 1.0, %v18513_v62  ;;  %v24943_v62 = vld [vmem:[#allocation76_spill] sm:$0xff] }
0x1d01   : > { %14147 = vrot.lane.b32.xlu0 %v18509_v54, %s19097_s7  ;;  %18514 = vrcp.f32 %v6778_v32 }
0x1d02   : > { %14153 = vrot.lane.b32.xlu1 %v18511_v8, %s19097_s7 }
0x1d05   : > { %13911 = vrot.lane.b32.xlu0 %v24934_v10, %s19095_s21 }
0x1d09   : > { %13915 = vrot.lane.b32.xlu0 %v24935_v56, %s19095_s21 }
0x1d0b   : > { %v18515_v35 = vpop.eup %18514 }
0x1d0d   : > { %13975 = vrot.lane.b32.xlu0 %v23711_v21, %s19096_s26 }
0x1d11   : > { %13979 = vrot.lane.b32.xlu0 %v23715_v58, %s19096_s26 }
0x1d15   : > { %14151 = vrot.lane.b32.xlu0 %v18515_v35, %s19097_s7 }
0x1d1e   : > { %v13045_v41 = vpop.xlane.xlu1 %13044 }
0x1d1f   : > { %18516 = vrcp.f32 %v13045_v41 }
0x1d20   : > { %v13048_v20 = vpop.xlane.xlu0 %13047 }
0x1d21   : > { %18518 = vrcp.f32 %v13048_v20  ;;  %v24944_v20 = vld [vmem:[#allocation79_spill] sm:$0xff] }
0x1d22   : > { %v13051_v31 = vpop.xlane.xlu1 %13050 }
0x1d23   : > { %18520 = vrcp.f32 %v13051_v31 }
0x1d26   : > { %v13824_v9 = vpop.permute.xlu1 %13823 }
0x1d29   : > { %v18517_v14 = vpop.eup %18516 }
0x1d2a   : > { %v13083_v17 = vmul.f32 %v18517_v14, %v23874_v13  ;;  %v13890_v33 = vpop.permute.xlu1 %13889  ;;  %v13829_v13 = vsel %vm7827_vm6, %v13824_v9, 0 }
0x1d2b   : > { %v18519_v43 = vpop.eup %18518  ;;  %v14064_v21 = vsel %vm1688_vm3, %v24936_v40, %v13890_v33  ;;  %v24945_v33 = vld [vmem:[#allocation81_spill] sm:$0xff] }
0x1d2c   : > { %v13099_v46 = vpack.c.bf16 %v13083_v17, %v13083_v17  ;;  %v13084_v58 = vmul.f32 %v18519_v43, %v23878_v34 }
0x1d2d   : > { %v18521_v23 = vpop.eup %18520 }
0x1d2e   : > { %v13100_v55 = vpack.c.bf16 %v13084_v58, %v13084_v58  ;;  %v13894_v44 = vpop.permute.xlu1 %13893  ;;  %17624 = vmatmul.mubr.msk.bf16.vlgmr.msra.gmra.mrb[136].mxu0 %vm1688_vm3, %v13099_v46  ;;  %v13085_v49 = vmul.f32 %v18521_v23, %v23882_v3 }
0x1d2f   : > { %v14066_v42 = vsel %vm1688_vm3, %v24937_v18, %v13894_v44  ;;  %17635 = vmatprep.mubr.msk.bf16.mxu0 %vm19083_vm2, %v24800_v57 }
0x1d30   : > { %17630 = vmatmul.mubr.msk.bf16.vlgmr.msra.gmra.mrb[152].mxu1 %vm1688_vm3, %v13100_v55  ;;  %v13054_v52 = vpop.xlane.xlu0 %13053  ;;  %v13101_v47 = vpack.c.bf16 %v13085_v49, %v13085_v49 }
0x1d31   : > { %17640 = vmatpush3.bf16.msra.mxu1 %v13829_v13  ;;  %18522 = vrcp.f32 %v13054_v52  ;;  %17641 = vmatprep.mubr.msk.bf16.mxu1 %vm19083_vm2, %v24800_v57 }
0x1d32   : > { %v13954_v34 = vpop.permute.xlu1 %13953 }
0x1d33   : > { %v24088_v61 = vsel %vm2086_vm4, %v14064_v21, %v13954_v34  ;;  %v24947_v34 = vld [vmem:[#allocation80_spill] sm:$0xff] }
0x1d34   : > { %v13776_v48 = vpop.permute.xlu0 %13775 }
0x1d35   : > { %v13781_v59 = vsel %vm7827_vm6, %v13776_v48, 0 }
0x1d36   : > { %v13958_v29 = vpop.permute.xlu1 %13957  ;;  %17634 = vmatpush3.bf16.msra.mxu0 %v13781_v59 }
0x1d37   : > { %v24092_v26 = vsel %vm2086_vm4, %v14066_v42, %v13958_v29  ;;  %v24946_v42 = vld [vmem:[#allocation78_spill] sm:$0xff] }
0x1d38   : > { %v13888_v6 = vpop.permute.xlu0 %13887 }
0x1d39   : > { %v14063_v36 = vsel %vm1688_vm3, %v24938_v15, %v13888_v6  ;;  %17636 = vmatmul.mubr.msk.bf16.vlgmr.msra.gmra.mrb[140].mxu0 %vm1688_vm3, %v13101_v47  ;;  %v24948_v6 = vld [vmem:[#allocation83_spill] sm:$0xff] }
0x1d3a   : > { %v24097_v57 = vpop.permute.xlu1 %14129 }
0x1d3b   : > { %v18523_v3 = vpop.eup %18522 }
0x1d3c   : > { %v13086_v60 = vmul.f32 %v18523_v3, %v23891_v38  ;;  %v13892_v11 = vpop.permute.xlu0 %13891 }
0x1d3d   : > { %v14065_v19 = vsel %vm1688_vm3, %v24939_v4, %v13892_v11  ;;  %v24949_v11 = vld [vmem:[#allocation85_spill] sm:$0xff] }
0x1d3e   : > { %v13102_v45 = vpack.c.bf16 %v13086_v60, %v13086_v60  ;;  %v24102_v39 = vpop.permute.xlu1 %14133 }
0x1d40   : > { %17642 = vmatmul.mubr.msk.bf16.vlgmr.msra.gmra.mrb[156].mxu1 %vm1688_vm3, %v13102_v45  ;;  %v13952_v7 = vpop.permute.xlu0 %13951 }
0x1d41   : > { %v24106_v28 = vsel %vm2086_vm4, %v14063_v36, %v13952_v7 }
0x1d42   : > { %v13898_v24 = vpop.permute.xlu1 %13897 }
0x1d43   : > { %v14068_v53 = vsel %vm1688_vm3, %v24940_v37, %v13898_v24 }
0x1d44   : > { %v13956_v1 = vpop.permute.xlu0 %13955 }
0x1d45   : > { %v24111_v38 = vsel %vm2086_vm4, %v14065_v19, %v13956_v1 }
0x1d46   : > { %v13902_v30 = vpop.permute.xlu1 %13901 }
0x1d47   : > { %v14070_v5 = vsel %vm1688_vm3, %v24941_v0, %v13902_v30  ;;  %v24950_v30 = vld [vmem:[#allocation82_spill] sm:$0xff] }
0x1d48   : > { %v24115_v25 = vpop.permute.xlu0 %14127 }
0x1d4a   : > { %v13962_v12 = vpop.permute.xlu1 %13961 }
0x1d4b   : > { %v24118_v27 = vsel %vm2086_vm4, %v14068_v53, %v13962_v12  ;;  %v24951_v12 = vld [vmem:[#allocation84_spill] sm:$0xff] }
0x1d4c   : > { %v24120_v63 = vpop.permute.xlu0 %14131 }
0x1d4e   : > { %v13966_v22 = vpop.permute.xlu1 %13965 }
0x1d4f   : > { %v24123_v51 = vsel %vm2086_vm4, %v14070_v5, %v13966_v22 }
0x1d50   : > { %v13896_v16 = vpop.permute.xlu0 %13895 }
0x1d51   : > { %v14067_v2 = vsel %vm1688_vm3, %v24942_v50, %v13896_v16 }
0x1d52   : > { %v24127_v54 = vpop.permute.xlu1 %14137 }
0x1d54   : > { %v13900_v8 = vpop.permute.xlu0 %13899 }
0x1d55   : > { %v14069_v10 = vsel %vm1688_vm3, %v24943_v62, %v13900_v8  ;;  %v17816_v62 = vld [vmem:[%s24952_s2] sm:$0xff]  }
0x1d56   : > { %v24131_v32 = vpop.permute.xlu1 %14141  ;;  %17645 = vmatprep.subr.bf16.mxu0 %v17816_v62 }
0x1d57   : > { %17646 = vmatpush3.bf16.msra.mxu0 %v17816_v62 }
0x1d58   : > { %v13960_v56 = vpop.permute.xlu0 %13959 }
0x1d59   : > { %v24134_v35 = vsel %vm2086_vm4, %v14067_v2, %v13960_v56 }
0x1d5a   : > { %v13906_v41 = vpop.permute.xlu1 %13905 }
0x1d5b   : > { %v14072_v31 = vsel %vm1688_vm3, %v24944_v20, %v13906_v41 }
0x1d5c   : > { %v13964_v9 = vpop.permute.xlu0 %13963 }
0x1d5d   : > { %v24139_v14 = vsel %vm2086_vm4, %v14069_v10, %v13964_v9 }
0x1d5e   : > { %v13910_v17 = vpop.permute.xlu1 %13909 }
0x1d5f   : > { %v14074_v43 = vsel %vm1688_vm3, %v24945_v33, %v13910_v17  ;;  %v17817_v17 = vld [vmem:[%s24953_s3 + $0x8] sm:$0xff]  }
0x1d60   : > { %v24143_v40 = vpop.permute.xlu0 %14135  ;;  %17647 = vmatprep.subr.bf16.mxu0 %v17817_v17 }
0x1d61   : > { %17648 = vmatpush3.bf16.msra.mxu0 %v17817_v17 }
0x1d62   : > { %v13970_v21 = vpop.permute.xlu1 %13969 }
0x1d63   : > { %v24146_v46 = vsel %vm2086_vm4, %v14072_v31, %v13970_v21 }
0x1d64   : > { %v24148_v58 = vpop.permute.xlu0 %14139 }
0x1d66   : > { %v13974_v55 = vpop.permute.xlu1 %13973 }
0x1d67   : > { %v24151_v44 = vsel %vm2086_vm4, %v14074_v43, %v13974_v55 }
0x1d68   : > { %v13904_v18 = vpop.permute.xlu0 %13903 }
0x1d69   : > { %v14071_v23 = vsel %vm1688_vm3, %v24946_v42, %v13904_v18 }
0x1d6a   : > { %v24155_v13 = vpop.permute.xlu1 %14145 }
0x1d6c   : > { %v13908_v52 = vpop.permute.xlu0 %13907 }
0x1d6d   : > { %v14073_v49 = vsel %vm1688_vm3, %v24947_v34, %v13908_v52 }
0x1d6e   : > { %v24159_v48 = vpop.permute.xlu1 %14149 }
0x1d70   : > { %v13968_v59 = vpop.permute.xlu0 %13967 }
0x1d71   : > { %v24162_v29 = vsel %vm2086_vm4, %v14071_v23, %v13968_v59 }
0x1d72   : > { %v13914_v47 = vpop.permute.xlu1 %13913 }
0x1d73   : > { %v14076_v15 = vsel %vm1688_vm3, %v24948_v6, %v13914_v47 }
0x1d74   : > { %v13972_v36 = vpop.permute.xlu0 %13971 }
0x1d75   : > { %v24167_v3 = vsel %vm2086_vm4, %v14073_v49, %v13972_v36 }
0x1d76   : > { %v13918_v60 = vpop.permute.xlu1 %13917 }
0x1d77   : > { %v14078_v4 = vsel %vm1688_vm3, %v24949_v11, %v13918_v60 }
0x1d78   : > { %v24171_v19 = vpop.permute.xlu0 %14143 }
0x1d7a   : > { %v13978_v45 = vpop.permute.xlu1 %13977 }
0x1d7b   : > { %v24174_v7 = vsel %vm2086_vm4, %v14076_v15, %v13978_v45 }
0x1d7c   : > { %v24176_v24 = vpop.permute.xlu0 %14147 }
0x1d7e   : > { %v13982_v37 = vpop.permute.xlu1 %13981 }
0x1d7f   : > { %v24179_v53 = vsel %vm2086_vm4, %v14078_v4, %v13982_v37 }
0x1d80   : > { %v13912_v1 = vpop.permute.xlu0 %13911 }
0x1d81   : > { %v14075_v0 = vsel %vm1688_vm3, %v24950_v30, %v13912_v1 }
0x1d84   : > { %v13916_v5 = vpop.permute.xlu0 %13915 }
0x1d85   : > { %v14077_v22 = vsel %vm1688_vm3, %v24951_v12, %v13916_v5 }
0x1d88   : > { %v13976_v16 = vpop.permute.xlu0 %13975 }
0x1d89   : > { %v24186_v50 = vsel %vm2086_vm4, %v14075_v0, %v13976_v16 }
0x1d8c   : > { %v13980_v2 = vpop.permute.xlu0 %13979 }
0x1d8d   : > { %v24189_v8 = vsel %vm2086_vm4, %v14077_v22, %v13980_v2 }
0x1da4   : > { %v13145_v10 = vpop.f32.mrb[112].mxu0 }
0x1da5   : > { %14015 = vrot.lane.b32.xlu0 %v13145_v10, %s19098_s12  ;;  %v17553_v56 = vpop.f32.mrb[113].mxu0 }
0x1da6   : > { %v13148_v41 = vpop.f32.mrb[114].mxu0  ;;  %v13193_v20 = vpop.f32.mrb[128].mxu1 }
0x1da7   : > { %v17559_v31 = vpop.f32.mrb[129].mxu1  ;;  %14017 = vrot.lane.b32.xlu1 %v13193_v20, %s19098_s12  ;;  %v17554_v9 = vpop.f32.mrb[115].mxu0 }
0x1da8   : > { %v13196_v33 = vpop.f32.mrb[130].mxu1 }
0x1da9   : > { %v17560_v43 = vpop.f32.mrb[131].mxu1 }
0x1dac   : > { %v13241_v21 = vpop.f32.mrb[116].mxu0 }
0x1dad   : > { %14019 = vrot.lane.b32.xlu0 %v13241_v21, %s19098_s12  ;;  %v17565_v55 = vpop.f32.mrb[117].mxu0 }
0x1dae   : > { %v13244_v18 = vpop.f32.mrb[118].mxu0 }
0x1daf   : > { %v17566_v42 = vpop.f32.mrb[119].mxu0 }
0x1db0   : > { %v13289_v23 = vpop.f32.mrb[132].mxu1 }
0x1db1   : > { %v17571_v52 = vpop.f32.mrb[133].mxu1  ;;  %14021 = vrot.lane.b32.xlu1 %v13289_v23, %s19098_s12  ;;  %v24954_v23 = vld [vmem:[#allocation54_spill] sm:$0xff] }
0x1db2   : > { %v13292_v34 = vpop.f32.mrb[134].mxu1  ;;  %v15778_v52 = vmul.f32 -1.442695, %v24954_v23 }
0x1db3   : > { %v17572_v49 = vpop.f32.mrb[135].mxu1  ;;  %v24955_v34 = vld [vmem:[#allocation58_spill] sm:$0xff] }
0x1db4   : > { %v13337_v59 = vpop.f32.mrb[120].mxu0  ;;  %18524 = vpow2.f32 %v15778_v52  ;;  %v15779_v49 = vmul.f32 -1.442695, %v24955_v34 }
0x1db5   : > { %14023 = vrot.lane.b32.xlu0 %v13337_v59, %s19098_s12  ;;  %v17577_v47 = vpop.f32.mrb[121].mxu0 }
0x1db6   : > { %v13340_v6 = vpop.f32.mrb[122].mxu0  ;;  %18526 = vpow2.f32 %v15779_v49 }
0x1db7   : > { %v17578_v15 = vpop.f32.mrb[123].mxu0 }
0x1db8   : > { %v13385_v36 = vpop.f32.mrb[136].mxu1 }
0x1db9   : > { %v17583_v60 = vpop.f32.mrb[137].mxu1  ;;  %14025 = vrot.lane.b32.xlu1 %v13385_v36, %s19098_s12 }
0x1dba   : > { %v13388_v11 = vpop.f32.mrb[138].mxu1 }
0x1dbb   : > { %v17584_v4 = vpop.f32.mrb[139].mxu1 }
0x1dbc   : > { %v13433_v45 = vpop.f32.mrb[124].mxu0 }
0x1dbd   : > { %14027 = vrot.lane.b32.xlu0 %v13433_v45, %s19098_s12  ;;  %v17589_v37 = vpop.f32.mrb[125].mxu0 }
0x1dbe   : > { %v13436_v1 = vpop.f32.mrb[126].mxu0  ;;  %v18525_v59 = vpop.eup %18524 }
0x1dbf   : > { %v17590_v30 = vpop.f32.mrb[127].mxu0  ;;  %v6780_v6 = vadd.f32 1.0, %v18525_v59 }
0x1dc0   : > { %v13481_v0 = vpop.f32.mrb[140].mxu1  ;;  %v18527_v37 = vpop.eup %18526 }
0x1dc1   : > { %v17595_v5 = vpop.f32.mrb[141].mxu1  ;;  %14029 = vrot.lane.b32.xlu1 %v13481_v0, %s19098_s12  ;;  %18528 = vrcp.f32 %v6780_v6  ;;  %v6781_v30 = vadd.f32 1.0, %v18527_v37 }
0x1dc2   : > { %v13484_v12 = vpop.f32.mrb[142].mxu1 }
0x1dc3   : > { %v17596_v22 = vpop.f32.mrb[143].mxu1  ;;  %18530 = vrcp.f32 %v6781_v30 }
0x1dc4   : > { %v13529_v16 = vpop.f32.mrb[128].mxu0 }
0x1dc5   : > { %14031 = vrot.lane.b32.xlu0 %v13529_v16, %s19098_s12  ;;  %v17601_v2 = vpop.f32.mrb[129].mxu0 }
0x1dc6   : > { %v13532_v62 = vpop.f32.mrb[130].mxu0  ;;  %v14152_v2 = vpop.permute.xlu0 %14151 }
0x1dc7   : > { %v17602_v10 = vpop.f32.mrb[131].mxu0 }
0x1dc8   : > { %v13577_v56 = vpop.f32.mrb[144].mxu1 }
0x1dc9   : > { %14033 = vrot.lane.b32.xlu1 %v13577_v56, %s19098_s12  ;;  %v17607_v41 = vpop.f32.mrb[145].mxu1  ;;  %v14154_v56 = vpop.permute.xlu1 %14153 }
0x1dca   : > { %v13580_v20 = vpop.f32.mrb[146].mxu1 }
0x1dcb   : > { %v17608_v31 = vpop.f32.mrb[147].mxu1  ;;  %v18529_v16 = vpop.eup %18528 }
0x1dcc   : > { %v13625_v9 = vpop.f32.mrb[132].mxu0 }
0x1dcd   : > { %14035 = vrot.lane.b32.xlu0 %v13625_v9, %s19098_s12  ;;  %v17613_v17 = vpop.f32.mrb[133].mxu0  ;;  %v18531_v31 = vpop.eup %18530 }
0x1dce   : > { %v13628_v33 = vpop.f32.mrb[134].mxu0 }
0x1dcf   : > { %v17614_v43 = vpop.f32.mrb[135].mxu0 }
0x1dd0   : > { %v13673_v21 = vpop.f32.mrb[148].mxu1 }
0x1dd1   : > { %14037 = vrot.lane.b32.xlu1 %v13673_v21, %s19098_s12  ;;  %v17619_v55 = vpop.f32.mrb[149].mxu1 }
0x1dd2   : > { %v13676_v18 = vpop.f32.mrb[150].mxu1 }
0x1dd3   : > { %v17620_v42 = vpop.f32.mrb[151].mxu1 }
0x1e01   : > { %v13721_v47 = vpop.f32.mrb[136].mxu0 }
0x1e02   : > { %14039 = vrot.lane.b32.xlu0 %v13721_v47, %s19098_s12  ;;  %v17625_v15 = vpop.f32.mrb[137].mxu0 }
0x1e03   : > { %v13724_v36 = vpop.f32.mrb[138].mxu0  ;;  %v13769_v60 = vpop.f32.mrb[152].mxu1 }
0x1e04   : > { %v17626_v11 = vpop.f32.mrb[139].mxu0  ;;  %14041 = vrot.lane.b32.xlu1 %v13769_v60, %s19098_s12  ;;  %v17631_v4 = vpop.f32.mrb[153].mxu1 }
0x1e05   : > { %v13772_v45 = vpop.f32.mrb[154].mxu1 }
0x1e06   : > { %v17632_v1 = vpop.f32.mrb[155].mxu1 }
0x1e0c   : > { %v13817_v0 = vpop.f32.mrb[140].mxu0 }
0x1e0d   : > { %14043 = vrot.lane.b32.xlu0 %v13817_v0, %s19098_s12  ;;  %v17637_v5 = vpop.f32.mrb[141].mxu0 }
0x1e0e   : > { %v13820_v12 = vpop.f32.mrb[142].mxu0 }
0x1e0f   : > { %v17638_v22 = vpop.f32.mrb[143].mxu0 }
0x1e11   : > { %14155 = vrot.lane.b32.xlu0 %v18529_v16, %s19097_s7 }
0x1e13   : > { %v13865_v62 = vpop.f32.mrb[156].mxu1 }
0x1e14   : > { %14045 = vrot.lane.b32.xlu1 %v13865_v62, %s19098_s12  ;;  %v17643_v10 = vpop.f32.mrb[157].mxu1 }
0x1e15   : > { %v13868_v41 = vpop.f32.mrb[158].mxu1 }
0x1e16   : > { %v17644_v20 = vpop.f32.mrb[159].mxu1 }
0x1e17   : > { %v14016_v9 = vpop.permute.xlu0 %14015 }
0x1e18   : > { %v14095_v17 = vsel %vm5775_vm5, %v24106_v28, %v14016_v9  ;;  %14157 = vrot.lane.b32.xlu1 %v18531_v31, %s19097_s7 }
0x1e19   : > { %v14018_v33 = vpop.permute.xlu1 %14017  ;;  %v14175_v21 = vmul.f32 %v24115_v25, %v14095_v17 }
0x1e1a   : > { %v14096_v43 = vsel %vm5775_vm5, %v24088_v61, %v14018_v33 }
0x1e1b   : > { %v14176_v55 = vmul.f32 %v24097_v57, %v14096_v43 }
0x1e1d   : > { %v14191_v18 = vpack.c.bf16 %v14176_v55, %v14175_v21  ;;  %v24958_v21 = vld [vmem:[#allocation67_spill] sm:$0xff] }
0x1e1f   : > { %17649 = vmatprep.mubr.msk.bf16.mxu0 %vm1175_vm1, %v14191_v18  ;;  %v14020_v42 = vpop.permute.xlu0 %14019 }
0x1e20   : > { %v14097_v23 = vsel %vm5775_vm5, %v24111_v38, %v14020_v42  ;;  %v24959_v42 = vld [vmem:[#allocation63_spill] sm:$0xff] }
0x1e21   : > { %v14177_v34 = vmul.f32 %v24120_v63, %v14097_v23 }
0x1e23   : > { %v14022_v52 = vpop.permute.xlu1 %14021 }
0x1e24   : > { %v14098_v28 = vsel %vm5775_vm5, %v24092_v26, %v14022_v52 }
0x1e25   : > { %v14178_v49 = vmul.f32 %v24102_v39, %v14098_v28 }
0x1e27   : > { %v14192_v61 = vpack.c.bf16 %v14178_v49, %v14177_v34  ;;  %v14024_v59 = vpop.permute.xlu0 %14023  ;;  %v24960_v34 = vld [vmem:[#allocation42_spill] sm:$0xff] }
0x1e28   : > { %v14099_v57 = vsel %vm5775_vm5, %v24134_v35, %v14024_v59 }
0x1e29   : > { %17650 = vmatmul.mubr.msk.bf16.vlgmr.msra.gmra.mrb[144].mxu0 %vm1175_vm1, %v14192_v61  ;;  %v14179_v38 = vmul.f32 %v24143_v40, %v14099_v57  ;;  %v24961_v57 = vld [vmem:[#allocation62_spill] sm:$0xff] }
0x1e2b   : > { %v14026_v25 = vpop.permute.xlu1 %14025 }
0x1e2c   : > { %v14100_v47 = vsel %vm5775_vm5, %v24118_v27, %v14026_v25 }
0x1e2d   : > { %v14180_v6 = vmul.f32 %v24127_v54, %v14100_v47 }
0x1e2f   : > { %v14193_v26 = vpack.c.bf16 %v14180_v6, %v14179_v38  ;;  %v14028_v15 = vpop.permute.xlu0 %14027 }
0x1e30   : > { %v14101_v39 = vsel %vm5775_vm5, %v24139_v14, %v14028_v15 }
0x1e31   : > { %17653 = vmatprep.mubr.msk.bf16.mxu0 %vm1175_vm1, %v14193_v26  ;;  %v14181_v35 = vmul.f32 %v24148_v58, %v14101_v39 }
0x1e33   : > { %v14030_v63 = vpop.permute.xlu1 %14029 }
0x1e34   : > { %v14102_v36 = vsel %vm5775_vm5, %v24123_v51, %v14030_v63 }
0x1e35   : > { %v14182_v60 = vmul.f32 %v24131_v32, %v14102_v36 }
0x1e37   : > { %v14194_v27 = vpack.c.bf16 %v14182_v60, %v14181_v35  ;;  %v14032_v11 = vpop.permute.xlu0 %14031 }
0x1e38   : > { %v14103_v54 = vsel %vm5775_vm5, %v24162_v29, %v14032_v11 }
0x1e39   : > { %17654 = vmatmul.mubr.msk.bf16.gmra.mrb[148].mxu0 %vm1175_vm1, %v14194_v27  ;;  %v14183_v14 = vmul.f32 %v24171_v19, %v14103_v54  ;;  %v24962_v54 = vld [vmem:[#allocation69_spill] sm:$0xff] }
0x1e3b   : > { %v14034_v40 = vpop.permute.xlu1 %14033 }
0x1e3c   : > { %v14104_v4 = vsel %vm5775_vm5, %v24146_v46, %v14034_v40 }
0x1e3d   : > { %v14184_v45 = vmul.f32 %v24155_v13, %v14104_v4 }
0x1e3f   : > { %v14195_v51 = vpack.c.bf16 %v14184_v45, %v14183_v14  ;;  %v14036_v37 = vpop.permute.xlu0 %14035  ;;  %v24963_v45 = vld [vmem:[#allocation64_spill] sm:$0xff] }
0x1e40   : > { %v14105_v32 = vsel %vm5775_vm5, %v24167_v3, %v14036_v37 }
0x1e41   : > { %v14185_v58 = vmul.f32 %v24176_v24, %v14105_v32  ;;  %17657 = vmatprep.mubr.msk.bf16.mxu0 %vm1175_vm1, %v14195_v51  ;;  %v24964_v32 = vld [vmem:[#allocation68_spill] sm:$0xff] }
0x1e43   : > { %v14038_v1 = vpop.permute.xlu1 %14037 }
0x1e44   : > { %v14106_v29 = vsel %vm5775_vm5, %v24151_v44, %v14038_v1 }
0x1e45   : > { %v14186_v30 = vmul.f32 %v24159_v48, %v14106_v29 }
0x1e47   : > { %v14196_v46 = vpack.c.bf16 %v14186_v30, %v14185_v58  ;;  %v24965_v30 = vld [vmem:[#allocation73_spill] sm:$0xff] }
0x1e49   : > { %17658 = vmatmul.mubr.msk.bf16.gmra.mrb[152].mxu0 %vm1175_vm1, %v14196_v46 }
0x1e74   : > { %v14040_v19 = vpop.permute.xlu0 %14039 }
0x1e75   : > { %v14107_v13 = vsel %vm5775_vm5, %v24186_v50, %v14040_v19 }
0x1e76   : > { %v14042_v0 = vpop.permute.xlu1 %14041  ;;  %v14187_v24 = vmul.f32 %v14152_v2, %v14107_v13 }
0x1e77   : > { %v14108_v3 = vsel %vm5775_vm5, %v24174_v7, %v14042_v0  ;;  %v24269_v7 = vld [vmem:[%s24956_s6] ss:$0 sm:$0xff] }
0x1e78   : > { %v14188_v5 = vmul.f32 %v14154_v56, %v14108_v3 }
0x1e7a   : > { %v14197_v12 = vpack.c.bf16 %v14188_v5, %v14187_v24 }
0x1e7c   : > { %17661 = vmatprep.mubr.msk.bf16.mxu0 %vm1175_vm1, %v14197_v12 }
0x1e7f   : > { %v14044_v44 = vpop.permute.xlu0 %14043 }
0x1e80   : > { %v14109_v16 = vsel %vm5775_vm5, %v24189_v8, %v14044_v44  ;;  %v24957_v8 = vld [vmem:[#allocation41_spill] sm:$0xff] }
0x1e83   : > { %v14156_v48 = vpop.permute.xlu0 %14155 }
0x1e84   : > { %v14189_v10 = vmul.f32 %v14156_v48, %v14109_v16  ;;  %v24966_v16 = vld [vmem:[#allocation71_spill] sm:$0xff] }
0x1e86   : > { %v14046_v22 = vpop.permute.xlu1 %14045 }
0x1e87   : > { %v14110_v62 = vsel %vm5775_vm5, %v24179_v53, %v14046_v22 }
0x1e8a   : > { %v14158_v50 = vpop.permute.xlu1 %14157 }
0x1e8b   : > { %v14190_v41 = vmul.f32 %v14158_v50, %v14110_v62 }
0x1e8d   : > { %v14198_v20 = vpack.c.bf16 %v14190_v41, %v14189_v10 }
0x1e8f   : > { %17662 = vmatmul.mubr.msk.bf16.gmra.mrb[156].mxu0 %vm1175_vm1, %v14198_v20 }
0x1efc   : > { %v17651_v2 = vpop.f32.mrb[144].mxu0 }
0x1efd   : > { %v14289_v56 = vadd.f32 %v17651_v2, %v24269_v7  ;;  %v14280_v31 = vpop.f32.mrb[145].mxu0 }
0x1efe   : > { %v14281_v9 = vadd.f32 %v24269_v7, %v14280_v31  ;;  %v17652_v17 = vpop.f32.mrb[146].mxu0 }
0x1eff   : > { %v14345_v33 = vadd.f32 %v14289_v56, %v24957_v8  ;;  %v14292_v53 = vadd.f32 %v17652_v17, %v24269_v7  ;;  %v14283_v43 = vpop.f32.mrb[147].mxu0 }
0x1f00   : > { %v14343_v55 = vadd.f32 %v14281_v9, %v24958_v21  ;;  %v14284_v18 = vadd.f32 %v24269_v7, %v14283_v43 }
0x1f01   : > { %v14346_v23 = vadd.f32 %v14292_v53, %v24959_v42 }
0x1f02   : > { %v14359_v52 = vcombine.low %v14343_v55, %v14345_v33  ;;  %v14360_v28 = vcombine.high %v14343_v55, %v14345_v33  ;;  %v14344_v49 = vadd.f32 %v14284_v18, %v24960_v34  ;;  %v24967_v34 = vld [vmem:[#allocation72_spill] sm:$0xff] }
0x1f04   : > { %v14375_v61 = vcombine.low %v14344_v49, %v14346_v23  ;;  %v14376_v59 = vcombine.high %v14344_v49, %v14346_v23  ;;  %v14367_v25 = vrot.slane %v14359_v52, %v24961_v57  ;;  %v14374_v47 = vrot.slane %v14360_v28, %v24961_v57 }
0x1f06   : > { %v14383_v38 = vrot.slane %v14375_v61, %v24961_v57  ;;  %v14390_v6 = vrot.slane %v14376_v59, %v24961_v57 }
0x1f08   : > { %v14423_v26 = vcombine.low %v14367_v25, %v14383_v38  ;;  %v14424_v15 = vcombine.high %v14367_v25, %v14383_v38  ;;  %v14439_v39 = vcombine.low %v14374_v47, %v14390_v6  ;;  %v14440_v63 = vcombine.high %v14374_v47, %v14390_v6  ;;  %v24968_v25 = vld [vmem:[#allocation70_spill] sm:$0xff]  ;;  %v24969_v6 = vld [vmem:[#allocation65_spill] sm:$0xff] }
0x1f0a   : > { %v14431_v62 = vrot.slane %v14423_v26, %v24966_v16  ;;  %v14438_v50 = vrot.slane %v14424_v15, %v24966_v16  ;;  %v14447_v56 = vrot.slane %v14439_v39, %v24966_v16  ;;  %v14454_v31 = vrot.slane %v14440_v63, %v24966_v16 }
0x1f0c   : > { %v17655_v36 = vpop.f32.mrb[148].mxu0 }
0x1f0d   : > { %v14305_v35 = vadd.f32 %v17655_v36, %v24269_v7  ;;  %v14296_v60 = vpop.f32.mrb[149].mxu0  ;;  %v24970_v36 = vld [vmem:[#allocation45_spill] sm:$0xff] }
0x1f0e   : > { %v14297_v27 = vadd.f32 %v24269_v7, %v14296_v60  ;;  %v17656_v11 = vpop.f32.mrb[150].mxu0 }
0x1f0f   : > { %v14349_v40 = vadd.f32 %v14305_v35, %v24962_v54  ;;  %v14308_v4 = vadd.f32 %v17656_v11, %v24269_v7  ;;  %v14299_v14 = vpop.f32.mrb[151].mxu0 }
0x1f10   : > { %v14347_v51 = vadd.f32 %v14297_v27, %v24963_v45  ;;  %v14300_v37 = vadd.f32 %v24269_v7, %v14299_v14 }
0x1f11   : > { %v14350_v58 = vadd.f32 %v14308_v4, %v24964_v32 }
0x1f12   : > { %v14391_v1 = vcombine.low %v14347_v51, %v14349_v40  ;;  %v14392_v29 = vcombine.high %v14347_v51, %v14349_v40  ;;  %v14348_v46 = vadd.f32 %v14300_v37, %v24965_v30 }
0x1f14   : > { %v14407_v19 = vcombine.low %v14348_v46, %v14350_v58  ;;  %v14408_v13 = vcombine.high %v14348_v46, %v14350_v58  ;;  %v14399_v0 = vrot.slane %v14391_v1, %v24961_v57  ;;  %v14406_v3 = vrot.slane %v14392_v29, %v24961_v57 }
0x1f16   : > { %v14415_v24 = vrot.slane %v14407_v19, %v24961_v57  ;;  %v14422_v5 = vrot.slane %v14408_v13, %v24961_v57  ;;  %v24971_v19 = vld [vmem:[#allocation44_spill] sm:$0xff] }
0x1f18   : > { %v14455_v12 = vcombine.low %v14399_v0, %v14415_v24  ;;  %v14456_v44 = vcombine.high %v14399_v0, %v14415_v24  ;;  %v14471_v22 = vcombine.low %v14406_v3, %v14422_v5  ;;  %v14472_v48 = vcombine.high %v14406_v3, %v14422_v5  ;;  %v24972_v24 = vld [vmem:[#allocation43_spill] sm:$0xff] }
0x1f1a   : > { %v14463_v10 = vrot.slane %v14455_v12, %v24966_v16  ;;  %v14470_v41 = vrot.slane %v14456_v44, %v24966_v16  ;;  %v14479_v20 = vrot.slane %v14471_v22, %v24966_v16  ;;  %v14486_v2 = vrot.slane %v14472_v48, %v24966_v16  ;;  %v24973_v44 = vld [vmem:[#allocation74_spill] sm:$0xff] }
0x1f1c   : > { %v17659_v9 = vpop.f32.mrb[152].mxu0  ;;  %v24303_v17 = vcombine.low %v14431_v62, %v14463_v10  ;;  %v24305_v8 = vcombine.high %v14431_v62, %v14463_v10  ;;  %v24307_v33 = vcombine.low %v14438_v50, %v14470_v41  ;;  %v24309_v53 = vcombine.high %v14438_v50, %v14470_v41  ;;  %v24974_v50 = vld [vmem:[#allocation66_spill] sm:$0xff] }
0x1f1d   : > { %v14321_v43 = vadd.f32 %v17659_v9, %v24269_v7  ;;  %v14312_v21 = vpop.f32.mrb[153].mxu0  ;;  %v24312_v55 = vcombine.low %v14447_v56, %v14479_v20  ;;  %v24314_v18 = vcombine.high %v14447_v56, %v14479_v20  ;;  %v24316_v42 = vcombine.low %v14454_v31, %v14486_v2 }
0x1f1e   : > { %v14313_v23 = vadd.f32 %v24269_v7, %v14312_v21  ;;  %v17660_v52 = vpop.f32.mrb[154].mxu0  ;;  %v14633_v28 = vsel %vm1175_vm1, %v24303_v17, 0.0  ;;  %v24326_v15 = vcombine.high %v14454_v31, %v14486_v2  ;;  %v14639_v60 = vsel %vm1175_vm1, %v24305_v8, 0.0 }
0x1f1f   : > { %v14353_v49 = vadd.f32 %v14321_v43, %v24967_v34  ;;  %v14324_v61 = vadd.f32 %v17660_v52, %v24269_v7  ;;  %14634 = vadd.xlane.f32.xlu0 %v14633_v28  ;;  %v14315_v59 = vpop.f32.mrb[155].mxu0 }
0x1f20   : > { %v14351_v47 = vadd.f32 %v14313_v23, %v24968_v25  ;;  %v14316_v38 = vadd.f32 %v24269_v7, %v14315_v59 }
0x1f21   : > { %v14354_v26 = vadd.f32 %v14324_v61, %v24969_v6 }
0x1f22   : > { %v14495_v39 = vcombine.low %v14351_v47, %v14353_v49  ;;  %v14496_v63 = vcombine.high %v14351_v47, %v14353_v49  ;;  %v14352_v35 = vadd.f32 %v14316_v38, %v24970_v36 }
0x1f23   : > { %14640 = vadd.xlane.f32.xlu0 %v14639_v60 }
0x1f24   : > { %v14511_v27 = vcombine.low %v14352_v35, %v14354_v26  ;;  %v14512_v11 = vcombine.high %v14352_v35, %v14354_v26  ;;  %v14503_v54 = vrot.slane %v14495_v39, %v24961_v57  ;;  %v14510_v40 = vrot.slane %v14496_v63, %v24961_v57 }
0x1f26   : > { %v14519_v4 = vrot.slane %v14511_v27, %v24961_v57  ;;  %v14526_v14 = vrot.slane %v14512_v11, %v24961_v57  ;;  %v14645_v27 = vsel %vm1175_vm1, %v24307_v33, 0.0 }
0x1f28   : > { %v14559_v45 = vcombine.low %v14503_v54, %v14519_v4  ;;  %v14560_v51 = vcombine.high %v14503_v54, %v14519_v4  ;;  %v14575_v37 = vcombine.low %v14510_v40, %v14526_v14  ;;  %v14576_v32 = vcombine.high %v14510_v40, %v14526_v14 }
0x1f29   : > { %v14651_v54 = vsel %vm1175_vm1, %v24309_v53, 0.0  ;;  %v14657_v4 = vsel %vm1175_vm1, %v24312_v55, 0.0 }
0x1f2a   : > { %v14567_v52 = vrot.slane %v14559_v45, %v24966_v16  ;;  %v14574_v28 = vrot.slane %v14560_v51, %v24966_v16  ;;  %v14583_v25 = vrot.slane %v14575_v37, %v24966_v16  ;;  %v14663_v45 = vsel %vm1175_vm1, %v24314_v18, 0.0 }
0x1f2b   : > { %v14669_v37 = vsel %vm1175_vm1, %v24316_v42, 0.0 }
0x1f62   : > { %v17663_v58 = vpop.f32.mrb[156].mxu0 }
0x1f63   : > { %v14337_v1 = vadd.f32 %v17663_v58, %v24269_v7  ;;  %v14328_v29 = vpop.f32.mrb[157].mxu0  ;;  %v14675_v58 = vsel %vm1175_vm1, %v24326_v15, 0.0 }
0x1f64   : > { %v14329_v30 = vadd.f32 %v24269_v7, %v14328_v29  ;;  %v17664_v46 = vpop.f32.mrb[158].mxu0 }
0x1f65   : > { %v14357_v13 = vadd.f32 %v14337_v1, %v24971_v19  ;;  %v14340_v0 = vadd.f32 %v17664_v46, %v24269_v7  ;;  %v14331_v3 = vpop.f32.mrb[159].mxu0 }
0x1f66   : > { %v14355_v5 = vadd.f32 %v14329_v30, %v24972_v24  ;;  %v14332_v12 = vadd.f32 %v24269_v7, %v14331_v3 }
0x1f67   : > { %v14358_v22 = vadd.f32 %v14340_v0, %v24973_v44 }
0x1f68   : > { %v14527_v48 = vcombine.low %v14355_v5, %v14357_v13  ;;  %v14528_v62 = vcombine.high %v14355_v5, %v14357_v13  ;;  %v14356_v10 = vadd.f32 %v14332_v12, %v24974_v50 }
0x1f6a   : > { %v14543_v41 = vcombine.low %v14356_v10, %v14358_v22  ;;  %v14544_v20 = vcombine.high %v14356_v10, %v14358_v22  ;;  %v14535_v2 = vrot.slane %v14527_v48, %v24961_v57  ;;  %v14542_v56 = vrot.slane %v14528_v62, %v24961_v57 }
0x1f6c   : > { %v14551_v31 = vrot.slane %v14543_v41, %v24961_v57  ;;  %v14558_v9 = vrot.slane %v14544_v20, %v24961_v57  ;;  %v14590_v57 = vrot.slane %v14576_v32, %v24966_v16 }
0x1f6e   : > { %v14591_v43 = vcombine.low %v14535_v2, %v14551_v31  ;;  %v14592_v21 = vcombine.high %v14535_v2, %v14551_v31  ;;  %v14607_v23 = vcombine.low %v14542_v56, %v14558_v9  ;;  %v14608_v7 = vcombine.high %v14542_v56, %v14558_v9 }
0x1f70   : > { %v14599_v34 = vrot.slane %v14591_v43, %v24966_v16  ;;  %v14606_v49 = vrot.slane %v14592_v21, %v24966_v16  ;;  %v14615_v61 = vrot.slane %v14607_v23, %v24966_v16  ;;  %v14622_v59 = vrot.slane %v14608_v7, %v24966_v16 }
0x1f72   : > { %v24355_v47 = vcombine.high %v14567_v52, %v14599_v34  ;;  %v24357_v38 = vcombine.low %v14567_v52, %v14599_v34  ;;  %v24359_v6 = vcombine.low %v14574_v28, %v14606_v49  ;;  %v24361_v26 = vcombine.high %v14574_v28, %v14606_v49 }
0x1f73   : > { %v24363_v39 = vcombine.low %v14583_v25, %v14615_v61  ;;  %v24365_v63 = vcombine.high %v14583_v25, %v14615_v61  ;;  %v24367_v36 = vcombine.low %v14590_v57, %v14622_v59  ;;  %v24369_v35 = vcombine.high %v14590_v57, %v14622_v59 }
0x1f74   : > { %v14642_v60 = vsel %vm1175_vm1, %v24355_v47, 0.0  ;;  %v14636_v16 = vsel %vm1175_vm1, %v24357_v38, 0.0  ;;  %v14648_v11 = vsel %vm1175_vm1, %v24359_v6, 0.0  ;;  %v14654_v40 = vsel %vm1175_vm1, %v24361_v26, 0.0 }
0x1f75   : > { %14643 = vadd.xlane.f32.xlu0 %v14642_v60  ;;  %14637 = vadd.xlane.f32.xlu1 %v14636_v16  ;;  %v14660_v14 = vsel %vm1175_vm1, %v24363_v39, 0.0  ;;  %v14666_v51 = vsel %vm1175_vm1, %v24365_v63, 0.0  ;;  %v14672_v32 = vsel %vm1175_vm1, %v24367_v36, 0.0  ;;  %v14678_v1 = vsel %vm1175_vm1, %v24369_v35, 0.0 }
0x1f79   : > { %14646 = vadd.xlane.f32.xlu0 %v14645_v27  ;;  %14649 = vadd.xlane.f32.xlu1 %v14648_v11 }
0x1f7d   : > { %14652 = vadd.xlane.f32.xlu0 %v14651_v54  ;;  %14655 = vadd.xlane.f32.xlu1 %v14654_v40 }
0x1f81   : > { %14658 = vadd.xlane.f32.xlu0 %v14657_v4  ;;  %14661 = vadd.xlane.f32.xlu1 %v14660_v14 }
0x1f85   : > { %14664 = vadd.xlane.f32.xlu0 %v14663_v45  ;;  %14667 = vadd.xlane.f32.xlu1 %v14666_v51 }
0x1f89   : > { %14670 = vadd.xlane.f32.xlu0 %v14669_v37  ;;  %14673 = vadd.xlane.f32.xlu1 %v14672_v32 }
0x1f8d   : > { %14676 = vadd.xlane.f32.xlu0 %v14675_v58  ;;  %14679 = vadd.xlane.f32.xlu1 %v14678_v1 }
0x1fac   : > { %v14635_v29 = vpop.xlane.xlu0 %14634 }
0x1fad   : > { %v14681_v30 = vmul.f32 0.03125, %v14635_v29 }
0x1faf   : > { %v24400_v46 = vsub.f32 %v24303_v17, %v14681_v30 }
0x1fb0   : > { %v14641_v19 = vpop.xlane.xlu0 %14640 }
0x1fb1   : > { %v14683_v13 = vmul.f32 0.03125, %v14641_v19  ;;  %v14713_v0 = vmul.f32 %v24400_v46, %v24400_v46 }
0x1fb3   : > { %v24405_v3 = vsub.f32 %v24305_v8, %v14683_v13  ;;  %v14729_v24 = vsel %vm1175_vm1, %v14713_v0, 0.0 }
0x1fb4   : > { %14730 = vadd.xlane.f32.xlu0 %v14729_v24 }
0x1fb5   : > { %v14715_v5 = vmul.f32 %v24405_v3, %v24405_v3 }
0x1fb7   : > { %v14735_v12 = vsel %vm1175_vm1, %v14715_v5, 0.0 }
0x1fb8   : > { %14736 = vadd.xlane.f32.xlu0 %v14735_v12 }
0x2002   : > { %v14638_v44 = vpop.xlane.xlu1 %14637  ;;  %v14644_v22 = vpop.xlane.xlu0 %14643 }
0x2003   : > { %v14682_v48 = vmul.f32 0.03125, %v14638_v44  ;;  %v14684_v62 = vmul.f32 0.03125, %v14644_v22 }
0x2005   : > { %v24412_v50 = vsub.f32 %v24357_v38, %v14682_v48  ;;  %v24415_v10 = vsub.f32 %v24355_v47, %v14684_v62 }
0x2006   : > { %v14650_v41 = vpop.xlane.xlu1 %14649  ;;  %v14647_v20 = vpop.xlane.xlu0 %14646 }
0x2007   : > { %v14686_v2 = vmul.f32 0.03125, %v14650_v41  ;;  %v14685_v56 = vmul.f32 0.03125, %v14647_v20  ;;  %v14714_v31 = vmul.f32 %v24412_v50, %v24412_v50  ;;  %v14716_v9 = vmul.f32 %v24415_v10, %v24415_v10 }
0x2009   : > { %v24422_v43 = vsub.f32 %v24359_v6, %v14686_v2  ;;  %v24425_v21 = vsub.f32 %v24307_v33, %v14685_v56  ;;  %v14732_v23 = vsel %vm1175_vm1, %v14714_v31, 0.0  ;;  %v14738_v61 = vsel %vm1175_vm1, %v14716_v9, 0.0 }
0x200a   : > { %14733 = vadd.xlane.f32.xlu1 %v14732_v23  ;;  %v14656_v7 = vpop.xlane.xlu1 %14655  ;;  %v14653_v52 = vpop.xlane.xlu0 %14652 }
0x200b   : > { %v14688_v28 = vmul.f32 0.03125, %v14656_v7  ;;  %v14687_v34 = vmul.f32 0.03125, %v14653_v52  ;;  %v14717_v49 = vmul.f32 %v24425_v21, %v24425_v21  ;;  %v14718_v60 = vmul.f32 %v24422_v43, %v24422_v43 }
0x200d   : > { %v24432_v59 = vsub.f32 %v24361_v26, %v14688_v28  ;;  %v24435_v25 = vsub.f32 %v24309_v53, %v14687_v34  ;;  %v14741_v57 = vsel %vm1175_vm1, %v14717_v49, 0.0  ;;  %v14744_v51 = vsel %vm1175_vm1, %v14718_v60, 0.0 }
0x200e   : > { %v14662_v16 = vpop.xlane.xlu1 %14661  ;;  %14739 = vadd.xlane.f32.xlu1 %v14738_v61  ;;  %14742 = vadd.xlane.f32.xlu0 %v14741_v57  ;;  %v14659_v27 = vpop.xlane.xlu0 %14658 }
0x200f   : > { %v14690_v11 = vmul.f32 0.03125, %v14662_v16  ;;  %v14689_v54 = vmul.f32 0.03125, %v14659_v27  ;;  %v14719_v40 = vmul.f32 %v24435_v25, %v24435_v25  ;;  %v14720_v4 = vmul.f32 %v24432_v59, %v24432_v59 }
0x2011   : > { %v24445_v14 = vsub.f32 %v24363_v39, %v14690_v11  ;;  %v24448_v45 = vsub.f32 %v24312_v55, %v14689_v54  ;;  %v14747_v37 = vsel %vm1175_vm1, %v14719_v40, 0.0  ;;  %v14750_v19 = vsel %vm1175_vm1, %v14720_v4, 0.0  ;;  %v17818_v4 = vld [vmem:[%s24975_s27] sm:$0xff]  }
0x2012   : > { %v14668_v32 = vpop.xlane.xlu1 %14667  ;;  %14745 = vadd.xlane.f32.xlu1 %v14744_v51  ;;  %14748 = vadd.xlane.f32.xlu0 %v14747_v37  ;;  %v14665_v58 = vpop.xlane.xlu0 %14664  ;;  %v17819_v51 = vld [vmem:[%s24976_s25 + $0x8] sm:$0xff]   ;;  %v17820_v37 = vld [vmem:[%s19753_s0] sm:$0xff]  }
0x2013   : > { %v14692_v1 = vmul.f32 0.03125, %v14668_v32  ;;  %v14691_v29 = vmul.f32 0.03125, %v14665_v58  ;;  %v14721_v30 = vmul.f32 %v24448_v45, %v24448_v45  ;;  %v14722_v5 = vmul.f32 %v24445_v14, %v24445_v14  ;;  %17665 = vmatprep.subr.bf16.mxu1 %v17818_v4  ;;  %v17821_v32 = vld [vmem:[%s19753_s0 + $0x8] sm:$0xff]   ;;  %17685 = vmatprep.subr.bf16.mxu0 %v17820_v37  ;;  %v17822_v58 = vld [vmem:[%s19753_s0 + $0x10] sm:$0xff]  }
0x2014   : > { %17666 = vmatpush3.bf16.msra.mxu1 %v17818_v4  ;;  %17686 = vmatpush3.bf16.msra.mxu0 %v17820_v37  ;;  %v24508_v37 = vld [vmem:[%s24977_s10] ss:$0 sm:$0xff] }
0x2015   : > { %v24456_v13 = vsub.f32 %v24365_v63, %v14692_v1  ;;  %v24459_v0 = vsub.f32 %v24314_v18, %v14691_v29  ;;  %v14753_v24 = vsel %vm1175_vm1, %v14721_v30, 0.0  ;;  %v14756_v56 = vsel %vm1175_vm1, %v14722_v5, 0.0  ;;  %17667 = vmatprep.subr.bf16.mxu1 %v17819_v51  ;;  %17687 = vmatprep.subr.bf16.mxu0 %v17821_v32  ;;  %v17823_v1 = vld [vmem:[%s19753_s0 + $0x18] sm:$0xff]   ;;  %v17824_v29 = vld [vmem:[%s19753_s0 + $0x20] sm:$0xff]   ;;  %v17825_v30 = vld [vmem:[%s19753_s0 + $0x28] sm:$0xff]  }
0x2016   : > { %v14674_v12 = vpop.xlane.xlu1 %14673  ;;  %14751 = vadd.xlane.f32.xlu1 %v14750_v19  ;;  %14754 = vadd.xlane.f32.xlu0 %v14753_v24  ;;  %v14671_v44 = vpop.xlane.xlu0 %14670 }
0x2017   : > { %v14694_v22 = vmul.f32 0.03125, %v14674_v12  ;;  %v14693_v48 = vmul.f32 0.03125, %v14671_v44  ;;  %v14723_v62 = vmul.f32 %v24459_v0, %v24459_v0  ;;  %v14724_v41 = vmul.f32 %v24456_v13, %v24456_v13 }
0x2018   : > { %17668 = vmatpush3.bf16.msra.mxu1 %v17819_v51  ;;  %17688 = vmatpush3.bf16.msra.mxu0 %v17821_v32 }
0x2019   : > { %v24469_v20 = vsub.f32 %v24367_v36, %v14694_v22  ;;  %v24472_v2 = vsub.f32 %v24316_v42, %v14693_v48  ;;  %v14759_v31 = vsel %vm1175_vm1, %v14723_v62, 0.0  ;;  %v14762_v34 = vsel %vm1175_vm1, %v14724_v41, 0.0  ;;  %17689 = vmatprep.subr.bf16.mxu0 %v17822_v58 }
0x201a   : > { %v14680_v9 = vpop.xlane.xlu1 %14679  ;;  %14757 = vadd.xlane.f32.xlu1 %v14756_v56  ;;  %14760 = vadd.xlane.f32.xlu0 %v14759_v31  ;;  %v14677_v23 = vpop.xlane.xlu0 %14676 }
0x201b   : > { %v14696_v7 = vmul.f32 0.03125, %v14680_v9  ;;  %v14695_v52 = vmul.f32 0.03125, %v14677_v23  ;;  %v14725_v28 = vmul.f32 %v24472_v2, %v24472_v2  ;;  %v14726_v60 = vmul.f32 %v24469_v20, %v24469_v20 }
0x201c   : > { %17690 = vmatpush3.bf16.msra.mxu0 %v17822_v58 }
0x201d   : > { %v24480_v49 = vsub.f32 %v24369_v35, %v14696_v7  ;;  %v24483_v61 = vsub.f32 %v24326_v15, %v14695_v52  ;;  %v14765_v57 = vsel %vm1175_vm1, %v14725_v28, 0.0  ;;  %v14768_v27 = vsel %vm1175_vm1, %v14726_v60, 0.0  ;;  %17691 = vmatprep.subr.bf16.mxu0 %v17823_v1 }
0x201e   : > { %14763 = vadd.xlane.f32.xlu1 %v14762_v34  ;;  %14766 = vadd.xlane.f32.xlu0 %v14765_v57 }
0x201f   : > { %v14727_v16 = vmul.f32 %v24483_v61, %v24483_v61  ;;  %v14728_v54 = vmul.f32 %v24480_v49, %v24480_v49 }
0x2020   : > { %17692 = vmatpush3.bf16.msra.mxu0 %v17823_v1 }
0x2021   : > { %v14771_v11 = vsel %vm1175_vm1, %v14727_v16, 0.0  ;;  %v14774_v40 = vsel %vm1175_vm1, %v14728_v54, 0.0  ;;  %17693 = vmatprep.subr.bf16.mxu0 %v17824_v29 }
0x2022   : > { %14769 = vadd.xlane.f32.xlu1 %v14768_v27  ;;  %14772 = vadd.xlane.f32.xlu0 %v14771_v11 }
0x2024   : > { %17694 = vmatpush3.bf16.msra.mxu0 %v17824_v29 }
0x2025   : > { %17695 = vmatprep.subr.bf16.mxu0 %v17825_v30 }
0x2026   : > { %14775 = vadd.xlane.f32.xlu1 %v14774_v40 }
0x2028   : > { %17696 = vmatpush3.bf16.msra.mxu0 %v17825_v30 }
0x2041   : > { %v14731_v19 = vpop.xlane.xlu0 %14730 }
0x2042   : > { %v14777_v24 = vmul.f32 0.03125, %v14731_v19 }
0x2044   : > { %v14793_v12 = vadd.f32 1e-05, %v14777_v24 }
0x2045   : > { %v14737_v5 = vpop.xlane.xlu0 %14736 }
0x2046   : > { %v14779_v44 = vmul.f32 0.03125, %v14737_v5  ;;  %18532 = vrsqrt.f32 %v14793_v12 }
0x2048   : > { %v14795_v22 = vadd.f32 1e-05, %v14779_v44  ;;  %v24515_v44 = vld [vmem:[%s24978_s20] ss:$0 sm:$0xff] }
0x204a   : > { %18534 = vrsqrt.f32 %v14795_v22 }
0x2050   : > { %v18533_v57 = vpop.eup %18532 }
0x2051   : > { %v14825_v54 = vmul.f32 %v18533_v57, %v24400_v46 }
0x2053   : > { %v14847_v12 = vmul.f32 %v24508_v37, %v14825_v54 }
0x2054   : > { %v18535_v51 = vpop.eup %18534 }
0x2055   : > { %v14827_v19 = vmul.f32 %v18535_v51, %v24405_v3 }
0x2057   : > { %v14849_v3 = vmul.f32 %v24508_v37, %v14827_v19 }
0x2097   : > { %v14734_v48 = vpop.xlane.xlu1 %14733 }
0x2098   : > { %v14778_v62 = vmul.f32 0.03125, %v14734_v48 }
0x209a   : > { %v14794_v41 = vadd.f32 1e-05, %v14778_v62 }
0x209b   : > { %v14740_v56 = vpop.xlane.xlu1 %14739  ;;  %v14743_v31 = vpop.xlane.xlu0 %14742 }
0x209c   : > { %18536 = vrsqrt.f32 %v14794_v41  ;;  %v14780_v9 = vmul.f32 0.03125, %v14740_v56  ;;  %v14781_v23 = vmul.f32 0.03125, %v14743_v31 }
0x209e   : > { %v14796_v7 = vadd.f32 1e-05, %v14780_v9  ;;  %v14797_v52 = vadd.f32 1e-05, %v14781_v23 }
0x209f   : > { %v14746_v28 = vpop.xlane.xlu1 %14745  ;;  %v14749_v34 = vpop.xlane.xlu0 %14748 }
0x20a0   : > { %18538 = vrsqrt.f32 %v14796_v7  ;;  %v14782_v60 = vmul.f32 0.03125, %v14746_v28  ;;  %v14783_v16 = vmul.f32 0.03125, %v14749_v34 }
0x20a1   : > { %18540 = vrsqrt.f32 %v14797_v52  ;;  %v14869_v52 = vadd.f32 %v24515_v44, %v14847_v12 }
0x20a2   : > { %v14798_v27 = vadd.f32 1e-05, %v14782_v60  ;;  %v14799_v11 = vadd.f32 1e-05, %v14783_v16 }
0x20a3   : > { %v14752_v40 = vpop.xlane.xlu1 %14751  ;;  %v14755_v4 = vpop.xlane.xlu0 %14754 }
0x20a4   : > { %18542 = vrsqrt.f32 %v14798_v27  ;;  %v14784_v32 = vmul.f32 0.03125, %v14752_v40  ;;  %v14785_v58 = vmul.f32 0.03125, %v14755_v4 }
0x20a5   : > { %18544 = vrsqrt.f32 %v14799_v11 }
0x20a6   : > { %v18537_v1 = vpop.eup %18536  ;;  %v14800_v29 = vadd.f32 1e-05, %v14784_v32  ;;  %v14801_v30 = vadd.f32 1e-05, %v14785_v58 }
0x20a7   : > { %v14826_v24 = vmul.f32 %v18537_v1, %v24412_v50  ;;  %v14758_v5 = vpop.xlane.xlu1 %14757  ;;  %v14761_v46 = vpop.xlane.xlu0 %14760 }
0x20a8   : > { %18546 = vrsqrt.f32 %v14800_v29  ;;  %v14786_v22 = vmul.f32 0.03125, %v14758_v5  ;;  %v14787_v48 = vmul.f32 0.03125, %v14761_v46 }
0x20a9   : > { %18548 = vrsqrt.f32 %v14801_v30  ;;  %v14848_v62 = vmul.f32 %v24508_v37, %v14826_v24 }
0x20aa   : > { %v18539_v41 = vpop.eup %18538  ;;  %v14802_v56 = vadd.f32 1e-05, %v14786_v22  ;;  %v14803_v31 = vadd.f32 1e-05, %v14787_v48 }
0x20ab   : > { %v18541_v9 = vpop.eup %18540  ;;  %v14828_v50 = vmul.f32 %v18539_v41, %v24415_v10  ;;  %v14764_v23 = vpop.xlane.xlu1 %14763  ;;  %v14870_v28 = vadd.f32 %v24515_v44, %v14848_v62  ;;  %v14871_v10 = vadd.f32 %v24515_v44, %v14849_v3 }
0x20ac   : > { %v14767_v7 = vpop.xlane.xlu0 %14766  ;;  %v14829_v34 = vmul.f32 %v18541_v9, %v24425_v21  ;;  %18550 = vrsqrt.f32 %v14802_v56  ;;  %v14788_v57 = vmul.f32 0.03125, %v14764_v23 }
0x20ad   : > { %v14789_v60 = vmul.f32 0.03125, %v14767_v7  ;;  %v14850_v16 = vmul.f32 %v24508_v37, %v14828_v50  ;;  %18552 = vrsqrt.f32 %v14803_v31  ;;  %v14885_v27 = vpack.c.bf16 %v14870_v28, %v14869_v52 }
0x20ae   : > { %v18543_v11 = vpop.eup %18542  ;;  %v14804_v54 = vadd.f32 1e-05, %v14788_v57  ;;  %v14851_v1 = vmul.f32 %v24508_v37, %v14829_v34 }
0x20af   : > { %v14805_v40 = vadd.f32 1e-05, %v14789_v60  ;;  %v18545_v4 = vpop.eup %18544  ;;  %v14872_v51 = vadd.f32 %v24515_v44, %v14850_v16  ;;  %v14830_v32 = vmul.f32 %v18543_v11, %v24422_v43  ;;  %v14770_v58 = vpop.xlane.xlu1 %14769  ;;  %17669 = vmatprep.mubr.msk.bf16.mxu1 %vm1175_vm1, %v14885_v27 }
0x20b0   : > { %v14773_v21 = vpop.xlane.xlu0 %14772  ;;  %v14831_v29 = vmul.f32 %v18545_v4, %v24435_v25  ;;  %18554 = vrsqrt.f32 %v14804_v54  ;;  %v14790_v30 = vmul.f32 0.03125, %v14770_v58  ;;  %v14873_v25 = vadd.f32 %v24515_v44, %v14851_v1 }
0x20b1   : > { %v14791_v19 = vmul.f32 0.03125, %v14773_v21  ;;  %v14886_v24 = vpack.c.bf16 %v14872_v51, %v14871_v10  ;;  %18556 = vrsqrt.f32 %v14805_v40  ;;  %v14852_v5 = vmul.f32 %v24508_v37, %v14830_v32 }
0x20b2   : > { %v18547_v46 = vpop.eup %18546  ;;  %v14806_v12 = vadd.f32 1e-05, %v14790_v30  ;;  %v14853_v43 = vmul.f32 %v24508_v37, %v14831_v29 }
0x20b3   : > { %v14807_v22 = vadd.f32 1e-05, %v14791_v19  ;;  %v18549_v48 = vpop.eup %18548  ;;  %v14832_v62 = vmul.f32 %v18547_v46, %v24432_v59  ;;  %v14776_v41 = vpop.xlane.xlu1 %14775  ;;  %17670 = vmatmul.mubr.msk.bf16.vlgmr.msra.gmra.mrb[160].mxu1 %vm1175_vm1, %v14886_v24  ;;  %v14874_v56 = vadd.f32 %v24515_v44, %v14852_v5 }
0x20b4   : > { %v14833_v31 = vmul.f32 %v18549_v48, %v24448_v45  ;;  %18558 = vrsqrt.f32 %v14806_v12  ;;  %v14792_v9 = vmul.f32 0.03125, %v14776_v41  ;;  %v14875_v59 = vadd.f32 %v24515_v44, %v14853_v43  ;;  %v17827_v41 = vld [vmem:[%s19753_s0 + $0x38] sm:$0xff]  }
0x20b5   : > { %v14854_v3 = vmul.f32 %v24508_v37, %v14832_v62  ;;  %18560 = vrsqrt.f32 %v14807_v22  ;;  %v14887_v50 = vpack.c.bf16 %v14874_v56, %v14873_v25  ;;  %v15937_v25 = vld [vmem:[%s24979_s28] ss:$0 sm:$0xff] }
0x20b6   : > { %v18551_v23 = vpop.eup %18550  ;;  %v14808_v7 = vadd.f32 1e-05, %v14792_v9  ;;  %v14855_v57 = vmul.f32 %v24508_v37, %v14833_v31 }
0x20b7   : > { %v18553_v52 = vpop.eup %18552  ;;  %v14876_v28 = vadd.f32 %v24515_v44, %v14854_v3  ;;  %v14834_v34 = vmul.f32 %v18551_v23, %v24445_v14  ;;  %17673 = vmatprep.mubr.msk.bf16.mxu1 %vm1175_vm1, %v14887_v50 }
0x20b8   : > { %v14835_v45 = vmul.f32 %v18553_v52, %v24459_v0  ;;  %18562 = vrsqrt.f32 %v14808_v7  ;;  %v14877_v14 = vadd.f32 %v24515_v44, %v14855_v57 }
0x20b9   : > { %v14888_v60 = vpack.c.bf16 %v14876_v28, %v14875_v59  ;;  %v14856_v16 = vmul.f32 %v24508_v37, %v14834_v34 }
0x20ba   : > { %v18555_v27 = vpop.eup %18554  ;;  %v14857_v54 = vmul.f32 %v24508_v37, %v14835_v45 }
0x20bb   : > { %v18557_v11 = vpop.eup %18556  ;;  %v14836_v40 = vmul.f32 %v18555_v27, %v24456_v13  ;;  %17674 = vmatmul.mubr.msk.bf16.gmra.mrb[164].mxu1 %vm1175_vm1, %v14888_v60  ;;  %v14878_v4 = vadd.f32 %v24515_v44, %v14856_v16 }
0x20bc   : > { %v14837_v10 = vmul.f32 %v18557_v11, %v24472_v2  ;;  %v14879_v21 = vadd.f32 %v24515_v44, %v14857_v54 }
0x20bd   : > { %v14858_v0 = vmul.f32 %v24508_v37, %v14836_v40  ;;  %v14889_v51 = vpack.c.bf16 %v14878_v4, %v14877_v14 }
0x20be   : > { %v18559_v32 = vpop.eup %18558  ;;  %v14859_v13 = vmul.f32 %v24508_v37, %v14837_v10 }
0x20bf   : > { %v18561_v58 = vpop.eup %18560  ;;  %v14880_v1 = vadd.f32 %v24515_v44, %v14858_v0  ;;  %v14838_v29 = vmul.f32 %v18559_v32, %v24469_v20  ;;  %17677 = vmatprep.mubr.msk.bf16.mxu1 %vm1175_vm1, %v14889_v51 }
0x20c0   : > { %v14839_v30 = vmul.f32 %v18561_v58, %v24483_v61  ;;  %v14881_v20 = vadd.f32 %v24515_v44, %v14859_v13 }
0x20c1   : > { %v14890_v19 = vpack.c.bf16 %v14880_v1, %v14879_v21  ;;  %v14860_v2 = vmul.f32 %v24508_v37, %v14838_v29 }
0x20c2   : > { %v18563_v24 = vpop.eup %18562  ;;  %v14861_v5 = vmul.f32 %v24508_v37, %v14839_v30 }
0x20c3   : > { %v14840_v46 = vmul.f32 %v18563_v24, %v24480_v49  ;;  %17678 = vmatmul.mubr.msk.bf16.gmra.mrb[168].mxu1 %vm1175_vm1, %v14890_v19  ;;  %v14882_v12 = vadd.f32 %v24515_v44, %v14860_v2  ;;  %v17826_v49 = vld [vmem:[%s19753_s0 + $0x30] sm:$0xff]  }
0x20c4   : > { %v14883_v48 = vadd.f32 %v24515_v44, %v14861_v5  ;;  %17697 = vmatprep.subr.bf16.mxu0 %v17826_v49 }
0x20c5   : > { %v14862_v22 = vmul.f32 %v24508_v37, %v14840_v46  ;;  %v14891_v61 = vpack.c.bf16 %v14882_v12, %v14881_v20  ;;  %17698 = vmatpush3.bf16.msra.mxu0 %v17826_v49 }
0x20c6   : > { %17699 = vmatprep.subr.bf16.mxu0 %v17827_v41 }
0x20c7   : > { %v14884_v43 = vadd.f32 %v24515_v44, %v14862_v22  ;;  %17681 = vmatprep.mubr.msk.bf16.mxu1 %vm1175_vm1, %v14891_v61 }
0x20c9   : > { %v14892_v62 = vpack.c.bf16 %v14884_v43, %v14883_v48  ;;  %17700 = vmatpush3.bf16.msra.mxu0 %v17827_v41 }
0x20cb   : > { %17682 = vmatmul.mubr.msk.bf16.gmra.mrb[172].mxu1 %vm1175_vm1, %v14892_v62 }
0x2186   : > { %v17671_v56 = vpop.f32.mrb[160].mxu1 }
0x2187   : > { %v14983_v37 = vadd.f32 %v17671_v56, %v15937_v25  ;;  %v14974_v31 = vpop.f32.mrb[161].mxu1 }
0x2188   : > { %v14975_v9 = vadd.f32 %v15937_v25, %v14974_v31  ;;  %v17672_v3 = vpop.f32.mrb[162].mxu1 }
0x2189   : > { %v14986_v50 = vadd.f32 %v17672_v3, %v15937_v25  ;;  %v14977_v44 = vpop.f32.mrb[163].mxu1  ;;  %v15039_v7 = vmax.f32 %v14983_v37, 0.0 }
0x218a   : > { %v14978_v23 = vadd.f32 %v15937_v25, %v14977_v44  ;;  %v15037_v59 = vmax.f32 %v14975_v9, 0.0 }
0x218b   : > { %v15040_v52 = vmax.f32 %v14986_v50, 0.0 }
0x218c   : > { %v15038_v28 = vmax.f32 %v14978_v23, 0.0 }
0x218d   : > { %v15054_v34 = vpack.c.bf16 %v15040_v52, %v15039_v7  ;;  %v15948_v52 = vld [vmem:[%s1118_s4] ss:$0 sm:$0xff]  ;;  %s24981_s4 = sld [smem:[#allocation37_spill]] }
0x218e   : > { %v15053_v57 = vpack.c.bf16 %v15038_v28, %v15037_v59  ;;  %v17675_v45 = vpop.f32.mrb[164].mxu1 }
0x218f   : > { %v14999_v60 = vadd.f32 %v17675_v45, %v15937_v25  ;;  %v14990_v16 = vpop.f32.mrb[165].mxu1 }
0x2190   : > { %v14991_v27 = vadd.f32 %v15937_v25, %v14990_v16  ;;  %v17676_v11 = vpop.f32.mrb[166].mxu1  ;;  %17701 = vmatprep.mubr.bf16.mxu0 %v15053_v57 }
0x2191   : > { %v15002_v54 = vadd.f32 %v17676_v11, %v15937_v25  ;;  %v14993_v40 = vpop.f32.mrb[167].mxu1  ;;  %17702 = vmatmul.mubr.bf16.vlgmr.msra.gmra.mrb[160].mxu0 %v15054_v34  ;;  %v15043_v4 = vmax.f32 %v14999_v60, 0.0 }
0x2192   : > { %v14994_v14 = vadd.f32 %v15937_v25, %v14993_v40  ;;  %v15041_v0 = vmax.f32 %v14991_v27, 0.0 }
0x2193   : > { %v15044_v10 = vmax.f32 %v15002_v54, 0.0  ;;  %p17753_p3 = scmp.eq.s32.totalorder %s24981_s4, 1 }
0x2194   : > { %v15042_v51 = vmax.f32 %v14994_v14, 0.0 }
0x2195   : > { %v15056_v32 = vpack.c.bf16 %v15044_v10, %v15043_v4  ;;  %p18974_p6 = pnand %p18973_p5, %p17753_p3 }
0x2196   : > { %v15055_v58 = vpack.c.bf16 %v15042_v51, %v15041_v0  ;;  %v17679_v21 = vpop.f32.mrb[168].mxu1 }
0x2197   : > { %v15015_v1 = vadd.f32 %v17679_v21, %v15937_v25  ;;  %v15006_v29 = vpop.f32.mrb[169].mxu1  ;;  %p18975_p8 = pneg %p18974_p6 }
0x2198   : > { %v15007_v13 = vadd.f32 %v15937_v25, %v15006_v29  ;;  %v17680_v30 = vpop.f32.mrb[170].mxu1  ;;  %17705 = vmatprep.mubr.bf16.mxu0 %v15055_v58 }
0x2199   : > { %v15018_v19 = vadd.f32 %v17680_v30, %v15937_v25  ;;  %v15009_v2 = vpop.f32.mrb[171].mxu1  ;;  %17706 = vmatmul.mubr.bf16.gmra.mrb[164].mxu0 %v15056_v32  ;;  %v15047_v5 = vmax.f32 %v15015_v1, 0.0  ;;  %p18982_p0 = pnand %p18981_p11, %p18975_p8 }
0x219a   : > { %v15010_v24 = vadd.f32 %v15937_v25, %v15009_v2  ;;  %v15045_v20 = vmax.f32 %v15007_v13, 0.0 }
0x219b   : > { %v15048_v46 = vmax.f32 %v15018_v19, 0.0 }
0x219c   : > { %v15046_v12 = vmax.f32 %v15010_v24, 0.0 }
0x219d   : > { %v15058_v22 = vpack.c.bf16 %v15048_v46, %v15047_v5 }
0x219e   : > { %v15057_v61 = vpack.c.bf16 %v15046_v12, %v15045_v20  ;;  %v17683_v48 = vpop.f32.mrb[172].mxu1 }
0x219f   : > { %v15031_v43 = vadd.f32 %v17683_v48, %v15937_v25  ;;  %v15022_v62 = vpop.f32.mrb[173].mxu1 }
0x21a0   : > { %v15023_v49 = vadd.f32 %v15937_v25, %v15022_v62  ;;  %v17684_v41 = vpop.f32.mrb[174].mxu1  ;;  %17709 = vmatprep.mubr.bf16.mxu0 %v15057_v61 }
0x21a1   : > { %v15034_v56 = vadd.f32 %v17684_v41, %v15937_v25  ;;  %v15025_v37 = vpop.f32.mrb[175].mxu1  ;;  %17710 = vmatmul.mubr.bf16.gmra.mrb[168].mxu0 %v15058_v22  ;;  %v15051_v9 = vmax.f32 %v15031_v43, 0.0 }
0x21a2   : > { %v15026_v31 = vadd.f32 %v15937_v25, %v15025_v37  ;;  %v15049_v50 = vmax.f32 %v15023_v49, 0.0 }
0x21a3   : > { %v15052_v3 = vmax.f32 %v15034_v56, 0.0 }
0x21a4   : > { %v15050_v44 = vmax.f32 %v15026_v31, 0.0 }
0x21a5   : > { %v15060_v23 = vpack.c.bf16 %v15052_v3, %v15051_v9 }
0x21a6   : > { %v15059_v7 = vpack.c.bf16 %v15050_v44, %v15049_v50 }
0x21a8   : > { %17713 = vmatprep.mubr.bf16.mxu0 %v15059_v7 }
0x21a9   : > { %17714 = vmatmul.mubr.bf16.gmra.mrb[172].mxu0 %v15060_v23 }
0x2264   : > { %v17703_v59 = vpop.f32.mrb[160].mxu0 }
0x2265   : > { %v15175_v28 = vadd.f32 %v17703_v59, %v15948_v52  ;;  %v15166_v34 = vpop.f32.mrb[161].mxu0 }
0x2266   : > { %v15167_v57 = vadd.f32 %v15948_v52, %v15166_v34  ;;  %v17704_v45 = vpop.f32.mrb[162].mxu0 }
0x2267   : > { %v15231_v25 = vadd.f32 %v15175_v28, %v24305_v8  ;;  %v15178_v60 = vadd.f32 %v17704_v45, %v15948_v52  ;;  %v15169_v16 = vpop.f32.mrb[163].mxu0 }
0x2268   : > { %v15229_v27 = vadd.f32 %v15167_v57, %v24303_v17  ;;  %v15170_v11 = vadd.f32 %v15948_v52, %v15169_v16 }
0x2269   : > { %15247 = vst.msk [vmem:[#allocation25 + $0x10] sm:$0xff] %vm1175_vm1, %v15231_v25  ;;  %v15232_v54 = vadd.f32 %v15178_v60, %v24355_v47 }
0x226a   : > { %15245 = vst.msk [vmem:[#allocation25] sm:$0xff] %vm1175_vm1, %v15229_v27  ;;  %v15230_v40 = vadd.f32 %v15170_v11, %v24357_v38 }
0x226b   : > { %15248 = vst.msk [vmem:[#allocation25 + $0x18] sm:$0xff] %vm1175_vm1, %v15232_v54 }
0x226c   : > { %15246 = vst.msk [vmem:[#allocation25 + $0x8] sm:$0xff] %vm1175_vm1, %v15230_v40  ;;  %v17707_v14 = vpop.f32.mrb[164].mxu0 }
0x226d   : > { %v15191_v4 = vadd.f32 %v17707_v14, %v15948_v52  ;;  %v15182_v8 = vpop.f32.mrb[165].mxu0 }
0x226e   : > { %v15183_v10 = vadd.f32 %v15948_v52, %v15182_v8  ;;  %v17708_v0 = vpop.f32.mrb[166].mxu0 }
0x226f   : > { %v15235_v17 = vadd.f32 %v15191_v4, %v24309_v53  ;;  %v15194_v51 = vadd.f32 %v17708_v0, %v15948_v52  ;;  %v15185_v32 = vpop.f32.mrb[167].mxu0 }
0x2270   : > { %v15233_v58 = vadd.f32 %v15183_v10, %v24307_v33  ;;  %v15186_v47 = vadd.f32 %v15948_v52, %v15185_v32 }
0x2271   : > { %15251 = vst.msk [vmem:[#allocation25 + $0x30] sm:$0xff] %vm1175_vm1, %v15235_v17  ;;  %v15236_v38 = vadd.f32 %v15194_v51, %v24361_v26 }
0x2272   : > { %15249 = vst.msk [vmem:[#allocation25 + $0x20] sm:$0xff] %vm1175_vm1, %v15233_v58  ;;  %v15234_v21 = vadd.f32 %v15186_v47, %v24359_v6 }
0x2273   : > { %15252 = vst.msk [vmem:[#allocation25 + $0x38] sm:$0xff] %vm1175_vm1, %v15236_v38 }
0x2274   : > { %15250 = vst.msk [vmem:[#allocation25 + $0x28] sm:$0xff] %vm1175_vm1, %v15234_v21  ;;  %v17711_v1 = vpop.f32.mrb[168].mxu0 }
0x2275   : > { %v15207_v29 = vadd.f32 %v17711_v1, %v15948_v52  ;;  %v15198_v53 = vpop.f32.mrb[169].mxu0 }
0x2276   : > { %v15199_v13 = vadd.f32 %v15948_v52, %v15198_v53  ;;  %v17712_v30 = vpop.f32.mrb[170].mxu0 }
0x2277   : > { %v15239_v33 = vadd.f32 %v15207_v29, %v24314_v18  ;;  %v15210_v19 = vadd.f32 %v17712_v30, %v15948_v52  ;;  %v15201_v2 = vpop.f32.mrb[171].mxu0 }
0x2278   : > { %v15237_v24 = vadd.f32 %v15199_v13, %v24312_v55  ;;  %v15202_v26 = vadd.f32 %v15948_v52, %v15201_v2 }
0x2279   : > { %15255 = vst.msk [vmem:[#allocation25 + $0x50] sm:$0xff] %vm1175_vm1, %v15239_v33  ;;  %v15240_v6 = vadd.f32 %v15210_v19, %v24365_v63 }
0x227a   : > { %15253 = vst.msk [vmem:[#allocation25 + $0x40] sm:$0xff] %vm1175_vm1, %v15237_v24  ;;  %v15238_v5 = vadd.f32 %v15202_v26, %v24363_v39 }
0x227b   : > { %15256 = vst.msk [vmem:[#allocation25 + $0x58] sm:$0xff] %vm1175_vm1, %v15240_v6 }
0x227c   : > { %15254 = vst.msk [vmem:[#allocation25 + $0x48] sm:$0xff] %vm1175_vm1, %v15238_v5  ;;  %v17715_v46 = vpop.f32.mrb[172].mxu0 }
0x227d   : > { %v15223_v18 = vadd.f32 %v17715_v46, %v15948_v52  ;;  %v15214_v20 = vpop.f32.mrb[173].mxu0 }
0x227e   : > { %v15215_v12 = vadd.f32 %v15948_v52, %v15214_v20  ;;  %v17716_v22 = vpop.f32.mrb[174].mxu0 }
0x227f   : > { %v15243_v55 = vadd.f32 %v15223_v18, %v24326_v15  ;;  %v15226_v61 = vadd.f32 %v17716_v22, %v15948_v52  ;;  %v15217_v48 = vpop.f32.mrb[175].mxu0 }
0x2280   : > { %v15241_v63 = vadd.f32 %v15215_v12, %v24316_v42  ;;  %v15218_v39 = vadd.f32 %v15948_v52, %v15217_v48 }
0x2281   : > { %15259 = vst.msk [vmem:[#allocation25 + $0x70] sm:$0xff] %vm1175_vm1, %v15243_v55  ;;  %v15244_v43 = vadd.f32 %v15226_v61, %v24369_v35 }
0x2282   : > { %15257 = vst.msk [vmem:[#allocation25 + $0x60] sm:$0xff] %vm1175_vm1, %v15241_v63  ;;  %v15242_v62 = vadd.f32 %v15218_v39, %v24367_v36 }
0x2283   : > { %15260 = vst.msk [vmem:[#allocation25 + $0x78] sm:$0xff] %vm1175_vm1, %v15244_v43 }
0x2284   : > { %15258 = vst.msk [vmem:[#allocation25 + $0x68] sm:$0xff] %vm1175_vm1, %v15242_v62 }
0x2285   : > { %18985 = shalt.err (!%p18982_p0)
}
0x2286   : > { %s24982_s7 = sld [smem:[#allocation113_spill]] }
0x228c   : > { %s18986_s12 = scalar_lea.hbm %s24982_s7, 2048 }
0x228d   : > { %p18987_p12 = scmp.ne.s32.totalorder %s24982_s7, %s18986_s12  ;;  %p18992_p7 = scmp.lt.u32.totalorder %s18986_s12, %s24982_s7 }
0x228f   : > { %p18988_p13 = pnand %p18987_p12, %p17753_p3 }
0x2291   : > { %p18989_p1 = pneg %p18988_p13 }
0x2293   : > { %p18994_p4 = pnand %p18992_p7, %p18989_p1 }
0x2295   : > { %18997 = shalt.err (!%p18994_p4)
}
0x2296   : > { %s19102_s3 = smov 128  }
0x2297   : > { %17750 = dma.vmem_to_hbm [thread:$0]  (%p17753_p3), %s15268_s1, 2048, %s24982_s7, [#allocation4], %s19102_s3, %s19102_s3, %s19095_s21  }
0x2298   : > { %19047 = dma.done.wait (%p17753_p3), [#allocation4], 2048  }
0x2299   : > { %19049 = vsyncadd (%p17753_p3), [#allocation4], 4294965248 }
0x229a PF: > { %s24983_s21 = sld [smem:[#allocation38_spill]]  ;;  %s24984_s0 = sld [smem:[#allocation35_spill]] }
0x229b   : > { %s24985_s30 = sld [smem:[#allocation36_spill]]  ;;  %s24986_s20 = sld [smem:[#allocation39_spill]] }
0x22a0   : > { %p51_p2 = scmp.ge.s32.totalorder %s24983_s21, 4  }
0x22a2   :  { %53 = sbr.rel (!%p51_p2) target bundleno = 33 (0x21), region = 306 }
0x22a9   :  { %15283 = vsyncpa [#allocation3], 1 }
0x22aa   :  { %15285 = vsyncpa [#allocation3 + $0x1], 1 }
0x22ab   :  { %15286 = vsyncpa [#allocation6], 1 }
0x22ac   :  { %15288 = vsyncpa [#allocation6 + $0x1], 1 }
0x22ad   :  { %15289 = vsyncpa [#allocation9], 1 }
0x22ae   :  { %15291 = vsyncpa [#allocation9 + $0x1], 1 }
0x22af   :  { %15292 = vsyncpa [#allocation12], 1 }
0x22b0   :  { %15294 = vsyncpa [#allocation12 + $0x1], 1 }
0x22b1   :  { %15295 = vsyncpa [#allocation15], 1 }
0x22b2   :  { %15297 = vsyncpa [#allocation15 + $0x1], 1 }
0x22b3   :  { %15298 = vsyncpa [#allocation18], 1 }
0x22b4   :  { %15300 = vsyncpa [#allocation18 + $0x1], 1 }
0x22b5   :  { %15301 = vsyncpa [#allocation21], 1 }
0x22b6   :  { %15303 = vsyncpa [#allocation21 + $0x1], 1 }
0x22b7   :  { %15304 = vsyncpa [#allocation24], 1 }
0x22b8   :  { %15306 = vsyncpa [#allocation24 + $0x1], 1 }
0x22b9   :  { %15307 = vsyncpa [#allocation4], 1 }
0x22ba   :  { %15309 = vsyncpa [#allocation4 + $0x1], 1 }

</bundles_post_ra>
